<compile_context>
chip_gen: v7x
topology: tpu7x:2x2x1
jax: 0.10.0
libtpu: 0.0.40
codegen_flags: <defaults>
</compile_context>

<pallas_src>
import functools

import jax
import jax.numpy as jnp
from jax.experimental import pallas as pl
from jax.experimental.pallas import tpu as pltpu


# ---------------------------------------------------------------------------
# In-kernel helpers
# ---------------------------------------------------------------------------
def _activation(acc, act):
    if act == 'relu':
        return jnp.maximum(acc, 0.0)
    elif act == 'lrelu':
        return jnp.where(acc >= 0, acc, 0.01 * acc)   # PyTorch LeakyReLU default slope
    return acc


def _group_norm(acc, gamma, beta, M, MT, inv_n, eps=1e-5):
    """acc: (P, Cout) f32. M: (Cout, G), MT: (G, Cout) group-membership constants."""
    ch_sum = jnp.sum(acc, axis=0, keepdims=True)                       # (1, Cout)
    mean_g = jnp.dot(ch_sum, M, preferred_element_type=jnp.float32) * inv_n
    mean_c = jnp.dot(mean_g, MT, preferred_element_type=jnp.float32)   # (1, Cout)
    centered = acc - mean_c
    sq_sum = jnp.sum(centered * centered, axis=0, keepdims=True)       # two-pass variance
    var_g = jnp.dot(sq_sum, M, preferred_element_type=jnp.float32) * inv_n
    rstd_c = jnp.dot(jax.lax.rsqrt(var_g + eps), MT,
                     preferred_element_type=jnp.float32)
    return centered * rstd_c * gamma + beta


# ---------------------------------------------------------------------------
# Kernel factories
# ---------------------------------------------------------------------------
def make_conv_s1_kernel(H, W, Cin, Cout, use_gn, cg, act):
    inv_n = (1.0 / float(H * W * cg)) if use_gn else 0.0

    def kernel(*refs):
        if use_gn:
            x_ref, w_ref, b_ref, g_ref, be_ref, m_ref, mt_ref, o_ref = refs
        else:
            x_ref, w_ref, b_ref, o_ref = refs
        x = x_ref[0]                                       # (H, W, Cin) bf16
        # in-kernel zero padding (halo) -> (H+2, W+2, Cin)
        zr = jnp.zeros((1, W, Cin), x.dtype)
        xv = jnp.concatenate([zr, x, zr], axis=0)
        zc = jnp.zeros((H + 2, 1, Cin), x.dtype)
        xp = jnp.concatenate([zc, xv, zc], axis=1)
        # im2col: single matmul with K = 9*Cin
        cols = []
        for kh in range(3):
            for kw in range(3):
                cols.append(xp[kh:kh + H, kw:kw + W, :].reshape(H * W, Cin))
        patches = jnp.concatenate(cols, axis=-1)           # (H*W, 9*Cin) bf16
        acc = jnp.dot(patches, w_ref[...], preferred_element_type=jnp.float32)
        acc = acc + b_ref[...]
        if use_gn:
            acc = _group_norm(acc, g_ref[...], be_ref[...], m_ref[...], mt_ref[...], inv_n)
        acc = _activation(acc, act)
        o_ref[0] = acc.reshape(H, W, Cout).astype(o_ref.dtype)

    return kernel


def make_conv_s2_kernel(Hh, Wh, Cin, Cout, use_gn, cg, act):
    """Stride-2 conv computed directly at the strided output resolution from the
    4-phase decomposition of the padded input (each phase (Hh+1, Wh+1, Cin))."""
    inv_n = (1.0 / float(Hh * Wh * cg)) if use_gn else 0.0

    def kernel(*refs):
        if use_gn:
            (ee_ref, eo_ref, oe_ref, oo_ref, w_ref, b_ref,
             g_ref, be_ref, m_ref, mt_ref, o_ref) = refs
        else:
            ee_ref, eo_ref, oe_ref, oo_ref, w_ref, b_ref, o_ref = refs
        phases = {(0, 0): ee_ref[0], (0, 1): eo_ref[0],
                  (1, 0): oe_ref[0], (1, 1): oo_ref[0]}
        cols = []
        for kh in range(3):
            for kw in range(3):
                ph = phases[(kh % 2, kw % 2)]
                dr, dc = kh // 2, kw // 2
                cols.append(ph[dr:dr + Hh, dc:dc + Wh, :].reshape(Hh * Wh, Cin))
        patches = jnp.concatenate(cols, axis=-1)           # (Hh*Wh, 9*Cin)
        acc = jnp.dot(patches, w_ref[...], preferred_element_type=jnp.float32)
        acc = acc + b_ref[...]
        if use_gn:
            acc = _group_norm(acc, g_ref[...], be_ref[...], m_ref[...], mt_ref[...], inv_n)
        acc = _activation(acc, act)
        o_ref[0] = acc.reshape(Hh, Wh, Cout).astype(o_ref.dtype)

    return kernel


def make_deconv_kernel(H, W, Cin, Cout, act):
    """ConvTranspose2d(k3,s2,p1,op1)+act as a sub-pixel decomposition: the kernel
    emits the 4 output phases as channel blocks (phase-major), one K=4*Cin matmul."""
    def kernel(x_ref, w_ref, b_ref, o_ref):
        x = x_ref[0]                                       # (H, W, Cin)
        zr = jnp.zeros((1, W, Cin), x.dtype)
        xv = jnp.concatenate([x, zr], axis=0)              # pad bottom row
        zc = jnp.zeros((H + 1, 1, Cin), x.dtype)
        xp = jnp.concatenate([xv, zc], axis=1)             # pad right col -> (H+1, W+1, Cin)
        cols = [xp[0:H, 0:W, :].reshape(H * W, Cin),       # x[i, j]
                xp[0:H, 1:W + 1, :].reshape(H * W, Cin),   # x[i, j+1]
                xp[1:H + 1, 0:W, :].reshape(H * W, Cin),   # x[i+1, j]
                xp[1:H + 1, 1:W + 1, :].reshape(H * W, Cin)]  # x[i+1, j+1]
        patches = jnp.concatenate(cols, axis=-1)           # (H*W, 4*Cin)
        acc = jnp.dot(patches, w_ref[...], preferred_element_type=jnp.float32)
        acc = acc + b_ref[...]
        acc = _activation(acc, act)
        o_ref[0] = acc.reshape(H, W, 4 * Cout).astype(o_ref.dtype)

    return kernel


# ---------------------------------------------------------------------------
# Cached pallas_call builders
# ---------------------------------------------------------------------------
def _weight_specs():
    return [pl.BlockSpec((1, None), None)]  # unused placeholder (never called)


@functools.lru_cache(maxsize=None)
def _get_conv_s1(N, H, W, Cin, Cout, use_gn, G, act):
    cg = (Cout // G) if use_gn else 1
    kernel = make_conv_s1_kernel(H, W, Cin, Cout, use_gn, cg, act)
    in_specs = [
        pl.BlockSpec((1, H, W, Cin), lambda n: (n, 0, 0, 0)),
        pl.BlockSpec((9 * Cin, Cout), lambda n: (0, 0)),
        pl.BlockSpec((1, Cout), lambda n: (0, 0)),
    ]
    if use_gn:
        in_specs += [
            pl.BlockSpec((1, Cout), lambda n: (0, 0)),
            pl.BlockSpec((1, Cout), lambda n: (0, 0)),
            pl.BlockSpec((Cout, G), lambda n: (0, 0)),
            pl.BlockSpec((G, Cout), lambda n: (0, 0)),
        ]
    fn = pl.pallas_call(
        kernel,
        out_shape=jax.ShapeDtypeStruct((N, H, W, Cout), jnp.bfloat16),
        grid=(N,),
        in_specs=in_specs,
        out_specs=pl.BlockSpec((1, H, W, Cout), lambda n: (n, 0, 0, 0)),
        compiler_params=pltpu.CompilerParams(dimension_semantics=("parallel",)),
    )
    return jax.jit(fn)


@functools.lru_cache(maxsize=None)
def _get_conv_s2(N, Hh, Wh, Cin, Cout, use_gn, G, act):
    cg = (Cout // G) if use_gn else 1
    Hp, Wp = Hh + 1, Wh + 1
    kernel = make_conv_s2_kernel(Hh, Wh, Cin, Cout, use_gn, cg, act)
    phase_spec = pl.BlockSpec((1, Hp, Wp, Cin), lambda n: (n, 0, 0, 0))
    in_specs = [phase_spec, phase_spec, phase_spec, phase_spec,
                pl.BlockSpec((9 * Cin, Cout), lambda n: (0, 0)),
                pl.BlockSpec((1, Cout), lambda n: (0, 0))]
    if use_gn:
        in_specs += [
            pl.BlockSpec((1, Cout), lambda n: (0, 0)),
            pl.BlockSpec((1, Cout), lambda n: (0, 0)),
            pl.BlockSpec((Cout, G), lambda n: (0, 0)),
            pl.BlockSpec((G, Cout), lambda n: (0, 0)),
        ]
    fn = pl.pallas_call(
        kernel,
        out_shape=jax.ShapeDtypeStruct((N, Hh, Wh, Cout), jnp.bfloat16),
        grid=(N,),
        in_specs=in_specs,
        out_specs=pl.BlockSpec((1, Hh, Wh, Cout), lambda n: (n, 0, 0, 0)),
        compiler_params=pltpu.CompilerParams(dimension_semantics=("parallel",)),
    )
    return jax.jit(fn)


@functools.lru_cache(maxsize=None)
def _get_deconv(N, H, W, Cin, Cout, act):
    kernel = make_deconv_kernel(H, W, Cin, Cout, act)
    fn = pl.pallas_call(
        kernel,
        out_shape=jax.ShapeDtypeStruct((N, H, W, 4 * Cout), jnp.bfloat16),
        grid=(N,),
        in_specs=[pl.BlockSpec((1, H, W, Cin), lambda n: (n, 0, 0, 0)),
                  pl.BlockSpec((4 * Cin, 4 * Cout), lambda n: (0, 0)),
                  pl.BlockSpec((1, 4 * Cout), lambda n: (0, 0))],
        out_specs=pl.BlockSpec((1, H, W, 4 * Cout), lambda n: (n, 0, 0, 0)),
        compiler_params=pltpu.CompilerParams(dimension_semantics=("parallel",)),
    )
    return jax.jit(fn)


# ---------------------------------------------------------------------------
# Thin JAX glue around the kernels
# ---------------------------------------------------------------------------
def apply_conv(x, p, stride=1, use_gn=False, num_groups=1, act='relu'):
    """Conv2d(k=3, pad=1, stride=s) + optional GroupNorm + activation.  x: NHWC bf16."""
    N, H, W, Cin = x.shape
    Cout = p['w'].shape[-1]
    if stride == 1:
        fn = _get_conv_s1(N, H, W, Cin, Cout, use_gn, num_groups if use_gn else 1, act)
        args = [x, p['w'], p['b']]
        if use_gn:
            args += [p['gamma'], p['beta'], p['M'], p['MT']]
        return fn(*args)

    # stride == 2: phase-decompose the padded input in XLA (cheap strided slices)
    # so the kernel only issues contiguous loads and computes the conv directly
    # at the strided output resolution (GN stats therefore match PyTorch).
    assert H % 2 == 0 and W % 2 == 0
    Hh, Wh = H // 2, W // 2
    xp = jnp.pad(x, ((0, 0), (1, 1), (1, 1), (0, 0)))
    ee = xp[:, 0::2, 0::2, :]
    eo = xp[:, 0::2, 1::2, :]
    oe = xp[:, 1::2, 0::2, :]
    oo = xp[:, 1::2, 1::2, :]
    fn = _get_conv_s2(N, Hh, Wh, Cin, Cout, use_gn, num_groups if use_gn else 1, act)
    args = [ee, eo, oe, oo, p['w'], p['b']]
    if use_gn:
        args += [p['gamma'], p['beta'], p['M'], p['MT']]
    return fn(*args)


def apply_conv_transpose(x, p, act='relu'):
    """nn.ConvTranspose2d(k=3, s=2, p=1, output_padding=1) + act, sub-pixel form."""
    N, H, W, Cin = x.shape
    Cout = p['w4'].shape[-1] // 4
    fn = _get_deconv(N, H, W, Cin, Cout, act)
    y = fn(x, p['w4'], p['b4'])                        # (N, H, W, 4*Cout), phase-major
    y = y.reshape(N, H, W, 2, 2, Cout)                 # (.., pr, pc, c)
    y = jnp.transpose(y, (0, 1, 3, 2, 4, 5))
    return y.reshape(N, 2 * H, 2 * W, Cout)


def pixel_shuffle2(x):
    """PyTorch nn.PixelShuffle(2) semantics, NHWC layout."""
    N, H, W, C4 = x.shape
    C = C4 // 4
    x = x.reshape(N, H, W, C, 2, 2)
    x = jnp.transpose(x, (0, 1, 4, 2, 5, 3))
    return x.reshape(N, 2 * H, 2 * W, C)


# ---------------------------------------------------------------------------
# Deterministic parameter init (synthetic weights — no checkpoint loading)
# ---------------------------------------------------------------------------
class KeyGen:
    def __init__(self, seed):
        self.key = jax.random.PRNGKey(seed)

    def __call__(self):
        self.key, sub = jax.random.split(self.key)
        return sub


def _gn_matrices(cout, groups):
    cg = cout // groups
    cid = jnp.arange(cout) // cg
    M = (cid[:, None] == jnp.arange(groups)[None, :]).astype(jnp.float32)  # (Cout, G)
    return M, jnp.transpose(M)


def init_conv(kg, cin, cout, bias=True, num_groups=None):
    fan = 9 * cin
    w = jax.random.normal(kg(), (9, cin, cout), jnp.float32) * ((2.0 / fan) ** 0.5)
    b = (jax.random.normal(kg(), (cout,), jnp.float32) * 0.01
         if bias else jnp.zeros((cout,), jnp.float32))
    p = {'w': w.reshape(9 * cin, cout).astype(jnp.bfloat16),   # im2col layout, bf16
         'b': b[None, :].astype(jnp.float32)}
    if num_groups is not None:
        M, MT = _gn_matrices(cout, num_groups)
        p['gamma'] = jnp.ones((1, cout), jnp.float32)
        p['beta'] = jnp.zeros((1, cout), jnp.float32)
        p['M'] = M
        p['MT'] = MT
    return p


def init_deconv(kg, cin, cout):
    """Sub-pixel weight for ConvTranspose2d(k3,s2,p1,op1): rows = taps
    [x(i,j), x(i,j+1), x(i+1,j), x(i+1,j+1)], cols = output phases [ee, eo, oe, oo]."""
    fan = 9 * cin
    w = jax.random.normal(kg(), (9, cin, cout), jnp.float32) * ((2.0 / fan) ** 0.5)
    b = jax.random.normal(kg(), (cout,), jnp.float32) * 0.01
    t = lambda kh, kw: w[kh * 3 + kw]
    W4 = jnp.zeros((4, cin, 4, cout), jnp.float32)
    W4 = W4.at[0, :, 0, :].set(t(1, 1))
    W4 = W4.at[0, :, 1, :].set(t(1, 2))
    W4 = W4.at[1, :, 1, :].set(t(1, 0))
    W4 = W4.at[0, :, 2, :].set(t(2, 1))
    W4 = W4.at[2, :, 2, :].set(t(0, 1))
    W4 = W4.at[0, :, 3, :].set(t(2, 2))
    W4 = W4.at[1, :, 3, :].set(t(2, 0))
    W4 = W4.at[2, :, 3, :].set(t(0, 2))
    W4 = W4.at[3, :, 3, :].set(t(0, 0))
    return {'w4': W4.reshape(4 * cin, 4 * cout).astype(jnp.bfloat16),
            'b4': jnp.tile(b, 4)[None, :].astype(jnp.float32)}


def init_G1(kg, ch):
    p = {'conv0': init_conv(kg, 3, ch)}
    for i in range(1, 6):
        p[f'conv{i}'] = [init_conv(kg, ch, ch), init_conv(kg, ch, ch)]
    p['deconv5'] = {'c0': init_conv(kg, ch, ch), 'ct': init_deconv(kg, ch, ch)}
    p['deconv4'] = {'c0': init_conv(kg, 2 * ch, 2 * ch),
                    'c1': init_conv(kg, 2 * ch, 2 * ch),
                    'ct': init_deconv(kg, 2 * ch, 2 * ch)}
    for name in ('deconv3', 'deconv2', 'deconv1'):
        p[name] = {'c0': init_conv(kg, 3 * ch, 2 * ch),
                   'c1': init_conv(kg, 2 * ch, 2 * ch),
                   'ct': init_deconv(kg, 2 * ch, 2 * ch)}
    p['deconv0'] = [init_conv(kg, 3 * ch, 64),
                    init_conv(kg, 64, 32),
                    init_conv(kg, 32, 3)]
    return p


def init_G2(kg, ch):
    num_g = {48: 3, 32: 2, 8: 1, 64: 4}[ch]
    p = {'num_g': num_g}
    p['conv1'] = [(init_conv(kg, 9, 90, bias=False, num_groups=5), 5, 1),
                  (init_conv(kg, 90, ch, bias=False, num_groups=num_g), num_g, 1)]
    p['conv2'] = [(init_conv(kg, ch, 2 * ch, bias=False, num_groups=2 * num_g), 2 * num_g, 2),
                  (init_conv(kg, 2 * ch, 2 * ch, bias=False, num_groups=2 * num_g), 2 * num_g, 1),
                  (init_conv(kg, 2 * ch, 2 * ch, bias=False, num_groups=2 * num_g), 2 * num_g, 1)]
    p['conv3'] = ([(init_conv(kg, 2 * ch, 4 * ch, bias=False, num_groups=4 * num_g), 4 * num_g, 2)]
                  + [(init_conv(kg, 4 * ch, 4 * ch, bias=False, num_groups=4 * num_g), 4 * num_g, 1)
                     for _ in range(4)]
                  + [(init_conv(kg, 4 * ch, 8 * ch, bias=False, num_groups=8 * num_g), 8 * num_g, 1)])
    p['conv4'] = [(init_conv(kg, 2 * ch, 2 * ch, bias=False, num_groups=2 * num_g), 2 * num_g, 1),
                  (init_conv(kg, 2 * ch, 2 * ch, bias=False, num_groups=2 * num_g), 2 * num_g, 1),
                  (init_conv(kg, 2 * ch, 4 * ch, bias=False, num_groups=4 * num_g), 4 * num_g, 1)]
    p['conv5_0'] = (init_conv(kg, ch, ch, bias=False, num_groups=num_g), num_g)
    p['conv5_1'] = init_conv(kg, ch, 3, bias=True)
    return p


# ---------------------------------------------------------------------------
# Forward passes (mirror the PyTorch modules, NHWC bf16 internally)
# ---------------------------------------------------------------------------
def g1_forward(p, x):  # x: (N, H, W, 3) bf16
    x0 = apply_conv(x, p['conv0'])

    def down(name, inp):
        t = apply_conv(inp, p[name][0], stride=1)
        return apply_conv(t, p[name][1], stride=2)

    x1 = down('conv1', x0)
    x2 = down('conv2', x1)
    x3 = down('conv3', x2)
    x4 = down('conv4', x3)
    tmp = down('conv5', x4)

    t = apply_conv(tmp, p['deconv5']['c0'])
    t = apply_conv_transpose(t, p['deconv5']['ct'], act='relu')
    t = jnp.concatenate([x4, t], axis=-1)
    d = p['deconv4']
    t = apply_conv(t, d['c0'])
    t = apply_conv(t, d['c1'])
    t = apply_conv_transpose(t, d['ct'], act='relu')
    t = jnp.concatenate([x3, t], axis=-1)
    for name, skip in (('deconv3', x2), ('deconv2', x1), ('deconv1', x0)):
        d = p[name]
        t = apply_conv(t, d['c0'])
        t = apply_conv(t, d['c1'])
        t = apply_conv_transpose(t, d['ct'], act='relu')
        t = jnp.concatenate([skip, t], axis=-1)
    t = apply_conv(t, p['deconv0'][0])
    t = apply_conv(t, p['deconv0'][1])
    t = apply_conv(t, p['deconv0'][2], act='lrelu')
    return t


def g2_forward(p, x):  # x: (N, H, W, 9) bf16
    t = x
    for pc, g, s in p['conv1']:
        t = apply_conv(t, pc, stride=s, use_gn=True, num_groups=g)
    x1 = t
    t = x1
    for pc, g, s in p['conv2']:
        t = apply_conv(t, pc, stride=s, use_gn=True, num_groups=g)
    x2 = t
    t = x2
    for pc, g, s in p['conv3']:
        t = apply_conv(t, pc, stride=s, use_gn=True, num_groups=g)
    x3 = x2 + pixel_shuffle2(t)
    t = x3
    for pc, g, s in p['conv4']:
        t = apply_conv(t, pc, stride=s, use_gn=True, num_groups=g)
    x4 = x1 + pixel_shuffle2(t)
    pc, g = p['conv5_0']
    t = apply_conv(x4, pc, stride=1, use_gn=True, num_groups=g)
    x5 = apply_conv(t, p['conv5_1'], stride=1, use_gn=False, act='relu')
    return x[..., 3:6] + x5


def mgtv2_forward(params, x, nframes):
    """x: (B, F, 3, H, W) f32 -> (HR_Gs (B,F,3,H,W), out (B,3,H,W)) f32."""
    B, F, C, H, W = x.shape
    xf = jnp.transpose(x.reshape(B * F, C, H, W), (0, 2, 3, 1)).astype(jnp.bfloat16)
    hr = g1_forward(params['g1'], xf)                      # (B*F, H, W, 3) bf16
    hr = hr.reshape(B, F, H, W, 3)

    # batch all temporal windows of G2_1 into one call (N = B*(nframes-2))
    nw = nframes - 2
    wins = [jnp.concatenate([hr[:, i], hr[:, i + 1], hr[:, i + 2]], axis=-1)
            for i in range(nw)]                            # each (B, H, W, 9)
    g2_in = jnp.stack(wins, axis=1).reshape(B * nw, H, W, 9)
    g2_out = g2_forward(params['g2_1'], g2_in)             # (B*nw, H, W, 3)
    g2_out = g2_out.reshape(B, nw, H, W, 3)
    cat_l = jnp.transpose(g2_out, (0, 2, 3, 1, 4)).reshape(B, H, W, 3 * nw)
    out2 = g2_forward(params['g2_2'], cat_l)               # (B, H, W, 3)

    HR_Gs = jnp.transpose(hr, (0, 1, 4, 2, 3)).astype(jnp.float32)
    out2 = jnp.transpose(out2, (0, 3, 1, 2)).astype(jnp.float32)
    return HR_Gs, out2


# ---------------------------------------------------------------------------
if __name__ == "__main__":
    # nframes must be 5 so that G2 sees 9 input channels; H=W=32 is the smallest
    # spatial size divisible by 2^5 (G1 has 5 downsamples).
    nframes, ch1, ch2 = 5, 8, 8
    B, H, W = 1, 32, 32

    kg = KeyGen(123)
    params = {
        'g1': init_G1(kg, ch1),
        'g2_1': init_G2(kg, ch2),
        'g2_2': init_G2(kg, ch2),
    }

    x = jax.random.normal(jax.random.PRNGKey(0), (B, nframes, 3, H, W), jnp.float32)

    hr, out = mgtv2_forward(params, x, nframes)
    hr, out = jax.block_until_ready((hr, out))

    assert hr.shape == (B, nframes, 3, H, W), hr.shape
    assert out.shape == (B, 3, H, W), out.shape
    assert jnp.all(jnp.isfinite(hr)) and jnp.all(jnp.isfinite(out))
    print("KERNEL_OK")
</pallas_src>

<mosaic_0001>
module attributes {stable_mosaic.version = 11 : i64} {
  func.func @kernel(%arg0: i32, %arg1: memref<1x32x32x3xbf16, #tpu.memory_space<vmem>>, %arg2: memref<27x8xbf16, #tpu.memory_space<vmem>>, %arg3: memref<1x8xf32, #tpu.memory_space<vmem>>, %arg4: memref<1x32x32x8xbf16, #tpu.memory_space<vmem>>) attributes {dimension_semantics = [#tpu.dimension_semantics<parallel>], iteration_bounds = array<i64: 5>, scalar_prefetch = 0 : i64, scratch_operands = 0 : i64, tpu.core_type = #tpu.core_type<tc>, window_params = [{transform_indices = @transform_0, window_bounds = array<i64: 1, 32, 32, 3>}, {pipeline_mode = #tpu.pipeline_mode<synchronous>, transform_indices = @transform_1, window_bounds = array<i64: 27, 8>}, {pipeline_mode = #tpu.pipeline_mode<synchronous>, transform_indices = @transform_2, window_bounds = array<i64: 1, 8>}, {transform_indices = @transform_3, window_bounds = array<i64: 1, 32, 32, 8>}]} {
    %c0 = arith.constant 0 : index
    %c0_0 = arith.constant 0 : index
    %c0_1 = arith.constant 0 : index
    %c0_2 = arith.constant 0 : index
    %0 = vector.load %arg1[%c0, %c0_0, %c0_1, %c0_2] : memref<1x32x32x3xbf16, #tpu.memory_space<vmem>>, vector<1x32x32x3xbf16>
    %1 = vector.shape_cast %0 : vector<1x32x32x3xbf16> to vector<32x32x3xbf16>
    %cst = arith.constant 0.000000e+00 : bf16
    %2 = vector.broadcast %cst : bf16 to vector<1x32x3xbf16>
    %3 = tpu.concatenate %2, %1, %2 in 0 : vector<1x32x3xbf16>, vector<32x32x3xbf16>, vector<1x32x3xbf16> -> vector<34x32x3xbf16>
    %cst_3 = arith.constant 0.000000e+00 : bf16
    %4 = vector.broadcast %cst_3 : bf16 to vector<34x1x3xbf16>
    %5 = tpu.concatenate %4, %3, %4 in 1 : vector<34x1x3xbf16>, vector<34x32x3xbf16>, vector<34x1x3xbf16> -> vector<34x34x3xbf16>
    %6 = vector.extract_strided_slice %5 {offsets = [0, 0, 0], sizes = [32, 32, 3], strides = [1, 1, 1]} : vector<34x34x3xbf16> to vector<32x32x3xbf16>
    %7 = vector.shape_cast %6 : vector<32x32x3xbf16> to vector<1024x3xbf16>
    %8 = vector.extract_strided_slice %5 {offsets = [0, 1, 0], sizes = [32, 32, 3], strides = [1, 1, 1]} : vector<34x34x3xbf16> to vector<32x32x3xbf16>
    %9 = vector.shape_cast %8 : vector<32x32x3xbf16> to vector<1024x3xbf16>
    %10 = vector.extract_strided_slice %5 {offsets = [0, 2, 0], sizes = [32, 32, 3], strides = [1, 1, 1]} : vector<34x34x3xbf16> to vector<32x32x3xbf16>
    %11 = vector.shape_cast %10 : vector<32x32x3xbf16> to vector<1024x3xbf16>
    %12 = vector.extract_strided_slice %5 {offsets = [1, 0, 0], sizes = [32, 32, 3], strides = [1, 1, 1]} : vector<34x34x3xbf16> to vector<32x32x3xbf16>
    %13 = vector.shape_cast %12 : vector<32x32x3xbf16> to vector<1024x3xbf16>
    %14 = vector.extract_strided_slice %5 {offsets = [1, 1, 0], sizes = [32, 32, 3], strides = [1, 1, 1]} : vector<34x34x3xbf16> to vector<32x32x3xbf16>
    %15 = vector.shape_cast %14 : vector<32x32x3xbf16> to vector<1024x3xbf16>
    %16 = vector.extract_strided_slice %5 {offsets = [1, 2, 0], sizes = [32, 32, 3], strides = [1, 1, 1]} : vector<34x34x3xbf16> to vector<32x32x3xbf16>
    %17 = vector.shape_cast %16 : vector<32x32x3xbf16> to vector<1024x3xbf16>
    %18 = vector.extract_strided_slice %5 {offsets = [2, 0, 0], sizes = [32, 32, 3], strides = [1, 1, 1]} : vector<34x34x3xbf16> to vector<32x32x3xbf16>
    %19 = vector.shape_cast %18 : vector<32x32x3xbf16> to vector<1024x3xbf16>
    %20 = vector.extract_strided_slice %5 {offsets = [2, 1, 0], sizes = [32, 32, 3], strides = [1, 1, 1]} : vector<34x34x3xbf16> to vector<32x32x3xbf16>
    %21 = vector.shape_cast %20 : vector<32x32x3xbf16> to vector<1024x3xbf16>
    %22 = vector.extract_strided_slice %5 {offsets = [2, 2, 0], sizes = [32, 32, 3], strides = [1, 1, 1]} : vector<34x34x3xbf16> to vector<32x32x3xbf16>
    %23 = vector.shape_cast %22 : vector<32x32x3xbf16> to vector<1024x3xbf16>
    %24 = tpu.concatenate %7, %9, %11, %13, %15, %17, %19, %21, %23 in 1 : vector<1024x3xbf16>, vector<1024x3xbf16>, vector<1024x3xbf16>, vector<1024x3xbf16>, vector<1024x3xbf16>, vector<1024x3xbf16>, vector<1024x3xbf16>, vector<1024x3xbf16>, vector<1024x3xbf16> -> vector<1024x27xbf16>
    %c0_4 = arith.constant 0 : index
    %c0_5 = arith.constant 0 : index
    %25 = vector.load %arg2[%c0_4, %c0_5] : memref<27x8xbf16, #tpu.memory_space<vmem>>, vector<27x8xbf16>
    %cst_6 = arith.constant dense<0.000000e+00> : vector<1024x8xf32>
    %26 = tpu.matmul %24, %25, %cst_6 {dimension_numbers = #tpu.dot_dimension_numbers<[1], [0], [0], [1], [0, 0, 1, 1], [], []>} : vector<1024x27xbf16>, vector<27x8xbf16>, vector<1024x8xf32> -> vector<1024x8xf32>
    %c0_7 = arith.constant 0 : index
    %c0_8 = arith.constant 0 : index
    %27 = vector.load %arg3[%c0_7, %c0_8] : memref<1x8xf32, #tpu.memory_space<vmem>>, vector<1x8xf32>
    %28 = vector.broadcast %27 : vector<1x8xf32> to vector<1024x8xf32>
    %29 = arith.addf %26, %28 : vector<1024x8xf32>
    %cst_9 = arith.constant 0.000000e+00 : f32
    %30 = vector.broadcast %cst_9 : f32 to vector<1024x8xf32>
    %31 = arith.maximumf %29, %30 : vector<1024x8xf32>
    %32 = vector.shape_cast %31 : vector<1024x8xf32> to vector<32x32x8xf32>
    %33 = arith.truncf %32 : vector<32x32x8xf32> to vector<32x32x8xbf16>
    %c0_10 = arith.constant 0 : index
    %c0_11 = arith.constant 0 : index
    %c0_12 = arith.constant 0 : index
    %c0_13 = arith.constant 0 : index
    %34 = vector.load %arg4[%c0_10, %c0_11, %c0_12, %c0_13] : memref<1x32x32x8xbf16, #tpu.memory_space<vmem>>, vector<1x32x32x8xbf16>
    %35 = vector.shape_cast %34 : vector<1x32x32x8xbf16> to vector<32x32x8xbf16>
    %36 = vector.shape_cast %33 : vector<32x32x8xbf16> to vector<1x32x32x8xbf16>
    tpu.vector_store %arg4[%c0_10, %c0_11, %c0_12, %c0_13], %36 {strides = array<i32>} : memref<1x32x32x8xbf16, #tpu.memory_space<vmem>>, vector<1x32x32x8xbf16>,
    return
  }
  func.func @transform_0(%arg0: i32) -> (i32, i32, i32, i32) {
    %c0_i32 = arith.constant 0 : i32
    %c0_i32_0 = arith.constant 0 : i32
    %c0_i32_1 = arith.constant 0 : i32
    %c0_i32_2 = arith.constant 0 : i32
    return %arg0, %c0_i32, %c0_i32_0, %c0_i32_1 : i32, i32, i32, i32
  }
  func.func @transform_1(%arg0: i32) -> (i32, i32) {
    %c0_i32 = arith.constant 0 : i32
    %c0_i32_0 = arith.constant 0 : i32
    %c0_i32_1 = arith.constant 0 : i32
    return %c0_i32, %c0_i32_0 : i32, i32
  }
  func.func @transform_2(%arg0: i32) -> (i32, i32) {
    %c0_i32 = arith.constant 0 : i32
    %c0_i32_0 = arith.constant 0 : i32
    %c0_i32_1 = arith.constant 0 : i32
    return %c0_i32, %c0_i32_0 : i32, i32
  }
  func.func @transform_3(%arg0: i32) -> (i32, i32, i32, i32) {
    %c0_i32 = arith.constant 0 : i32
    %c0_i32_0 = arith.constant 0 : i32
    %c0_i32_1 = arith.constant 0 : i32
    %c0_i32_2 = arith.constant 0 : i32
    return %arg0, %c0_i32, %c0_i32_0, %c0_i32_1 : i32, i32, i32, i32
  }
}

</mosaic_0001>

<bundles_post_ra>
// kernel: tpu_custom_call.1
= control target key start
LH: loop header
LB: loop body
LE: loop exit
PB: predicated region body
PF: predicated region fallthrough
CT: control target
= control target key end

     0   :  { %s6459_s12 = smov 0   ;;  %s10623_s0 = inlined_call_operand.vmem [shape: bf16[5,32,32,3], index: 0, kind: input, shape index: {}]   ;;  %s10624_s1 = inlined_call_operand.vmem [shape: bf16[27,8], index: 1, kind: input, shape index: {}]   ;;  %s10625_s2 = inlined_call_operand.vmem [shape: f32[1,8], index: 2, kind: input, shape index: {}]   ;;  %s10626_s3 = inlined_call_operand.vmem [shape: bf16[5,32,32,8], index: 3, kind: output, shape index: {}]  }
   0x1 LB: > { %s5719_s13 = sadd.s32 4294967295, %s6427_s12   ;;  %p5723_p0 = scmp.ge.s32.totalorder %s6427_s12, 1  ;;  %s6427_s12 = sphi %s6459_s12, %s13_s12  }
   0x2   : > { %p137_p1 = scmp.lt.s32.totalorder %s6427_s12, 6 }
   0x4   : > { %p138_p2 = pnand %p5723_p0, %p137_p1 }
   0x6   : > { %141 = sbr.rel (%p138_p2) target bundleno = 1435 (0x59b), region = 32 }
   0xd   : > { %vm620_vm0 = vsmask.f32 256  ;;  %vm1175_vm1 = vcmask 1040384   ;;  %v6429_v0 = vmov 0   ;;  %v11026_v2 = vmov 0  ;;  %p161_p3 = scmp.lt.s32.totalorder %s5719_s13, 4 }
   0xe   : > { %v6467_v1 = vrot.slane %v6429_v0, 7  ;;  %vm6470_vm2 = vmand %vm1175_vm1, %vm620_vm0  ;;  %vm1243_vm3 = vsmask.f32 7424  ;;  %s6430_s18 = smov 3   ;;  %vm1948_vm4 = vcmask 1046528   ;;  %s6431_s19 = smov 6  }
   0xf   : > { %v11027_v2 = vsel %vm6470_vm2, 4294967295, %v11026_v2  ;;  %s12136_s13 = smov (!%p161_p3, %s5719_s13), 4  ;;  %s6432_s20 = smov 9   ;;  %vm4343_vm5 = vcmask 1044480   ;;  %vm4344_vm6 = vcmask 1045504   ;;  %vm3289_vm7 = vcmask 48128  }
  0x10   : > { %11025 = vst [vmem:[#allocation2_spill] sm:$0xff] %v6467_v1  ;;  %11028 = vst [vmem:[#allocation3_spill] sm:$0xff] %v11027_v2  ;;  %v6477_v3 = vsel %vm6470_vm2, %v6467_v1, 0  ;;  %v1252_v4 = vshll.u32 %v6467_v1, 16  ;;  %v1256_v5 = vshrl.u32 %v6467_v1, 16  ;;  %v6484_v6 = vsel %vm6470_vm2, 0, %v6467_v1 }
  0x11   : > { %11029 = vst [vmem:[#allocation4_spill] sm:$0xff] %v6484_v6  ;;  %v1260_v7 = vshll.u32 %v6477_v3, 16  ;;  %v1245_v8 = vshrl.u32 %v6484_v6, 16  ;;  %v1247_v9 = vshll.u32 %v6484_v6, 16  ;;  %s5989_s14 = sshll.u32 %s12136_s13, 9  ;;  %s6433_s21 = smov 12  }
  0x12   : > { %v1254_v10 = vrot.slane %v1252_v4, 1  ;;  %s6497_s17 = scalar_lea.vmem %s10623_s0, %s5989_s14  ;;  %s6434_s22 = smov 15   ;;  %vm3160_vm8 = vcmask 23552   ;;  %vm3418_vm9 = vcmask 72704   ;;  %vm3547_vm10 = vcmask 97280  }
  0x13   : > { %v1262_v11 = vrot.slane %v1260_v7, 1  ;;  %v1249_v12 = vrot.slane %v1247_v9, 1  ;;  %v6354_v15 = vld [vmem:[%s6497_s17 + $0x10] sm:$0xff]   ;;  %v6355_v16 = vld [vmem:[%s6497_s17 + $0x18] sm:$0xff]   ;;  %v6356_v21 = vld [vmem:[%s6497_s17] sm:$0xff]   ;;  %s6435_s25 = smov 18   ;;  %s9776_s7 = scalar_lea.vmem %s10626_s3, %s5989_s14 }
  0x14   : > { %v1258_v13 = vor.u32 %v1256_v5, %v1254_v10  ;;  %v645_v18 = vshrl.u32 %v6354_v15, 16  ;;  %v648_v19 = vshll.u32 %v6354_v15, 16  ;;  %v652_v20 = vshrl.u32 %v6355_v16, 16  ;;  %v6357_v24 = vld [vmem:[%s6497_s17 + $0x8] sm:$0xff]   ;;  %v6358_v31 = vld [vmem:[%s6497_s17 + $0x20] sm:$0xff]   ;;  %v6360_v48 = vld [vmem:[%s6497_s17 + $0x30] sm:$0xff]  }
  0x15   : > { %v1250_v14 = vor.u32 %v1249_v12, %v1245_v8  ;;  %v655_v23 = vshll.u32 %v6355_v16, 16  ;;  %v630_v27 = vshrl.u32 %v6356_v21, 16  ;;  %v633_v28 = vshll.u32 %v6356_v21, 16  ;;  %v6359_v32 = vld [vmem:[%s6497_s17 + $0x28] sm:$0xff]   ;;  %v6361_v0 = vld [vmem:[%s6497_s17 + $0x38] sm:$0xff]   ;;  %s6437_s28 = smov 21  }
  0x16   : > { %v6502_v17 = vsel %vm1243_vm3, %v1258_v13, %v1262_v11  ;;  %v647_v25 = vrot.slane %v645_v18, 7  ;;  %v6511_v26 = vrot.slane %v652_v20, 7  ;;  %v637_v29 = vshrl.u32 %v6357_v24, 16  ;;  %v6363_v15 = vld [vmem:[%s6497_s17 + $0x48] sm:$0xff]   ;;  %s6438_s29 = smov 24  }
  0x17   : > { %11030 = vst [vmem:[#allocation5_spill] sm:$0xff] %v6502_v17  ;;  %2138 = vrot.lane.b32.xlu0 %v6502_v17, %s6430_s18  ;;  %v6508_v22 = vsel %vm1243_vm3, %v1250_v14, %v1254_v10  ;;  %v640_v30 = vshll.u32 %v6357_v24, 16  ;;  %v632_v35 = vrot.slane %v630_v27, 7  ;;  %v660_v37 = vshrl.u32 %v6358_v31, 16  ;;  %v6362_v10 = vld [vmem:[%s6497_s17 + $0x40] sm:$0xff]  }
  0x18   : > { %11031 = vst [vmem:[#allocation6_spill] sm:$0xff] %v6508_v22  ;;  %v650_v33 = vor.u32 %v648_v19, %v647_v25  ;;  %v657_v34 = vor.u32 %v655_v23, %v6511_v26  ;;  %v639_v36 = vrot.slane %v637_v29, 7  ;;  %v663_v38 = vshll.u32 %v6358_v31, 16 }
  0x19   : > { %v667_v39 = vshrl.u32 %v6359_v32, 16  ;;  %v635_v42 = vor.u32 %v633_v28, %v632_v35  ;;  %v670_v43 = vshll.u32 %v6359_v32, 16  ;;  %v662_v50 = vrot.slane %v660_v37, 7 }
  0x1a   : > { %v6519_v40 = vsel %vm620_vm0, %v647_v25, %v657_v34  ;;  %v6523_v41 = vsel %vm6470_vm2, 0, %v650_v33  ;;  %v642_v47 = vor.u32 %v640_v30, %v639_v36  ;;  %v6535_v52 = vsel %vm6470_vm2, %v639_v36, 0 }
  0x1b   : > { %2136 = vrot.lane.b32.xlu0 %v6508_v22, %s6430_s18  ;;  %v1285_v44 = vshrl.u32 %v6523_v41, 16  ;;  %v1287_v45 = vshll.u32 %v6523_v41, 16  ;;  %v1292_v46 = vshll.u32 %v6519_v40, 16  ;;  %v6531_v49 = vsel %vm6470_vm2, 0, %v635_v42 }
  0x1c   : > { %11032 = vst [vmem:[#allocation7_spill] sm:$0xff] %v6531_v49  ;;  %v669_v51 = vrot.slane %v667_v39, 7  ;;  %v6538_v55 = vsel %vm620_vm0, %v632_v35, %v642_v47  ;;  %v1265_v56 = vshrl.u32 %v6531_v49, 16  ;;  %v1267_v57 = vshll.u32 %v6531_v49, 16 }
  0x1d   : > { %v1289_v53 = vrot.slane %v1287_v45, 1  ;;  %v1294_v54 = vrot.slane %v1292_v46, 1  ;;  %11033 = vst [vmem:[#allocation8_spill] sm:$0xff] %v6538_v55  ;;  %v1272_v58 = vshll.u32 %v6538_v55, 16  ;;  %v665_v59 = vor.u32 %v663_v38, %v662_v50 }
  0x1e   : > { %v672_v60 = vor.u32 %v670_v43, %v669_v51  ;;  %v1276_v62 = vshrl.u32 %v6538_v55, 16  ;;  %v1280_v63 = vshll.u32 %v6535_v52, 16  ;;  %v675_v4 = vshrl.u32 %v6360_v48, 16 }
  0x1f   : > { %v1290_v61 = vor.u32 %v1289_v53, %v1285_v44  ;;  %v1269_v5 = vrot.slane %v1267_v57, 1  ;;  %v1274_v7 = vrot.slane %v1272_v58, 1  ;;  %v6551_v9 = vsel %vm6470_vm2, 0, %v665_v59  ;;  %v6364_v44 = vld [vmem:[%s6497_s17 + $0x50] sm:$0xff]  }
  0x20   : > { %v6547_v8 = vsel %vm620_vm0, %v662_v50, %v672_v60  ;;  %v1305_v12 = vshrl.u32 %v6551_v9, 16  ;;  %v1307_v13 = vshll.u32 %v6551_v9, 16  ;;  %v1282_v19 = vrot.slane %v1280_v63, 1 }
  0x21   : > { %v6555_v11 = vsel %vm1243_vm3, %v1290_v61, %v1294_v54  ;;  %v1312_v14 = vshll.u32 %v6547_v8, 16  ;;  %v1270_v16 = vor.u32 %v1269_v5, %v1265_v56  ;;  %v1278_v18 = vor.u32 %v1276_v62, %v1274_v7 }
  0x22   : > { %11034 = vst [vmem:[#allocation9_spill] sm:$0xff] %v6555_v11  ;;  %2144 = vrot.lane.b32.xlu0 %v6555_v11, %s6430_s18  ;;  %v677_v20 = vrot.slane %v675_v4, 7  ;;  %v1309_v21 = vrot.slane %v1307_v13, 1  ;;  %v678_v24 = vshll.u32 %v6360_v48, 16  ;;  %v682_v25 = vshrl.u32 %v6361_v0, 16 }
  0x23   : > { %v1314_v23 = vrot.slane %v1312_v14, 1  ;;  %v6564_v27 = vsel %vm1243_vm3, %v1270_v16, %v1274_v7  ;;  %v6567_v28 = vsel %vm1243_vm3, %v1278_v18, %v1282_v19  ;;  %v685_v29 = vshll.u32 %v6361_v0, 16  ;;  %v6365_v0 = vld [vmem:[%s6497_s17 + $0x58] sm:$0xff]  }
  0x24   : > { %11035 = vst [vmem:[#allocation10_spill] sm:$0xff] %v6564_v27  ;;  %11036 = vst [vmem:[#allocation11_spill] sm:$0xff] %v6567_v28  ;;  %v6572_v30 = vsel %vm6470_vm2, %v6511_v26, 0  ;;  %2140 = vrot.lane.b32.xlu1 %v6564_v27, %s6430_s18  ;;  %v1310_v31 = vor.u32 %v1309_v21, %v1305_v12  ;;  %v680_v32 = vor.u32 %v678_v24, %v677_v20  ;;  %v684_v33 = vrot.slane %v682_v25, 7  ;;  %v6366_v12 = vld [vmem:[%s6497_s17 + $0x60] sm:$0xff]   ;;  %v6367_v24 = vld [vmem:[%s6497_s17 + $0x68] sm:$0xff]  }
  0x25   : > { %v1296_v34 = vshrl.u32 %v6519_v40, 16  ;;  %v1300_v35 = vshll.u32 %v6572_v30, 16  ;;  %v690_v36 = vshrl.u32 %v6362_v10, 16  ;;  %v693_v37 = vshll.u32 %v6362_v10, 16 }
  0x26   : > { %v697_v38 = vshrl.u32 %v6363_v15, 16  ;;  %v6579_v39 = vsel %vm1243_vm3, %v1310_v31, %v1314_v23  ;;  %v687_v42 = vor.u32 %v685_v29, %v684_v33  ;;  %v6583_v26 = vsel %vm6470_vm2, 0, %v680_v32 }
  0x27   : > { %11037 = vst [vmem:[#allocation12_spill] sm:$0xff] %v6579_v39  ;;  %v1298_v43 = vor.u32 %v1296_v34, %v1294_v54  ;;  %2148 = vrot.lane.b32.xlu0 %v6579_v39, %s6430_s18  ;;  %v1325_v45 = vshrl.u32 %v6583_v26, 16  ;;  %v1327_v46 = vshll.u32 %v6583_v26, 16  ;;  %v1302_v47 = vrot.slane %v1300_v35, 1 }
  0x28   : > { %v692_v48 = vrot.slane %v690_v36, 7  ;;  %2142 = vrot.lane.b32.xlu1 %v6567_v28, %s6430_s18  ;;  %v6593_v50 = vsel %vm620_vm0, %v677_v20, %v687_v42  ;;  %v699_v53 = vrot.slane %v697_v38, 7  ;;  %v700_v54 = vshll.u32 %v6363_v15, 16  ;;  %v6383_v28 = vld [vmem:[%s6497_s17 + $0xe8] sm:$0xff]  }
  0x29   : > { %v6597_v56 = vsel %vm6470_vm2, %v669_v51, 0  ;;  %v1329_v57 = vrot.slane %v1327_v46, 1  ;;  %v1332_v58 = vshll.u32 %v6593_v50, 16  ;;  %v6601_v59 = vsel %vm1243_vm3, %v1298_v43, %v1302_v47  ;;  %v6368_v47 = vld [vmem:[%s6497_s17 + $0x70] sm:$0xff]  }
  0x2a   : > { %11038 = vst [vmem:[#allocation13_spill] sm:$0xff] %v6601_v59  ;;  %v695_v60 = vor.u32 %v693_v37, %v692_v48  ;;  %v702_v61 = vor.u32 %v700_v54, %v699_v53  ;;  %v1316_v62 = vshrl.u32 %v6547_v8, 16  ;;  %v1320_v63 = vshll.u32 %v6597_v56, 16 }
  0x2b   : > { %v705_v4 = vshrl.u32 %v6364_v44, 16  ;;  %v1330_v5 = vor.u32 %v1329_v57, %v1325_v45  ;;  %v1334_v7 = vrot.slane %v1332_v58, 1  ;;  %v708_v10 = vshll.u32 %v6364_v44, 16 }
  0x2c   : > { %v6608_v51 = vsel %vm6470_vm2, 0, %v695_v60  ;;  %2146 = vrot.lane.b32.xlu1 %v6601_v59, %s6430_s18  ;;  %v6614_v13 = vsel %vm620_vm0, %v692_v48, %v702_v61  ;;  %v1318_v16 = vor.u32 %v1316_v62, %v1314_v23  ;;  %v1322_v20 = vrot.slane %v1320_v63, 1 }
  0x2d   : > { %v1345_v14 = vshrl.u32 %v6608_v51, 16  ;;  %v1347_v15 = vshll.u32 %v6608_v51, 16  ;;  %v6619_v18 = vsel %vm1243_vm3, %v1330_v5, %v1334_v7  ;;  %v1352_v19 = vshll.u32 %v6614_v13, 16 }
  0x2e   : > { %11039 = vst [vmem:[#allocation14_spill] sm:$0xff] %v6619_v18  ;;  %v707_v21 = vrot.slane %v705_v4, 7  ;;  %2152 = vrot.lane.b32.xlu0 %v6619_v18, %s6430_s18  ;;  %v712_v29 = vshrl.u32 %v6365_v0, 16  ;;  %v715_v31 = vshll.u32 %v6365_v0, 16  ;;  %v6627_v32 = vsel %vm6470_vm2, %v684_v33, 0 }
  0x2f   : > { %v1349_v25 = vrot.slane %v1347_v15, 1  ;;  %v1354_v23 = vrot.slane %v1352_v19, 1  ;;  %v6630_v34 = vsel %vm1243_vm3, %v1318_v16, %v1322_v20  ;;  %v1336_v36 = vshrl.u32 %v6593_v50, 16  ;;  %v6369_v16 = vld [vmem:[%s6497_s17 + $0x78] sm:$0xff]  }
  0x30   : > { %11040 = vst [vmem:[#allocation15_spill] sm:$0xff] %v6630_v34  ;;  %v710_v35 = vor.u32 %v708_v10, %v707_v21  ;;  %2150 = vrot.lane.b32.xlu1 %v6630_v34, %s6430_s18  ;;  %v714_v38 = vrot.slane %v712_v29, 7  ;;  %v1340_v42 = vshll.u32 %v6627_v32, 16  ;;  %v720_v43 = vshrl.u32 %v6366_v12, 16  ;;  %v6380_v34 = vld [vmem:[%s6497_s17 + $0xd0] sm:$0xff]  }
  0x31   : > { %v1350_v37 = vor.u32 %v1349_v25, %v1345_v14  ;;  %v1338_v33 = vor.u32 %v1336_v36, %v1334_v7  ;;  %v723_v45 = vshll.u32 %v6366_v12, 16  ;;  %v727_v46 = vshrl.u32 %v6367_v24, 16  ;;  %v6371_v36 = vld [vmem:[%s6497_s17 + $0x88] sm:$0xff]  }
  0x32   : > { %v6638_v44 = vsel %vm6470_vm2, 0, %v710_v35  ;;  %v717_v54 = vor.u32 %v715_v31, %v714_v38  ;;  %v1342_v60 = vrot.slane %v1340_v42, 1  ;;  %v722_v61 = vrot.slane %v720_v43, 7 }
  0x33   : > { %11041 = vst [vmem:[#allocation16_spill] sm:$0xff] %v6638_v44  ;;  %v6642_v48 = vsel %vm1243_vm3, %v1350_v37, %v1354_v23  ;;  %v1365_v57 = vshrl.u32 %v6638_v44, 16  ;;  %v1367_v58 = vshll.u32 %v6638_v44, 16  ;;  %v729_v62 = vrot.slane %v727_v46, 7 }
  0x34   : > { %11042 = vst [vmem:[#allocation17_spill] sm:$0xff] %v6642_v48  ;;  %2156 = vrot.lane.b32.xlu0 %v6642_v48, %s6430_s18  ;;  %v730_v63 = vshll.u32 %v6367_v24, 16  ;;  %v6649_v0 = vsel %vm620_vm0, %v707_v21, %v717_v54  ;;  %v6653_v5 = vsel %vm6470_vm2, %v699_v53, 0  ;;  %v1356_v7 = vshrl.u32 %v6614_v13, 16  ;;  %v6370_v24 = vld [vmem:[%s6497_s17 + $0x80] sm:$0xff]  }
  0x35   : > { %11043 = vst [vmem:[#allocation18_spill] sm:$0xff] %v6649_v0  ;;  %v1369_v4 = vrot.slane %v1367_v58, 1  ;;  %v1372_v10 = vshll.u32 %v6649_v0, 16  ;;  %v6658_v12 = vsel %vm1243_vm3, %v1338_v33, %v1342_v60  ;;  %v725_v14 = vor.u32 %v723_v45, %v722_v61 }
  0x36   : > { %11044 = vst [vmem:[#allocation19_spill] sm:$0xff] %v6658_v12  ;;  %v732_v15 = vor.u32 %v730_v63, %v729_v62  ;;  %2154 = vrot.lane.b32.xlu1 %v6658_v12, %s6430_s18  ;;  %v1358_v20 = vor.u32 %v1356_v7, %v1354_v23  ;;  %v1360_v21 = vshll.u32 %v6653_v5, 16  ;;  %v735_v53 = vshrl.u32 %v6368_v47, 16 }
  0x37   : > { %v1370_v19 = vor.u32 %v1369_v4, %v1365_v57  ;;  %v1374_v25 = vrot.slane %v1372_v10, 1  ;;  %v6670_v31 = vsel %vm6470_vm2, 0, %v725_v14  ;;  %v738_v35 = vshll.u32 %v6368_v47, 16 }
  0x38   : > { %v6666_v29 = vsel %vm620_vm0, %v722_v61, %v732_v15  ;;  %11046 = vst [vmem:[#allocation21_spill] sm:$0xff] %v6670_v31  ;;  %v1385_v37 = vshrl.u32 %v6670_v31, 16  ;;  %v1387_v42 = vshll.u32 %v6670_v31, 16  ;;  %v1362_v43 = vrot.slane %v1360_v21, 1 }
  0x39   : > { %11045 = vst [vmem:[#allocation20_spill] sm:$0xff] %v6666_v29  ;;  %v1392_v23 = vshll.u32 %v6666_v29, 16  ;;  %v6677_v33 = vsel %vm1243_vm3, %v1370_v19, %v1374_v25  ;;  %v737_v45 = vrot.slane %v735_v53, 7  ;;  %v742_v46 = vshrl.u32 %v6369_v16, 16  ;;  %v6372_v19 = vld [vmem:[%s6497_s17 + $0x90] sm:$0xff]  }
  0x3a   : > { %11047 = vst [vmem:[#allocation22_spill] sm:$0xff] %v6677_v33  ;;  %v745_v54 = vshll.u32 %v6369_v16, 16  ;;  %2160 = vrot.lane.b32.xlu0 %v6677_v33, %s6430_s18  ;;  %v1389_v57 = vrot.slane %v1387_v42, 1  ;;  %v6682_v58 = vsel %vm1243_vm3, %v1358_v20, %v1362_v43  ;;  %v6686_v60 = vsel %vm6470_vm2, %v714_v38, 0 }
  0x3b   : > { %v1394_v47 = vrot.slane %v1392_v23, 1  ;;  %11048 = vst [vmem:[#allocation23_spill] sm:$0xff] %v6682_v58  ;;  %2158 = vrot.lane.b32.xlu1 %v6682_v58, %s6430_s18  ;;  %v740_v61 = vor.u32 %v738_v35, %v737_v45  ;;  %v744_v63 = vrot.slane %v742_v46, 7  ;;  %v1376_v4 = vshrl.u32 %v6649_v0, 16 }
  0x3c   : > { %v1380_v7 = vshll.u32 %v6686_v60, 16  ;;  %v1390_v10 = vor.u32 %v1389_v57, %v1385_v37  ;;  %v750_v14 = vshrl.u32 %v6370_v24, 16  ;;  %v753_v15 = vshll.u32 %v6370_v24, 16 }
  0x3d   : > { %v757_v16 = vshrl.u32 %v6371_v36, 16  ;;  %v747_v20 = vor.u32 %v745_v54, %v744_v63  ;;  %v6695_v21 = vsel %vm6470_vm2, 0, %v740_v61  ;;  %v1378_v38 = vor.u32 %v1376_v4, %v1374_v25 }
  0x3e   : > { %11049 = vst [vmem:[#allocation24_spill] sm:$0xff] %v6695_v21  ;;  %v1382_v53 = vrot.slane %v1380_v7, 1  ;;  %v6698_v42 = vsel %vm1243_vm3, %v1390_v10, %v1394_v47  ;;  %v1405_v35 = vshrl.u32 %v6695_v21, 16  ;;  %v1407_v23 = vshll.u32 %v6695_v21, 16 }
  0x3f   : > { %11050 = vst [vmem:[#allocation25_spill] sm:$0xff] %v6698_v42  ;;  %v752_v37 = vrot.slane %v750_v14, 7  ;;  %2164 = vrot.lane.b32.xlu0 %v6698_v42, %s6430_s18  ;;  %v6705_v24 = vsel %vm620_vm0, %v737_v45, %v747_v20  ;;  %v759_v25 = vrot.slane %v757_v16, 7  ;;  %v760_v46 = vshll.u32 %v6371_v36, 16  ;;  %v6373_v14 = vld [vmem:[%s6497_s17 + $0x98] sm:$0xff]   ;;  %v6375_v42 = vld [vmem:[%s6497_s17 + $0xa8] sm:$0xff]  }
  0x40   : > { %11051 = vst [vmem:[#allocation26_spill] sm:$0xff] %v6705_v24  ;;  %v6708_v43 = vsel %vm1243_vm3, %v1378_v38, %v1382_v53  ;;  %v1409_v54 = vrot.slane %v1407_v23, 1  ;;  %v1412_v57 = vshll.u32 %v6705_v24, 16  ;;  %v6715_v4 = vsel %vm6470_vm2, %v729_v62, 0 }
  0x41   : > { %11052 = vst [vmem:[#allocation27_spill] sm:$0xff] %v6708_v43  ;;  %2162 = vrot.lane.b32.xlu1 %v6708_v43, %s6430_s18  ;;  %v755_v61 = vor.u32 %v753_v15, %v752_v37  ;;  %v762_v7 = vor.u32 %v760_v46, %v759_v25  ;;  %v1396_v45 = vshrl.u32 %v6666_v29, 16  ;;  %v1400_v10 = vshll.u32 %v6715_v4, 16  ;;  %v6374_v15 = vld [vmem:[%s6497_s17 + $0xa0] sm:$0xff]  }
  0x42   : > { %v765_v16 = vshrl.u32 %v6372_v19, 16  ;;  %v1410_v36 = vor.u32 %v1409_v54, %v1405_v35  ;;  %v1414_v20 = vrot.slane %v1412_v57, 1  ;;  %v768_v53 = vshll.u32 %v6372_v19, 16 }
  0x43   : > { %v6722_v38 = vsel %vm6470_vm2, 0, %v755_v61  ;;  %v6726_v23 = vsel %vm620_vm0, %v752_v37, %v762_v7  ;;  %v1398_v17 = vor.u32 %v1396_v45, %v1394_v47  ;;  %v1402_v54 = vrot.slane %v1400_v10, 1 }
  0x44   : > { %11053 = vst [vmem:[#allocation28_spill] sm:$0xff] %v6722_v38  ;;  %11054 = vst [vmem:[#allocation29_spill] sm:$0xff] %v6726_v23  ;;  %v1425_v62 = vshrl.u32 %v6722_v38, 16  ;;  %v1427_v46 = vshll.u32 %v6722_v38, 16  ;;  %v6731_v22 = vsel %vm1243_vm3, %v1410_v36, %v1414_v20  ;;  %v1432_v35 = vshll.u32 %v6726_v23, 16 }
  0x45   : > { %11055 = vst [vmem:[#allocation30_spill] sm:$0xff] %v6731_v22  ;;  %v767_v57 = vrot.slane %v765_v16, 7  ;;  %2168 = vrot.lane.b32.xlu0 %v6731_v22, %s6430_s18  ;;  %v772_v61 = vshrl.u32 %v6373_v14, 16  ;;  %v775_v37 = vshll.u32 %v6373_v14, 16  ;;  %v6739_v7 = vsel %vm6470_vm2, %v744_v63, 0 }
  0x46   : > { %v1429_v19 = vrot.slane %v1427_v46, 1  ;;  %v1434_v47 = vrot.slane %v1432_v35, 1  ;;  %v6742_v45 = vsel %vm1243_vm3, %v1398_v17, %v1402_v54  ;;  %v1416_v10 = vshrl.u32 %v6705_v24, 16  ;;  %v6376_v17 = vld [vmem:[%s6497_s17 + $0xb0] sm:$0xff]  }
  0x47   : > { %11056 = vst [vmem:[#allocation31_spill] sm:$0xff] %v6742_v45  ;;  %v770_v36 = vor.u32 %v768_v53, %v767_v57  ;;  %2166 = vrot.lane.b32.xlu1 %v6742_v45, %s6430_s18  ;;  %v774_v22 = vrot.slane %v772_v61, 7  ;;  %v1420_v46 = vshll.u32 %v6739_v7, 16  ;;  %v780_v33 = vshrl.u32 %v6374_v15, 16 }
  0x48   : > { %v1430_v16 = vor.u32 %v1429_v19, %v1425_v62  ;;  %v1418_v63 = vor.u32 %v1416_v10, %v1414_v20  ;;  %v783_v35 = vshll.u32 %v6374_v15, 16  ;;  %v787_v43 = vshrl.u32 %v6375_v42, 16 }
  0x49   : > { %v6750_v14 = vsel %vm6470_vm2, 0, %v770_v36  ;;  %v777_v54 = vor.u32 %v775_v37, %v774_v22  ;;  %v1422_v61 = vrot.slane %v1420_v46, 1  ;;  %v782_v45 = vrot.slane %v780_v33, 7 }
  0x4a   : > { %11057 = vst [vmem:[#allocation32_spill] sm:$0xff] %v6750_v14  ;;  %v6754_v53 = vsel %vm1243_vm3, %v1430_v16, %v1434_v47  ;;  %v1445_v62 = vshrl.u32 %v6750_v14, 16  ;;  %v1447_v19 = vshll.u32 %v6750_v14, 16  ;;  %v789_v36 = vrot.slane %v787_v43, 7 }
  0x4b   : > { %11058 = vst [vmem:[#allocation33_spill] sm:$0xff] %v6754_v53  ;;  %2172 = vrot.lane.b32.xlu0 %v6754_v53, %s6430_s18  ;;  %v790_v48 = vshll.u32 %v6375_v42, 16  ;;  %v6761_v20 = vsel %vm620_vm0, %v767_v57, %v777_v54  ;;  %v6765_v10 = vsel %vm6470_vm2, %v759_v25, 0  ;;  %v1436_v37 = vshrl.u32 %v6726_v23, 16  ;;  %v6377_v42 = vld [vmem:[%s6497_s17 + $0xb8] sm:$0xff]  }
  0x4c   : > { %11059 = vst [vmem:[#allocation34_spill] sm:$0xff] %v6761_v20  ;;  %v1449_v15 = vrot.slane %v1447_v19, 1  ;;  %v1452_v16 = vshll.u32 %v6761_v20, 16  ;;  %v6770_v53 = vsel %vm1243_vm3, %v1418_v63, %v1422_v61  ;;  %v785_v33 = vor.u32 %v783_v35, %v782_v45  ;;  %v6378_v35 = vld [vmem:[%s6497_s17 + $0xc0] sm:$0xff]  }
  0x4d   : > { %11060 = vst [vmem:[#allocation35_spill] sm:$0xff] %v6770_v53  ;;  %v792_v43 = vor.u32 %v790_v48, %v789_v36  ;;  %2170 = vrot.lane.b32.xlu1 %v6770_v53, %s6430_s18  ;;  %v1438_v57 = vor.u32 %v1436_v37, %v1434_v47  ;;  %v1440_v25 = vshll.u32 %v6765_v10, 16  ;;  %v795_v54 = vshrl.u32 %v6376_v17, 16  ;;  %v6379_v48 = vld [vmem:[%s6497_s17 + $0xc8] sm:$0xff]  }
  0x4e   : > { %v1450_v46 = vor.u32 %v1449_v15, %v1445_v62  ;;  %v1454_v19 = vrot.slane %v1452_v16, 1  ;;  %v6781_v18 = vsel %vm6470_vm2, 0, %v785_v33  ;;  %v798_v63 = vshll.u32 %v6376_v17, 16 }
  0x4f   : > { %v6777_v58 = vsel %vm620_vm0, %v782_v45, %v792_v43  ;;  %11062 = vst [vmem:[#allocation37_spill] sm:$0xff] %v6781_v18  ;;  %v1465_v62 = vshrl.u32 %v6781_v18, 16  ;;  %v1467_v61 = vshll.u32 %v6781_v18, 16  ;;  %v1442_v15 = vrot.slane %v1440_v25, 1 }
  0x50   : > { %11061 = vst [vmem:[#allocation36_spill] sm:$0xff] %v6777_v58  ;;  %v1472_v47 = vshll.u32 %v6777_v58, 16  ;;  %v6789_v37 = vsel %vm1243_vm3, %v1450_v46, %v1454_v19  ;;  %v797_v16 = vrot.slane %v795_v54, 7  ;;  %v802_v45 = vshrl.u32 %v6377_v42, 16 }
  0x51   : > { %11063 = vst [vmem:[#allocation38_spill] sm:$0xff] %v6789_v37  ;;  %v805_v43 = vshll.u32 %v6377_v42, 16  ;;  %2176 = vrot.lane.b32.xlu0 %v6789_v37, %s6430_s18  ;;  %v1469_v17 = vrot.slane %v1467_v61, 1  ;;  %v6794_v53 = vsel %vm1243_vm3, %v1438_v57, %v1442_v15  ;;  %v6798_v12 = vsel %vm6470_vm2, %v774_v22, 0 }
  0x52   : > { %v1474_v33 = vrot.slane %v1472_v47, 1  ;;  %11064 = vst [vmem:[#allocation39_spill] sm:$0xff] %v6794_v53  ;;  %2174 = vrot.lane.b32.xlu1 %v6794_v53, %s6430_s18  ;;  %v800_v46 = vor.u32 %v798_v63, %v797_v16  ;;  %v804_v25 = vrot.slane %v802_v45, 7  ;;  %v1456_v54 = vshrl.u32 %v6761_v20, 16 }
  0x53   : > { %v1460_v42 = vshll.u32 %v6798_v12, 16  ;;  %v1470_v39 = vor.u32 %v1469_v17, %v1465_v62  ;;  %v810_v37 = vshrl.u32 %v6378_v35, 16  ;;  %v813_v61 = vshll.u32 %v6378_v35, 16 }
  0x54   : > { %v817_v47 = vshrl.u32 %v6379_v48, 16  ;;  %v807_v57 = vor.u32 %v805_v43, %v804_v25  ;;  %v6807_v15 = vsel %vm6470_vm2, 0, %v800_v46  ;;  %v1458_v22 = vor.u32 %v1456_v54, %v1454_v19 }
  0x55   : > { %11065 = vst [vmem:[#allocation40_spill] sm:$0xff] %v6807_v15  ;;  %v1462_v11 = vrot.slane %v1460_v42, 1  ;;  %v6810_v53 = vsel %vm1243_vm3, %v1470_v39, %v1474_v33  ;;  %v1485_v63 = vshrl.u32 %v6807_v15, 16  ;;  %v1487_v45 = vshll.u32 %v6807_v15, 16 }
  0x56   : > { %11066 = vst [vmem:[#allocation41_spill] sm:$0xff] %v6810_v53  ;;  %v812_v62 = vrot.slane %v810_v37, 7  ;;  %2180 = vrot.lane.b32.xlu0 %v6810_v53, %s6430_s18  ;;  %v6817_v35 = vsel %vm620_vm0, %v797_v16, %v807_v57  ;;  %v819_v19 = vrot.slane %v817_v47, 7  ;;  %v820_v17 = vshll.u32 %v6379_v48, 16  ;;  %v6381_v47 = vld [vmem:[%s6497_s17 + $0xd8] sm:$0xff]  }
  0x57   : > { %11067 = vst [vmem:[#allocation42_spill] sm:$0xff] %v6817_v35  ;;  %v6820_v43 = vsel %vm1243_vm3, %v1458_v22, %v1462_v11  ;;  %v1489_v39 = vrot.slane %v1487_v45, 1  ;;  %v1492_v46 = vshll.u32 %v6817_v35, 16  ;;  %v6827_v37 = vsel %vm6470_vm2, %v789_v36, 0 }
  0x58   : > { %11068 = vst [vmem:[#allocation43_spill] sm:$0xff] %v6820_v43  ;;  %2178 = vrot.lane.b32.xlu1 %v6820_v43, %s6430_s18  ;;  %v815_v54 = vor.u32 %v813_v61, %v812_v62  ;;  %v822_v42 = vor.u32 %v820_v17, %v819_v19  ;;  %v1476_v16 = vshrl.u32 %v6777_v58, 16  ;;  %v1480_v11 = vshll.u32 %v6827_v37, 16  ;;  %v6382_v61 = vld [vmem:[%s6497_s17 + $0xe0] sm:$0xff]  }
  0x59   : > { %v825_v57 = vshrl.u32 %v6380_v34, 16  ;;  %v1490_v48 = vor.u32 %v1489_v39, %v1485_v63  ;;  %v1494_v22 = vrot.slane %v1492_v46, 1  ;;  %v828_v53 = vshll.u32 %v6380_v34, 16 }
  0x5a   : > { %v6834_v45 = vsel %vm6470_vm2, 0, %v815_v54  ;;  %v6838_v43 = vsel %vm620_vm0, %v812_v62, %v822_v42  ;;  %v1478_v59 = vor.u32 %v1476_v16, %v1474_v33  ;;  %v1482_v39 = vrot.slane %v1480_v11, 1 }
  0x5b   : > { %11069 = vst [vmem:[#allocation44_spill] sm:$0xff] %v6834_v45  ;;  %11070 = vst [vmem:[#allocation45_spill] sm:$0xff] %v6838_v43  ;;  %v1505_v36 = vshrl.u32 %v6834_v45, 16  ;;  %v1507_v17 = vshll.u32 %v6834_v45, 16  ;;  %v6843_v27 = vsel %vm1243_vm3, %v1490_v48, %v1494_v22  ;;  %v1512_v63 = vshll.u32 %v6838_v43, 16 }
  0x5c   : > { %11071 = vst [vmem:[#allocation46_spill] sm:$0xff] %v6843_v27  ;;  %v827_v46 = vrot.slane %v825_v57, 7  ;;  %2184 = vrot.lane.b32.xlu0 %v6843_v27, %s6430_s18  ;;  %v832_v54 = vshrl.u32 %v6381_v47, 16  ;;  %v835_v62 = vshll.u32 %v6381_v47, 16  ;;  %v6851_v42 = vsel %vm6470_vm2, %v804_v25, 0 }
  0x5d   : > { %v1509_v34 = vrot.slane %v1507_v17, 1  ;;  %11072 = vst [vmem:[#allocation47_spill] sm:$0xff] %v6851_v42  ;;  %v1514_v33 = vrot.slane %v1512_v63, 1  ;;  %v6854_v16 = vsel %vm1243_vm3, %v1478_v59, %v1482_v39  ;;  %v1496_v11 = vshrl.u32 %v6817_v35, 16  ;;  %v6384_v59 = vld [vmem:[%s6497_s17 + $0xf0] sm:$0xff]  }
  0x5e   : > { %11073 = vst [vmem:[#allocation48_spill] sm:$0xff] %v6854_v16  ;;  %v830_v48 = vor.u32 %v828_v53, %v827_v46  ;;  %2182 = vrot.lane.b32.xlu1 %v6854_v16, %s6430_s18  ;;  %v834_v27 = vrot.slane %v832_v54, 7  ;;  %v1500_v17 = vshll.u32 %v6851_v42, 16  ;;  %v840_v45 = vshrl.u32 %v6382_v61, 16  ;;  %v6388_v35 = vld [vmem:[%s6497_s17 + $0x110] sm:$0xff]  }
  0x5f   : > { %v1510_v57 = vor.u32 %v1509_v34, %v1505_v36  ;;  %v1498_v25 = vor.u32 %v1496_v11, %v1494_v22  ;;  %v843_v63 = vshll.u32 %v6382_v61, 16  ;;  %v847_v15 = vshrl.u32 %v6383_v28, 16 }
  0x60   : > { %v6862_v47 = vsel %vm6470_vm2, 0, %v830_v48  ;;  %v837_v39 = vor.u32 %v835_v62, %v834_v27  ;;  %v1502_v54 = vrot.slane %v1500_v17, 1  ;;  %v842_v16 = vrot.slane %v840_v45, 7  ;;  %v6385_v17 = vld [vmem:[%s6497_s17 + $0xf8] sm:$0xff]  }
  0x61   : > { %11074 = vst [vmem:[#allocation49_spill] sm:$0xff] %v6862_v47  ;;  %v6866_v53 = vsel %vm1243_vm3, %v1510_v57, %v1514_v33  ;;  %v1525_v36 = vshrl.u32 %v6862_v47, 16  ;;  %v1527_v34 = vshll.u32 %v6862_v47, 16  ;;  %v849_v48 = vrot.slane %v847_v15, 7 }
  0x62   : > { %11075 = vst [vmem:[#allocation50_spill] sm:$0xff] %v6866_v53  ;;  %2188 = vrot.lane.b32.xlu0 %v6866_v53, %s6430_s18  ;;  %v850_v22 = vshll.u32 %v6383_v28, 16  ;;  %v6873_v61 = vsel %vm620_vm0, %v827_v46, %v837_v39  ;;  %v6877_v62 = vsel %vm6470_vm2, %v819_v19, 0  ;;  %v1516_v57 = vshrl.u32 %v6838_v43, 16 }
  0x63   : > { %11076 = vst [vmem:[#allocation51_spill] sm:$0xff] %v6873_v61  ;;  %v1529_v11 = vrot.slane %v1527_v34, 1  ;;  %11077 = vst [vmem:[#allocation52_spill] sm:$0xff] %v6877_v62  ;;  %v1532_v47 = vshll.u32 %v6873_v61, 16  ;;  %v6882_v53 = vsel %vm1243_vm3, %v1498_v25, %v1502_v54  ;;  %v845_v45 = vor.u32 %v843_v63, %v842_v16  ;;  %v6386_v34 = vld [vmem:[%s6497_s17 + $0x100] sm:$0xff]   ;;  %v6387_v54 = vld [vmem:[%s6497_s17 + $0x108] sm:$0xff]  }
  0x64   : > { %11078 = vst [vmem:[#allocation53_spill] sm:$0xff] %v6882_v53  ;;  %v852_v15 = vor.u32 %v850_v22, %v849_v48  ;;  %2186 = vrot.lane.b32.xlu1 %v6882_v53, %s6430_s18  ;;  %v1518_v46 = vor.u32 %v1516_v57, %v1514_v33  ;;  %v1520_v39 = vshll.u32 %v6877_v62, 16  ;;  %v855_v19 = vshrl.u32 %v6384_v59, 16 }
  0x65   : > { %v1530_v28 = vor.u32 %v1529_v11, %v1525_v36  ;;  %v1534_v42 = vrot.slane %v1532_v47, 1  ;;  %v6894_v25 = vsel %vm6470_vm2, 0, %v845_v45  ;;  %v858_v63 = vshll.u32 %v6384_v59, 16 }
  0x66   : > { %v6890_v43 = vsel %vm620_vm0, %v842_v16, %v852_v15  ;;  %11080 = vst [vmem:[#allocation55_spill] sm:$0xff] %v6894_v25  ;;  %v1545_v36 = vshrl.u32 %v6894_v25, 16  ;;  %v1547_v22 = vshll.u32 %v6894_v25, 16  ;;  %v1522_v11 = vrot.slane %v1520_v39, 1 }
  0x67   : > { %11079 = vst [vmem:[#allocation54_spill] sm:$0xff] %v6890_v43  ;;  %v1552_v33 = vshll.u32 %v6890_v43, 16  ;;  %v6901_v57 = vsel %vm1243_vm3, %v1530_v28, %v1534_v42  ;;  %v857_v47 = vrot.slane %v855_v19, 7  ;;  %v862_v53 = vshrl.u32 %v6385_v17, 16 }
  0x68   : > { %11081 = vst [vmem:[#allocation56_spill] sm:$0xff] %v6901_v57  ;;  %v865_v16 = vshll.u32 %v6385_v17, 16  ;;  %2192 = vrot.lane.b32.xlu0 %v6901_v57, %s6430_s18  ;;  %v1549_v45 = vrot.slane %v1547_v22, 1  ;;  %v6906_v15 = vsel %vm1243_vm3, %v1518_v46, %v1522_v11  ;;  %v6910_v25 = vsel %vm6470_vm2, %v834_v27, 0 }
  0x69   : > { %v1554_v59 = vrot.slane %v1552_v33, 1  ;;  %11082 = vst [vmem:[#allocation57_spill] sm:$0xff] %v6906_v15  ;;  %11083 = vst [vmem:[#allocation58_spill] sm:$0xff] %v6910_v25  ;;  %2190 = vrot.lane.b32.xlu1 %v6906_v15, %s6430_s18  ;;  %v860_v28 = vor.u32 %v858_v63, %v857_v47  ;;  %v864_v39 = vrot.slane %v862_v53, 7  ;;  %v1536_v19 = vshrl.u32 %v6873_v61, 16  ;;  %v6396_v61 = vld [vmem:[%s6497_s17 + $0x150] sm:$0xff]  }
  0x6a   : > { %v1540_v17 = vshll.u32 %v6910_v25, 16  ;;  %v1550_v62 = vor.u32 %v1549_v45, %v1545_v36  ;;  %v870_v57 = vshrl.u32 %v6386_v34, 16  ;;  %v873_v22 = vshll.u32 %v6386_v34, 16 }
  0x6b   : > { %v877_v33 = vshrl.u32 %v6387_v54, 16  ;;  %v867_v46 = vor.u32 %v865_v16, %v864_v39  ;;  %v6919_v11 = vsel %vm6470_vm2, 0, %v860_v28  ;;  %v1538_v27 = vor.u32 %v1536_v19, %v1534_v42 }
  0x6c   : > { %11084 = vst [vmem:[#allocation59_spill] sm:$0xff] %v6919_v11  ;;  %v1542_v18 = vrot.slane %v1540_v17, 1  ;;  %v6922_v15 = vsel %vm1243_vm3, %v1550_v62, %v1554_v59  ;;  %v1565_v53 = vshrl.u32 %v6919_v11, 16  ;;  %v1567_v63 = vshll.u32 %v6919_v11, 16  ;;  %v6390_v11 = vld [vmem:[%s6497_s17 + $0x120] sm:$0xff]  }
  0x6d   : > { %11085 = vst [vmem:[#allocation60_spill] sm:$0xff] %v6922_v15  ;;  %v872_v36 = vrot.slane %v870_v57, 7  ;;  %2196 = vrot.lane.b32.xlu0 %v6922_v15, %s6430_s18  ;;  %v6929_v34 = vsel %vm620_vm0, %v857_v47, %v867_v46  ;;  %v879_v42 = vrot.slane %v877_v33, 7  ;;  %v880_v45 = vshll.u32 %v6387_v54, 16  ;;  %v6389_v33 = vld [vmem:[%s6497_s17 + $0x118] sm:$0xff]  }
  0x6e   : > { %11086 = vst [vmem:[#allocation61_spill] sm:$0xff] %v6929_v34  ;;  %v6932_v16 = vsel %vm1243_vm3, %v1538_v27, %v1542_v18  ;;  %v1569_v28 = vrot.slane %v1567_v63, 1  ;;  %v1572_v62 = vshll.u32 %v6929_v34, 16  ;;  %v6939_v57 = vsel %vm6470_vm2, %v849_v48, 0 }
  0x6f   : > { %11087 = vst [vmem:[#allocation62_spill] sm:$0xff] %v6932_v16  ;;  %2194 = vrot.lane.b32.xlu1 %v6932_v16, %s6430_s18  ;;  %v875_v19 = vor.u32 %v873_v22, %v872_v36  ;;  %11088 = vst [vmem:[#allocation63_spill] sm:$0xff] %v6939_v57  ;;  %v882_v17 = vor.u32 %v880_v45, %v879_v42  ;;  %v1556_v47 = vshrl.u32 %v6890_v43, 16  ;;  %v1560_v18 = vshll.u32 %v6939_v57, 16  ;;  %v6391_v43 = vld [vmem:[%s6497_s17 + $0x128] sm:$0xff]  }
  0x70   : > { %v885_v54 = vshrl.u32 %v6388_v35, 16  ;;  %v1570_v46 = vor.u32 %v1569_v28, %v1565_v53  ;;  %v1574_v27 = vrot.slane %v1572_v62, 1  ;;  %v888_v15 = vshll.u32 %v6388_v35, 16 }
  0x71   : > { %v6946_v63 = vsel %vm6470_vm2, 0, %v875_v19  ;;  %v6949_v22 = vsel %vm620_vm0, %v872_v36, %v882_v17  ;;  %v1558_v16 = vor.u32 %v1556_v47, %v1554_v59  ;;  %v1562_v28 = vrot.slane %v1560_v18, 1 }
  0x72   : > { %11089 = vst [vmem:[#allocation64_spill] sm:$0xff] %v6946_v63  ;;  %11090 = vst [vmem:[#allocation65_spill] sm:$0xff] %v6949_v22  ;;  %v1585_v48 = vshrl.u32 %v6946_v63, 16  ;;  %v1587_v45 = vshll.u32 %v6946_v63, 16  ;;  %v6955_v57 = vsel %vm1243_vm3, %v1570_v46, %v1574_v27  ;;  %v1592_v53 = vshll.u32 %v6949_v22, 16 }
  0x73   : > { %11091 = vst [vmem:[#allocation66_spill] sm:$0xff] %v6955_v57  ;;  %v887_v62 = vrot.slane %v885_v54, 7  ;;  %2200 = vrot.lane.b32.xlu0 %v6955_v57, %s6430_s18  ;;  %v892_v36 = vshrl.u32 %v6389_v33, 16  ;;  %v895_v19 = vshll.u32 %v6389_v33, 16  ;;  %v6963_v17 = vsel %vm6470_vm2, %v864_v39, 0 }
  0x74   : > { %v1589_v35 = vrot.slane %v1587_v45, 1  ;;  %11092 = vst [vmem:[#allocation67_spill] sm:$0xff] %v6963_v17  ;;  %v1594_v59 = vrot.slane %v1592_v53, 1  ;;  %v6966_v47 = vsel %vm1243_vm3, %v1558_v16, %v1562_v28  ;;  %v1576_v18 = vshrl.u32 %v6929_v34, 16 }
  0x75   : > { %11093 = vst [vmem:[#allocation68_spill] sm:$0xff] %v6966_v47  ;;  %v890_v46 = vor.u32 %v888_v15, %v887_v62  ;;  %2198 = vrot.lane.b32.xlu1 %v6966_v47, %s6430_s18  ;;  %v894_v57 = vrot.slane %v892_v36, 7  ;;  %v1580_v45 = vshll.u32 %v6963_v17, 16  ;;  %v900_v33 = vshrl.u32 %v6390_v11, 16  ;;  %v6392_v36 = vld [vmem:[%s6497_s17 + $0x130] sm:$0xff]  }
  0x76   : > { %v1590_v54 = vor.u32 %v1589_v35, %v1585_v48  ;;  %v1578_v53 = vor.u32 %v1576_v18, %v1574_v27  ;;  %v903_v63 = vshll.u32 %v6390_v11, 16  ;;  %v907_v16 = vshrl.u32 %v6391_v43, 16 }
  0x77   : > { %v6974_v39 = vsel %vm6470_vm2, 0, %v890_v46  ;;  %v897_v15 = vor.u32 %v895_v19, %v894_v57  ;;  %v1582_v47 = vrot.slane %v1580_v45, 1  ;;  %v902_v17 = vrot.slane %v900_v33, 7 }
  0x78   : > { %11094 = vst [vmem:[#allocation69_spill] sm:$0xff] %v6974_v39  ;;  %v6977_v28 = vsel %vm1243_vm3, %v1590_v54, %v1594_v59  ;;  %v1605_v48 = vshrl.u32 %v6974_v39, 16  ;;  %v1607_v35 = vshll.u32 %v6974_v39, 16  ;;  %v909_v46 = vrot.slane %v907_v16, 7 }
  0x79   : > { %11095 = vst [vmem:[#allocation70_spill] sm:$0xff] %v6977_v28  ;;  %2204 = vrot.lane.b32.xlu0 %v6977_v28, %s6430_s18  ;;  %v910_v34 = vshll.u32 %v6391_v43, 16  ;;  %v6985_v11 = vsel %vm620_vm0, %v887_v62, %v897_v15  ;;  %v6989_v19 = vsel %vm6470_vm2, %v879_v42, 0  ;;  %v1596_v18 = vshrl.u32 %v6949_v22, 16  ;;  %v6393_v43 = vld [vmem:[%s6497_s17 + $0x138] sm:$0xff]  }
  0x7a   : > { %11096 = vst [vmem:[#allocation71_spill] sm:$0xff] %v6985_v11  ;;  %v1609_v27 = vrot.slane %v1607_v35, 1  ;;  %11097 = vst [vmem:[#allocation72_spill] sm:$0xff] %v6989_v19  ;;  %v1612_v54 = vshll.u32 %v6985_v11, 16  ;;  %v6994_v39 = vsel %vm1243_vm3, %v1578_v53, %v1582_v47  ;;  %v905_v28 = vor.u32 %v903_v63, %v902_v17 }
  0x7b   : > { %11098 = vst [vmem:[#allocation73_spill] sm:$0xff] %v6994_v39  ;;  %v912_v45 = vor.u32 %v910_v34, %v909_v46  ;;  %2202 = vrot.lane.b32.xlu1 %v6994_v39, %s6430_s18  ;;  %v1598_v62 = vor.u32 %v1596_v18, %v1594_v59  ;;  %v1600_v42 = vshll.u32 %v6989_v19, 16  ;;  %v915_v16 = vshrl.u32 %v6392_v36, 16  ;;  %v6394_v59 = vld [vmem:[%s6497_s17 + $0x140] sm:$0xff]   ;;  %v6395_v18 = vld [vmem:[%s6497_s17 + $0x148] sm:$0xff]  }
  0x7c   : > { %v1610_v33 = vor.u32 %v1609_v27, %v1605_v48  ;;  %v1614_v15 = vrot.slane %v1612_v54, 1  ;;  %v7005_v47 = vsel %vm6470_vm2, 0, %v905_v28  ;;  %v918_v63 = vshll.u32 %v6392_v36, 16 }
  0x7d   : > { %v7001_v35 = vsel %vm620_vm0, %v902_v17, %v912_v45  ;;  %11100 = vst [vmem:[#allocation75_spill] sm:$0xff] %v7005_v47  ;;  %v1625_v34 = vshrl.u32 %v7005_v47, 16  ;;  %v1627_v53 = vshll.u32 %v7005_v47, 16  ;;  %v1602_v27 = vrot.slane %v1600_v42, 1 }
  0x7e   : > { %11099 = vst [vmem:[#allocation74_spill] sm:$0xff] %v7001_v35  ;;  %v1632_v48 = vshll.u32 %v7001_v35, 16  ;;  %v7013_v39 = vsel %vm1243_vm3, %v1610_v33, %v1614_v15  ;;  %v917_v54 = vrot.slane %v915_v16, 7  ;;  %v922_v17 = vshrl.u32 %v6393_v43, 16 }
  0x7f   : > { %11101 = vst [vmem:[#allocation76_spill] sm:$0xff] %v7013_v39  ;;  %v925_v45 = vshll.u32 %v6393_v43, 16  ;;  %2208 = vrot.lane.b32.xlu0 %v7013_v39, %s6430_s18  ;;  %v1629_v28 = vrot.slane %v1627_v53, 1  ;;  %v7018_v19 = vsel %vm1243_vm3, %v1598_v62, %v1602_v27  ;;  %v7022_v42 = vsel %vm6470_vm2, %v894_v57, 0 }
  0x80   : > { %v1634_v36 = vrot.slane %v1632_v48, 1  ;;  %11102 = vst [vmem:[#allocation77_spill] sm:$0xff] %v7018_v19  ;;  %11103 = vst [vmem:[#allocation78_spill] sm:$0xff] %v7022_v42  ;;  %2206 = vrot.lane.b32.xlu1 %v7018_v19, %s6430_s18  ;;  %v920_v33 = vor.u32 %v918_v63, %v917_v54  ;;  %v924_v16 = vrot.slane %v922_v17, 7  ;;  %v1616_v43 = vshrl.u32 %v6985_v11, 16  ;;  %v6404_v11 = vld [vmem:[%s6497_s17 + $0x190] sm:$0xff]  }
  0x81   : > { %v1620_v47 = vshll.u32 %v7022_v42, 16  ;;  %v1630_v39 = vor.u32 %v1629_v28, %v1625_v34  ;;  %v930_v53 = vshrl.u32 %v6394_v59, 16  ;;  %v933_v48 = vshll.u32 %v6394_v59, 16 }
  0x82   : > { %v937_v22 = vshrl.u32 %v6395_v18, 16  ;;  %v927_v25 = vor.u32 %v925_v45, %v924_v16  ;;  %v7030_v62 = vsel %vm6470_vm2, 0, %v920_v33  ;;  %v1618_v57 = vor.u32 %v1616_v43, %v1614_v15 }
  0x83   : > { %11104 = vst [vmem:[#allocation79_spill] sm:$0xff] %v7030_v62  ;;  %v1622_v27 = vrot.slane %v1620_v47, 1  ;;  %v7034_v19 = vsel %vm1243_vm3, %v1630_v39, %v1634_v36  ;;  %v1645_v63 = vshrl.u32 %v7030_v62, 16  ;;  %v1647_v17 = vshll.u32 %v7030_v62, 16  ;;  %v6398_v62 = vld [vmem:[%s6497_s17 + $0x160] sm:$0xff]  }
  0x84   : > { %11105 = vst [vmem:[#allocation80_spill] sm:$0xff] %v7034_v19  ;;  %v932_v34 = vrot.slane %v930_v53, 7  ;;  %2212 = vrot.lane.b32.xlu0 %v7034_v19, %s6430_s18  ;;  %v7041_v59 = vsel %vm620_vm0, %v917_v54, %v927_v25  ;;  %v939_v15 = vrot.slane %v937_v22, 7  ;;  %v940_v47 = vshll.u32 %v6395_v18, 16 }
  0x85   : > { %11106 = vst [vmem:[#allocation81_spill] sm:$0xff] %v7041_v59  ;;  %v7044_v45 = vsel %vm1243_vm3, %v1618_v57, %v1622_v27  ;;  %v1649_v28 = vrot.slane %v1647_v17, 1  ;;  %v1652_v39 = vshll.u32 %v7041_v59, 16  ;;  %v7051_v43 = vsel %vm6470_vm2, %v909_v46, 0  ;;  %v6397_v57 = vld [vmem:[%s6497_s17 + $0x158] sm:$0xff]  }
  0x86   : > { %11107 = vst [vmem:[#allocation82_spill] sm:$0xff] %v7044_v45  ;;  %2210 = vrot.lane.b32.xlu1 %v7044_v45, %s6430_s18  ;;  %v935_v33 = vor.u32 %v933_v48, %v932_v34  ;;  %11108 = vst [vmem:[#allocation83_spill] sm:$0xff] %v7051_v43  ;;  %v942_v53 = vor.u32 %v940_v47, %v939_v15  ;;  %v1636_v25 = vshrl.u32 %v7001_v35, 16  ;;  %v1640_v54 = vshll.u32 %v7051_v43, 16 }
  0x87   : > { %v945_v22 = vshrl.u32 %v6396_v61, 16  ;;  %v1650_v18 = vor.u32 %v1649_v28, %v1645_v63  ;;  %v1654_v27 = vrot.slane %v1652_v39, 1  ;;  %v948_v19 = vshll.u32 %v6396_v61, 16 }
  0x88   : > { %v7058_v17 = vsel %vm6470_vm2, 0, %v935_v33  ;;  %v7061_v48 = vsel %vm620_vm0, %v932_v34, %v942_v53  ;;  %v1638_v45 = vor.u32 %v1636_v25, %v1634_v36  ;;  %v1642_v28 = vrot.slane %v1640_v54, 1  ;;  %v6399_v33 = vld [vmem:[%s6497_s17 + $0x168] sm:$0xff]  }
  0x89   : > { %11109 = vst [vmem:[#allocation84_spill] sm:$0xff] %v7058_v17  ;;  %11110 = vst [vmem:[#allocation85_spill] sm:$0xff] %v7061_v48  ;;  %v1665_v46 = vshrl.u32 %v7058_v17, 16  ;;  %v1667_v47 = vshll.u32 %v7058_v17, 16  ;;  %v7066_v43 = vpop.permute.xlu0 %2138  ;;  %v7069_v35 = vsel %vm1243_vm3, %v1650_v18, %v1654_v27  ;;  %v1672_v63 = vshll.u32 %v7061_v48, 16 }
  0x8a   : > { %11111 = vst [vmem:[#allocation86_spill] sm:$0xff] %v7066_v43  ;;  %11112 = vst [vmem:[#allocation87_spill] sm:$0xff] %v7069_v35  ;;  %v947_v39 = vrot.slane %v945_v22, 7  ;;  %2216 = vrot.lane.b32.xlu0 %v7069_v35, %s6430_s18  ;;  %v952_v34 = vshrl.u32 %v6397_v57, 16  ;;  %v955_v53 = vshll.u32 %v6397_v57, 16  ;;  %v7077_v36 = vsel %vm6470_vm2, %v924_v16, 0 }
  0x8b   : > { %v1669_v61 = vrot.slane %v1667_v47, 1  ;;  %11113 = vst [vmem:[#allocation88_spill] sm:$0xff] %v7077_v36  ;;  %v1674_v25 = vrot.slane %v1672_v63, 1  ;;  %v7080_v43 = vsel %vm1243_vm3, %v1638_v45, %v1642_v28  ;;  %v1656_v54 = vshrl.u32 %v7041_v59, 16 }
  0x8c   : > { %11114 = vst [vmem:[#allocation89_spill] sm:$0xff] %v7080_v43  ;;  %v950_v18 = vor.u32 %v948_v19, %v947_v39  ;;  %2214 = vrot.lane.b32.xlu1 %v7080_v43, %s6430_s18  ;;  %v954_v35 = vrot.slane %v952_v34, 7  ;;  %v1660_v47 = vshll.u32 %v7077_v36, 16  ;;  %v960_v57 = vshrl.u32 %v6398_v62, 16  ;;  %v6400_v34 = vld [vmem:[%s6497_s17 + $0x170] sm:$0xff]  }
  0x8d   : > { %v1670_v22 = vor.u32 %v1669_v61, %v1665_v46  ;;  %v1658_v63 = vor.u32 %v1656_v54, %v1654_v27  ;;  %v963_v17 = vshll.u32 %v6398_v62, 16  ;;  %v967_v45 = vshrl.u32 %v6399_v33, 16  ;;  %v7096_v43 = vpop.permute.xlu0 %2136 }
  0x8e   : > { %v7088_v16 = vsel %vm6470_vm2, 0, %v950_v18  ;;  %v957_v19 = vor.u32 %v955_v53, %v954_v35  ;;  %11117 = vst [vmem:[#allocation92_spill] sm:$0xff] %v7096_v43  ;;  %v1662_v18 = vrot.slane %v1660_v47, 1  ;;  %v962_v36 = vrot.slane %v960_v57, 7 }
  0x8f   : > { %11115 = vst [vmem:[#allocation90_spill] sm:$0xff] %v7088_v16  ;;  %v7091_v28 = vsel %vm1243_vm3, %v1670_v22, %v1674_v25  ;;  %v1685_v46 = vshrl.u32 %v7088_v16, 16  ;;  %v1687_v61 = vshll.u32 %v7088_v16, 16  ;;  %v7100_v27 = vrot.slane %v967_v45, 7 }
  0x90   : > { %11116 = vst [vmem:[#allocation91_spill] sm:$0xff] %v7091_v28  ;;  %2220 = vrot.lane.b32.xlu0 %v7091_v28, %s6430_s18  ;;  %v970_v62 = vshll.u32 %v6399_v33, 16  ;;  %v7103_v54 = vsel %vm620_vm0, %v947_v39, %v957_v19  ;;  %v7107_v22 = vsel %vm6470_vm2, %v939_v15, 0  ;;  %v1676_v16 = vshrl.u32 %v7061_v48, 16  ;;  %v6401_v33 = vld [vmem:[%s6497_s17 + $0x178] sm:$0xff]   ;;  %v11286_v2 = vld [vmem:[#allocation84_spill] sm:$0xff] }
  0x91   : > { %11118 = vst [vmem:[#allocation93_spill] sm:$0xff] %v7103_v54  ;;  %v1689_v53 = vrot.slane %v1687_v61, 1  ;;  %11119 = vst [vmem:[#allocation94_spill] sm:$0xff] %v7107_v22  ;;  %v1692_v43 = vshll.u32 %v7103_v54, 16  ;;  %v7112_v59 = vsel %vm1243_vm3, %v1658_v63, %v1662_v18  ;;  %v965_v47 = vor.u32 %v963_v17, %v962_v36 }
  0x92   : > { %11120 = vst [vmem:[#allocation95_spill] sm:$0xff] %v7112_v59  ;;  %v972_v57 = vor.u32 %v970_v62, %v7100_v27  ;;  %2218 = vrot.lane.b32.xlu1 %v7112_v59, %s6430_s18  ;;  %v1678_v45 = vor.u32 %v1676_v16, %v1674_v25  ;;  %v1680_v15 = vshll.u32 %v7107_v22, 16  ;;  %v975_v19 = vshrl.u32 %v6400_v34, 16  ;;  %v6402_v25 = vld [vmem:[%s6497_s17 + $0x180] sm:$0xff]   ;;  %v6403_v16 = vld [vmem:[%s6497_s17 + $0x188] sm:$0xff]  }
  0x93   : > { %v1690_v39 = vor.u32 %v1689_v53, %v1685_v46  ;;  %v1694_v61 = vrot.slane %v1692_v43, 1  ;;  %v7124_v17 = vsel %vm6470_vm2, 0, %v965_v47  ;;  %v978_v63 = vshll.u32 %v6400_v34, 16 }
  0x94   : > { %v7120_v28 = vsel %vm620_vm0, %v962_v36, %v972_v57  ;;  %11122 = vst [vmem:[#allocation97_spill] sm:$0xff] %v7124_v17  ;;  %v1705_v18 = vshrl.u32 %v7124_v17, 16  ;;  %v1707_v46 = vshll.u32 %v7124_v17, 16  ;;  %v1682_v53 = vrot.slane %v1680_v15, 1  ;;  %v7131_v59 = vpop.permute.xlu0 %2144 }
  0x95   : > { %11121 = vst [vmem:[#allocation96_spill] sm:$0xff] %v7120_v28  ;;  %v1712_v62 = vshll.u32 %v7120_v28, 16  ;;  %11123 = vst [vmem:[#allocation98_spill] sm:$0xff] %v7131_v59  ;;  %v7134_v43 = vsel %vm1243_vm3, %v1690_v39, %v1694_v61  ;;  %v977_v36 = vrot.slane %v975_v19, 7  ;;  %v982_v57 = vshrl.u32 %v6401_v33, 16 }
  0x96   : > { %11124 = vst [vmem:[#allocation99_spill] sm:$0xff] %v7134_v43  ;;  %v985_v22 = vshll.u32 %v6401_v33, 16  ;;  %2224 = vrot.lane.b32.xlu0 %v7134_v43, %s6430_s18  ;;  %v1709_v34 = vrot.slane %v1707_v46, 1  ;;  %v7139_v17 = vsel %vm1243_vm3, %v1678_v45, %v1682_v53  ;;  %v7143_v15 = vsel %vm6470_vm2, %v954_v35, 0  ;;  %v7145_v59 = vpop.permute.xlu1 %2140 }
  0x97   : > { %v1714_v47 = vrot.slane %v1712_v62, 1  ;;  %11125 = vst [vmem:[#allocation100_spill] sm:$0xff] %v7139_v17  ;;  %11126 = vst [vmem:[#allocation101_spill] sm:$0xff] %v7143_v15  ;;  %2222 = vrot.lane.b32.xlu1 %v7139_v17, %s6430_s18  ;;  %v980_v39 = vor.u32 %v978_v63, %v977_v36  ;;  %v984_v33 = vrot.slane %v982_v57, 7  ;;  %v1696_v19 = vshrl.u32 %v7103_v54, 16 }
  0x98   : > { %11127 = vst [vmem:[#allocation102_spill] sm:$0xff] %v7145_v59  ;;  %v1700_v46 = vshll.u32 %v7143_v15, 16  ;;  %v1710_v62 = vor.u32 %v1709_v34, %v1705_v18  ;;  %v990_v43 = vshrl.u32 %v6402_v25, 16  ;;  %v993_v45 = vshll.u32 %v6402_v25, 16 }
  0x99   : > { %v997_v53 = vshrl.u32 %v6403_v16, 16  ;;  %v987_v48 = vor.u32 %v985_v22, %v984_v33  ;;  %v7153_v35 = vsel %vm6470_vm2, 0, %v980_v39  ;;  %v1698_v42 = vor.u32 %v1696_v19, %v1694_v61  ;;  %v7161_v18 = vpop.permute.xlu0 %2148 }
  0x9a   : > { %11128 = vst [vmem:[#allocation103_spill] sm:$0xff] %v7153_v35  ;;  %v1702_v59 = vrot.slane %v1700_v46, 1  ;;  %v7157_v17 = vsel %vm1243_vm3, %v1710_v62, %v1714_v47  ;;  %v1725_v63 = vshrl.u32 %v7153_v35, 16  ;;  %v1727_v57 = vshll.u32 %v7153_v35, 16  ;;  %11130 = vst [vmem:[#allocation105_spill] sm:$0xff] %v7161_v18  ;;  %v7163_v25 = vpop.permute.xlu1 %2142  ;;  %v6406_v35 = vld [vmem:[%s6497_s17 + $0x1a0] sm:$0xff]  }
  0x9b   : > { %11129 = vst [vmem:[#allocation104_spill] sm:$0xff] %v7157_v17  ;;  %v992_v15 = vrot.slane %v990_v43, 7  ;;  %11131 = vst [vmem:[#allocation106_spill] sm:$0xff] %v7163_v25  ;;  %2228 = vrot.lane.b32.xlu0 %v7157_v17, %s6430_s18  ;;  %v7168_v22 = vsel %vm620_vm0, %v977_v36, %v987_v48  ;;  %v999_v34 = vrot.slane %v997_v53, 7  ;;  %v1000_v39 = vshll.u32 %v6403_v16, 16 }
  0x9c   : > { %11132 = vst [vmem:[#allocation107_spill] sm:$0xff] %v7168_v22  ;;  %v7171_v61 = vsel %vm1243_vm3, %v1698_v42, %v1702_v59  ;;  %v1729_v19 = vrot.slane %v1727_v57, 1  ;;  %v1732_v46 = vshll.u32 %v7168_v22, 16  ;;  %v7179_v62 = vsel %vm6470_vm2, %v7100_v27, 0  ;;  %v6405_v59 = vld [vmem:[%s6497_s17 + $0x198] sm:$0xff]  }
  0x9d   : > { %11133 = vst [vmem:[#allocation108_spill] sm:$0xff] %v7171_v61  ;;  %2226 = vrot.lane.b32.xlu1 %v7171_v61, %s6430_s18  ;;  %v995_v43 = vor.u32 %v993_v45, %v992_v15  ;;  %11134 = vst [vmem:[#allocation109_spill] sm:$0xff] %v7179_v62  ;;  %v1002_v48 = vor.u32 %v1000_v39, %v999_v34  ;;  %v1716_v36 = vshrl.u32 %v7120_v28, 16  ;;  %v1720_v42 = vshll.u32 %v7179_v62, 16 }
  0x9e   : > { %v1005_v16 = vshrl.u32 %v6404_v11, 16  ;;  %v1730_v53 = vor.u32 %v1729_v19, %v1725_v63  ;;  %v1734_v57 = vrot.slane %v1732_v46, 1  ;;  %v1008_v45 = vshll.u32 %v6404_v11, 16  ;;  %v7188_v25 = vpop.permute.xlu1 %2146 }
  0x9f   : > { %v7186_v18 = vsel %vm6470_vm2, 0, %v995_v43  ;;  %11136 = vst [vmem:[#allocation111_spill] sm:$0xff] %v7188_v25  ;;  %v7191_v27 = vsel %vm620_vm0, %v992_v15, %v1002_v48  ;;  %v1718_v61 = vor.u32 %v1716_v36, %v1714_v47  ;;  %v1722_v19 = vrot.slane %v1720_v42, 1  ;;  %v6407_v43 = vld [vmem:[%s6497_s17 + $0x1a8] sm:$0xff]  }
  0xa0   : > { %11135 = vst [vmem:[#allocation110_spill] sm:$0xff] %v7186_v18  ;;  %11137 = vst [vmem:[#allocation112_spill] sm:$0xff] %v7191_v27  ;;  %v1745_v39 = vshrl.u32 %v7186_v18, 16  ;;  %v1747_v17 = vshll.u32 %v7186_v18, 16  ;;  %v7197_v62 = vsel %vm1243_vm3, %v1730_v53, %v1734_v57  ;;  %v1752_v63 = vshll.u32 %v7191_v27, 16  ;;  %v7201_v11 = vpop.permute.xlu0 %2152 }
  0xa1   : > { %11138 = vst [vmem:[#allocation113_spill] sm:$0xff] %v7197_v62  ;;  %v1007_v46 = vrot.slane %v1005_v16, 7  ;;  %11139 = vst [vmem:[#allocation114_spill] sm:$0xff] %v7201_v11  ;;  %2232 = vrot.lane.b32.xlu0 %v7197_v62, %s6430_s18  ;;  %v1012_v48 = vshrl.u32 %v6405_v59, 16  ;;  %v1015_v25 = vshll.u32 %v6405_v59, 16  ;;  %v7207_v47 = vsel %vm6470_vm2, %v984_v33, 0 }
  0xa2   : > { %v1749_v15 = vrot.slane %v1747_v17, 1  ;;  %11140 = vst [vmem:[#allocation115_spill] sm:$0xff] %v7207_v47  ;;  %v1754_v36 = vrot.slane %v1752_v63, 1  ;;  %v7210_v53 = vsel %vm1243_vm3, %v1718_v61, %v1722_v19  ;;  %v1736_v42 = vshrl.u32 %v7168_v22, 16  ;;  %v7213_v16 = vpop.permute.xlu1 %2150 }
  0xa3   : > { %11141 = vst [vmem:[#allocation116_spill] sm:$0xff] %v7210_v53  ;;  %v1010_v18 = vor.u32 %v1008_v45, %v1007_v46  ;;  %11142 = vst [vmem:[#allocation117_spill] sm:$0xff] %v7213_v16  ;;  %2230 = vrot.lane.b32.xlu1 %v7210_v53, %s6430_s18  ;;  %v1014_v17 = vrot.slane %v1012_v48, 7  ;;  %v1740_v59 = vshll.u32 %v7207_v47, 16  ;;  %v1020_v62 = vshrl.u32 %v6406_v35, 16  ;;  %v6408_v48 = vld [vmem:[%s6497_s17 + $0x1b0] sm:$0xff]  }
  0xa4   : > { %v1750_v11 = vor.u32 %v1749_v15, %v1745_v39  ;;  %v1738_v61 = vor.u32 %v1736_v42, %v1734_v57  ;;  %v1023_v63 = vshll.u32 %v6406_v35, 16  ;;  %v1027_v45 = vshrl.u32 %v6407_v43, 16 }
  0xa5   : > { %v7220_v33 = vsel %vm6470_vm2, 0, %v1010_v18  ;;  %v1017_v22 = vor.u32 %v1015_v25, %v1014_v17  ;;  %v1742_v16 = vrot.slane %v1740_v59, 1  ;;  %v1022_v53 = vrot.slane %v1020_v62, 7 }
  0xa6   : > { %11143 = vst [vmem:[#allocation118_spill] sm:$0xff] %v7220_v33  ;;  %v7223_v19 = vsel %vm1243_vm3, %v1750_v11, %v1754_v36  ;;  %v1765_v39 = vshrl.u32 %v7220_v33, 16  ;;  %v1767_v15 = vshll.u32 %v7220_v33, 16  ;;  %v7230_v18 = vrot.slane %v1027_v45, 7  ;;  %v7232_v35 = vpop.permute.xlu0 %2156  ;;  %v6409_v45 = vld [vmem:[%s6497_s17 + $0x1b8] sm:$0xff]  }
  0xa7   : > { %11144 = vst [vmem:[#allocation119_spill] sm:$0xff] %v7223_v19  ;;  %2236 = vrot.lane.b32.xlu0 %v7223_v19, %s6430_s18  ;;  %v1030_v57 = vshll.u32 %v6407_v43, 16  ;;  %11145 = vst [vmem:[#allocation120_spill] sm:$0xff] %v7232_v35  ;;  %v7235_v11 = vsel %vm620_vm0, %v1007_v46, %v1017_v22  ;;  %v7239_v42 = vsel %vm6470_vm2, %v999_v34, 0  ;;  %v1756_v33 = vshrl.u32 %v7191_v27, 16 }
  0xa8   : > { %11146 = vst [vmem:[#allocation121_spill] sm:$0xff] %v7235_v11  ;;  %v1769_v25 = vrot.slane %v1767_v15, 1  ;;  %11147 = vst [vmem:[#allocation122_spill] sm:$0xff] %v7239_v42  ;;  %v1772_v47 = vshll.u32 %v7235_v11, 16  ;;  %v7244_v59 = vsel %vm1243_vm3, %v1738_v61, %v1742_v16  ;;  %v1025_v62 = vor.u32 %v1023_v63, %v1022_v53  ;;  %v7248_v35 = vpop.permute.xlu1 %2154 }
  0xa9   : > { %11148 = vst [vmem:[#allocation123_spill] sm:$0xff] %v7244_v59  ;;  %v1032_v43 = vor.u32 %v1030_v57, %v7230_v18  ;;  %11149 = vst [vmem:[#allocation124_spill] sm:$0xff] %v7248_v35  ;;  %2234 = vrot.lane.b32.xlu1 %v7244_v59, %s6430_s18  ;;  %v1758_v34 = vor.u32 %v1756_v33, %v1754_v36  ;;  %v1760_v46 = vshll.u32 %v7239_v42, 16  ;;  %v1035_v15 = vshrl.u32 %v6408_v48, 16  ;;  %v6410_v36 = vld [vmem:[%s6497_s17 + $0x1c0] sm:$0xff]  }
  0xaa   : > { %v1770_v22 = vor.u32 %v1769_v25, %v1765_v39  ;;  %v1774_v19 = vrot.slane %v1772_v47, 1  ;;  %v7258_v16 = vsel %vm6470_vm2, 0, %v1025_v62  ;;  %v1038_v61 = vshll.u32 %v6408_v48, 16 }
  0xab   : > { %v7254_v27 = vsel %vm620_vm0, %v1022_v53, %v1032_v43  ;;  %11151 = vst [vmem:[#allocation126_spill] sm:$0xff] %v7258_v16  ;;  %v1785_v63 = vshrl.u32 %v7258_v16, 16  ;;  %v1787_v39 = vshll.u32 %v7258_v16, 16  ;;  %v1762_v25 = vrot.slane %v1760_v46, 1 }
  0xac   : > { %11150 = vst [vmem:[#allocation125_spill] sm:$0xff] %v7254_v27  ;;  %v1792_v57 = vshll.u32 %v7254_v27, 16  ;;  %v7265_v33 = vsel %vm1243_vm3, %v1770_v22, %v1774_v19  ;;  %v1037_v47 = vrot.slane %v1035_v15, 7  ;;  %v1042_v53 = vshrl.u32 %v6409_v45, 16  ;;  %v7267_v35 = vpop.permute.xlu0 %2160 }
  0xad   : > { %11152 = vst [vmem:[#allocation127_spill] sm:$0xff] %v7265_v33  ;;  %v1045_v43 = vshll.u32 %v6409_v45, 16  ;;  %11153 = vst [vmem:[#allocation128_spill] sm:$0xff] %v7267_v35  ;;  %2240 = vrot.lane.b32.xlu0 %v7265_v33, %s6430_s18  ;;  %v1789_v48 = vrot.slane %v1787_v39, 1  ;;  %v7272_v59 = vsel %vm1243_vm3, %v1758_v34, %v1762_v25  ;;  %v7276_v46 = vsel %vm6470_vm2, %v1014_v17, 0  ;;  %v7278_v22 = vpop.permute.xlu1 %2158 }
  0xae   : > { %v1794_v62 = vrot.slane %v1792_v57, 1  ;;  %11154 = vst [vmem:[#allocation129_spill] sm:$0xff] %v7272_v59  ;;  %11155 = vst [vmem:[#allocation130_spill] sm:$0xff] %v7276_v46  ;;  %2238 = vrot.lane.b32.xlu1 %v7272_v59, %s6430_s18  ;;  %v1040_v45 = vor.u32 %v1038_v61, %v1037_v47  ;;  %v1044_v15 = vrot.slane %v1042_v53, 7  ;;  %v1776_v35 = vshrl.u32 %v7235_v11, 16  ;;  %v6411_v57 = vld [vmem:[%s6497_s17 + $0x1c8] sm:$0xff]  }
  0xaf   : > { %11156 = vst [vmem:[#allocation131_spill] sm:$0xff] %v7278_v22  ;;  %v1780_v39 = vshll.u32 %v7276_v46, 16  ;;  %v1790_v33 = vor.u32 %v1789_v48, %v1785_v63  ;;  %v1050_v34 = vshrl.u32 %v6410_v36, 16  ;;  %v1053_v25 = vshll.u32 %v6410_v36, 16  ;;  %v6412_v11 = vld [vmem:[%s6497_s17 + $0x1d0] sm:$0xff]  }
  0xb0   : > { %v1047_v16 = vor.u32 %v1045_v43, %v1044_v15  ;;  %v7287_v17 = vsel %vm6470_vm2, 0, %v1040_v45  ;;  %v1778_v22 = vor.u32 %v1776_v35, %v1774_v19  ;;  %v1057_v36 = vshrl.u32 %v6411_v57, 16 }
  0xb1   : > { %11157 = vst [vmem:[#allocation132_spill] sm:$0xff] %v7287_v17  ;;  %v1782_v42 = vrot.slane %v1780_v39, 1  ;;  %v7290_v59 = vsel %vm1243_vm3, %v1790_v33, %v1794_v62  ;;  %v1805_v61 = vshrl.u32 %v7287_v17, 16  ;;  %v1807_v53 = vshll.u32 %v7287_v17, 16  ;;  %v7295_v46 = vpop.permute.xlu0 %2164 }
  0xb2   : > { %11158 = vst [vmem:[#allocation133_spill] sm:$0xff] %v7290_v59  ;;  %11159 = vst [vmem:[#allocation134_spill] sm:$0xff] %v7295_v46  ;;  %2244 = vrot.lane.b32.xlu0 %v7290_v59, %s6430_s18  ;;  %v7300_v63 = vsel %vm620_vm0, %v1037_v47, %v1047_v16  ;;  %v1052_v35 = vrot.slane %v1050_v34, 7  ;;  %v1060_v48 = vshll.u32 %v6411_v57, 16  ;;  %v7311_v45 = vsel %vm6470_vm2, %v7230_v18, 0  ;;  %v6413_v34 = vld [vmem:[%s6497_s17 + $0x1d8] sm:$0xff]  }
  0xb3   : > { %11160 = vst [vmem:[#allocation135_spill] sm:$0xff] %v7300_v63  ;;  %v7303_v19 = vsel %vm1243_vm3, %v1778_v22, %v1782_v42  ;;  %v1809_v33 = vrot.slane %v1807_v53, 1  ;;  %v1812_v43 = vshll.u32 %v7300_v63, 16  ;;  %11162 = vst [vmem:[#allocation137_spill] sm:$0xff] %v7311_v45  ;;  %v7313_v39 = vpop.permute.xlu1 %2162  ;;  %v1059_v47 = vrot.slane %v1057_v36, 7 }
  0xb4   : > { %11161 = vst [vmem:[#allocation136_spill] sm:$0xff] %v7303_v19  ;;  %2242 = vrot.lane.b32.xlu1 %v7303_v19, %s6430_s18  ;;  %11163 = vst [vmem:[#allocation138_spill] sm:$0xff] %v7313_v39  ;;  %v1055_v16 = vor.u32 %v1053_v25, %v1052_v35  ;;  %v1796_v42 = vshrl.u32 %v7254_v27, 16  ;;  %v1800_v22 = vshll.u32 %v7311_v45, 16  ;;  %v1065_v59 = vshrl.u32 %v6412_v11, 16 }
  0xb5   : > { %v1810_v53 = vor.u32 %v1809_v33, %v1805_v61  ;;  %v1814_v46 = vrot.slane %v1812_v43, 1  ;;  %v1062_v17 = vor.u32 %v1060_v48, %v1059_v47  ;;  %v1068_v33 = vshll.u32 %v6412_v11, 16 }
  0xb6   : > { %v7320_v57 = vsel %vm6470_vm2, 0, %v1055_v16  ;;  %v1798_v19 = vor.u32 %v1796_v42, %v1794_v62  ;;  %v1802_v18 = vrot.slane %v1800_v22, 1  ;;  %v1067_v45 = vrot.slane %v1065_v59, 7  ;;  %v6414_v22 = vld [vmem:[%s6497_s17 + $0x1e0] sm:$0xff]  }
  0xb7   : > { %11164 = vst [vmem:[#allocation139_spill] sm:$0xff] %v7320_v57  ;;  %v7323_v39 = vsel %vm1243_vm3, %v1810_v53, %v1814_v46  ;;  %v1825_v25 = vshrl.u32 %v7320_v57, 16  ;;  %v1827_v36 = vshll.u32 %v7320_v57, 16  ;;  %v7327_v27 = vpop.permute.xlu0 %2168  ;;  %v7332_v61 = vsel %vm620_vm0, %v1052_v35, %v1062_v17 }
  0xb8   : > { %11165 = vst [vmem:[#allocation140_spill] sm:$0xff] %v7323_v39  ;;  %11166 = vst [vmem:[#allocation141_spill] sm:$0xff] %v7327_v27  ;;  %2248 = vrot.lane.b32.xlu0 %v7323_v39, %s6430_s18  ;;  %v7335_v62 = vsel %vm1243_vm3, %v1798_v19, %v1802_v18  ;;  %v1072_v43 = vshrl.u32 %v6413_v34, 16  ;;  %v1832_v16 = vshll.u32 %v7332_v61, 16  ;;  %v1075_v59 = vshll.u32 %v6413_v34, 16  ;;  %v6415_v18 = vld [vmem:[%s6497_s17 + $0x1e8] sm:$0xff]  }
  0xb9   : > { %11167 = vst [vmem:[#allocation142_spill] sm:$0xff] %v7332_v61  ;;  %11168 = vst [vmem:[#allocation143_spill] sm:$0xff] %v7335_v62  ;;  %v1829_v48 = vrot.slane %v1827_v36, 1  ;;  %2246 = vrot.lane.b32.xlu1 %v7335_v62, %s6430_s18  ;;  %v7342_v42 = vsel %vm6470_vm2, %v1044_v15, 0  ;;  %v7345_v53 = vpop.permute.xlu1 %2166  ;;  %v1070_v17 = vor.u32 %v1068_v33, %v1067_v45  ;;  %v1816_v19 = vshrl.u32 %v7300_v63, 16 }
  0xba   : > { %11169 = vst [vmem:[#allocation144_spill] sm:$0xff] %v7345_v53  ;;  %v1074_v35 = vrot.slane %v1072_v43, 7  ;;  %v1820_v11 = vshll.u32 %v7342_v42, 16  ;;  %v1834_v27 = vrot.slane %v1832_v16, 1  ;;  %v1080_v53 = vshrl.u32 %v6414_v22, 16 }
  0xbb   : > { %v1830_v36 = vor.u32 %v1829_v48, %v1825_v25  ;;  %v7352_v34 = vsel %vm6470_vm2, 0, %v1070_v17  ;;  %v1818_v62 = vor.u32 %v1816_v19, %v1814_v46  ;;  %v1083_v46 = vshll.u32 %v6414_v22, 16 }
  0xbc   : > { %v1077_v39 = vor.u32 %v1075_v59, %v1074_v35  ;;  %11170 = vst [vmem:[#allocation145_spill] sm:$0xff] %v7352_v34  ;;  %v1822_v15 = vrot.slane %v1820_v11, 1  ;;  %v1845_v33 = vshrl.u32 %v7352_v34, 16  ;;  %v1847_v43 = vshll.u32 %v7352_v34, 16 }
  0xbd   : > { %v7355_v57 = vsel %vm1243_vm3, %v1830_v36, %v1834_v27  ;;  %v7359_v63 = vpop.permute.xlu0 %2172  ;;  %v1087_v16 = vshrl.u32 %v6415_v18, 16  ;;  %v1082_v19 = vrot.slane %v1080_v53, 7  ;;  %v1090_v11 = vshll.u32 %v6415_v18, 16 }
  0xbe   : > { %11171 = vst [vmem:[#allocation146_spill] sm:$0xff] %v7355_v57  ;;  %11172 = vst [vmem:[#allocation147_spill] sm:$0xff] %v7359_v63  ;;  %2252 = vrot.lane.b32.xlu0 %v7355_v57, %s6430_s18  ;;  %v7364_v25 = vsel %vm620_vm0, %v1067_v45, %v1077_v39  ;;  %v7367_v48 = vsel %vm1243_vm3, %v1818_v62, %v1822_v15  ;;  %v1849_v59 = vrot.slane %v1847_v43, 1  ;;  %v7376_v45 = vsel %vm6470_vm2, %v1059_v47, 0 }
  0xbf   : > { %11173 = vst [vmem:[#allocation148_spill] sm:$0xff] %v7364_v25  ;;  %11174 = vst [vmem:[#allocation149_spill] sm:$0xff] %v7367_v48  ;;  %v1852_v17 = vshll.u32 %v7364_v25, 16  ;;  %2250 = vrot.lane.b32.xlu1 %v7367_v48, %s6430_s18  ;;  %v7372_v36 = vpop.permute.xlu1 %2170  ;;  %v1089_v63 = vrot.slane %v1087_v16, 7  ;;  %v1836_v39 = vshrl.u32 %v7332_v61, 16  ;;  %v1085_v15 = vor.u32 %v1083_v46, %v1082_v19 }
  0xc0   : > { %11175 = vst [vmem:[#allocation150_spill] sm:$0xff] %v7372_v36  ;;  %v1850_v62 = vor.u32 %v1849_v59, %v1845_v33  ;;  %v1840_v43 = vshll.u32 %v7376_v45, 16  ;;  %v1952_v57 = vrot.slane %v6477_v3, 1  ;;  %v1949_v16 = vrot.slane %v6484_v6, 1 }
  0xc1   : > { %v1854_v22 = vrot.slane %v1852_v17, 1  ;;  %v1092_v34 = vor.u32 %v1090_v11, %v1089_v63  ;;  %v1838_v48 = vor.u32 %v1836_v39, %v1834_v27  ;;  %v7386_v18 = vsel %vm6470_vm2, 0, %v1085_v15 }
  0xc2   : > { %11177 = vst [vmem:[#allocation152_spill] sm:$0xff] %v7386_v18  ;;  %v1842_v47 = vrot.slane %v1840_v43, 1  ;;  %v1865_v27 = vshrl.u32 %v7386_v18, 16  ;;  %v1867_v46 = vshll.u32 %v7386_v18, 16  ;;  %v1950_v59 = vrot.slane %v6467_v1, 1 }
  0xc3   : > { %v7382_v53 = vsel %vm1243_vm3, %v1850_v62, %v1854_v22  ;;  %v7389_v33 = vpop.permute.xlu0 %2176  ;;  %v7394_v3 = vsel %vm620_vm0, %v1082_v19, %v1092_v34  ;;  %v7407_v62 = vsel %vm6470_vm2, %v1074_v35, 0  ;;  %v1856_v34 = vshrl.u32 %v7364_v25, 16 }
  0xc4   : > { %11176 = vst [vmem:[#allocation151_spill] sm:$0xff] %v7382_v53  ;;  %11178 = vst [vmem:[#allocation153_spill] sm:$0xff] %v7389_v33  ;;  %2256 = vrot.lane.b32.xlu0 %v7382_v53, %s6430_s18  ;;  %v7399_v17 = vpop.permute.xlu1 %2174  ;;  %v1872_v11 = vshll.u32 %v7394_v3, 16  ;;  %v7403_v39 = vsel %vm1243_vm3, %v1838_v48, %v1842_v47  ;;  %v1869_v19 = vrot.slane %v1867_v46, 1  ;;  %v1951_v15 = vsel %vm1948_vm4, %v1949_v16, %v1950_v59 }
  0xc5   : > { %11179 = vst [vmem:[#allocation154_spill] sm:$0xff] %v7394_v3  ;;  %11180 = vst [vmem:[#allocation155_spill] sm:$0xff] %v7399_v17  ;;  %2254 = vrot.lane.b32.xlu1 %v7403_v39, %s6430_s18  ;;  %v1953_v43 = vsel %vm1948_vm4, %v1950_v59, %v1952_v57  ;;  %v1860_v33 = vshll.u32 %v7407_v62, 16  ;;  %v1858_v48 = vor.u32 %v1856_v34, %v1854_v22  ;;  %v7421_v46 = vsel %vm6470_vm2, %v1089_v63, 0 }
  0xc6   : > { %11181 = vst [vmem:[#allocation156_spill] sm:$0xff] %v7403_v39  ;;  %v1874_v17 = vrot.slane %v1872_v11, 1  ;;  %v7415_v36 = vpack.i.bf16 %v1953_v43, %v1951_v15  ;;  %v1870_v47 = vor.u32 %v1869_v19, %v1865_v27  ;;  %v1876_v6 = vshrl.u32 %v7394_v3, 16 }
  0xc7   : > { %v1862_v1 = vrot.slane %v1860_v33, 1  ;;  %v1880_v59 = vshll.u32 %v7421_v46, 16  ;;  %v1955_v63 = vrot.slane %v6538_v55, 1  ;;  %v1957_v22 = vrot.slane %v6535_v52, 1 }
  0xc8   : > { %11182 = vst [vmem:[#allocation157_spill] sm:$0xff] %v7415_v36  ;;  %v7417_v35 = vpop.permute.xlu0 %2180  ;;  %v7425_v16 = vsel %vm1243_vm3, %v1870_v47, %v1874_v17  ;;  %v1878_v33 = vor.u32 %v1876_v6, %v1874_v17  ;;  %v1954_v34 = vrot.slane %v6531_v49, 1  ;;  %v1960_v6 = vrot.slane %v6519_v40, 1 }
  0xc9   : > { %11183 = vst [vmem:[#allocation158_spill] sm:$0xff] %v7417_v35  ;;  %11184 = vst [vmem:[#allocation159_spill] sm:$0xff] %v7425_v16  ;;  %v7428_v57 = vsel %vm1243_vm3, %v1858_v48, %v1862_v1  ;;  %2260 = vrot.lane.b32.xlu0 %v7425_v16, %s6430_s18  ;;  %v1882_v27 = vrot.slane %v1880_v59, 1  ;;  %v7448_v15 = vsel %vm1948_vm4, %v1955_v63, %v1957_v22  ;;  %v1962_v52 = vrot.slane %v6572_v30, 1 }
  0xca   : > { %11185 = vst [vmem:[#allocation160_spill] sm:$0xff] %v7428_v57  ;;  %v7431_v11 = vpop.permute.xlu1 %2178  ;;  %2258 = vrot.lane.b32.xlu1 %v7428_v57, %s6430_s18  ;;  %11189 = vst [vmem:[#allocation164_spill] sm:$0xff] %v7448_v15  ;;  %v7455_v17 = vsel %vm1948_vm4, %v1954_v34, %v1955_v63  ;;  %v1959_v43 = vrot.slane %v6523_v41, 1  ;;  %v1965_v47 = vrot.slane %v6547_v8, 1  ;;  %v1967_v59 = vrot.slane %v6597_v56, 1 }
  0xcb   : > { %11186 = vst [vmem:[#allocation161_spill] sm:$0xff] %v7431_v11  ;;  %v7441_v1 = vsel %vm1243_vm3, %v1878_v33, %v1882_v27  ;;  %11190 = vst [vmem:[#allocation165_spill] sm:$0xff] %v7455_v17  ;;  %v7467_v22 = vsel %vm1948_vm4, %v1960_v6, %v1962_v52  ;;  %v1964_v63 = vrot.slane %v6551_v9, 1  ;;  %v1970_v56 = vrot.slane %v6593_v50, 1 }
  0xcc   : > { %11187 = vst [vmem:[#allocation162_spill] sm:$0xff] %v7441_v1  ;;  %11192 = vst [vmem:[#allocation167_spill] sm:$0xff] %v7467_v22  ;;  %v7470_v30 = vsel %vm1948_vm4, %v1959_v43, %v1960_v6  ;;  %v7480_v34 = vsel %vm1948_vm4, %v1965_v47, %v1967_v59  ;;  %v1972_v6 = vrot.slane %v6627_v32, 1  ;;  %v1969_v43 = vrot.slane %v6583_v26, 1 }
  0xcd   : > { %6340 = vrot.lane.b32.xlu0 %v7415_v36, %s6431_s19  ;;  %11193 = vst [vmem:[#allocation168_spill] sm:$0xff] %v7470_v30  ;;  %11196 = vst [vmem:[#allocation171_spill] sm:$0xff] %v7480_v34  ;;  %v7487_v52 = vsel %vm1948_vm4, %v1964_v63, %v1965_v47  ;;  %v1975_v59 = vrot.slane %v6614_v13, 1  ;;  %v1977_v32 = vrot.slane %v6653_v5, 1  ;;  %v1974_v63 = vrot.slane %v6608_v51, 1 }
  0xce   : > { %v7443_v19 = vpop.permute.xlu0 %2184  ;;  %2262 = vrot.lane.b32.xlu1 %v7441_v1, %s6430_s18  ;;  %11197 = vst [vmem:[#allocation172_spill] sm:$0xff] %v7487_v52  ;;  %v7504_v47 = vsel %vm1948_vm4, %v1969_v43, %v1970_v56  ;;  %v1982_v5 = vrot.slane %v6686_v60, 1  ;;  %v1979_v43 = vrot.slane %v6638_v44, 1  ;;  %v1987_v60 = vrot.slane %v6715_v4, 1 }
  0xcf   : > { %11188 = vst [vmem:[#allocation163_spill] sm:$0xff] %v7443_v19  ;;  %v7500_v19 = vsel %vm1948_vm4, %v1970_v56, %v1972_v6  ;;  %11201 = vst [vmem:[#allocation176_spill] sm:$0xff] %v7504_v47  ;;  %v7515_v6 = vsel %vm1948_vm4, %v1975_v59, %v1977_v32  ;;  %v7519_v56 = vsel %vm1948_vm4, %v1974_v63, %v1975_v59  ;;  %v1984_v63 = vrot.slane %v6670_v31, 1 }
  0xd0   : > { %v7458_v48 = vpop.permute.xlu1 %2182  ;;  %11200 = vst [vmem:[#allocation175_spill] sm:$0xff] %v7500_v19  ;;  %11203 = vst [vmem:[#allocation178_spill] sm:$0xff] %v7515_v6  ;;  %vm3805_vm11 = vcmask 146432   ;;  %vm3676_vm12 = vcmask 121856   ;;  %vm3934_vm13 = vcmask 171008   ;;  %vm4063_vm14 = vcmask 195584  }
  0xd1   : > { %11191 = vst [vmem:[#allocation166_spill] sm:$0xff] %v7458_v48  ;;  %2270 = vrot.lane.b32.xlu0 %v7448_v15, %s6431_s19  ;;  %11204 = vst [vmem:[#allocation179_spill] sm:$0xff] %v7519_v56  ;;  %v11267_v15 = vld [vmem:[#allocation69_spill] sm:$0xff]  ;;  %vm4214_vm15 = vcmask 220160  }
  0xd2   : > { %2268 = vrot.lane.b32.xlu1 %v7455_v17, %s6431_s19 }
  0xd4   : > { %v7473_v33 = vpop.permute.xlu0 %2188 }
  0xd5   : > { %11194 = vst [vmem:[#allocation169_spill] sm:$0xff] %v7473_v33  ;;  %2274 = vrot.lane.b32.xlu0 %v7467_v22, %s6431_s19  ;;  %v11260_v22 = vld [vmem:[#allocation64_spill] sm:$0xff] }
  0xd6   : > { %v7475_v27 = vpop.permute.xlu1 %2186  ;;  %2272 = vrot.lane.b32.xlu1 %v7470_v30, %s6431_s19 }
  0xd7   : > { %11195 = vst [vmem:[#allocation170_spill] sm:$0xff] %v7475_v27 }
  0xd9   : > { %2278 = vrot.lane.b32.xlu0 %v7480_v34, %s6431_s19 }
  0xda   : > { %v7490_v33 = vpop.permute.xlu0 %2192  ;;  %2276 = vrot.lane.b32.xlu1 %v7487_v52, %s6431_s19 }
  0xdb   : > { %11198 = vst [vmem:[#allocation173_spill] sm:$0xff] %v7490_v33  ;;  %v7497_v27 = vpop.permute.xlu1 %2190  ;;  %v1980_v33 = vrot.slane %v6649_v0, 1 }
  0xdc   : > { %11199 = vst [vmem:[#allocation174_spill] sm:$0xff] %v7497_v27 }
  0xdd   : > { %2282 = vrot.lane.b32.xlu0 %v7500_v19, %s6431_s19  ;;  %v7530_v32 = vsel %vm1948_vm4, %v1980_v33, %v1982_v5  ;;  %v7534_v59 = vsel %vm1948_vm4, %v1979_v43, %v1980_v33  ;;  %v1992_v5 = vrot.slane %v6739_v7, 1  ;;  %v1989_v43 = vrot.slane %v6695_v21, 1 }
  0xde   : > { %2280 = vrot.lane.b32.xlu1 %v7504_v47, %s6431_s19  ;;  %11206 = vst [vmem:[#allocation181_spill] sm:$0xff] %v7530_v32  ;;  %11207 = vst [vmem:[#allocation182_spill] sm:$0xff] %v7534_v59 }
  0xdf   : > { %v7512_v36 = vpop.permute.xlu0 %2196 }
  0xe0   : > { %11202 = vst [vmem:[#allocation177_spill] sm:$0xff] %v7512_v36  ;;  %v1985_v36 = vrot.slane %v6666_v29, 1 }
  0xe1   : > { %v7522_v27 = vpop.permute.xlu1 %2194  ;;  %2286 = vrot.lane.b32.xlu0 %v7515_v6, %s6431_s19 }
  0xe2   : > { %11205 = vst [vmem:[#allocation180_spill] sm:$0xff] %v7522_v27  ;;  %2284 = vrot.lane.b32.xlu1 %v7519_v56, %s6431_s19  ;;  %v1990_v27 = vrot.slane %v6705_v24, 1  ;;  %v7548_v4 = vsel %vm1948_vm4, %v1985_v36, %v1987_v60  ;;  %v7551_v33 = vsel %vm1948_vm4, %v1984_v63, %v1985_v36  ;;  %v1997_v60 = vrot.slane %v6765_v10, 1 }
  0xe3   : > { %11210 = vst [vmem:[#allocation185_spill] sm:$0xff] %v7548_v4  ;;  %11211 = vst [vmem:[#allocation186_spill] sm:$0xff] %v7551_v33  ;;  %v1994_v63 = vrot.slane %v6722_v38, 1  ;;  %v2002_v10 = vrot.slane %v6798_v12, 1 }
  0xe4   : > { %v7557_v11 = vsel %vm1948_vm4, %v1990_v27, %v1992_v5  ;;  %v7566_v36 = vsel %vm1948_vm4, %v1989_v43, %v1990_v27  ;;  %v2000_v5 = vrot.slane %v6761_v20, 1  ;;  %v1999_v43 = vrot.slane %v6750_v14, 1 }
  0xe5   : > { %v7537_v35 = vpop.permute.xlu0 %2200  ;;  %2290 = vrot.lane.b32.xlu0 %v7530_v32, %s6431_s19  ;;  %11212 = vst [vmem:[#allocation187_spill] sm:$0xff] %v7557_v11  ;;  %11214 = vst [vmem:[#allocation189_spill] sm:$0xff] %v7566_v36 }
  0xe6   : > { %11208 = vst [vmem:[#allocation183_spill] sm:$0xff] %v7537_v35  ;;  %2288 = vrot.lane.b32.xlu1 %v7534_v59, %s6431_s19  ;;  %v7595_v12 = vsel %vm1948_vm4, %v2000_v5, %v2002_v10  ;;  %v11226_v10 = vld [vmem:[#allocation47_spill] sm:$0xff] }
  0xe7   : > { %v7545_v48 = vpop.permute.xlu1 %2198  ;;  %11220 = vst [vmem:[#allocation195_spill] sm:$0xff] %v7595_v12 }
  0xe8   : > { %11209 = vst [vmem:[#allocation184_spill] sm:$0xff] %v7545_v48  ;;  %v1995_v48 = vrot.slane %v6726_v23, 1 }
  0xe9   : > { %2294 = vrot.lane.b32.xlu0 %v7548_v4, %s6431_s19 }
  0xea   : > { %2292 = vrot.lane.b32.xlu1 %v7551_v33, %s6431_s19  ;;  %v7581_v27 = vsel %vm1948_vm4, %v1994_v63, %v1995_v48  ;;  %v11222_v63 = vld [vmem:[#allocation37_spill] sm:$0xff] }
  0xeb   : > { %v7561_v7 = vpop.permute.xlu0 %2204  ;;  %11217 = vst [vmem:[#allocation192_spill] sm:$0xff] %v7581_v27 }
  0xec   : > { %11213 = vst [vmem:[#allocation188_spill] sm:$0xff] %v7561_v7  ;;  %v7577_v7 = vsel %vm1948_vm4, %v1995_v48, %v1997_v60  ;;  %v2005_v60 = vrot.slane %v6777_v58, 1  ;;  %v7598_v48 = vsel %vm1948_vm4, %v1999_v43, %v2000_v5  ;;  %v11228_v43 = vld [vmem:[#allocation40_spill] sm:$0xff] }
  0xed   : > { %v7569_v35 = vpop.permute.xlu1 %2202  ;;  %2298 = vrot.lane.b32.xlu0 %v7557_v11, %s6431_s19  ;;  %11216 = vst [vmem:[#allocation191_spill] sm:$0xff] %v7577_v7  ;;  %11221 = vst [vmem:[#allocation196_spill] sm:$0xff] %v7598_v48  ;;  %v2009_v4 = vrot.slane %v11228_v43, 1 }
  0xee   : > { %11215 = vst [vmem:[#allocation190_spill] sm:$0xff] %v7569_v35  ;;  %2296 = vrot.lane.b32.xlu1 %v7566_v36, %s6431_s19  ;;  %v2007_v36 = vrot.slane %v6827_v37, 1  ;;  %v11225_v37 = vld [vmem:[#allocation42_spill] sm:$0xff] }
  0xf1   : > { %v7584_v33 = vpop.permute.xlu0 %2208  ;;  %2302 = vrot.lane.b32.xlu0 %v7577_v7, %s6431_s19  ;;  %v2012_v7 = vrot.slane %v11226_v10, 1 }
  0xf2   : > { %11218 = vst [vmem:[#allocation193_spill] sm:$0xff] %v7584_v33  ;;  %v7586_v35 = vpop.permute.xlu1 %2206  ;;  %2300 = vrot.lane.b32.xlu1 %v7581_v27, %s6431_s19  ;;  %v2004_v33 = vrot.slane %v11222_v63, 1  ;;  %v2010_v27 = vrot.slane %v11225_v37, 1 }
  0xf3   : > { %11219 = vst [vmem:[#allocation194_spill] sm:$0xff] %v7586_v35  ;;  %v7606_v35 = vsel %vm1948_vm4, %v2005_v60, %v2007_v36  ;;  %v11230_v36 = vld [vmem:[#allocation45_spill] sm:$0xff] }
  0xf4   : > { %11224 = vst [vmem:[#allocation198_spill] sm:$0xff] %v7606_v35  ;;  %v7613_v5 = vsel %vm1948_vm4, %v2004_v33, %v2005_v60  ;;  %v7628_v33 = vsel %vm1948_vm4, %v2009_v4, %v2010_v27  ;;  %v11234_v60 = vld [vmem:[#allocation44_spill] sm:$0xff] }
  0xf5   : > { %2306 = vrot.lane.b32.xlu0 %v7595_v12, %s6431_s19  ;;  %11227 = vst [vmem:[#allocation47_spill] sm:$0xff] %v7613_v5  ;;  %v11232_v12 = vld [vmem:[#allocation52_spill] sm:$0xff]  ;;  %v2014_v32 = vrot.slane %v11234_v60, 1 }
  0xf6   : > { %v7601_v11 = vpop.permute.xlu0 %2212  ;;  %2304 = vrot.lane.b32.xlu1 %v7598_v48, %s6431_s19  ;;  %v7624_v48 = vsel %vm1948_vm4, %v2010_v27, %v2012_v7  ;;  %v2017_v10 = vrot.slane %v11232_v12, 1  ;;  %11233 = vst [vmem:[#allocation52_spill] sm:$0xff] %v7628_v33  ;;  %v11241_v27 = vld [vmem:[#allocation49_spill] sm:$0xff] }
  0xf7   : > { %11223 = vst [vmem:[#allocation197_spill] sm:$0xff] %v7601_v11  ;;  %v2015_v11 = vrot.slane %v11230_v36, 1  ;;  %11231 = vst [vmem:[#allocation200_spill] sm:$0xff] %v7624_v48 }
  0xf8   : > { %v7616_v59 = vpop.permute.xlu1 %2210 }
  0xf9   : > { %11229 = vst [vmem:[#allocation199_spill] sm:$0xff] %v7616_v59  ;;  %2310 = vrot.lane.b32.xlu0 %v7606_v35, %s6431_s19  ;;  %v11238_v35 = vld [vmem:[#allocation58_spill] sm:$0xff]  ;;  %v7642_v12 = vsel %vm1948_vm4, %v2015_v11, %v2017_v10  ;;  %v7645_v4 = vsel %vm1948_vm4, %v2014_v32, %v2015_v11  ;;  %v11245_v10 = vld [vmem:[#allocation63_spill] sm:$0xff] }
  0xfa   : > { %2308 = vrot.lane.b32.xlu1 %v7613_v5, %s6431_s19  ;;  %v11237_v5 = vld [vmem:[#allocation51_spill] sm:$0xff]  ;;  %v2022_v6 = vrot.slane %v11238_v35, 1  ;;  %11239 = vst [vmem:[#allocation58_spill] sm:$0xff] %v7642_v12  ;;  %11240 = vst [vmem:[#allocation203_spill] sm:$0xff] %v7645_v4  ;;  %v11244_v35 = vld [vmem:[#allocation54_spill] sm:$0xff] }
  0xfb   : > { %v2020_v7 = vrot.slane %v11237_v5, 1  ;;  %v11247_v32 = vld [vmem:[#allocation55_spill] sm:$0xff] }
  0xfc   : > { %v7631_v56 = vpop.permute.xlu0 %2216  ;;  %v2024_v19 = vrot.slane %v11247_v32, 1 }
  0xfd   : > { %11235 = vst [vmem:[#allocation201_spill] sm:$0xff] %v7631_v56  ;;  %2314 = vrot.lane.b32.xlu0 %v7624_v48, %s6431_s19  ;;  %v2019_v56 = vrot.slane %v11241_v27, 1  ;;  %v2027_v48 = vrot.slane %v11245_v10, 1 }
  0xfe   : > { %v7633_v59 = vpop.permute.xlu1 %2214  ;;  %2312 = vrot.lane.b32.xlu1 %v7628_v33, %s6431_s19  ;;  %v2025_v33 = vrot.slane %v11244_v35, 1 }
  0xff   : > { %11236 = vst [vmem:[#allocation202_spill] sm:$0xff] %v7633_v59  ;;  %v7653_v59 = vsel %vm1948_vm4, %v2020_v7, %v2022_v6  ;;  %v7660_v11 = vsel %vm1948_vm4, %v2019_v56, %v2020_v7  ;;  %v11249_v6 = vld [vmem:[#allocation61_spill] sm:$0xff]  ;;  %v11253_v7 = vld [vmem:[#allocation59_spill] sm:$0xff] }
 0x100   : > { %11243 = vst [vmem:[#allocation205_spill] sm:$0xff] %v7653_v59  ;;  %11246 = vst [vmem:[#allocation63_spill] sm:$0xff] %v7660_v11  ;;  %v7675_v56 = vsel %vm1948_vm4, %v2024_v19, %v2025_v33  ;;  %v2029_v34 = vrot.slane %v11253_v7, 1 }
 0x101   : > { %2318 = vrot.lane.b32.xlu0 %v7642_v12, %s6431_s19  ;;  %v11251_v12 = vld [vmem:[#allocation67_spill] sm:$0xff] }
 0x102   : > { %v7648_v47 = vpop.permute.xlu0 %2220  ;;  %2316 = vrot.lane.b32.xlu1 %v7645_v4, %s6431_s19  ;;  %v7671_v4 = vsel %vm1948_vm4, %v2025_v33, %v2027_v48  ;;  %v2032_v10 = vrot.slane %v11251_v12, 1  ;;  %11252 = vst [vmem:[#allocation67_spill] sm:$0xff] %v7675_v56  ;;  %v11258_v12 = vld [vmem:[#allocation72_spill] sm:$0xff] }
 0x103   : > { %11242 = vst [vmem:[#allocation204_spill] sm:$0xff] %v7648_v47  ;;  %v2030_v47 = vrot.slane %v11249_v6, 1  ;;  %11250 = vst [vmem:[#allocation207_spill] sm:$0xff] %v7671_v4  ;;  %v2037_v19 = vrot.slane %v11258_v12, 1  ;;  %v11265_v12 = vld [vmem:[#allocation78_spill] sm:$0xff] }
 0x104   : > { %v7663_v52 = vpop.permute.xlu1 %2218 }
 0x105   : > { %11248 = vst [vmem:[#allocation206_spill] sm:$0xff] %v7663_v52  ;;  %2322 = vrot.lane.b32.xlu0 %v7653_v59, %s6431_s19  ;;  %v7688_v59 = vsel %vm1948_vm4, %v2030_v47, %v2032_v10  ;;  %v7692_v33 = vsel %vm1948_vm4, %v2029_v34, %v2030_v47  ;;  %v2042_v34 = vrot.slane %v11265_v12, 1 }
 0x106   : > { %2320 = vrot.lane.b32.xlu1 %v7660_v11, %s6431_s19  ;;  %v11256_v11 = vld [vmem:[#allocation65_spill] sm:$0xff]  ;;  %11257 = vst [vmem:[#allocation210_spill] sm:$0xff] %v7688_v59  ;;  %11259 = vst [vmem:[#allocation72_spill] sm:$0xff] %v7692_v33 }
 0x107   : > { %v2035_v48 = vrot.slane %v11256_v11, 1 }
 0x108   : > { %v7678_v30 = vpop.permute.xlu0 %2224 }
 0x109   : > { %11254 = vst [vmem:[#allocation208_spill] sm:$0xff] %v7678_v30  ;;  %v7680_v52 = vpop.permute.xlu1 %2222  ;;  %2326 = vrot.lane.b32.xlu0 %v7671_v4, %s6431_s19  ;;  %v2034_v30 = vrot.slane %v11260_v22, 1  ;;  %v7705_v10 = vsel %vm1948_vm4, %v2035_v48, %v2037_v19 }
 0x10a   : > { %11255 = vst [vmem:[#allocation209_spill] sm:$0xff] %v7680_v52  ;;  %2324 = vrot.lane.b32.xlu1 %v7675_v56, %s6431_s19  ;;  %v11262_v52 = vld [vmem:[#allocation71_spill] sm:$0xff]  ;;  %11264 = vst [vmem:[#allocation212_spill] sm:$0xff] %v7705_v10 }
 0x10b   : > { %v2040_v56 = vrot.slane %v11262_v52, 1  ;;  %v7709_v47 = vsel %vm1948_vm4, %v2034_v30, %v2035_v48  ;;  %v11273_v48 = vld [vmem:[#allocation75_spill] sm:$0xff] }
 0x10c   : > { %11266 = vst [vmem:[#allocation78_spill] sm:$0xff] %v7709_v47  ;;  %v2044_v1 = vrot.slane %v11273_v48, 1 }
 0x10d   : > { %v7695_v17 = vpop.permute.xlu0 %2228  ;;  %2330 = vrot.lane.b32.xlu0 %v7688_v59, %s6431_s19  ;;  %v7720_v19 = vsel %vm1948_vm4, %v2040_v56, %v2042_v34 }
 0x10e   : > { %11261 = vst [vmem:[#allocation211_spill] sm:$0xff] %v7695_v17  ;;  %2328 = vrot.lane.b32.xlu1 %v7692_v33, %s6431_s19  ;;  %v2039_v17 = vrot.slane %v11267_v15, 1  ;;  %v11268_v33 = vld [vmem:[#allocation74_spill] sm:$0xff] }
 0x10f   : > { %v7702_v4 = vpop.permute.xlu1 %2226  ;;  %v2045_v59 = vrot.slane %v11268_v33, 1  ;;  %11270 = vst [vmem:[#allocation74_spill] sm:$0xff] %v7720_v19 }
 0x110   : > { %11263 = vst [vmem:[#allocation71_spill] sm:$0xff] %v7702_v4  ;;  %v11271_v4 = vld [vmem:[#allocation83_spill] sm:$0xff]  ;;  %v7724_v30 = vsel %vm1948_vm4, %v2039_v17, %v2040_v56 }
 0x111   : > { %2334 = vrot.lane.b32.xlu0 %v7705_v10, %s6431_s19  ;;  %v2047_v12 = vrot.slane %v11271_v4, 1  ;;  %11272 = vst [vmem:[#allocation83_spill] sm:$0xff] %v7724_v30  ;;  %v11277_v10 = vld [vmem:[#allocation88_spill] sm:$0xff]  ;;  %v7739_v17 = vsel %vm1948_vm4, %v2044_v1, %v2045_v59  ;;  %v11279_v56 = vld [vmem:[#allocation79_spill] sm:$0xff] }
 0x112   : > { %2332 = vrot.lane.b32.xlu1 %v7709_v47, %s6431_s19  ;;  %v11275_v47 = vld [vmem:[#allocation81_spill] sm:$0xff]  ;;  %v2052_v4 = vrot.slane %v11277_v10, 1  ;;  %11278 = vst [vmem:[#allocation88_spill] sm:$0xff] %v7739_v17  ;;  %v2049_v57 = vrot.slane %v11279_v56, 1  ;;  %v11284_v10 = vld [vmem:[#allocation94_spill] sm:$0xff] }
 0x113   : > { %v7717_v16 = vpop.permute.xlu0 %2232  ;;  %v7735_v34 = vsel %vm1948_vm4, %v2045_v59, %v2047_v12  ;;  %v2057_v1 = vrot.slane %v11284_v10, 1 }
 0x114   : > { %11269 = vst [vmem:[#allocation69_spill] sm:$0xff] %v7717_v16  ;;  %v2050_v16 = vrot.slane %v11275_v47, 1  ;;  %11276 = vst [vmem:[#allocation81_spill] sm:$0xff] %v7735_v34 }
 0x115   : > { %v7727_v53 = vpop.permute.xlu1 %2230  ;;  %2338 = vrot.lane.b32.xlu0 %v7720_v19, %s6431_s19 }
 0x116   : > { %11274 = vst [vmem:[#allocation75_spill] sm:$0xff] %v7727_v53  ;;  %2336 = vrot.lane.b32.xlu1 %v7724_v30, %s6431_s19  ;;  %v11281_v53 = vld [vmem:[#allocation85_spill] sm:$0xff]  ;;  %v7752_v12 = vsel %vm1948_vm4, %v2050_v16, %v2052_v4  ;;  %v7756_v59 = vsel %vm1948_vm4, %v2049_v57, %v2050_v16  ;;  %v11291_v57 = vld [vmem:[#allocation90_spill] sm:$0xff] }
 0x117   : > { %v2055_v30 = vrot.slane %v11281_v53, 1  ;;  %11283 = vst [vmem:[#allocation214_spill] sm:$0xff] %v7752_v12  ;;  %11285 = vst [vmem:[#allocation94_spill] sm:$0xff] %v7756_v59  ;;  %v2059_v10 = vrot.slane %v11291_v57, 1 }
 0x119   : > { %v7742_v39 = vpop.permute.xlu0 %2236  ;;  %2342 = vrot.lane.b32.xlu0 %v7735_v34, %s6431_s19  ;;  %v11287_v34 = vld [vmem:[#allocation101_spill] sm:$0xff]  ;;  %v7768_v4 = vsel %vm1948_vm4, %v2055_v30, %v2057_v1 }
 0x11a   : > { %11280 = vst [vmem:[#allocation79_spill] sm:$0xff] %v7742_v39  ;;  %2340 = vrot.lane.b32.xlu1 %v7739_v17, %s6431_s19  ;;  %v2054_v39 = vrot.slane %v11286_v2, 1  ;;  %v2060_v17 = vrot.slane %v7103_v54, 1  ;;  %11289 = vst [vmem:[#allocation215_spill] sm:$0xff] %v7768_v4  ;;  %v11294_v1 = vld [vmem:[#allocation109_spill] sm:$0xff] }
 0x11b   : > { %v7749_v19 = vpop.permute.xlu1 %2234 }
 0x11c   : > { %11282 = vst [vmem:[#allocation213_spill] sm:$0xff] %v7749_v19  ;;  %v2062_v19 = vrot.slane %v11287_v34, 1  ;;  %v7771_v16 = vsel %vm1948_vm4, %v2054_v39, %v2055_v30  ;;  %v2065_v34 = vrot.slane %v7120_v28, 1  ;;  %v7786_v39 = vsel %vm1948_vm4, %v2059_v10, %v2060_v17  ;;  %v11296_v30 = vld [vmem:[#allocation97_spill] sm:$0xff] }
 0x11d   : > { %2346 = vrot.lane.b32.xlu0 %v7752_v12, %s6431_s19  ;;  %11290 = vst [vmem:[#allocation216_spill] sm:$0xff] %v7771_v16  ;;  %11295 = vst [vmem:[#allocation109_spill] sm:$0xff] %v7786_v39  ;;  %v2064_v12 = vrot.slane %v11296_v30, 1  ;;  %v11303_v30 = vld [vmem:[#allocation103_spill] sm:$0xff] }
 0x11e   : > { %2344 = vrot.lane.b32.xlu1 %v7756_v59, %s6431_s19  ;;  %v7779_v59 = vsel %vm1948_vm4, %v2060_v17, %v2062_v19  ;;  %v11299_v19 = vld [vmem:[#allocation107_spill] sm:$0xff] }
 0x11f   : > { %v7765_v53 = vpop.permute.xlu0 %2240  ;;  %11293 = vst [vmem:[#allocation218_spill] sm:$0xff] %v7779_v59  ;;  %v7803_v10 = vsel %vm1948_vm4, %v2064_v12, %v2065_v34 }
 0x120   : > { %11288 = vst [vmem:[#allocation101_spill] sm:$0xff] %v7765_v53  ;;  %v7774_v2 = vpop.permute.xlu1 %2238  ;;  %v2067_v53 = vrot.slane %v11294_v1, 1  ;;  %v11301_v1 = vld [vmem:[#allocation115_spill] sm:$0xff] }
 0x121   : > { %11292 = vst [vmem:[#allocation217_spill] sm:$0xff] %v7774_v2  ;;  %2350 = vrot.lane.b32.xlu0 %v7768_v4, %s6431_s19  ;;  %v2072_v17 = vrot.slane %v11301_v1, 1  ;;  %11302 = vst [vmem:[#allocation115_spill] sm:$0xff] %v7803_v10 }
 0x122   : > { %2348 = vrot.lane.b32.xlu1 %v7771_v16, %s6431_s19  ;;  %v2070_v16 = vrot.slane %v11299_v19, 1  ;;  %v7799_v4 = vsel %vm1948_vm4, %v2065_v34, %v2067_v53  ;;  %v11307_v19 = vld [vmem:[#allocation122_spill] sm:$0xff] }
 0x123   : > { %11300 = vst [vmem:[#allocation221_spill] sm:$0xff] %v7799_v4  ;;  %v2077_v1 = vrot.slane %v11307_v19, 1 }
 0x124   : > { %v7789_v57 = vpop.permute.xlu0 %2244  ;;  %v7814_v53 = vsel %vm1948_vm4, %v2070_v16, %v2072_v17 }
 0x125   : > { %11297 = vst [vmem:[#allocation219_spill] sm:$0xff] %v7789_v57  ;;  %2354 = vrot.lane.b32.xlu0 %v7779_v59, %s6431_s19  ;;  %v2069_v57 = vrot.slane %v11303_v30, 1  ;;  %11306 = vst [vmem:[#allocation223_spill] sm:$0xff] %v7814_v53  ;;  %v11310_v30 = vld [vmem:[#allocation110_spill] sm:$0xff] }
 0x126   : > { %v7791_v2 = vpop.permute.xlu1 %2242  ;;  %2352 = vrot.lane.b32.xlu1 %v7786_v39, %s6431_s19  ;;  %v11305_v39 = vld [vmem:[#allocation112_spill] sm:$0xff]  ;;  %v2074_v28 = vrot.slane %v11310_v30, 1 }
 0x127   : > { %11298 = vst [vmem:[#allocation220_spill] sm:$0xff] %v7791_v2  ;;  %v2075_v59 = vrot.slane %v11305_v39, 1  ;;  %v7818_v12 = vsel %vm1948_vm4, %v2069_v57, %v2070_v16  ;;  %v11315_v57 = vld [vmem:[#allocation118_spill] sm:$0xff] }
 0x128   : > { %11308 = vst [vmem:[#allocation122_spill] sm:$0xff] %v7818_v12 }
 0x129   : > { %2358 = vrot.lane.b32.xlu0 %v7799_v4, %s6431_s19  ;;  %v7829_v17 = vsel %vm1948_vm4, %v2075_v59, %v2077_v1  ;;  %v11313_v4 = vld [vmem:[#allocation130_spill] sm:$0xff]  ;;  %v7833_v16 = vsel %vm1948_vm4, %v2074_v28, %v2075_v59 }
 0x12a   : > { %2356 = vrot.lane.b32.xlu1 %v7803_v10, %s6431_s19  ;;  %v7810_v2 = vpop.permute.xlu0 %2248  ;;  %11312 = vst [vmem:[#allocation225_spill] sm:$0xff] %v7829_v17  ;;  %v2082_v19 = vrot.slane %v11313_v4, 1  ;;  %11314 = vst [vmem:[#allocation130_spill] sm:$0xff] %v7833_v16  ;;  %v11320_v4 = vld [vmem:[#allocation137_spill] sm:$0xff] }
 0x12b   : > { %11304 = vst [vmem:[#allocation222_spill] sm:$0xff] %v7810_v2  ;;  %v7820_v34 = vpop.permute.xlu1 %2246  ;;  %v11311_v2 = vld [vmem:[#allocation121_spill] sm:$0xff]  ;;  %v2087_v28 = vrot.slane %v11320_v4, 1  ;;  %v11328_v4 = vld [vmem:[#allocation132_spill] sm:$0xff] }
 0x12c   : > { %11309 = vst [vmem:[#allocation224_spill] sm:$0xff] %v7820_v34  ;;  %v2080_v10 = vrot.slane %v11311_v2, 1  ;;  %v2079_v34 = vrot.slane %v11315_v57, 1  ;;  %v11322_v57 = vld [vmem:[#allocation126_spill] sm:$0xff] }
 0x12d   : > { %2362 = vrot.lane.b32.xlu0 %v7814_v53, %s6431_s19 }
 0x12e   : > { %2360 = vrot.lane.b32.xlu1 %v7818_v12, %s6431_s19  ;;  %v11318_v12 = vld [vmem:[#allocation125_spill] sm:$0xff]  ;;  %v7846_v53 = vsel %vm1948_vm4, %v2080_v10, %v2082_v19  ;;  %v7850_v59 = vsel %vm1948_vm4, %v2079_v34, %v2080_v10  ;;  %v2092_v10 = vrot.slane %v7342_v42, 1 }
 0x12f   : > { %v2085_v1 = vrot.slane %v11318_v12, 1  ;;  %11319 = vst [vmem:[#allocation228_spill] sm:$0xff] %v7846_v53  ;;  %11321 = vst [vmem:[#allocation137_spill] sm:$0xff] %v7850_v59 }
 0x130   : > { %v7836_v39 = vpop.permute.xlu0 %2252 }
 0x131   : > { %11316 = vst [vmem:[#allocation226_spill] sm:$0xff] %v7836_v39  ;;  %v7838_v30 = vpop.permute.xlu1 %2250  ;;  %2366 = vrot.lane.b32.xlu0 %v7829_v17, %s6431_s19  ;;  %v2084_v39 = vrot.slane %v11322_v57, 1  ;;  %v7861_v19 = vsel %vm1948_vm4, %v2085_v1, %v2087_v28  ;;  %v2089_v57 = vrot.slane %v11328_v4, 1 }
 0x132   : > { %11317 = vst [vmem:[#allocation227_spill] sm:$0xff] %v7838_v30  ;;  %2364 = vrot.lane.b32.xlu1 %v7833_v16, %s6431_s19  ;;  %v11324_v16 = vld [vmem:[#allocation135_spill] sm:$0xff]  ;;  %11325 = vst [vmem:[#allocation230_spill] sm:$0xff] %v7861_v19 }
 0x133   : > { %v2090_v17 = vrot.slane %v11324_v16, 1  ;;  %v7867_v34 = vsel %vm1948_vm4, %v2084_v39, %v2085_v1  ;;  %v11331_v39 = vld [vmem:[#allocation139_spill] sm:$0xff] }
 0x134   : > { %11327 = vst [vmem:[#allocation232_spill] sm:$0xff] %v7867_v34  ;;  %v2094_v1 = vrot.slane %v11331_v39, 1 }
 0x135   : > { %2370 = vrot.lane.b32.xlu0 %v7846_v53, %s6431_s19  ;;  %v7876_v28 = vsel %vm1948_vm4, %v2090_v17, %v2092_v10  ;;  %v7880_v42 = vsel %vm1948_vm4, %v2089_v57, %v2090_v17  ;;  %v2100_v10 = vrot.slane %v7364_v25, 1  ;;  %v11336_v57 = vld [vmem:[#allocation145_spill] sm:$0xff] }
 0x136   : > { %v7855_v30 = vpop.permute.xlu0 %2256  ;;  %2368 = vrot.lane.b32.xlu1 %v7850_v59, %s6431_s19  ;;  %11329 = vst [vmem:[#allocation233_spill] sm:$0xff] %v7876_v28  ;;  %11330 = vst [vmem:[#allocation234_spill] sm:$0xff] %v7880_v42 }
 0x137   : > { %11323 = vst [vmem:[#allocation229_spill] sm:$0xff] %v7855_v30  ;;  %v7863_v12 = vpop.permute.xlu1 %2254  ;;  %v2095_v30 = vrot.slane %v7332_v61, 1 }
 0x138   : > { %11326 = vst [vmem:[#allocation231_spill] sm:$0xff] %v7863_v12  ;;  %v2097_v12 = vrot.slane %v7376_v45, 1 }
 0x139   : > { %2374 = vrot.lane.b32.xlu0 %v7861_v19, %s6431_s19  ;;  %v7897_v17 = vsel %vm1948_vm4, %v2094_v1, %v2095_v30  ;;  %v2104_v1 = vrot.slane %v7386_v18, 1 }
 0x13a   : > { %2372 = vrot.lane.b32.xlu1 %v7867_v34, %s6431_s19  ;;  %v2102_v34 = vrot.slane %v7407_v62, 1  ;;  %v7894_v45 = vsel %vm1948_vm4, %v2095_v30, %v2097_v12  ;;  %11335 = vst [vmem:[#allocation238_spill] sm:$0xff] %v7897_v17  ;;  %v2105_v62 = vrot.slane %v7394_v3, 1  ;;  %v2107_v30 = vrot.slane %v7421_v46, 1 }
 0x13b   : > { %v7883_v59 = vpop.permute.xlu0 %2260  ;;  %11334 = vst [vmem:[#allocation237_spill] sm:$0xff] %v7894_v45 }
 0x13c   : > { %11332 = vst [vmem:[#allocation235_spill] sm:$0xff] %v7883_v59  ;;  %v7885_v53 = vpop.permute.xlu1 %2258  ;;  %v2099_v59 = vrot.slane %v11336_v57, 1  ;;  %v7929_v46 = vsel %vm1948_vm4, %v2104_v1, %v2105_v62 }
 0x13d   : > { %11333 = vst [vmem:[#allocation236_spill] sm:$0xff] %v7885_v53  ;;  %2378 = vrot.lane.b32.xlu0 %v7876_v28, %s6431_s19  ;;  %v7907_v28 = vsel %vm1948_vm4, %v2100_v10, %v2102_v34  ;;  %v7926_v34 = vsel %vm1948_vm4, %v2105_v62, %v2107_v30  ;;  %11344 = vst [vmem:[#allocation246_spill] sm:$0xff] %v7929_v46 }
 0x13e   : > { %2376 = vrot.lane.b32.xlu1 %v7880_v42, %s6431_s19  ;;  %11339 = vst [vmem:[#allocation241_spill] sm:$0xff] %v7907_v28  ;;  %v7914_v12 = vsel %vm1948_vm4, %v2099_v59, %v2100_v10  ;;  %11343 = vst [vmem:[#allocation245_spill] sm:$0xff] %v7926_v34 }
 0x13f   : > { %v7900_v19 = vpop.permute.xlu0 %6340  ;;  %11340 = vst [vmem:[#allocation242_spill] sm:$0xff] %v7914_v12 }
 0x140   : > { %11337 = vst [vmem:[#allocation239_spill] sm:$0xff] %v7900_v19  ;;  %v7902_v53 = vpop.permute.xlu1 %2262 }
 0x141   : > { %11338 = vst [vmem:[#allocation240_spill] sm:$0xff] %v7902_v53  ;;  %2382 = vrot.lane.b32.xlu0 %v7894_v45, %s6431_s19 }
 0x142   : > { %2380 = vrot.lane.b32.xlu1 %v7897_v17, %s6431_s19 }
 0x143   : > { %v7917_v19 = vpop.permute.xlu0 %2270 }
 0x144   : > { %11341 = vst [vmem:[#allocation243_spill] sm:$0xff] %v7917_v19  ;;  %v7919_v53 = vpop.permute.xlu1 %2268 }
 0x145   : > { %11342 = vst [vmem:[#allocation244_spill] sm:$0xff] %v7919_v53  ;;  %2386 = vrot.lane.b32.xlu0 %v7907_v28, %s6431_s19  ;;  %v11509_v53 = vld [vmem:[#allocation91_spill] sm:$0xff] }
 0x146   : > { %2384 = vrot.lane.b32.xlu1 %v7914_v12, %s6431_s19 }
 0x147   : > { %v7931_v59 = vpop.permute.xlu0 %2274 }
 0x148   : > { %11345 = vst [vmem:[#allocation247_spill] sm:$0xff] %v7931_v59  ;;  %v7933_v10 = vpop.permute.xlu1 %2272  ;;  %v11441_v59 = vld [vmem:[#allocation14_spill] sm:$0xff] }
 0x149   : > { %11346 = vst [vmem:[#allocation248_spill] sm:$0xff] %v7933_v10  ;;  %2390 = vrot.lane.b32.xlu0 %v7926_v34, %s6431_s19 }
 0x14a   : > { %2388 = vrot.lane.b32.xlu1 %v7929_v46, %s6431_s19 }
 0x14b   : > { %v7939_v28 = vpop.permute.xlu0 %2278 }
 0x14c   : > { %11347 = vst [vmem:[#allocation249_spill] sm:$0xff] %v7939_v28  ;;  %v7941_v45 = vpop.permute.xlu1 %2276  ;;  %v11404_v28 = vld [vmem:[#allocation112_spill] sm:$0xff] }
 0x14d   : > { %11348 = vst [vmem:[#allocation250_spill] sm:$0xff] %v7941_v45  ;;  %2394 = vrot.lane.b32.xlu0 %v6538_v55, %s6432_s20  ;;  %v11405_v45 = vld [vmem:[#allocation110_spill] sm:$0xff]  ;;  %v11488_v55 = vld [vmem:[#allocation73_spill] sm:$0xff] }
 0x14e   : > { %2392 = vrot.lane.b32.xlu1 %v6531_v49, %s6432_s20  ;;  %v11513_v49 = vld [vmem:[#allocation99_spill] sm:$0xff] }
 0x14f   : > { %v7947_v62 = vpop.permute.xlu0 %2282 }
 0x150   : > { %11349 = vst [vmem:[#allocation251_spill] sm:$0xff] %v7947_v62  ;;  %v7949_v30 = vpop.permute.xlu1 %2280  ;;  %v11390_v62 = vld [vmem:[#allocation84_spill] sm:$0xff] }
 0x151   : > { %11350 = vst [vmem:[#allocation252_spill] sm:$0xff] %v7949_v30  ;;  %2398 = vrot.lane.b32.xlu0 %v6519_v40, %s6432_s20 }
 0x152   : > { %2396 = vrot.lane.b32.xlu1 %v6523_v41, %s6432_s20 }
 0x153   : > { %v7955_v1 = vpop.permute.xlu0 %2286 }
 0x154   : > { %11351 = vst [vmem:[#allocation253_spill] sm:$0xff] %v7955_v1  ;;  %v7957_v34 = vpop.permute.xlu1 %2284 }
 0x155   : > { %11352 = vst [vmem:[#allocation254_spill] sm:$0xff] %v7957_v34  ;;  %2402 = vrot.lane.b32.xlu0 %v6547_v8, %s6432_s20 }
 0x156   : > { %2400 = vrot.lane.b32.xlu1 %v6551_v9, %s6432_s20 }
 0x157   : > { %v7963_v46 = vpop.permute.xlu0 %2290 }
 0x158   : > { %11353 = vst [vmem:[#allocation255_spill] sm:$0xff] %v7963_v46  ;;  %v7965_v12 = vpop.permute.xlu1 %2288 }
 0x159   : > { %11354 = vst [vmem:[#allocation256_spill] sm:$0xff] %v7965_v12  ;;  %2406 = vrot.lane.b32.xlu0 %v6593_v50, %s6432_s20 }
 0x15a   : > { %2404 = vrot.lane.b32.xlu1 %v6583_v26, %s6432_s20 }
 0x15b   : > { %v7971_v17 = vpop.permute.xlu0 %2294 }
 0x15c   : > { %11355 = vst [vmem:[#allocation257_spill] sm:$0xff] %v7971_v17  ;;  %v7973_v1 = vpop.permute.xlu1 %2292 }
 0x15d   : > { %11356 = vst [vmem:[#allocation258_spill] sm:$0xff] %v7973_v1  ;;  %2410 = vrot.lane.b32.xlu0 %v6614_v13, %s6432_s20 }
 0x15e   : > { %2408 = vrot.lane.b32.xlu1 %v6608_v51, %s6432_s20 }
 0x15f   : > { %v7979_v34 = vpop.permute.xlu0 %2298 }
 0x160   : > { %11357 = vst [vmem:[#allocation259_spill] sm:$0xff] %v7979_v34  ;;  %v7981_v46 = vpop.permute.xlu1 %2296 }
 0x161   : > { %11358 = vst [vmem:[#allocation260_spill] sm:$0xff] %v7981_v46  ;;  %2414 = vrot.lane.b32.xlu0 %v6649_v0, %s6432_s20 }
 0x162   : > { %2412 = vrot.lane.b32.xlu1 %v6638_v44, %s6432_s20 }
 0x163   : > { %v7987_v12 = vpop.permute.xlu0 %2302 }
 0x164   : > { %11359 = vst [vmem:[#allocation261_spill] sm:$0xff] %v7987_v12  ;;  %v7989_v17 = vpop.permute.xlu1 %2300 }
 0x165   : > { %11360 = vst [vmem:[#allocation262_spill] sm:$0xff] %v7989_v17  ;;  %2418 = vrot.lane.b32.xlu0 %v6666_v29, %s6432_s20  ;;  %v11638_v29 = vld [vmem:[#allocation216_spill] sm:$0xff] }
 0x166   : > { %2416 = vrot.lane.b32.xlu1 %v6670_v31, %s6432_s20 }
 0x167   : > { %v7995_v1 = vpop.permute.xlu0 %2306 }
 0x168   : > { %11361 = vst [vmem:[#allocation263_spill] sm:$0xff] %v7995_v1  ;;  %v7997_v34 = vpop.permute.xlu1 %2304 }
 0x169   : > { %11362 = vst [vmem:[#allocation264_spill] sm:$0xff] %v7997_v34  ;;  %2422 = vrot.lane.b32.xlu0 %v6705_v24, %s6432_s20 }
 0x16a   : > { %2420 = vrot.lane.b32.xlu1 %v6695_v21, %s6432_s20 }
 0x16b   : > { %v8003_v46 = vpop.permute.xlu0 %2310 }
 0x16c   : > { %11363 = vst [vmem:[#allocation265_spill] sm:$0xff] %v8003_v46  ;;  %v8005_v12 = vpop.permute.xlu1 %2308 }
 0x16d   : > { %11364 = vst [vmem:[#allocation266_spill] sm:$0xff] %v8005_v12  ;;  %2426 = vrot.lane.b32.xlu0 %v6726_v23, %s6432_s20  ;;  %v11449_v23 = vld [vmem:[#allocation22_spill] sm:$0xff] }
 0x16e   : > { %2424 = vrot.lane.b32.xlu1 %v6722_v38, %s6432_s20 }
 0x16f   : > { %v8011_v17 = vpop.permute.xlu0 %2314 }
 0x170   : > { %11365 = vst [vmem:[#allocation267_spill] sm:$0xff] %v8011_v17  ;;  %v8013_v1 = vpop.permute.xlu1 %2312 }
 0x171   : > { %11366 = vst [vmem:[#allocation268_spill] sm:$0xff] %v8013_v1  ;;  %2430 = vrot.lane.b32.xlu0 %v6761_v20, %s6432_s20  ;;  %v11408_v20 = vld [vmem:[#allocation118_spill] sm:$0xff] }
 0x172   : > { %2428 = vrot.lane.b32.xlu1 %v6750_v14, %s6432_s20 }
 0x173   : > { %v8019_v34 = vpop.permute.xlu0 %2318 }
 0x174   : > { %11367 = vst [vmem:[#allocation269_spill] sm:$0xff] %v8019_v34  ;;  %v8021_v46 = vpop.permute.xlu1 %2316 }
 0x175   : > { %11368 = vst [vmem:[#allocation270_spill] sm:$0xff] %v8021_v46  ;;  %2434 = vrot.lane.b32.xlu0 %v6777_v58, %s6432_s20 }
 0x176   : > { %2432 = vrot.lane.b32.xlu1 %v11222_v63, %s6432_s20  ;;  %v11397_v63 = vld [vmem:[#allocation97_spill] sm:$0xff] }
 0x177   : > { %v8027_v12 = vpop.permute.xlu0 %2322 }
 0x178   : > { %11369 = vst [vmem:[#allocation271_spill] sm:$0xff] %v8027_v12  ;;  %v8029_v17 = vpop.permute.xlu1 %2320 }
 0x179   : > { %11370 = vst [vmem:[#allocation272_spill] sm:$0xff] %v8029_v17  ;;  %2438 = vrot.lane.b32.xlu0 %v11225_v37, %s6432_s20 }
 0x17a   : > { %2436 = vrot.lane.b32.xlu1 %v11228_v43, %s6432_s20 }
 0x17b   : > { %v8035_v1 = vpop.permute.xlu0 %2326 }
 0x17c   : > { %11371 = vst [vmem:[#allocation273_spill] sm:$0xff] %v8035_v1  ;;  %v8037_v34 = vpop.permute.xlu1 %2324 }
 0x17d   : > { %11372 = vst [vmem:[#allocation274_spill] sm:$0xff] %v8037_v34  ;;  %2442 = vrot.lane.b32.xlu0 %v11230_v36, %s6432_s20 }
 0x17e   : > { %2440 = vrot.lane.b32.xlu1 %v11234_v60, %s6432_s20 }
 0x17f   : > { %v8043_v46 = vpop.permute.xlu0 %2330 }
 0x180   : > { %11373 = vst [vmem:[#allocation275_spill] sm:$0xff] %v8043_v46  ;;  %v8045_v12 = vpop.permute.xlu1 %2328 }
 0x181   : > { %11374 = vst [vmem:[#allocation276_spill] sm:$0xff] %v8045_v12  ;;  %2446 = vrot.lane.b32.xlu0 %v11237_v5, %s6432_s20 }
 0x182   : > { %2444 = vrot.lane.b32.xlu1 %v11241_v27, %s6432_s20 }
 0x183   : > { %v8051_v17 = vpop.permute.xlu0 %2334 }
 0x184   : > { %11375 = vst [vmem:[#allocation277_spill] sm:$0xff] %v8051_v17  ;;  %v8053_v1 = vpop.permute.xlu1 %2332  ;;  %v11453_v17 = vld [vmem:[#allocation25_spill] sm:$0xff] }
 0x185   : > { %11376 = vst [vmem:[#allocation278_spill] sm:$0xff] %v8053_v1  ;;  %2450 = vrot.lane.b32.xlu0 %v11244_v35, %s6432_s20  ;;  %v11461_v1 = vld [vmem:[#allocation33_spill] sm:$0xff] }
 0x186   : > { %2448 = vrot.lane.b32.xlu1 %v11247_v32, %s6432_s20 }
 0x187   : > { %v8059_v34 = vpop.permute.xlu0 %2338 }
 0x188   : > { %11377 = vst [vmem:[#allocation279_spill] sm:$0xff] %v8059_v34  ;;  %v8061_v36 = vpop.permute.xlu1 %2336  ;;  %v11412_v34 = vld [vmem:[#allocation126_spill] sm:$0xff] }
 0x189   : > { %11378 = vst [vmem:[#allocation280_spill] sm:$0xff] %v8061_v36  ;;  %2454 = vrot.lane.b32.xlu0 %v11249_v6, %s6432_s20  ;;  %v6416_v36 = vld [vmem:[%s6497_s17 + $0x1f0] sm:$0xff]  }
 0x18a   : > { %2452 = vrot.lane.b32.xlu1 %v11253_v7, %s6432_s20  ;;  %v11586_v7 = vld [vmem:[#allocation189_spill] sm:$0xff] }
 0x18b   : > { %v8067_v5 = vpop.permute.xlu0 %2342 }
 0x18c   : > { %11379 = vst [vmem:[#allocation281_spill] sm:$0xff] %v8067_v5  ;;  %v8069_v27 = vpop.permute.xlu1 %2340 }
 0x18d   : > { %11380 = vst [vmem:[#allocation282_spill] sm:$0xff] %v8069_v27  ;;  %2458 = vrot.lane.b32.xlu0 %v11256_v11, %s6432_s20  ;;  %v11401_v27 = vld [vmem:[#allocation103_spill] sm:$0xff] }
 0x18e   : > { %2456 = vrot.lane.b32.xlu1 %v11260_v22, %s6432_s20 }
 0x18f   : > { %v8075_v35 = vpop.permute.xlu0 %2346 }
 0x190   : > { %11381 = vst [vmem:[#allocation283_spill] sm:$0xff] %v8075_v35  ;;  %v8077_v32 = vpop.permute.xlu1 %2344 }
 0x191   : > { %11382 = vst [vmem:[#allocation284_spill] sm:$0xff] %v8077_v32  ;;  %2462 = vrot.lane.b32.xlu0 %v11262_v52, %s6432_s20 }
 0x192   : > { %2460 = vrot.lane.b32.xlu1 %v11267_v15, %s6432_s20 }
 0x193   : > { %v8083_v60 = vpop.permute.xlu0 %2350 }
 0x194   : > { %11383 = vst [vmem:[#allocation285_spill] sm:$0xff] %v8083_v60  ;;  %v8085_v37 = vpop.permute.xlu1 %2348 }
 0x195   : > { %11384 = vst [vmem:[#allocation286_spill] sm:$0xff] %v8085_v37  ;;  %2466 = vrot.lane.b32.xlu0 %v11268_v33, %s6432_s20  ;;  %v11389_v37 = vld [vmem:[#allocation85_spill] sm:$0xff] }
 0x196   : > { %2464 = vrot.lane.b32.xlu1 %v11273_v48, %s6432_s20 }
 0x197   : > { %v8091_v43 = vpop.permute.xlu0 %2354 }
 0x198   : > { %11385 = vst [vmem:[#allocation287_spill] sm:$0xff] %v8091_v43  ;;  %v8093_v35 = vpop.permute.xlu1 %2352 }
 0x199   : > { %11386 = vst [vmem:[#allocation288_spill] sm:$0xff] %v8093_v35  ;;  %2470 = vrot.lane.b32.xlu0 %v11275_v47, %s6432_s20  ;;  %v11393_v35 = vld [vmem:[#allocation90_spill] sm:$0xff] }
 0x19a   : > { %2468 = vrot.lane.b32.xlu1 %v11279_v56, %s6432_s20 }
 0x19b   : > { %v8099_v32 = vpop.permute.xlu0 %2358 }
 0x19c   : > { %11387 = vst [vmem:[#allocation289_spill] sm:$0xff] %v8099_v32  ;;  %v8101_v60 = vpop.permute.xlu1 %2356 }
 0x19d   : > { %11388 = vst [vmem:[#allocation290_spill] sm:$0xff] %v8101_v60  ;;  %2474 = vrot.lane.b32.xlu0 %v11389_v37, %s6432_s20  ;;  %v11396_v60 = vld [vmem:[#allocation96_spill] sm:$0xff] }
 0x19e   : > { %2472 = vrot.lane.b32.xlu1 %v11390_v62, %s6432_s20 }
 0x19f   : > { %v8107_v30 = vpop.permute.xlu0 %2362 }
 0x1a0   : > { %11391 = vst [vmem:[#allocation85_spill] sm:$0xff] %v8107_v30  ;;  %v8109_v43 = vpop.permute.xlu1 %2360 }
 0x1a1   : > { %11392 = vst [vmem:[#allocation84_spill] sm:$0xff] %v8109_v43  ;;  %2478 = vrot.lane.b32.xlu0 %v7103_v54, %s6432_s20  ;;  %v11400_v43 = vld [vmem:[#allocation107_spill] sm:$0xff] }
 0x1a2   : > { %2476 = vrot.lane.b32.xlu1 %v11393_v35, %s6432_s20 }
 0x1a3   : > { %v8115_v58 = vpop.permute.xlu0 %2366 }
 0x1a4   : > { %11394 = vst [vmem:[#allocation291_spill] sm:$0xff] %v8115_v58  ;;  %v8117_v32 = vpop.permute.xlu1 %2364 }
 0x1a5   : > { %11395 = vst [vmem:[#allocation292_spill] sm:$0xff] %v8117_v32  ;;  %2482 = vrot.lane.b32.xlu0 %v11396_v60, %s6432_s20 }
 0x1a6   : > { %2480 = vrot.lane.b32.xlu1 %v11397_v63, %s6432_s20 }
 0x1a7   : > { %v8123_v5 = vpop.permute.xlu0 %2370 }
 0x1a8   : > { %11398 = vst [vmem:[#allocation293_spill] sm:$0xff] %v8123_v5  ;;  %v8125_v30 = vpop.permute.xlu1 %2368 }
 0x1a9   : > { %11399 = vst [vmem:[#allocation294_spill] sm:$0xff] %v8125_v30  ;;  %2486 = vrot.lane.b32.xlu0 %v11400_v43, %s6432_s20 }
 0x1aa   : > { %2484 = vrot.lane.b32.xlu1 %v11401_v27, %s6432_s20 }
 0x1ab   : > { %v8131_v58 = vpop.permute.xlu0 %2374 }
 0x1ac   : > { %11402 = vst [vmem:[#allocation295_spill] sm:$0xff] %v8131_v58  ;;  %v8133_v32 = vpop.permute.xlu1 %2372 }
 0x1ad   : > { %11403 = vst [vmem:[#allocation296_spill] sm:$0xff] %v8133_v32  ;;  %2490 = vrot.lane.b32.xlu0 %v11404_v28, %s6432_s20  ;;  %v11411_v32 = vld [vmem:[#allocation125_spill] sm:$0xff] }
 0x1ae   : > { %2488 = vrot.lane.b32.xlu1 %v11405_v45, %s6432_s20  ;;  %v6417_v28 = vld [vmem:[%s6497_s17 + $0x1f8] sm:$0xff]  }
 0x1af   : > { %v8139_v5 = vpop.permute.xlu0 %2378  ;;  %v11445_v45 = vld [vmem:[#allocation17_spill] sm:$0xff] }
 0x1b0   : > { %11406 = vst [vmem:[#allocation297_spill] sm:$0xff] %v8139_v5  ;;  %v8141_v30 = vpop.permute.xlu1 %2376 }
 0x1b1   : > { %11407 = vst [vmem:[#allocation298_spill] sm:$0xff] %v8141_v30  ;;  %2494 = vrot.lane.b32.xlu0 %v11311_v2, %s6432_s20 }
 0x1b2   : > { %2492 = vrot.lane.b32.xlu1 %v11408_v20, %s6432_s20 }
 0x1b3   : > { %v8147_v14 = vpop.permute.xlu0 %2382 }
 0x1b4   : > { %11409 = vst [vmem:[#allocation299_spill] sm:$0xff] %v8147_v14  ;;  %v8149_v58 = vpop.permute.xlu1 %2380  ;;  %v1102_v14 = vshrl.u32 %v6417_v28, 16 }
 0x1b5   : > { %11410 = vst [vmem:[#allocation300_spill] sm:$0xff] %v8149_v58  ;;  %2498 = vrot.lane.b32.xlu0 %v11411_v32, %s6432_s20  ;;  %v1095_v32 = vshrl.u32 %v6416_v36, 16 }
 0x1b6   : > { %2496 = vrot.lane.b32.xlu1 %v11412_v34, %s6432_s20  ;;  %v1098_v34 = vshll.u32 %v6416_v36, 16 }
 0x1b7   : > { %v8156_v5 = vpop.permute.xlu0 %2386 }
 0x1b8   : > { %11413 = vst [vmem:[#allocation301_spill] sm:$0xff] %v8156_v5  ;;  %v8158_v30 = vpop.permute.xlu1 %2384  ;;  %v8173_v5 = vrot.slane %v1102_v14, 7 }
 0x1b9   : > { %11414 = vst [vmem:[#allocation302_spill] sm:$0xff] %v8158_v30  ;;  %2502 = vrot.lane.b32.xlu0 %v11324_v16, %s6432_s20  ;;  %v1105_v30 = vshll.u32 %v6417_v28, 16 }
 0x1ba   : > { %2500 = vrot.lane.b32.xlu1 %v11328_v4, %s6432_s20  ;;  %v1097_v4 = vrot.slane %v1095_v32, 7  ;;  %v11546_v32 = vld [vmem:[#allocation151_spill] sm:$0xff] }
 0x1bb   : > { %v8165_v58 = vpop.permute.xlu0 %2390 }
 0x1bc   : > { %11415 = vst [vmem:[#allocation303_spill] sm:$0xff] %v8165_v58  ;;  %v8167_v2 = vpop.permute.xlu1 %2388  ;;  %v1107_v58 = vor.u32 %v1105_v30, %v8173_v5 }
 0x1bd   : > { %11416 = vst [vmem:[#allocation304_spill] sm:$0xff] %v8167_v2  ;;  %2506 = vrot.lane.b32.xlu0 %v7332_v61, %s6432_s20  ;;  %v1100_v2 = vor.u32 %v1098_v34, %v1097_v4 }
 0x1be   : > { %2504 = vrot.lane.b32.xlu1 %v11331_v39, %s6432_s20  ;;  %v8193_v36 = vsel %vm620_vm0, %v1097_v4, %v1107_v58  ;;  %v11428_v58 = vld [vmem:[#allocation11_spill] sm:$0xff]  ;;  %v11433_v39 = vld [vmem:[#allocation9_spill] sm:$0xff]  ;;  %vm5535_vm0 = vcmask 60416  }
 0x1bf   : > { %v8175_v16 = vpop.permute.xlu0 %2394  ;;  %11421 = vst [vmem:[#allocation309_spill] sm:$0xff] %v8193_v36  ;;  %v8197_v28 = vsel %vm6470_vm2, 0, %v1100_v2  ;;  %v11429_v2 = vld [vmem:[#allocation10_spill] sm:$0xff] }
 0x1c0   : > { %11417 = vst [vmem:[#allocation305_spill] sm:$0xff] %v8175_v16  ;;  %v8177_v20 = vpop.permute.xlu1 %2392  ;;  %11423 = vst [vmem:[#allocation3_spill] sm:$0xff] %v8197_v28 }
 0x1c1   : > { %11418 = vst [vmem:[#allocation306_spill] sm:$0xff] %v8177_v20  ;;  %2510 = vrot.lane.b32.xlu0 %v7364_v25, %s6432_s20  ;;  %v11634_v20 = vld [vmem:[#allocation94_spill] sm:$0xff] }
 0x1c2   : > { %2508 = vrot.lane.b32.xlu1 %v11336_v57, %s6432_s20  ;;  %v11432_v57 = vld [vmem:[#allocation13_spill] sm:$0xff] }
 0x1c3   : > { %v8184_v61 = vpop.permute.xlu0 %2398 }
 0x1c4   : > { %11419 = vst [vmem:[#allocation307_spill] sm:$0xff] %v8184_v61  ;;  %v8186_v14 = vpop.permute.xlu1 %2396  ;;  %v11457_v61 = vld [vmem:[#allocation30_spill] sm:$0xff] }
 0x1c5   : > { %11420 = vst [vmem:[#allocation308_spill] sm:$0xff] %v8186_v14  ;;  %2514 = vrot.lane.b32.xlu0 %v7394_v3, %s6432_s20  ;;  %v11505_v14 = vld [vmem:[#allocation87_spill] sm:$0xff] }
 0x1c6   : > { %2512 = vrot.lane.b32.xlu1 %v7386_v18, %s6432_s20 }
 0x1c7   : > { %v8199_v25 = vpop.permute.xlu0 %2402 }
 0x1c8   : > { %11424 = vst [vmem:[#allocation310_spill] sm:$0xff] %v8199_v25  ;;  %v8201_v34 = vpop.permute.xlu1 %2400  ;;  %v11436_v25 = vld [vmem:[#allocation15_spill] sm:$0xff] }
 0x1c9   : > { %11425 = vst [vmem:[#allocation311_spill] sm:$0xff] %v8201_v34  ;;  %2518 = vrot.lane.b32.xlu0 %v8193_v36, %s6432_s20 }
 0x1ca   : > { %2516 = vrot.lane.b32.xlu1 %v8197_v28, %s6432_s20 }
 0x1cb   : > { %v8207_v30 = vpop.permute.xlu0 %2406 }
 0x1cc   : > { %11426 = vst [vmem:[#allocation312_spill] sm:$0xff] %v8207_v30  ;;  %v8209_v3 = vpop.permute.xlu1 %2404 }
 0x1cd   : > { %11427 = vst [vmem:[#allocation313_spill] sm:$0xff] %v8209_v3  ;;  %2522 = vrot.lane.b32.xlu0 %v11428_v58, %s6433_s21  ;;  %v11437_v58 = vld [vmem:[#allocation12_spill] sm:$0xff] }
 0x1ce   : > { %2520 = vrot.lane.b32.xlu1 %v11429_v2, %s6433_s21 }
 0x1cf   : > { %v8215_v4 = vpop.permute.xlu0 %2410 }
 0x1d0   : > { %11430 = vst [vmem:[#allocation11_spill] sm:$0xff] %v8215_v4  ;;  %v8217_v18 = vpop.permute.xlu1 %2408 }
 0x1d1   : > { %11431 = vst [vmem:[#allocation10_spill] sm:$0xff] %v8217_v18  ;;  %2526 = vrot.lane.b32.xlu0 %v11432_v57, %s6433_s21  ;;  %v11440_v18 = vld [vmem:[#allocation19_spill] sm:$0xff] }
 0x1d2   : > { %2524 = vrot.lane.b32.xlu1 %v11433_v39, %s6433_s21 }
 0x1d3   : > { %v8223_v30 = vpop.permute.xlu0 %2414 }
 0x1d4   : > { %11434 = vst [vmem:[#allocation13_spill] sm:$0xff] %v8223_v30  ;;  %v8225_v3 = vpop.permute.xlu1 %2412 }
 0x1d5   : > { %11435 = vst [vmem:[#allocation9_spill] sm:$0xff] %v8225_v3  ;;  %2530 = vrot.lane.b32.xlu0 %v11436_v25, %s6433_s21  ;;  %v11444_v3 = vld [vmem:[#allocation23_spill] sm:$0xff] }
 0x1d6   : > { %2528 = vrot.lane.b32.xlu1 %v11437_v58, %s6433_s21 }
 0x1d7   : > { %v8231_v2 = vpop.permute.xlu0 %2418 }
 0x1d8   : > { %11438 = vst [vmem:[#allocation15_spill] sm:$0xff] %v8231_v2  ;;  %v8233_v4 = vpop.permute.xlu1 %2416 }
 0x1d9   : > { %11439 = vst [vmem:[#allocation12_spill] sm:$0xff] %v8233_v4  ;;  %2534 = vrot.lane.b32.xlu0 %v11440_v18, %s6433_s21  ;;  %v11448_v4 = vld [vmem:[#allocation27_spill] sm:$0xff] }
 0x1da   : > { %2532 = vrot.lane.b32.xlu1 %v11441_v59, %s6433_s21 }
 0x1db   : > { %v8239_v34 = vpop.permute.xlu0 %2422 }
 0x1dc   : > { %11442 = vst [vmem:[#allocation19_spill] sm:$0xff] %v8239_v34  ;;  %v8241_v30 = vpop.permute.xlu1 %2420 }
 0x1dd   : > { %11443 = vst [vmem:[#allocation14_spill] sm:$0xff] %v8241_v30  ;;  %2538 = vrot.lane.b32.xlu0 %v11444_v3, %s6433_s21  ;;  %v11452_v30 = vld [vmem:[#allocation31_spill] sm:$0xff] }
 0x1de   : > { %2536 = vrot.lane.b32.xlu1 %v11445_v45, %s6433_s21 }
 0x1df   : > { %v8247_v10 = vpop.permute.xlu0 %2426 }
 0x1e0   : > { %11446 = vst [vmem:[#allocation23_spill] sm:$0xff] %v8247_v10  ;;  %v8249_v2 = vpop.permute.xlu1 %2424 }
 0x1e1   : > { %11447 = vst [vmem:[#allocation17_spill] sm:$0xff] %v8249_v2  ;;  %2542 = vrot.lane.b32.xlu0 %v11448_v4, %s6433_s21  ;;  %v11456_v2 = vld [vmem:[#allocation35_spill] sm:$0xff] }
 0x1e2   : > { %2540 = vrot.lane.b32.xlu1 %v11449_v23, %s6433_s21 }
 0x1e3   : > { %v8255_v38 = vpop.permute.xlu0 %2430 }
 0x1e4   : > { %11450 = vst [vmem:[#allocation27_spill] sm:$0xff] %v8255_v38  ;;  %v8257_v34 = vpop.permute.xlu1 %2428 }
 0x1e5   : > { %11451 = vst [vmem:[#allocation22_spill] sm:$0xff] %v8257_v34  ;;  %2546 = vrot.lane.b32.xlu0 %v11452_v30, %s6433_s21  ;;  %v11460_v34 = vld [vmem:[#allocation39_spill] sm:$0xff]  ;;  %v11521_v30 = vld [vmem:[#allocation113_spill] sm:$0xff] }
 0x1e6   : > { %2544 = vrot.lane.b32.xlu1 %v11453_v17, %s6433_s21 }
 0x1e7   : > { %v8263_v11 = vpop.permute.xlu0 %2434 }
 0x1e8   : > { %11454 = vst [vmem:[#allocation314_spill] sm:$0xff] %v8263_v11  ;;  %v8265_v10 = vpop.permute.xlu1 %2432 }
 0x1e9   : > { %11455 = vst [vmem:[#allocation315_spill] sm:$0xff] %v8265_v10  ;;  %2550 = vrot.lane.b32.xlu0 %v11456_v2, %s6433_s21  ;;  %v11464_v10 = vld [vmem:[#allocation43_spill] sm:$0xff]  ;;  %v11465_v2 = vld [vmem:[#allocation38_spill] sm:$0xff] }
 0x1ea   : > { %2548 = vrot.lane.b32.xlu1 %v11457_v61, %s6433_s21 }
 0x1eb   : > { %v8271_v43 = vpop.permute.xlu0 %2438 }
 0x1ec   : > { %11458 = vst [vmem:[#allocation316_spill] sm:$0xff] %v8271_v43  ;;  %v8273_v38 = vpop.permute.xlu1 %2436 }
 0x1ed   : > { %11459 = vst [vmem:[#allocation317_spill] sm:$0xff] %v8273_v38  ;;  %2554 = vrot.lane.b32.xlu0 %v11460_v34, %s6433_s21  ;;  %v11468_v38 = vld [vmem:[#allocation48_spill] sm:$0xff]  ;;  %v11469_v34 = vld [vmem:[#allocation41_spill] sm:$0xff] }
 0x1ee   : > { %2552 = vrot.lane.b32.xlu1 %v11461_v1, %s6433_s21 }
 0x1ef   : > { %v8279_v19 = vpop.permute.xlu0 %2442 }
 0x1f0   : > { %11462 = vst [vmem:[#allocation318_spill] sm:$0xff] %v8279_v19  ;;  %v8281_v11 = vpop.permute.xlu1 %2440 }
 0x1f1   : > { %11463 = vst [vmem:[#allocation319_spill] sm:$0xff] %v8281_v11  ;;  %2558 = vrot.lane.b32.xlu0 %v11464_v10, %s6433_s21  ;;  %v11472_v11 = vld [vmem:[#allocation53_spill] sm:$0xff]  ;;  %v11473_v10 = vld [vmem:[#allocation46_spill] sm:$0xff] }
 0x1f2   : > { %2556 = vrot.lane.b32.xlu1 %v11465_v2, %s6433_s21 }
 0x1f3   : > { %v8287_v61 = vpop.permute.xlu0 %2446 }
 0x1f4   : > { %11466 = vst [vmem:[#allocation320_spill] sm:$0xff] %v8287_v61  ;;  %v8289_v43 = vpop.permute.xlu1 %2444 }
 0x1f5   : > { %11467 = vst [vmem:[#allocation321_spill] sm:$0xff] %v8289_v43  ;;  %2562 = vrot.lane.b32.xlu0 %v11468_v38, %s6433_s21  ;;  %v11476_v43 = vld [vmem:[#allocation57_spill] sm:$0xff]  ;;  %v11477_v38 = vld [vmem:[#allocation50_spill] sm:$0xff] }
 0x1f6   : > { %2560 = vrot.lane.b32.xlu1 %v11469_v34, %s6433_s21 }
 0x1f7   : > { %v8295_v1 = vpop.permute.xlu0 %2450 }
 0x1f8   : > { %11470 = vst [vmem:[#allocation322_spill] sm:$0xff] %v8295_v1  ;;  %v8297_v19 = vpop.permute.xlu1 %2448 }
 0x1f9   : > { %11471 = vst [vmem:[#allocation323_spill] sm:$0xff] %v8297_v19  ;;  %2566 = vrot.lane.b32.xlu0 %v11472_v11, %s6433_s21  ;;  %v11480_v19 = vld [vmem:[#allocation62_spill] sm:$0xff]  ;;  %v11481_v11 = vld [vmem:[#allocation56_spill] sm:$0xff] }
 0x1fa   : > { %2564 = vrot.lane.b32.xlu1 %v11473_v10, %s6433_s21 }
 0x1fb   : > { %v8303_v2 = vpop.permute.xlu0 %2454 }
 0x1fc   : > { %11474 = vst [vmem:[#allocation324_spill] sm:$0xff] %v8303_v2  ;;  %v8305_v61 = vpop.permute.xlu1 %2452 }
 0x1fd   : > { %11475 = vst [vmem:[#allocation325_spill] sm:$0xff] %v8305_v61  ;;  %2570 = vrot.lane.b32.xlu0 %v11476_v43, %s6433_s21  ;;  %v11484_v61 = vld [vmem:[#allocation68_spill] sm:$0xff] }
 0x1fe   : > { %2568 = vrot.lane.b32.xlu1 %v11477_v38, %s6433_s21  ;;  %v11485_v43 = vld [vmem:[#allocation60_spill] sm:$0xff] }
 0x1ff   : > { %v8311_v34 = vpop.permute.xlu0 %2458 }
 0x200   : > { %11478 = vst [vmem:[#allocation326_spill] sm:$0xff] %v8311_v34  ;;  %v8313_v1 = vpop.permute.xlu1 %2456  ;;  %v11517_v34 = vld [vmem:[#allocation104_spill] sm:$0xff] }
 0x201   : > { %11479 = vst [vmem:[#allocation327_spill] sm:$0xff] %v8313_v1  ;;  %2574 = vrot.lane.b32.xlu0 %v11480_v19, %s6433_s21  ;;  %v11489_v19 = vld [vmem:[#allocation66_spill] sm:$0xff] }
 0x202   : > { %2572 = vrot.lane.b32.xlu1 %v11481_v11, %s6433_s21 }
 0x203   : > { %v8319_v10 = vpop.permute.xlu0 %2462 }
 0x204   : > { %11482 = vst [vmem:[#allocation328_spill] sm:$0xff] %v8319_v10  ;;  %v8321_v2 = vpop.permute.xlu1 %2460 }
 0x205   : > { %11483 = vst [vmem:[#allocation329_spill] sm:$0xff] %v8321_v2  ;;  %2578 = vrot.lane.b32.xlu0 %v11484_v61, %s6433_s21  ;;  %v11492_v2 = vld [vmem:[#allocation77_spill] sm:$0xff]  ;;  %v11493_v61 = vld [vmem:[#allocation70_spill] sm:$0xff] }
 0x206   : > { %2576 = vrot.lane.b32.xlu1 %v11485_v43, %s6433_s21 }
 0x207   : > { %v8327_v38 = vpop.permute.xlu0 %2466 }
 0x208   : > { %11486 = vst [vmem:[#allocation330_spill] sm:$0xff] %v8327_v38  ;;  %v8329_v22 = vpop.permute.xlu1 %2464 }
 0x209   : > { %11487 = vst [vmem:[#allocation331_spill] sm:$0xff] %v8329_v22  ;;  %2582 = vrot.lane.b32.xlu0 %v11488_v55, %s6433_s21  ;;  %v11496_v22 = vld [vmem:[#allocation82_spill] sm:$0xff]  ;;  %v11497_v55 = vld [vmem:[#allocation76_spill] sm:$0xff] }
 0x20a   : > { %2580 = vrot.lane.b32.xlu1 %v11489_v19, %s6433_s21 }
 0x20b   : > { %v8335_v11 = vpop.permute.xlu0 %2470 }
 0x20c   : > { %11490 = vst [vmem:[#allocation332_spill] sm:$0xff] %v8335_v11  ;;  %v8337_v10 = vpop.permute.xlu1 %2468 }
 0x20d   : > { %11491 = vst [vmem:[#allocation333_spill] sm:$0xff] %v8337_v10  ;;  %2586 = vrot.lane.b32.xlu0 %v11492_v2, %s6433_s21  ;;  %v11500_v10 = vld [vmem:[#allocation89_spill] sm:$0xff]  ;;  %v11501_v2 = vld [vmem:[#allocation80_spill] sm:$0xff] }
 0x20e   : > { %2584 = vrot.lane.b32.xlu1 %v11493_v61, %s6433_s21 }
 0x20f   : > { %v8343_v43 = vpop.permute.xlu0 %2474 }
 0x210   : > { %11494 = vst [vmem:[#allocation334_spill] sm:$0xff] %v8343_v43  ;;  %v8345_v38 = vpop.permute.xlu1 %2472 }
 0x211   : > { %11495 = vst [vmem:[#allocation335_spill] sm:$0xff] %v8345_v38  ;;  %2590 = vrot.lane.b32.xlu0 %v11496_v22, %s6433_s21  ;;  %v11504_v38 = vld [vmem:[#allocation95_spill] sm:$0xff] }
 0x212   : > { %2588 = vrot.lane.b32.xlu1 %v11497_v55, %s6433_s21 }
 0x213   : > { %v8351_v19 = vpop.permute.xlu0 %2478 }
 0x214   : > { %11498 = vst [vmem:[#allocation82_spill] sm:$0xff] %v8351_v19  ;;  %v8353_v11 = vpop.permute.xlu1 %2476 }
 0x215   : > { %11499 = vst [vmem:[#allocation76_spill] sm:$0xff] %v8353_v11  ;;  %2594 = vrot.lane.b32.xlu0 %v11500_v10, %s6433_s21  ;;  %v11508_v11 = vld [vmem:[#allocation100_spill] sm:$0xff] }
 0x216   : > { %2592 = vrot.lane.b32.xlu1 %v11501_v2, %s6433_s21 }
 0x217   : > { %v8359_v61 = vpop.permute.xlu0 %2482 }
 0x218   : > { %11502 = vst [vmem:[#allocation89_spill] sm:$0xff] %v8359_v61  ;;  %v8361_v43 = vpop.permute.xlu1 %2480 }
 0x219   : > { %11503 = vst [vmem:[#allocation80_spill] sm:$0xff] %v8361_v43  ;;  %2598 = vrot.lane.b32.xlu0 %v11504_v38, %s6433_s21  ;;  %v11512_v43 = vld [vmem:[#allocation108_spill] sm:$0xff] }
 0x21a   : > { %2596 = vrot.lane.b32.xlu1 %v11505_v14, %s6433_s21 }
 0x21b   : > { %v8367_v27 = vpop.permute.xlu0 %2486 }
 0x21c   : > { %11506 = vst [vmem:[#allocation95_spill] sm:$0xff] %v8367_v27  ;;  %v8369_v19 = vpop.permute.xlu1 %2484 }
 0x21d   : > { %11507 = vst [vmem:[#allocation87_spill] sm:$0xff] %v8369_v19  ;;  %2602 = vrot.lane.b32.xlu0 %v11508_v11, %s6433_s21  ;;  %v11516_v19 = vld [vmem:[#allocation116_spill] sm:$0xff] }
 0x21e   : > { %2600 = vrot.lane.b32.xlu1 %v11509_v53, %s6433_s21 }
 0x21f   : > { %v8375_v24 = vpop.permute.xlu0 %2490 }
 0x220   : > { %11510 = vst [vmem:[#allocation100_spill] sm:$0xff] %v8375_v24  ;;  %v8377_v61 = vpop.permute.xlu1 %2488 }
 0x221   : > { %11511 = vst [vmem:[#allocation91_spill] sm:$0xff] %v8377_v61  ;;  %2606 = vrot.lane.b32.xlu0 %v11512_v43, %s6433_s21  ;;  %v11520_v61 = vld [vmem:[#allocation123_spill] sm:$0xff] }
 0x222   : > { %2604 = vrot.lane.b32.xlu1 %v11513_v49, %s6433_s21 }
 0x223   : > { %v8383_v21 = vpop.permute.xlu0 %2494 }
 0x224   : > { %11514 = vst [vmem:[#allocation336_spill] sm:$0xff] %v8383_v21  ;;  %v8385_v27 = vpop.permute.xlu1 %2492 }
 0x225   : > { %11515 = vst [vmem:[#allocation337_spill] sm:$0xff] %v8385_v27  ;;  %2610 = vrot.lane.b32.xlu0 %v11516_v19, %s6433_s21  ;;  %v11524_v27 = vld [vmem:[#allocation129_spill] sm:$0xff]  ;;  %v11525_v19 = vld [vmem:[#allocation119_spill] sm:$0xff] }
 0x226   : > { %2608 = vrot.lane.b32.xlu1 %v11517_v34, %s6433_s21 }
 0x227   : > { %v8391_v46 = vpop.permute.xlu0 %2498 }
 0x228   : > { %11518 = vst [vmem:[#allocation338_spill] sm:$0xff] %v8391_v46  ;;  %v8393_v24 = vpop.permute.xlu1 %2496 }
 0x229   : > { %11519 = vst [vmem:[#allocation339_spill] sm:$0xff] %v8393_v24  ;;  %2614 = vrot.lane.b32.xlu0 %v11520_v61, %s6433_s21  ;;  %v11528_v24 = vld [vmem:[#allocation136_spill] sm:$0xff]  ;;  %v11529_v61 = vld [vmem:[#allocation127_spill] sm:$0xff] }
 0x22a   : > { %2612 = vrot.lane.b32.xlu1 %v11521_v30, %s6433_s21 }
 0x22b   : > { %v8399_v6 = vpop.permute.xlu0 %2502 }
 0x22c   : > { %11522 = vst [vmem:[#allocation340_spill] sm:$0xff] %v8399_v6  ;;  %v8401_v21 = vpop.permute.xlu1 %2500 }
 0x22d   : > { %11523 = vst [vmem:[#allocation341_spill] sm:$0xff] %v8401_v21  ;;  %2618 = vrot.lane.b32.xlu0 %v11524_v27, %s6433_s21  ;;  %v11532_v21 = vld [vmem:[#allocation143_spill] sm:$0xff]  ;;  %v11533_v27 = vld [vmem:[#allocation133_spill] sm:$0xff] }
 0x22e   : > { %2616 = vrot.lane.b32.xlu1 %v11525_v19, %s6433_s21 }
 0x22f   : > { %v8407_v34 = vpop.permute.xlu0 %2506 }
 0x230   : > { %11526 = vst [vmem:[#allocation342_spill] sm:$0xff] %v8407_v34  ;;  %v8409_v46 = vpop.permute.xlu1 %2504 }
 0x231   : > { %11527 = vst [vmem:[#allocation343_spill] sm:$0xff] %v8409_v46  ;;  %2622 = vrot.lane.b32.xlu0 %v11528_v24, %s6433_s21  ;;  %v11536_v46 = vld [vmem:[#allocation149_spill] sm:$0xff]  ;;  %v11537_v24 = vld [vmem:[#allocation140_spill] sm:$0xff] }
 0x232   : > { %2620 = vrot.lane.b32.xlu1 %v11529_v61, %s6433_s21 }
 0x233   : > { %v8415_v30 = vpop.permute.xlu0 %2510 }
 0x234   : > { %11530 = vst [vmem:[#allocation344_spill] sm:$0xff] %v8415_v30  ;;  %v8417_v6 = vpop.permute.xlu1 %2508  ;;  %v2117_v30 = vshll.u32 %v8193_v36, 16 }
 0x235   : > { %11531 = vst [vmem:[#allocation345_spill] sm:$0xff] %v8417_v6  ;;  %2626 = vrot.lane.b32.xlu0 %v11532_v21, %s6433_s21  ;;  %v2112_v6 = vshll.u32 %v8197_v28, 16 }
 0x236   : > { %2624 = vrot.lane.b32.xlu1 %v11533_v27, %s6433_s21  ;;  %v2121_v27 = vshrl.u32 %v8193_v36, 16 }
 0x237   : > { %v8423_v19 = vpop.permute.xlu0 %2514  ;;  %v2114_v16 = vrot.slane %v2112_v6, 1  ;;  %v11550_v6 = vld [vmem:[#allocation159_spill] sm:$0xff] }
 0x238   : > { %11534 = vst [vmem:[#allocation346_spill] sm:$0xff] %v8423_v19  ;;  %v8425_v34 = vpop.permute.xlu1 %2512  ;;  %v8440_v19 = vsel %vm6470_vm2, %v8173_v5, 0  ;;  %v11545_v5 = vld [vmem:[#allocation160_spill] sm:$0xff] }
 0x239   : > { %11535 = vst [vmem:[#allocation347_spill] sm:$0xff] %v8425_v34  ;;  %2630 = vrot.lane.b32.xlu0 %v11536_v46, %s6433_s21  ;;  %11540 = vst [vmem:[#allocation350_spill] sm:$0xff] %v8440_v19  ;;  %v11541_v34 = vld [vmem:[#allocation156_spill] sm:$0xff]  ;;  %v11542_v46 = vld [vmem:[#allocation146_spill] sm:$0xff]  ;;  %v2125_v1 = vshll.u32 %v8440_v19, 16 }
 0x23a   : > { %2628 = vrot.lane.b32.xlu1 %v11537_v24, %s6433_s21  ;;  %v2119_v24 = vrot.slane %v2117_v30, 1  ;;  %v11549_v19 = vld [vmem:[#allocation162_spill] sm:$0xff] }
 0x23b   : > { %v8433_v61 = vpop.permute.xlu0 %2518 }
 0x23c   : > { %11538 = vst [vmem:[#allocation348_spill] sm:$0xff] %v8433_v61  ;;  %v8435_v21 = vpop.permute.xlu1 %2516  ;;  %v2110_v61 = vshrl.u32 %v8197_v28, 16 }
 0x23d   : > { %11539 = vst [vmem:[#allocation349_spill] sm:$0xff] %v8435_v21  ;;  %2634 = vrot.lane.b32.xlu0 %v11541_v34, %s6433_s21  ;;  %v2123_v34 = vor.u32 %v2121_v27, %v2119_v24 }
 0x23e   : > { %2632 = vrot.lane.b32.xlu1 %v11542_v46, %s6433_s21  ;;  %v2127_v46 = vrot.slane %v2125_v1, 1  ;;  %v2115_v30 = vor.u32 %v2114_v16, %v2110_v61 }
 0x23f   : > { %v8449_v21 = vpop.permute.xlu0 %2522 }
 0x240   : > { %11543 = vst [vmem:[#allocation351_spill] sm:$0xff] %v8449_v21  ;;  %v8451_v12 = vpop.permute.xlu1 %2520  ;;  %v8466_v28 = vsel %vm1243_vm3, %v2123_v34, %v2127_v46  ;;  %v11557_v46 = vld [vmem:[#allocation164_spill] sm:$0xff]  ;;  %v11582_v21 = vld [vmem:[#allocation186_spill] sm:$0xff] }
 0x241   : > { %11544 = vst [vmem:[#allocation352_spill] sm:$0xff] %v8451_v12  ;;  %2638 = vrot.lane.b32.xlu0 %v11545_v5, %s6433_s21  ;;  %11551 = vst [vmem:[#allocation355_spill] sm:$0xff] %v8466_v28  ;;  %v8469_v5 = vsel %vm1243_vm3, %v2115_v30, %v2119_v24  ;;  %v11558_v24 = vld [vmem:[#allocation165_spill] sm:$0xff]  ;;  %v11561_v30 = vld [vmem:[#allocation167_spill] sm:$0xff] }
 0x242   : > { %2636 = vrot.lane.b32.xlu1 %v11546_v32, %s6433_s21  ;;  %11552 = vst [vmem:[#allocation356_spill] sm:$0xff] %v8469_v5 }
 0x243   : > { %v8457_v60 = vpop.permute.xlu0 %2526 }
 0x244   : > { %11547 = vst [vmem:[#allocation353_spill] sm:$0xff] %v8457_v60  ;;  %v8459_v36 = vpop.permute.xlu1 %2524  ;;  %v11578_v60 = vld [vmem:[#allocation182_spill] sm:$0xff] }
 0x245   : > { %11548 = vst [vmem:[#allocation354_spill] sm:$0xff] %v8459_v36  ;;  %2642 = vrot.lane.b32.xlu0 %v11549_v19, %s6433_s21 }
 0x246   : > { %2640 = vrot.lane.b32.xlu1 %v11550_v6, %s6433_s21  ;;  %v11565_v6 = vld [vmem:[#allocation171_spill] sm:$0xff] }
 0x247   : > { %v8471_v32 = vpop.permute.xlu0 %2530 }
 0x248   : > { %11553 = vst [vmem:[#allocation357_spill] sm:$0xff] %v8471_v32  ;;  %v8473_v27 = vpop.permute.xlu1 %2528  ;;  %v11574_v32 = vld [vmem:[#allocation179_spill] sm:$0xff] }
 0x249   : > { %11554 = vst [vmem:[#allocation358_spill] sm:$0xff] %v8473_v27  ;;  %2646 = vrot.lane.b32.xlu0 %v8466_v28, %s6433_s21  ;;  %v11562_v28 = vld [vmem:[#allocation168_spill] sm:$0xff] }
 0x24a   : > { %2644 = vrot.lane.b32.xlu1 %v8469_v5, %s6433_s21 }
 0x24b   : > { %v8479_v61 = vpop.permute.xlu0 %2534 }
 0x24c   : > { %11555 = vst [vmem:[#allocation359_spill] sm:$0xff] %v8479_v61  ;;  %v8481_v16 = vpop.permute.xlu1 %2532  ;;  %v11570_v61 = vld [vmem:[#allocation176_spill] sm:$0xff] }
 0x24d   : > { %11556 = vst [vmem:[#allocation360_spill] sm:$0xff] %v8481_v16  ;;  %2650 = vrot.lane.b32.xlu0 %v11557_v46, %s6434_s22  ;;  %v11566_v46 = vld [vmem:[#allocation172_spill] sm:$0xff] }
 0x24e   : > { %2648 = vrot.lane.b32.xlu1 %v11558_v24, %s6434_s22 }
 0x24f   : > { %v8487_v1 = vpop.permute.xlu0 %2538 }
 0x250   : > { %11559 = vst [vmem:[#allocation164_spill] sm:$0xff] %v8487_v1  ;;  %v8489_v34 = vpop.permute.xlu1 %2536 }
 0x251   : > { %11560 = vst [vmem:[#allocation165_spill] sm:$0xff] %v8489_v34  ;;  %2654 = vrot.lane.b32.xlu0 %v11561_v30, %s6434_s22  ;;  %v11569_v34 = vld [vmem:[#allocation175_spill] sm:$0xff] }
 0x252   : > { %2652 = vrot.lane.b32.xlu1 %v11562_v28, %s6434_s22 }
 0x253   : > { %v8495_v5 = vpop.permute.xlu0 %2542 }
 0x254   : > { %11563 = vst [vmem:[#allocation167_spill] sm:$0xff] %v8495_v5  ;;  %v8497_v19 = vpop.permute.xlu1 %2540 }
 0x255   : > { %11564 = vst [vmem:[#allocation168_spill] sm:$0xff] %v8497_v19  ;;  %2658 = vrot.lane.b32.xlu0 %v11565_v6, %s6434_s22  ;;  %v11573_v19 = vld [vmem:[#allocation178_spill] sm:$0xff] }
 0x256   : > { %2656 = vrot.lane.b32.xlu1 %v11566_v46, %s6434_s22 }
 0x257   : > { %v8503_v24 = vpop.permute.xlu0 %2546 }
 0x258   : > { %11567 = vst [vmem:[#allocation171_spill] sm:$0xff] %v8503_v24  ;;  %v8505_v1 = vpop.permute.xlu1 %2544 }
 0x259   : > { %11568 = vst [vmem:[#allocation172_spill] sm:$0xff] %v8505_v1  ;;  %2662 = vrot.lane.b32.xlu0 %v11569_v34, %s6434_s22  ;;  %v11577_v1 = vld [vmem:[#allocation181_spill] sm:$0xff] }
 0x25a   : > { %2660 = vrot.lane.b32.xlu1 %v11570_v61, %s6434_s22 }
 0x25b   : > { %v8511_v16 = vpop.permute.xlu0 %2550 }
 0x25c   : > { %11571 = vst [vmem:[#allocation175_spill] sm:$0xff] %v8511_v16  ;;  %v8513_v5 = vpop.permute.xlu1 %2548 }
 0x25d   : > { %11572 = vst [vmem:[#allocation176_spill] sm:$0xff] %v8513_v5  ;;  %2666 = vrot.lane.b32.xlu0 %v11573_v19, %s6434_s22  ;;  %v11581_v5 = vld [vmem:[#allocation185_spill] sm:$0xff] }
 0x25e   : > { %2664 = vrot.lane.b32.xlu1 %v11574_v32, %s6434_s22 }
 0x25f   : > { %v8519_v27 = vpop.permute.xlu0 %2554 }
 0x260   : > { %11575 = vst [vmem:[#allocation178_spill] sm:$0xff] %v8519_v27  ;;  %v8521_v24 = vpop.permute.xlu1 %2552 }
 0x261   : > { %11576 = vst [vmem:[#allocation179_spill] sm:$0xff] %v8521_v24  ;;  %2670 = vrot.lane.b32.xlu0 %v11577_v1, %s6434_s22  ;;  %v11585_v24 = vld [vmem:[#allocation187_spill] sm:$0xff]  ;;  %v11642_v1 = vld [vmem:[#allocation109_spill] sm:$0xff] }
 0x262   : > { %2668 = vrot.lane.b32.xlu1 %v11578_v60, %s6434_s22  ;;  %v11646_v60 = vld [vmem:[#allocation115_spill] sm:$0xff] }
 0x263   : > { %v8527_v36 = vpop.permute.xlu0 %2558 }
 0x264   : > { %11579 = vst [vmem:[#allocation361_spill] sm:$0xff] %v8527_v36  ;;  %v8529_v16 = vpop.permute.xlu1 %2556 }
 0x265   : > { %11580 = vst [vmem:[#allocation362_spill] sm:$0xff] %v8529_v16  ;;  %2674 = vrot.lane.b32.xlu0 %v11581_v5, %s6434_s22  ;;  %v11589_v16 = vld [vmem:[#allocation191_spill] sm:$0xff]  ;;  %v11590_v5 = vld [vmem:[#allocation192_spill] sm:$0xff] }
 0x266   : > { %2672 = vrot.lane.b32.xlu1 %v11582_v21, %s6434_s22 }
 0x267   : > { %v8535_v17 = vpop.permute.xlu0 %2562 }
 0x268   : > { %11583 = vst [vmem:[#allocation363_spill] sm:$0xff] %v8535_v17  ;;  %v8537_v27 = vpop.permute.xlu1 %2560 }
 0x269   : > { %11584 = vst [vmem:[#allocation364_spill] sm:$0xff] %v8537_v27  ;;  %2678 = vrot.lane.b32.xlu0 %v11585_v24, %s6434_s22  ;;  %v11593_v27 = vld [vmem:[#allocation195_spill] sm:$0xff]  ;;  %v11594_v24 = vld [vmem:[#allocation196_spill] sm:$0xff] }
 0x26a   : > { %2676 = vrot.lane.b32.xlu1 %v11586_v7, %s6434_s22 }
 0x26b   : > { %v8543_v12 = vpop.permute.xlu0 %2566 }
 0x26c   : > { %11587 = vst [vmem:[#allocation365_spill] sm:$0xff] %v8543_v12  ;;  %v8545_v36 = vpop.permute.xlu1 %2564 }
 0x26d   : > { %11588 = vst [vmem:[#allocation366_spill] sm:$0xff] %v8545_v36  ;;  %2682 = vrot.lane.b32.xlu0 %v11589_v16, %s6434_s22  ;;  %v11597_v36 = vld [vmem:[#allocation198_spill] sm:$0xff]  ;;  %v11598_v16 = vld [vmem:[#allocation47_spill] sm:$0xff] }
 0x26e   : > { %2680 = vrot.lane.b32.xlu1 %v11590_v5, %s6434_s22 }
 0x26f   : > { %v8551_v21 = vpop.permute.xlu0 %2570 }
 0x270   : > { %11591 = vst [vmem:[#allocation367_spill] sm:$0xff] %v8551_v21  ;;  %v8553_v17 = vpop.permute.xlu1 %2568 }
 0x271   : > { %11592 = vst [vmem:[#allocation368_spill] sm:$0xff] %v8553_v17  ;;  %2686 = vrot.lane.b32.xlu0 %v11593_v27, %s6434_s22  ;;  %v11601_v17 = vld [vmem:[#allocation200_spill] sm:$0xff] }
 0x272   : > { %2684 = vrot.lane.b32.xlu1 %v11594_v24, %s6434_s22  ;;  %v11602_v27 = vld [vmem:[#allocation52_spill] sm:$0xff] }
 0x273   : > { %v8559_v7 = vpop.permute.xlu0 %2574 }
 0x274   : > { %11595 = vst [vmem:[#allocation369_spill] sm:$0xff] %v8559_v7  ;;  %v8561_v12 = vpop.permute.xlu1 %2572 }
 0x275   : > { %11596 = vst [vmem:[#allocation370_spill] sm:$0xff] %v8561_v12  ;;  %2690 = vrot.lane.b32.xlu0 %v11597_v36, %s6434_s22  ;;  %v11605_v12 = vld [vmem:[#allocation58_spill] sm:$0xff]  ;;  %v11606_v36 = vld [vmem:[#allocation203_spill] sm:$0xff] }
 0x276   : > { %2688 = vrot.lane.b32.xlu1 %v11598_v16, %s6434_s22 }
 0x277   : > { %v8567_v5 = vpop.permute.xlu0 %2578 }
 0x278   : > { %11599 = vst [vmem:[#allocation371_spill] sm:$0xff] %v8567_v5  ;;  %v8569_v21 = vpop.permute.xlu1 %2576 }
 0x279   : > { %11600 = vst [vmem:[#allocation372_spill] sm:$0xff] %v8569_v21  ;;  %2694 = vrot.lane.b32.xlu0 %v11601_v17, %s6434_s22  ;;  %v11609_v21 = vld [vmem:[#allocation205_spill] sm:$0xff]  ;;  %v11610_v17 = vld [vmem:[#allocation63_spill] sm:$0xff] }
 0x27a   : > { %2692 = vrot.lane.b32.xlu1 %v11602_v27, %s6434_s22 }
 0x27b   : > { %v8575_v24 = vpop.permute.xlu0 %2582 }
 0x27c   : > { %11603 = vst [vmem:[#allocation373_spill] sm:$0xff] %v8575_v24  ;;  %v8577_v7 = vpop.permute.xlu1 %2580 }
 0x27d   : > { %11604 = vst [vmem:[#allocation374_spill] sm:$0xff] %v8577_v7  ;;  %2698 = vrot.lane.b32.xlu0 %v11605_v12, %s6434_s22  ;;  %v11613_v7 = vld [vmem:[#allocation207_spill] sm:$0xff] }
 0x27e   : > { %2696 = vrot.lane.b32.xlu1 %v11606_v36, %s6434_s22  ;;  %v11614_v12 = vld [vmem:[#allocation67_spill] sm:$0xff] }
 0x27f   : > { %v8583_v16 = vpop.permute.xlu0 %2586 }
 0x280   : > { %11607 = vst [vmem:[#allocation375_spill] sm:$0xff] %v8583_v16  ;;  %v8585_v5 = vpop.permute.xlu1 %2584 }
 0x281   : > { %11608 = vst [vmem:[#allocation376_spill] sm:$0xff] %v8585_v5  ;;  %2702 = vrot.lane.b32.xlu0 %v11609_v21, %s6434_s22  ;;  %v11617_v5 = vld [vmem:[#allocation210_spill] sm:$0xff]  ;;  %v11618_v21 = vld [vmem:[#allocation72_spill] sm:$0xff] }
 0x282   : > { %2700 = vrot.lane.b32.xlu1 %v11610_v17, %s6434_s22 }
 0x283   : > { %v8591_v27 = vpop.permute.xlu0 %2590 }
 0x284   : > { %11611 = vst [vmem:[#allocation377_spill] sm:$0xff] %v8591_v27  ;;  %v8593_v24 = vpop.permute.xlu1 %2588 }
 0x285   : > { %11612 = vst [vmem:[#allocation378_spill] sm:$0xff] %v8593_v24  ;;  %2706 = vrot.lane.b32.xlu0 %v11613_v7, %s6434_s22  ;;  %v11621_v24 = vld [vmem:[#allocation212_spill] sm:$0xff]  ;;  %v11622_v7 = vld [vmem:[#allocation78_spill] sm:$0xff] }
 0x286   : > { %2704 = vrot.lane.b32.xlu1 %v11614_v12, %s6434_s22 }
 0x287   : > { %v8599_v36 = vpop.permute.xlu0 %2594 }
 0x288   : > { %11615 = vst [vmem:[#allocation379_spill] sm:$0xff] %v8599_v36  ;;  %v8601_v16 = vpop.permute.xlu1 %2592 }
 0x289   : > { %11616 = vst [vmem:[#allocation380_spill] sm:$0xff] %v8601_v16  ;;  %2710 = vrot.lane.b32.xlu0 %v11617_v5, %s6434_s22  ;;  %v11625_v16 = vld [vmem:[#allocation74_spill] sm:$0xff]  ;;  %v11626_v5 = vld [vmem:[#allocation83_spill] sm:$0xff] }
 0x28a   : > { %2708 = vrot.lane.b32.xlu1 %v11618_v21, %s6434_s22 }
 0x28b   : > { %v8607_v17 = vpop.permute.xlu0 %2598 }
 0x28c   : > { %11619 = vst [vmem:[#allocation381_spill] sm:$0xff] %v8607_v17  ;;  %v8609_v27 = vpop.permute.xlu1 %2596 }
 0x28d   : > { %11620 = vst [vmem:[#allocation382_spill] sm:$0xff] %v8609_v27  ;;  %2714 = vrot.lane.b32.xlu0 %v11621_v24, %s6434_s22  ;;  %v11629_v27 = vld [vmem:[#allocation81_spill] sm:$0xff]  ;;  %v11630_v24 = vld [vmem:[#allocation88_spill] sm:$0xff] }
 0x28e   : > { %2712 = vrot.lane.b32.xlu1 %v11622_v7, %s6434_s22 }
 0x28f   : > { %v8615_v12 = vpop.permute.xlu0 %2602 }
 0x290   : > { %11623 = vst [vmem:[#allocation383_spill] sm:$0xff] %v8615_v12  ;;  %v8617_v36 = vpop.permute.xlu1 %2600 }
 0x291   : > { %11624 = vst [vmem:[#allocation384_spill] sm:$0xff] %v8617_v36  ;;  %2718 = vrot.lane.b32.xlu0 %v11625_v16, %s6434_s22  ;;  %v11633_v36 = vld [vmem:[#allocation214_spill] sm:$0xff] }
 0x292   : > { %2716 = vrot.lane.b32.xlu1 %v11626_v5, %s6434_s22 }
 0x293   : > { %v8623_v21 = vpop.permute.xlu0 %2606 }
 0x294   : > { %11627 = vst [vmem:[#allocation74_spill] sm:$0xff] %v8623_v21  ;;  %v8625_v17 = vpop.permute.xlu1 %2604 }
 0x295   : > { %11628 = vst [vmem:[#allocation83_spill] sm:$0xff] %v8625_v17  ;;  %2722 = vrot.lane.b32.xlu0 %v11629_v27, %s6434_s22  ;;  %v11637_v17 = vld [vmem:[#allocation215_spill] sm:$0xff] }
 0x296   : > { %2720 = vrot.lane.b32.xlu1 %v11630_v24, %s6434_s22 }
 0x297   : > { %v8631_v7 = vpop.permute.xlu0 %2610 }
 0x298   : > { %11631 = vst [vmem:[#allocation81_spill] sm:$0xff] %v8631_v7  ;;  %v8633_v12 = vpop.permute.xlu1 %2608 }
 0x299   : > { %11632 = vst [vmem:[#allocation88_spill] sm:$0xff] %v8633_v12  ;;  %2726 = vrot.lane.b32.xlu0 %v11633_v36, %s6434_s22  ;;  %v11641_v12 = vld [vmem:[#allocation218_spill] sm:$0xff] }
 0x29a   : > { %2724 = vrot.lane.b32.xlu1 %v11634_v20, %s6434_s22 }
 0x29b   : > { %v8639_v63 = vpop.permute.xlu0 %2614 }
 0x29c   : > { %11635 = vst [vmem:[#allocation214_spill] sm:$0xff] %v8639_v63  ;;  %v8641_v21 = vpop.permute.xlu1 %2612 }
 0x29d   : > { %11636 = vst [vmem:[#allocation94_spill] sm:$0xff] %v8641_v21  ;;  %2730 = vrot.lane.b32.xlu0 %v11637_v17, %s6434_s22  ;;  %v11645_v21 = vld [vmem:[#allocation221_spill] sm:$0xff] }
 0x29e   : > { %2728 = vrot.lane.b32.xlu1 %v11638_v29, %s6434_s22 }
 0x29f   : > { %v8647_v31 = vpop.permute.xlu0 %2618 }
 0x2a0   : > { %11639 = vst [vmem:[#allocation215_spill] sm:$0xff] %v8647_v31  ;;  %v8649_v7 = vpop.permute.xlu1 %2616 }
 0x2a1   : > { %11640 = vst [vmem:[#allocation216_spill] sm:$0xff] %v8649_v7  ;;  %2734 = vrot.lane.b32.xlu0 %v11641_v12, %s6434_s22  ;;  %v11649_v7 = vld [vmem:[#allocation223_spill] sm:$0xff]  ;;  %v11650_v12 = vld [vmem:[#allocation122_spill] sm:$0xff] }
 0x2a2   : > { %2732 = vrot.lane.b32.xlu1 %v11642_v1, %s6434_s22 }
 0x2a3   : > { %v8655_v43 = vpop.permute.xlu0 %2622 }
 0x2a4   : > { %11643 = vst [vmem:[#allocation385_spill] sm:$0xff] %v8655_v43  ;;  %v8657_v63 = vpop.permute.xlu1 %2620 }
 0x2a5   : > { %11644 = vst [vmem:[#allocation386_spill] sm:$0xff] %v8657_v63  ;;  %2738 = vrot.lane.b32.xlu0 %v11645_v21, %s6434_s22  ;;  %v11653_v63 = vld [vmem:[#allocation225_spill] sm:$0xff]  ;;  %v11654_v21 = vld [vmem:[#allocation130_spill] sm:$0xff] }
 0x2a6   : > { %2736 = vrot.lane.b32.xlu1 %v11646_v60, %s6434_s22 }
 0x2a7   : > { %v8663_v49 = vpop.permute.xlu0 %2626 }
 0x2a8   : > { %11647 = vst [vmem:[#allocation387_spill] sm:$0xff] %v8663_v49  ;;  %v8665_v31 = vpop.permute.xlu1 %2624 }
 0x2a9   : > { %11648 = vst [vmem:[#allocation388_spill] sm:$0xff] %v8665_v31  ;;  %2742 = vrot.lane.b32.xlu0 %v11649_v7, %s6434_s22  ;;  %v11657_v31 = vld [vmem:[#allocation228_spill] sm:$0xff]  ;;  %v11658_v7 = vld [vmem:[#allocation137_spill] sm:$0xff] }
 0x2aa   : > { %2740 = vrot.lane.b32.xlu1 %v11650_v12, %s6434_s22 }
 0x2ab   : > { %v8671_v1 = vpop.permute.xlu0 %2630 }
 0x2ac   : > { %11651 = vst [vmem:[#allocation389_spill] sm:$0xff] %v8671_v1  ;;  %v8673_v43 = vpop.permute.xlu1 %2628 }
 0x2ad   : > { %11652 = vst [vmem:[#allocation390_spill] sm:$0xff] %v8673_v43  ;;  %2746 = vrot.lane.b32.xlu0 %v11653_v63, %s6434_s22  ;;  %v11661_v43 = vld [vmem:[#allocation230_spill] sm:$0xff]  ;;  %v11662_v63 = vld [vmem:[#allocation232_spill] sm:$0xff] }
 0x2ae   : > { %2744 = vrot.lane.b32.xlu1 %v11654_v21, %s6434_s22 }
 0x2af   : > { %v8679_v60 = vpop.permute.xlu0 %2634 }
 0x2b0   : > { %11655 = vst [vmem:[#allocation391_spill] sm:$0xff] %v8679_v60  ;;  %v8681_v49 = vpop.permute.xlu1 %2632 }
 0x2b1   : > { %11656 = vst [vmem:[#allocation392_spill] sm:$0xff] %v8681_v49  ;;  %2750 = vrot.lane.b32.xlu0 %v11657_v31, %s6434_s22  ;;  %v6418_v49 = vld [vmem:[%s10624_s1] sm:$0xff]  }
 0x2b2   : > { %2748 = vrot.lane.b32.xlu1 %v11658_v7, %s6434_s22  ;;  %6185 = vmatprep.subr.bf16.mxu0 %v6418_v49 }
 0x2b3   : > { %v8687_v12 = vpop.permute.xlu0 %2638  ;;  %6317 = vmatprep.subr.bf16.mxu1 %v6418_v49  ;;  %6186 = vmatpush3.bf16.msra.mxu0 %v6418_v49 }
 0x2b4   : > { %11659 = vst [vmem:[#allocation137_spill] sm:$0xff] %v8687_v12  ;;  %v8689_v1 = vpop.permute.xlu1 %2636  ;;  %v6419_v12 = vld [vmem:[%s10624_s1 + $0x8] sm:$0x3f]   ;;  %6319 = vmatpush3.bf16.msra.mxu1 %v6418_v49 }
 0x2b5   : > { %11660 = vst [vmem:[#allocation393_spill] sm:$0xff] %v8689_v1  ;;  %2754 = vrot.lane.b32.xlu0 %v11661_v43, %s6434_s22 }
 0x2b6   : > { %2752 = vrot.lane.b32.xlu1 %v11662_v63, %s6434_s22 }
 0x2b7   : > { %v8695_v21 = vpop.permute.xlu0 %2642 }
 0x2b8   : > { %11663 = vst [vmem:[#allocation394_spill] sm:$0xff] %v8695_v21  ;;  %v8697_v60 = vpop.permute.xlu1 %2640  ;;  %v6436_v21 = vmov 65535  }
 0x2b9   : > { %11664 = vst [vmem:[#allocation395_spill] sm:$0xff] %v8697_v60  ;;  %2776 = vrot.lane.b32.xlu0 %v6523_v41, %s6435_s25  ;;  %v4345_v1 = vsel %vm4343_vm5, 4294967295, %v6436_v21 }
 0x2ba   : > { %2756 = vrot.lane.b32.xlu1 %v7880_v42, %s6434_s22  ;;  %v4346_v60 = vsel %vm4344_vm6, %v4345_v1, 0 }
 0x2bb   : > { %v8709_v43 = vpop.permute.xlu0 %2646  ;;  %v4348_v31 = vand.u32 %v6419_v12, %v4346_v60 }
 0x2bc   : > { %11665 = vst [vmem:[#allocation396_spill] sm:$0xff] %v8709_v43  ;;  %v8711_v63 = vpop.permute.xlu1 %2644 }
 0x2bd   : > { %11666 = vst [vmem:[#allocation397_spill] sm:$0xff] %v8711_v63  ;;  %2778 = vrot.lane.b32.xlu0 %v6519_v40, %s6435_s25  ;;  %6187 = vmatprep.subr.bf16.mxu0 %v4348_v31 }
 0x2be   : > { %2840 = vrot.lane.b32.xlu1 %v11267_v15, %s6435_s25  ;;  %6318 = vmatprep.subr.bf16.mxu1 %v4348_v31 }
 0x2bf   : > { %v8717_v42 = vpop.permute.xlu0 %2650  ;;  %6188 = vmatpush3.bf16.msra.mxu0 %v4348_v31  ;;  %6320 = vmatpush3.bf16.msra.mxu1 %v4348_v31 }
 0x2c0   : > { %v8719_v21 = vpop.permute.xlu1 %2648 }
 0x2c1   : > { %2904 = vrot.lane.b32.xlu0 %v11433_v39, %s6437_s28 }
 0x2c2   : > { %2842 = vrot.lane.b32.xlu1 %v11262_v52, %s6435_s25 }
 0x2c3   : > { %v8725_v49 = vpop.permute.xlu0 %2654 }
 0x2c4   : > { %v8727_v60 = vpop.permute.xlu1 %2652 }
 0x2c5   : > { %2906 = vrot.lane.b32.xlu0 %v11432_v57, %s6437_s28 }
 0x2c6   : > { %2968 = vrot.lane.b32.xlu1 %v11497_v55, %s6437_s28 }
 0x2c7   : > { %v8733_v12 = vpop.permute.xlu0 %2658 }
 0x2c8   : > { %v8735_v31 = vpop.permute.xlu1 %2656 }
 0x2c9   : > { %3032 = vrot.lane.b32.xlu0 %v11562_v28, %s6438_s29 }
 0x2ca   : > { %2970 = vrot.lane.b32.xlu1 %v11496_v22, %s6437_s28 }
 0x2cb   : > { %v8741_v39 = vpop.permute.xlu0 %2662 }
 0x2cc   : > { %v8743_v1 = vpop.permute.xlu1 %2660 }
 0x2cd   : > { %3034 = vrot.lane.b32.xlu0 %v11561_v30, %s6438_s29 }
 0x2ce   : > { %3096 = vrot.lane.b32.xlu1 %v11626_v5, %s6438_s29 }
 0x2cf   : > { %v8749_v55 = vpop.permute.xlu0 %2666 }
 0x2d0   : > { %v8751_v57 = vpop.permute.xlu1 %2664 }
 0x2d1   : > { %2780 = vrot.lane.b32.xlu0 %v6551_v9, %s6435_s25 }
 0x2d2   : > { %3098 = vrot.lane.b32.xlu1 %v11625_v16, %s6438_s29 }
 0x2d3   : > { %v8757_v22 = vpop.permute.xlu0 %2670 }
 0x2d4   : > { %v8759_v28 = vpop.permute.xlu1 %2668 }
 0x2d5   : > { %2782 = vrot.lane.b32.xlu0 %v6547_v8, %s6435_s25 }
 0x2d6   : > { %2844 = vrot.lane.b32.xlu1 %v11273_v48, %s6435_s25 }
 0x2d7   : > { %v8765_v5 = vpop.permute.xlu0 %2674 }
 0x2d8   : > { %11667 = vst [vmem:[#allocation398_spill] sm:$0xff] %v8765_v5  ;;  %v8767_v30 = vpop.permute.xlu1 %2672 }
 0x2d9   : > { %11668 = vst [vmem:[#allocation399_spill] sm:$0xff] %v8767_v30  ;;  %2908 = vrot.lane.b32.xlu0 %v11437_v58, %s6437_s28 }
 0x2da   : > { %2846 = vrot.lane.b32.xlu1 %v11268_v33, %s6435_s25 }
 0x2db   : > { %v8773_v16 = vpop.permute.xlu0 %2678 }
 0x2dc   : > { %11669 = vst [vmem:[#allocation400_spill] sm:$0xff] %v8773_v16  ;;  %v8775_v43 = vpop.permute.xlu1 %2676 }
 0x2dd   : > { %11670 = vst [vmem:[#allocation401_spill] sm:$0xff] %v8775_v43  ;;  %2910 = vrot.lane.b32.xlu0 %v11436_v25, %s6437_s28  ;;  %v11711_v43 = vld [vmem:[#allocation306_spill] sm:$0xff] }
 0x2de   : > { %2972 = vrot.lane.b32.xlu1 %v11501_v2, %s6437_s28 }
 0x2df   : > { %v8781_v63 = vpop.permute.xlu0 %2682 }
 0x2e0   : > { %11671 = vst [vmem:[#allocation402_spill] sm:$0xff] %v8781_v63  ;;  %v8783_v5 = vpop.permute.xlu1 %2680 }
 0x2e1   : > { %11672 = vst [vmem:[#allocation403_spill] sm:$0xff] %v8783_v5  ;;  %3036 = vrot.lane.b32.xlu0 %v11566_v46, %s6438_s29  ;;  %v11708_v5 = vld [vmem:[#allocation4_spill] sm:$0xff] }
 0x2e2   : > { %2974 = vrot.lane.b32.xlu1 %v11500_v10, %s6437_s28 }
 0x2e3   : > { %v8789_v58 = vpop.permute.xlu0 %2686 }
 0x2e4   : > { %11673 = vst [vmem:[#allocation404_spill] sm:$0xff] %v8789_v58  ;;  %v8791_v16 = vpop.permute.xlu1 %2684  ;;  %v11699_v58 = vld [vmem:[#allocation182_spill] sm:$0xff] }
 0x2e5   : > { %11674 = vst [vmem:[#allocation405_spill] sm:$0xff] %v8791_v16  ;;  %3038 = vrot.lane.b32.xlu0 %v11565_v6, %s6438_s29 }
 0x2e6   : > { %3100 = vrot.lane.b32.xlu1 %v11630_v24, %s6438_s29 }
 0x2e7   : > { %v8797_v25 = vpop.permute.xlu0 %2690 }
 0x2e8   : > { %11675 = vst [vmem:[#allocation406_spill] sm:$0xff] %v8797_v25  ;;  %v8799_v2 = vpop.permute.xlu1 %2688 }
 0x2e9   : > { %11676 = vst [vmem:[#allocation407_spill] sm:$0xff] %v8799_v2  ;;  %2784 = vrot.lane.b32.xlu0 %v6583_v26, %s6435_s25 }
 0x2ea   : > { %3102 = vrot.lane.b32.xlu1 %v11629_v27, %s6438_s29 }
 0x2eb   : > { %v8805_v10 = vpop.permute.xlu0 %2694 }
 0x2ec   : > { %11677 = vst [vmem:[#allocation408_spill] sm:$0xff] %v8805_v10  ;;  %v8807_v46 = vpop.permute.xlu1 %2692 }
 0x2ed   : > { %11678 = vst [vmem:[#allocation409_spill] sm:$0xff] %v8807_v46  ;;  %2786 = vrot.lane.b32.xlu0 %v6593_v50, %s6435_s25 }
 0x2ee   : > { %2848 = vrot.lane.b32.xlu1 %v11279_v56, %s6435_s25 }
 0x2ef   : > { %v8813_v6 = vpop.permute.xlu0 %2698 }
 0x2f0   : > { %11679 = vst [vmem:[#allocation410_spill] sm:$0xff] %v8813_v6  ;;  %v8815_v24 = vpop.permute.xlu1 %2696 }
 0x2f1   : > { %11680 = vst [vmem:[#allocation411_spill] sm:$0xff] %v8815_v24  ;;  %2912 = vrot.lane.b32.xlu0 %v11441_v59, %s6437_s28  ;;  %v11696_v24 = vld [vmem:[#allocation99_spill] sm:$0xff] }
 0x2f2   : > { %2850 = vrot.lane.b32.xlu1 %v11275_v47, %s6435_s25 }
 0x2f3   : > { %v8821_v27 = vpop.permute.xlu0 %2702 }
 0x2f4   : > { %11681 = vst [vmem:[#allocation412_spill] sm:$0xff] %v8821_v27  ;;  %v8823_v10 = vpop.permute.xlu1 %2700 }
 0x2f5   : > { %11682 = vst [vmem:[#allocation413_spill] sm:$0xff] %v8823_v10  ;;  %2914 = vrot.lane.b32.xlu0 %v11440_v18, %s6437_s28 }
 0x2f6   : > { %2976 = vrot.lane.b32.xlu1 %v11505_v14, %s6437_s28 }
 0x2f7   : > { %v8829_v46 = vpop.permute.xlu0 %2706 }
 0x2f8   : > { %11683 = vst [vmem:[#allocation414_spill] sm:$0xff] %v8829_v46  ;;  %v8831_v6 = vpop.permute.xlu1 %2704 }
 0x2f9   : > { %11684 = vst [vmem:[#allocation415_spill] sm:$0xff] %v8831_v6  ;;  %3040 = vrot.lane.b32.xlu0 %v11570_v61, %s6438_s29 }
 0x2fa   : > { %2978 = vrot.lane.b32.xlu1 %v11504_v38, %s6437_s28 }
 0x2fb   : > { %v8837_v59 = vpop.permute.xlu0 %2710 }
 0x2fc   : > { %11685 = vst [vmem:[#allocation416_spill] sm:$0xff] %v8837_v59  ;;  %v8839_v27 = vpop.permute.xlu1 %2708 }
 0x2fd   : > { %11686 = vst [vmem:[#allocation417_spill] sm:$0xff] %v8839_v27  ;;  %3042 = vrot.lane.b32.xlu0 %v11569_v34, %s6438_s29 }
 0x2fe   : > { %3104 = vrot.lane.b32.xlu1 %v11634_v20, %s6438_s29 }
 0x2ff   : > { %v8845_v18 = vpop.permute.xlu0 %2714 }
 0x300   : > { %v8847_v14 = vpop.permute.xlu1 %2712 }
 0x301   : > { %2788 = vrot.lane.b32.xlu0 %v6608_v51, %s6435_s25 }
 0x302   : > { %3106 = vrot.lane.b32.xlu1 %v11633_v36, %s6438_s29 }
 0x303   : > { %v8853_v38 = vpop.permute.xlu0 %2718 }
 0x304   : > { %v8855_v61 = vpop.permute.xlu1 %2716 }
 0x305   : > { %2790 = vrot.lane.b32.xlu0 %v6614_v13, %s6435_s25 }
 0x306   : > { %2852 = vrot.lane.b32.xlu1 %v11390_v62, %s6435_s25 }
 0x307   : > { %v8861_v20 = vpop.permute.xlu0 %2722 }
 0x308   : > { %v8863_v34 = vpop.permute.xlu1 %2720 }
 0x309   : > { %2916 = vrot.lane.b32.xlu0 %v11445_v45, %s6437_s28 }
 0x30a   : > { %2854 = vrot.lane.b32.xlu1 %v11389_v37, %s6435_s25 }
 0x30b   : > { %v8869_v36 = vpop.permute.xlu0 %2726 }
 0x30c   : > { %v8871_v59 = vpop.permute.xlu1 %2724 }
 0x30d   : > { %2918 = vrot.lane.b32.xlu0 %v11444_v3, %s6437_s28 }
 0x30e   : > { %2980 = vrot.lane.b32.xlu1 %v11509_v53, %s6437_s28 }
 0x30f   : > { %v8877_v27 = vpop.permute.xlu0 %2730 }
 0x310   : > { %v8879_v46 = vpop.permute.xlu1 %2728 }
 0x311   : > { %3044 = vrot.lane.b32.xlu0 %v11574_v32, %s6438_s29 }
 0x312   : > { %2982 = vrot.lane.b32.xlu1 %v11508_v11, %s6437_s28 }
 0x313   : > { %v8885_v45 = vpop.permute.xlu0 %2734 }
 0x314   : > { %11687 = vst [vmem:[#allocation418_spill] sm:$0xff] %v8885_v45  ;;  %v8887_v6 = vpop.permute.xlu1 %2732  ;;  %v11723_v45 = vld [vmem:[#allocation376_spill] sm:$0xff] }
 0x315   : > { %3046 = vrot.lane.b32.xlu0 %v11573_v19, %s6438_s29 }
 0x316   : > { %3108 = vrot.lane.b32.xlu1 %v11638_v29, %s6438_s29 }
 0x317   : > { %v8893_v3 = vpop.permute.xlu0 %2738 }
 0x318   : > { %11688 = vst [vmem:[#allocation419_spill] sm:$0xff] %v8893_v3  ;;  %v8895_v53 = vpop.permute.xlu1 %2736 }
 0x319   : > { %11689 = vst [vmem:[#allocation420_spill] sm:$0xff] %v8895_v53  ;;  %2792 = vrot.lane.b32.xlu0 %v6638_v44, %s6435_s25  ;;  %v11722_v44 = vld [vmem:[#allocation351_spill] sm:$0xff] }
 0x31a   : > { %3110 = vrot.lane.b32.xlu1 %v11637_v17, %s6438_s29 }
 0x31b   : > { %v8901_v11 = vpop.permute.xlu0 %2742 }
 0x31c   : > { %11690 = vst [vmem:[#allocation421_spill] sm:$0xff] %v8901_v11  ;;  %v8903_v32 = vpop.permute.xlu1 %2740  ;;  %v11710_v11 = vld [vmem:[#allocation97_spill] sm:$0xff] }
 0x31d   : > { %11691 = vst [vmem:[#allocation422_spill] sm:$0xff] %v8903_v32  ;;  %2794 = vrot.lane.b32.xlu0 %v6649_v0, %s6435_s25 }
 0x31e   : > { %2856 = vrot.lane.b32.xlu1 %v11393_v35, %s6435_s25  ;;  %v11716_v35 = vld [vmem:[#allocation59_spill] sm:$0xff] }
 0x31f   : > { %v8909_v29 = vpop.permute.xlu0 %2746 }
 0x320   : > { %11692 = vst [vmem:[#allocation423_spill] sm:$0xff] %v8909_v29  ;;  %v8911_v19 = vpop.permute.xlu1 %2744 }
 0x321   : > { %11693 = vst [vmem:[#allocation424_spill] sm:$0xff] %v8911_v19  ;;  %2920 = vrot.lane.b32.xlu0 %v11449_v23, %s6437_s28  ;;  %v11700_v23 = vld [vmem:[#allocation108_spill] sm:$0xff] }
 0x322   : > { %2858 = vrot.lane.b32.xlu1 %v7103_v54, %s6435_s25  ;;  %v11712_v54 = vld [vmem:[#allocation352_spill] sm:$0xff] }
 0x323   : > { %v8917_v17 = vpop.permute.xlu0 %2750 }
 0x324   : > { %11694 = vst [vmem:[#allocation425_spill] sm:$0xff] %v8917_v17  ;;  %v8919_v10 = vpop.permute.xlu1 %2748 }
 0x325   : > { %11695 = vst [vmem:[#allocation426_spill] sm:$0xff] %v8919_v10  ;;  %2922 = vrot.lane.b32.xlu0 %v11448_v4, %s6437_s28  ;;  %v11702_v10 = vld [vmem:[#allocation181_spill] sm:$0xff] }
 0x326   : > { %2984 = vrot.lane.b32.xlu1 %v11696_v24, %s6437_s28  ;;  %v11703_v4 = vld [vmem:[#allocation109_spill] sm:$0xff] }
 0x327   : > { %v8925_v25 = vpop.permute.xlu0 %2754 }
 0x328   : > { %11697 = vst [vmem:[#allocation99_spill] sm:$0xff] %v8925_v25  ;;  %v8927_v2 = vpop.permute.xlu1 %2752  ;;  %v11704_v25 = vld [vmem:[#allocation21_spill] sm:$0xff] }
 0x329   : > { %11698 = vst [vmem:[#allocation427_spill] sm:$0xff] %v8927_v2  ;;  %3048 = vrot.lane.b32.xlu0 %v11699_v58, %s6438_s29  ;;  %v11705_v2 = vld [vmem:[#allocation218_spill] sm:$0xff]  ;;  %v11706_v58 = vld [vmem:[#allocation239_spill] sm:$0xff] }
 0x32a   : > { %2986 = vrot.lane.b32.xlu1 %v11700_v23, %s6437_s28  ;;  %v6342_v19 = vunpack.i.l.bf16 %v11706_v58  ;;  %v6343_v32 = vunpack.i.h.bf16 %v11706_v58  ;;  %v11715_v58 = vld [vmem:[#allocation183_spill] sm:$0xff] }
 0x32b   : > { %v2777_v16 = vpop.permute.xlu0 %2776 }
 0x32c   : > { %v8933_v17 = vpop.permute.xlu1 %2756 }
 0x32d   : > { %11701 = vst [vmem:[#allocation182_spill] sm:$0xff] %v8933_v17  ;;  %3050 = vrot.lane.b32.xlu0 %v11702_v10, %s6438_s29  ;;  %v11707_v17 = vld [vmem:[#allocation92_spill] sm:$0xff] }
 0x32e   : > { %3112 = vrot.lane.b32.xlu1 %v11703_v4, %s6438_s29  ;;  %v3162_v10 = vsel %vm3160_vm8, %v11708_v5, %v11707_v17  ;;  %v11709_v4 = vld [vmem:[#allocation20_spill] sm:$0xff]  ;;  %v11713_v5 = vld [vmem:[#allocation86_spill] sm:$0xff] }
 0x32f   : > { %v2779_v24 = vpop.permute.xlu0 %2778 }
 0x330   : > { %v2841_v29 = vpop.permute.xlu1 %2840 }
 0x331   : > { %2796 = vrot.lane.b32.xlu0 %v11704_v25, %s6435_s25 }
 0x332   : > { %3114 = vrot.lane.b32.xlu1 %v11705_v2, %s6438_s29  ;;  %v3291_v2 = vsel %vm3289_vm7, %v3162_v10, %v6342_v19  ;;  %v3226_v19 = vsel %vm3160_vm8, %v11716_v35, %v11715_v58  ;;  %v11717_v10 = vld [vmem:[#allocation25_spill] sm:$0xff]  ;;  %v11721_v35 = vld [vmem:[#allocation327_spill] sm:$0xff] }
 0x333   : > { %v2905_v23 = vpop.permute.xlu0 %2904  ;;  %v3420_v25 = vsel %vm3418_vm9, %v3291_v2, %v11711_v43  ;;  %v11718_v2 = vld [vmem:[#allocation96_spill] sm:$0xff] }
 0x334   : > { %v2843_v63 = vpop.permute.xlu1 %2842  ;;  %v3549_v17 = vsel %vm3547_vm10, %v3420_v25, %v11712_v54  ;;  %v11719_v54 = vld [vmem:[#allocation276_spill] sm:$0xff] }
 0x335   : > { %2798 = vrot.lane.b32.xlu0 %v11709_v4, %s6435_s25  ;;  %v11714_v4 = vld [vmem:[#allocation2_spill] sm:$0xff]  ;;  %v3678_v43 = vsel %vm3676_vm12, %v3549_v17, %v8719_v21  ;;  %v3355_v25 = vsel %vm3289_vm7, %v3226_v19, %v11719_v54 }
 0x336   : > { %2860 = vrot.lane.b32.xlu1 %v11710_v11, %s6435_s25  ;;  %v3164_v11 = vsel %vm3160_vm8, %v11714_v4, %v11713_v5  ;;  %v3807_v5 = vsel %vm3805_vm11, %v3678_v43, %v2777_v16  ;;  %v11720_v4 = vld [vmem:[#allocation305_spill] sm:$0xff]  ;;  %v3484_v21 = vsel %vm3418_vm9, %v3355_v25, %v11721_v35  ;;  %v11724_v16 = vld [vmem:[#allocation190_spill] sm:$0xff]  ;;  %v11728_v25 = vld [vmem:[#allocation104_spill] sm:$0xff] }
 0x337   : > { %v2907_v3 = vpop.permute.xlu0 %2906  ;;  %v3293_v30 = vsel %vm3289_vm7, %v3164_v11, %v6343_v32  ;;  %v3936_v17 = vsel %vm3934_vm13, %v3807_v5, %v2905_v23  ;;  %v3613_v19 = vsel %vm3547_vm10, %v3484_v21, %v11723_v45  ;;  %v11725_v32 = vld [vmem:[#allocation61_spill] sm:$0xff]  ;;  %v11726_v23 = vld [vmem:[#allocation31_spill] sm:$0xff]  ;;  %v11729_v5 = vld [vmem:[#allocation326_spill] sm:$0xff] }
 0x338   : > { %v2969_v53 = vpop.permute.xlu1 %2968  ;;  %v3422_v58 = vsel %vm3418_vm9, %v3293_v30, %v11720_v4  ;;  %v3228_v43 = vsel %vm3160_vm8, %v11725_v32, %v11724_v16  ;;  %v3742_v35 = vsel %vm3676_vm12, %v3613_v19, %v8847_v14 }
 0x339   : > { %2924 = vrot.lane.b32.xlu0 %v11717_v10, %s6437_s28  ;;  %v3871_v54 = vsel %vm3805_vm11, %v3742_v35, %v2841_v29 }
 0x33a   : > { %2862 = vrot.lane.b32.xlu1 %v11718_v2, %s6435_s25  ;;  %v3551_v2 = vsel %vm3547_vm10, %v3422_v58, %v11722_v44  ;;  %v11727_v44 = vld [vmem:[#allocation275_spill] sm:$0xff] }
 0x33b   : > { %v3033_v10 = vpop.permute.xlu0 %3032  ;;  %v3680_v30 = vsel %vm3676_vm12, %v3551_v2, %v8717_v42  ;;  %v3357_v45 = vsel %vm3289_vm7, %v3228_v43, %v11727_v44  ;;  %v4000_v2 = vsel %vm3934_vm13, %v3871_v54, %v2969_v53  ;;  %v11732_v53 = vld [vmem:[#allocation116_spill] sm:$0xff] }
 0x33c   : > { %v2971_v0 = vpop.permute.xlu1 %2970  ;;  %v4065_v11 = vsel %vm4063_vm14, %v3936_v17, %v3033_v10  ;;  %v3809_v4 = vsel %vm3805_vm11, %v3680_v30, %v2779_v24  ;;  %v3486_v42 = vsel %vm3418_vm9, %v3357_v45, %v11729_v5  ;;  %v11730_v17 = vld [vmem:[#allocation375_spill] sm:$0xff]  ;;  %v11735_v45 = vld [vmem:[#allocation24_spill] sm:$0xff] }
 0x33d   : > { %2926 = vrot.lane.b32.xlu0 %v11726_v23, %s6437_s28  ;;  %6189 = vmatprep.mubr.msk.bf16.mxu0 %vm4214_vm15, %v4065_v11  ;;  %v3938_v14 = vsel %vm3934_vm13, %v3809_v4, %v2907_v3  ;;  %v3615_v10 = vsel %vm3547_vm10, %v3486_v42, %v11730_v17  ;;  %v11731_v11 = vld [vmem:[#allocation186_spill] sm:$0xff]  ;;  %v11734_v23 = vld [vmem:[#allocation115_spill] sm:$0xff]  ;;  %v11736_v4 = vld [vmem:[#allocation221_spill] sm:$0xff] }
 0x33e   : > { %2988 = vrot.lane.b32.xlu1 %v11728_v25, %s6437_s28  ;;  %v3744_v29 = vsel %vm3676_vm12, %v3615_v10, %v8845_v18  ;;  %v11733_v18 = vld [vmem:[#allocation185_spill] sm:$0xff]  ;;  %v11737_v25 = vld [vmem:[#allocation102_spill] sm:$0xff]  ;;  %v11738_v5 = vld [vmem:[#allocation7_spill] sm:$0xff] }
 0x33f   : > { %v3035_v58 = vpop.permute.xlu0 %3034  ;;  %v3873_v3 = vsel %vm3805_vm11, %v3744_v29, %v2843_v63  ;;  %v3166_v42 = vsel %vm3160_vm8, %v11738_v5, %v11737_v25  ;;  %v11742_v17 = vld [vmem:[#allocation308_spill] sm:$0xff]  ;;  %v11743_v29 = vld [vmem:[#allocation354_spill] sm:$0xff]  ;;  %v11749_v25 = vld [vmem:[#allocation243_spill] sm:$0xff] }
 0x340   : > { %v3097_v21 = vpop.permute.xlu1 %3096  ;;  %v4067_v19 = vsel %vm4063_vm14, %v3938_v14, %v3035_v58  ;;  %v4002_v16 = vsel %vm3934_vm13, %v3873_v3, %v2971_v0  ;;  %v11739_v14 = vld [vmem:[#allocation26_spill] sm:$0xff] }
 0x341   : > { %v4129_v24 = vsel %vm4063_vm14, %v4000_v2, %v3097_v21  ;;  %3052 = vrot.lane.b32.xlu0 %v11731_v11, %s6438_s29  ;;  %6190 = vmatmul.mubr.msk.bf16.vlgmr.msra.gmra.mrb[0].mxu0 %vm4214_vm15, %v4067_v19  ;;  %v11740_v2 = vld [vmem:[#allocation244_spill] sm:$0xff]  ;;  %v11741_v21 = vld [vmem:[#allocation103_spill] sm:$0xff]  ;;  %v11744_v3 = vld [vmem:[#allocation106_spill] sm:$0xff] }
 0x342   : > { %2990 = vrot.lane.b32.xlu1 %v11732_v53, %s6437_s28  ;;  %6253 = vmatprep.mubr.msk.bf16.mxu1 %vm4214_vm15, %v4129_v24  ;;  %v3295_v58 = vsel %vm3289_vm7, %v3166_v42, %v11740_v2  ;;  %v11745_v53 = vld [vmem:[#allocation8_spill] sm:$0xff]  ;;  %v11750_v42 = vld [vmem:[#allocation278_spill] sm:$0xff] }
 0x343   : > { %v2781_v43 = vpop.permute.xlu0 %2780  ;;  %v3424_v10 = vsel %vm3418_vm9, %v3295_v58, %v11742_v17  ;;  %v11751_v17 = vld [vmem:[#allocation107_spill] sm:$0xff] }
 0x344   : > { %v3099_v30 = vpop.permute.xlu1 %3098  ;;  %v3553_v11 = vsel %vm3547_vm10, %v3424_v10, %v11743_v29  ;;  %v11752_v10 = vld [vmem:[#allocation307_spill] sm:$0xff] }
 0x345   : > { %v4131_v35 = vsel %vm4063_vm14, %v4002_v16, %v3099_v30  ;;  %3054 = vrot.lane.b32.xlu0 %v11733_v18, %s6438_s29  ;;  %v3168_v16 = vsel %vm3160_vm8, %v11745_v53, %v11744_v3  ;;  %v11746_v30 = vld [vmem:[#allocation188_spill] sm:$0xff]  ;;  %v11753_v3 = vld [vmem:[#allocation329_spill] sm:$0xff] }
 0x346   : > { %6254 = vmatmul.mubr.msk.bf16.vlgmr.msra.gmra.mrb[0].mxu1 %vm4214_vm15, %v4131_v35  ;;  %3116 = vrot.lane.b32.xlu1 %v11734_v23, %s6438_s29  ;;  %v11747_v35 = vld [vmem:[#allocation64_spill] sm:$0xff]  ;;  %v3682_v23 = vsel %vm3676_vm12, %v3553_v11, %v8727_v60  ;;  %v3297_v5 = vsel %vm3289_vm7, %v3168_v16, %v11749_v25  ;;  %v11755_v25 = vld [vmem:[#allocation378_spill] sm:$0xff] }
 0x347   : > { %v2783_v63 = vpop.permute.xlu0 %2782  ;;  %v3230_v18 = vsel %vm3160_vm8, %v11747_v35, %v11746_v30  ;;  %v3811_v58 = vsel %vm3805_vm11, %v3682_v23, %v2781_v43  ;;  %v3426_v29 = vsel %vm3418_vm9, %v3297_v5, %v11752_v10  ;;  %v11756_v23 = vld [vmem:[#allocation194_spill] sm:$0xff] }
 0x348   : > { %v2845_v44 = vpop.permute.xlu1 %2844  ;;  %v3359_v2 = vsel %vm3289_vm7, %v3230_v18, %v11750_v42  ;;  %v11757_v42 = vld [vmem:[#allocation65_spill] sm:$0xff] }
 0x349   : > { %2800 = vrot.lane.b32.xlu0 %v11735_v45, %s6435_s25  ;;  %v3488_v60 = vsel %vm3418_vm9, %v3359_v2, %v11753_v3  ;;  %v3232_v35 = vsel %vm3160_vm8, %v11757_v42, %v11756_v23  ;;  %v11758_v2 = vld [vmem:[#allocation35_spill] sm:$0xff] }
 0x34a   : > { %3118 = vrot.lane.b32.xlu1 %v11736_v4, %s6438_s29  ;;  %v11748_v4 = vld [vmem:[#allocation30_spill] sm:$0xff]  ;;  %v3617_v18 = vsel %vm3547_vm10, %v3488_v60, %v11755_v25  ;;  %v11760_v60 = vld [vmem:[#allocation113_spill] sm:$0xff] }
 0x34b   : > { %v2909_v0 = vpop.permute.xlu0 %2908  ;;  %v11762_v25 = vld [vmem:[#allocation377_spill] sm:$0xff] }
 0x34c   : > { %v2847_v54 = vpop.permute.xlu1 %2846  ;;  %v3940_v11 = vsel %vm3934_vm13, %v3811_v58, %v2909_v0  ;;  %v3746_v0 = vsel %vm3676_vm12, %v3617_v18, %v8855_v61  ;;  %v11759_v58 = vld [vmem:[#allocation277_spill] sm:$0xff] }
 0x34d   : > { %2802 = vrot.lane.b32.xlu0 %v11739_v14, %s6435_s25  ;;  %v3361_v10 = vsel %vm3289_vm7, %v3232_v35, %v11759_v58  ;;  %v3875_v3 = vsel %vm3805_vm11, %v3746_v0, %v2845_v44  ;;  %v11766_v58 = vld [vmem:[#allocation122_spill] sm:$0xff] }
 0x34e   : > { %2864 = vrot.lane.b32.xlu1 %v11741_v21, %s6435_s25 }
 0x34f   : > { %v2911_v19 = vpop.permute.xlu0 %2910 }
 0x350   : > { %v2973_v24 = vpop.permute.xlu1 %2972 }
 0x351   : > { %2928 = vrot.lane.b32.xlu0 %v11748_v4, %s6437_s28  ;;  %v11754_v4 = vld [vmem:[#allocation353_spill] sm:$0xff] }
 0x352   : > { %2866 = vrot.lane.b32.xlu1 %v11751_v17, %s6435_s25  ;;  %v3555_v16 = vsel %vm3547_vm10, %v3426_v29, %v11754_v4 }
 0x353   : > { %v3037_v53 = vpop.permute.xlu0 %3036  ;;  %v3684_v5 = vsel %vm3676_vm12, %v3555_v16, %v8725_v49 }
 0x354   : > { %v2975_v30 = vpop.permute.xlu1 %2974  ;;  %v4069_v43 = vsel %vm4063_vm14, %v3940_v11, %v3037_v53  ;;  %v3813_v29 = vsel %vm3805_vm11, %v3684_v5, %v2783_v63  ;;  %v11761_v11 = vld [vmem:[#allocation328_spill] sm:$0xff]  ;;  %v4004_v53 = vsel %vm3934_vm13, %v3875_v3, %v2973_v24  ;;  %v11764_v24 = vld [vmem:[#allocation123_spill] sm:$0xff] }
 0x355   : > { %2930 = vrot.lane.b32.xlu0 %v11758_v2, %s6437_s28  ;;  %6193 = vmatprep.mubr.msk.bf16.mxu0 %vm4214_vm15, %v4069_v43  ;;  %v3490_v49 = vsel %vm3418_vm9, %v3361_v10, %v11761_v11  ;;  %v3942_v61 = vsel %vm3934_vm13, %v3813_v29, %v2911_v19  ;;  %v11763_v43 = vld [vmem:[#allocation189_spill] sm:$0xff]  ;;  %v11767_v29 = vld [vmem:[#allocation28_spill] sm:$0xff]  ;;  %v11768_v3 = vld [vmem:[#allocation223_spill] sm:$0xff] }
 0x356   : > { %2992 = vrot.lane.b32.xlu1 %v11760_v60, %s6437_s28  ;;  %v3619_v18 = vsel %vm3547_vm10, %v3490_v49, %v11762_v25  ;;  %v11769_v11 = vld [vmem:[#allocation98_spill] sm:$0xff]  ;;  %v11773_v25 = vld [vmem:[#allocation311_spill] sm:$0xff] }
 0x357   : > { %v3039_v4 = vpop.permute.xlu0 %3038  ;;  %v3748_v44 = vsel %vm3676_vm12, %v3619_v18, %v8853_v38  ;;  %v11765_v38 = vld [vmem:[#allocation187_spill] sm:$0xff]  ;;  %v3170_v49 = vsel %vm3160_vm8, %v6523_v41, %v11769_v11 }
 0x358   : > { %v3101_v16 = vpop.permute.xlu1 %3100  ;;  %v4071_v35 = vsel %vm4063_vm14, %v3942_v61, %v3039_v4  ;;  %v3877_v19 = vsel %vm3805_vm11, %v3748_v44, %v2847_v54  ;;  %v11770_v61 = vld [vmem:[#allocation29_spill] sm:$0xff]  ;;  %v11774_v44 = vld [vmem:[#allocation358_spill] sm:$0xff] }
 0x359   : > { %v4133_v63 = vsel %vm4063_vm14, %v4004_v53, %v3101_v16  ;;  %3056 = vrot.lane.b32.xlu0 %v11763_v43, %s6438_s29  ;;  %6194 = vmatmul.mubr.msk.bf16.gmra.mrb[4].mxu0 %vm4214_vm15, %v4071_v35  ;;  %v4006_v23 = vsel %vm3934_vm13, %v3877_v19, %v2975_v30  ;;  %v11771_v53 = vld [vmem:[#allocation248_spill] sm:$0xff]  ;;  %v11772_v16 = vld [vmem:[#allocation110_spill] sm:$0xff]  ;;  %v11775_v19 = vld [vmem:[#allocation111_spill] sm:$0xff] }
 0x35a   : > { %2994 = vrot.lane.b32.xlu1 %v11764_v24, %s6437_s28  ;;  %6257 = vmatprep.mubr.msk.bf16.mxu1 %vm4214_vm15, %v4133_v63  ;;  %v3299_v4 = vsel %vm3289_vm7, %v3170_v49, %v11771_v53  ;;  %v3172_v41 = vsel %vm3160_vm8, %v6519_v40, %v11775_v19  ;;  %v11776_v24 = vld [vmem:[#allocation193_spill] sm:$0xff]  ;;  %v11780_v40 = vld [vmem:[#allocation112_spill] sm:$0xff]  ;;  %v11781_v53 = vld [vmem:[#allocation310_spill] sm:$0xff] }
 0x35b   : > { %v2785_v5 = vpop.permute.xlu0 %2784  ;;  %v3428_v18 = vsel %vm3418_vm9, %v3299_v4, %v11773_v25  ;;  %v11782_v4 = vld [vmem:[#allocation331_spill] sm:$0xff] }
 0x35c   : > { %v3103_v0 = vpop.permute.xlu1 %3102  ;;  %v3557_v43 = vsel %vm3547_vm10, %v3428_v18, %v11774_v44 }
 0x35d   : > { %v4135_v2 = vsel %vm4063_vm14, %v4006_v23, %v3103_v0  ;;  %3058 = vrot.lane.b32.xlu0 %v11765_v38, %s6438_s29  ;;  %v3234_v23 = vsel %vm3160_vm8, %v11267_v15, %v11776_v24  ;;  %v3686_v0 = vsel %vm3676_vm12, %v3557_v43, %v8735_v31  ;;  %v11778_v38 = vld [vmem:[#allocation247_spill] sm:$0xff]  ;;  %v11783_v43 = vld [vmem:[#allocation357_spill] sm:$0xff] }
 0x35e   : > { %6258 = vmatmul.mubr.msk.bf16.gmra.mrb[4].mxu1 %vm4214_vm15, %v4135_v2  ;;  %3120 = vrot.lane.b32.xlu1 %v11766_v58, %s6438_s29  ;;  %v11777_v2 = vld [vmem:[#allocation33_spill] sm:$0xff]  ;;  %v3301_v58 = vsel %vm3289_vm7, %v3172_v41, %v11778_v38  ;;  %v3815_v49 = vsel %vm3805_vm11, %v3686_v0, %v2785_v5  ;;  %v11784_v41 = vld [vmem:[#allocation380_spill] sm:$0xff]  ;;  %v11786_v38 = vld [vmem:[#allocation39_spill] sm:$0xff] }
 0x35f   : > { %v2787_v54 = vpop.permute.xlu0 %2786  ;;  %v3430_v15 = vsel %vm3418_vm9, %v3301_v58, %v11781_v53  ;;  %v11787_v58 = vld [vmem:[#allocation279_spill] sm:$0xff]  ;;  %v11789_v53 = vld [vmem:[#allocation330_spill] sm:$0xff] }
 0x360   : > { %v2849_v10 = vpop.permute.xlu1 %2848  ;;  %v3559_v19 = vsel %vm3547_vm10, %v3430_v15, %v11783_v43 }
 0x361   : > { %2804 = vrot.lane.b32.xlu0 %v11767_v29, %s6435_s25 }
 0x362   : > { %3122 = vrot.lane.b32.xlu1 %v11768_v3, %s6438_s29  ;;  %v11779_v3 = vld [vmem:[#allocation280_spill] sm:$0xff] }
 0x363   : > { %v2913_v30 = vpop.permute.xlu0 %2912  ;;  %v3363_v11 = vsel %vm3289_vm7, %v3234_v23, %v11779_v3  ;;  %v11785_v23 = vld [vmem:[#allocation199_spill] sm:$0xff] }
 0x364   : > { %v2851_v60 = vpop.permute.xlu1 %2850  ;;  %v3492_v31 = vsel %vm3418_vm9, %v3363_v11, %v11782_v4  ;;  %v3944_v25 = vsel %vm3934_vm13, %v3815_v49, %v2913_v30  ;;  %v3236_v0 = vsel %vm3160_vm8, %v11262_v52, %v11785_v23  ;;  %v11788_v52 = vld [vmem:[#allocation119_spill] sm:$0xff] }
 0x365   : > { %2806 = vrot.lane.b32.xlu0 %v11770_v61, %s6435_s25  ;;  %v3621_v24 = vsel %vm3547_vm10, %v3492_v31, %v11784_v41  ;;  %v3365_v3 = vsel %vm3289_vm7, %v3236_v0, %v11787_v58  ;;  %v11794_v0 = vld [vmem:[#allocation130_spill] sm:$0xff] }
 0x366   : > { %2868 = vrot.lane.b32.xlu1 %v11772_v16, %s6435_s25  ;;  %v3750_v30 = vsel %vm3676_vm12, %v3621_v24, %v8863_v34 }
 0x367   : > { %v2915_v35 = vpop.permute.xlu0 %2914  ;;  %v3879_v49 = vsel %vm3805_vm11, %v3750_v30, %v2849_v10  ;;  %v11795_v30 = vld [vmem:[#allocation32_spill] sm:$0xff] }
 0x368   : > { %v2977_v63 = vpop.permute.xlu1 %2976 }
 0x369   : > { %2932 = vrot.lane.b32.xlu0 %v11777_v2, %s6437_s28  ;;  %v3688_v2 = vsel %vm3676_vm12, %v3559_v19, %v8733_v12  ;;  %v3494_v12 = vsel %vm3418_vm9, %v3365_v3, %v11789_v53  ;;  %v4008_v15 = vsel %vm3934_vm13, %v3879_v49, %v2977_v63  ;;  %v11791_v19 = vld [vmem:[#allocation192_spill] sm:$0xff]  ;;  %v11792_v63 = vld [vmem:[#allocation129_spill] sm:$0xff]  ;;  %v11798_v49 = vld [vmem:[#allocation34_spill] sm:$0xff] }
 0x36a   : > { %2870 = vrot.lane.b32.xlu1 %v11780_v40, %s6435_s25  ;;  %v3817_v11 = vsel %vm3805_vm11, %v3688_v2, %v2787_v54  ;;  %v11797_v3 = vld [vmem:[#allocation105_spill] sm:$0xff] }
 0x36b   : > { %v3041_v18 = vpop.permute.xlu0 %3040  ;;  %v3946_v34 = vsel %vm3934_vm13, %v3817_v11, %v2915_v35  ;;  %v3174_v11 = vsel %vm3160_vm8, %v6551_v9, %v11797_v3 }
 0x36c   : > { %v2979_v44 = vpop.permute.xlu1 %2978  ;;  %v4073_v5 = vsel %vm4063_vm14, %v3944_v25, %v3041_v18  ;;  %v11790_v25 = vld [vmem:[#allocation379_spill] sm:$0xff] }
 0x36d   : > { %2934 = vrot.lane.b32.xlu0 %v11786_v38, %s6437_s28  ;;  %6197 = vmatprep.mubr.msk.bf16.mxu0 %vm4214_vm15, %v4073_v5  ;;  %v3623_v18 = vsel %vm3547_vm10, %v3494_v12, %v11790_v25  ;;  %v11796_v38 = vld [vmem:[#allocation225_spill] sm:$0xff]  ;;  %v11800_v12 = vld [vmem:[#allocation118_spill] sm:$0xff]  ;;  %v11802_v25 = vld [vmem:[#allocation360_spill] sm:$0xff] }
 0x36e   : > { %2996 = vrot.lane.b32.xlu1 %v11788_v52, %s6437_s28  ;;  %v3752_v10 = vsel %vm3676_vm12, %v3623_v18, %v8861_v20  ;;  %v11793_v20 = vld [vmem:[#allocation191_spill] sm:$0xff]  ;;  %v11799_v52 = vld [vmem:[#allocation250_spill] sm:$0xff] }
 0x36f   : > { %v3043_v4 = vpop.permute.xlu0 %3042  ;;  %v3881_v35 = vsel %vm3805_vm11, %v3752_v10, %v2851_v60  ;;  %v3303_v53 = vsel %vm3289_vm7, %v3174_v11, %v11799_v52 }
 0x370   : > { %v3105_v31 = vpop.permute.xlu1 %3104  ;;  %v4075_v43 = vsel %vm4063_vm14, %v3946_v34, %v3043_v4  ;;  %v4010_v41 = vsel %vm3934_vm13, %v3881_v35, %v2979_v44  ;;  %v11801_v34 = vld [vmem:[#allocation313_spill] sm:$0xff]  ;;  %v11805_v35 = vld [vmem:[#allocation38_spill] sm:$0xff] }
 0x371   : > { %v4137_v54 = vsel %vm4063_vm14, %v4008_v15, %v3105_v31  ;;  %3060 = vrot.lane.b32.xlu0 %v11791_v19, %s6438_s29  ;;  %6198 = vmatmul.mubr.msk.bf16.gmra.mrb[8].mxu0 %vm4214_vm15, %v4075_v43  ;;  %v3432_v15 = vsel %vm3418_vm9, %v3303_v53, %v11801_v34  ;;  %v11803_v43 = vld [vmem:[#allocation117_spill] sm:$0xff]  ;;  %v11811_v53 = vld [vmem:[#allocation359_spill] sm:$0xff] }
 0x372   : > { %2998 = vrot.lane.b32.xlu1 %v11792_v63, %s6437_s28  ;;  %6261 = vmatprep.mubr.msk.bf16.mxu1 %vm4214_vm15, %v4137_v54  ;;  %v3561_v18 = vsel %vm3547_vm10, %v3432_v15, %v11802_v25  ;;  %v3176_v9 = vsel %vm3160_vm8, %v6547_v8, %v11803_v43  ;;  %v11804_v54 = vld [vmem:[#allocation197_spill] sm:$0xff]  ;;  %v11812_v15 = vld [vmem:[#allocation382_spill] sm:$0xff] }
 0x373   : > { %v2789_v24 = vpop.permute.xlu0 %2788  ;;  %v3238_v10 = vsel %vm3160_vm8, %v11273_v48, %v11804_v54  ;;  %v3690_v19 = vsel %vm3676_vm12, %v3561_v18, %v8743_v1  ;;  %v11806_v63 = vld [vmem:[#allocation249_spill] sm:$0xff]  ;;  %v11813_v18 = vld [vmem:[#allocation202_spill] sm:$0xff]  ;;  %v11814_v54 = vld [vmem:[#allocation43_spill] sm:$0xff] }
 0x374   : > { %v3107_v5 = vpop.permute.xlu1 %3106  ;;  %v11808_v8 = vld [vmem:[#allocation121_spill] sm:$0xff]  ;;  %v3240_v43 = vsel %vm3160_vm8, %v11268_v33, %v11813_v18  ;;  %v11816_v33 = vld [vmem:[#allocation127_spill] sm:$0xff] }
 0x375   : > { %v4139_v23 = vsel %vm4063_vm14, %v4010_v41, %v3107_v5  ;;  %3062 = vrot.lane.b32.xlu0 %v11793_v20, %s6438_s29  ;;  %v3305_v41 = vsel %vm3289_vm7, %v3176_v9, %v11806_v63  ;;  %v11807_v5 = vld [vmem:[#allocation282_spill] sm:$0xff]  ;;  %v3819_v20 = vsel %vm3805_vm11, %v3690_v19, %v2789_v24 }
 0x376   : > { %6262 = vmatmul.mubr.msk.bf16.gmra.mrb[8].mxu1 %vm4214_vm15, %v4139_v23  ;;  %3124 = vrot.lane.b32.xlu1 %v11794_v0, %s6438_s29  ;;  %v3367_v23 = vsel %vm3289_vm7, %v3238_v10, %v11807_v5  ;;  %v11809_v0 = vld [vmem:[#allocation312_spill] sm:$0xff]  ;;  %v11815_v10 = vld [vmem:[#allocation281_spill] sm:$0xff] }
 0x377   : > { %v2791_v60 = vpop.permute.xlu0 %2790  ;;  %v3434_v48 = vsel %vm3418_vm9, %v3305_v41, %v11809_v0  ;;  %v3369_v19 = vsel %vm3289_vm7, %v3240_v43, %v11815_v10  ;;  %v11817_v41 = vld [vmem:[#allocation332_spill] sm:$0xff]  ;;  %v11818_v0 = vld [vmem:[#allocation381_spill] sm:$0xff]  ;;  %v11824_v43 = vld [vmem:[#allocation114_spill] sm:$0xff] }
 0x378   : > { %v2853_v2 = vpop.permute.xlu1 %2852  ;;  %v3563_v34 = vsel %vm3547_vm10, %v3434_v48, %v11811_v53  ;;  %v11827_v10 = vld [vmem:[#allocation126_spill] sm:$0xff] }
 0x379   : > { %2808 = vrot.lane.b32.xlu0 %v11795_v30, %s6435_s25  ;;  %v3692_v9 = vsel %vm3676_vm12, %v3563_v34, %v8741_v39  ;;  %v3498_v39 = vsel %vm3418_vm9, %v3369_v19, %v11817_v41  ;;  %v11828_v19 = vld [vmem:[#allocation10_spill] sm:$0xff]  ;;  %v11829_v41 = vld [vmem:[#allocation165_spill] sm:$0xff] }
 0x37a   : > { %3126 = vrot.lane.b32.xlu1 %v11796_v38, %s6438_s29  ;;  %v11810_v38 = vld [vmem:[#allocation333_spill] sm:$0xff]  ;;  %v3627_v48 = vsel %vm3547_vm10, %v3498_v39, %v11818_v0 }
 0x37b   : > { %v2917_v44 = vpop.permute.xlu0 %2916  ;;  %v3496_v1 = vsel %vm3418_vm9, %v3367_v23, %v11810_v38  ;;  %v11832_v0 = vld [vmem:[#allocation41_spill] sm:$0xff] }
 0x37c   : > { %v2855_v58 = vpop.permute.xlu1 %2854  ;;  %v3948_v3 = vsel %vm3934_vm13, %v3819_v20, %v2917_v44  ;;  %v3625_v25 = vsel %vm3547_vm10, %v3496_v1, %v11812_v15  ;;  %v11819_v1 = vld [vmem:[#allocation196_spill] sm:$0xff] }
 0x37d   : > { %2810 = vrot.lane.b32.xlu0 %v11798_v49, %s6435_s25  ;;  %v3754_v44 = vsel %vm3676_vm12, %v3625_v25, %v8871_v59  ;;  %v11822_v25 = vld [vmem:[#allocation37_spill] sm:$0xff] }
 0x37e   : > { %2872 = vrot.lane.b32.xlu1 %v11800_v12, %s6435_s25  ;;  %v3883_v63 = vsel %vm3805_vm11, %v3754_v44, %v2853_v2  ;;  %v3756_v2 = vsel %vm3676_vm12, %v3627_v48, %v8869_v36  ;;  %v11821_v36 = vld [vmem:[#allocation195_spill] sm:$0xff]  ;;  %v11825_v44 = vld [vmem:[#allocation36_spill] sm:$0xff] }
 0x37f   : > { %v2919_v4 = vpop.permute.xlu0 %2918  ;;  %v11833_v48 = vld [vmem:[#allocation251_spill] sm:$0xff] }
 0x380   : > { %v2981_v31 = vpop.permute.xlu1 %2980 }
 0x381   : > { %2936 = vrot.lane.b32.xlu0 %v11805_v35, %s6437_s28  ;;  %v3821_v35 = vsel %vm3805_vm11, %v3692_v9, %v2791_v60  ;;  %v4012_v5 = vsel %vm3934_vm13, %v3883_v63, %v2981_v31  ;;  %v11820_v31 = vld [vmem:[#allocation136_spill] sm:$0xff]  ;;  %v3178_v9 = vsel %vm3160_vm8, %v6583_v26, %v11824_v43 }
 0x382   : > { %2874 = vrot.lane.b32.xlu1 %v11808_v8, %s6435_s25  ;;  %v3950_v59 = vsel %vm3934_vm13, %v3821_v35, %v2919_v4  ;;  %v3885_v4 = vsel %vm3805_vm11, %v3756_v2, %v2855_v58  ;;  %v11839_v43 = vld [vmem:[#allocation384_spill] sm:$0xff] }
 0x383   : > { %v3045_v11 = vpop.permute.xlu0 %3044 }
 0x384   : > { %v2983_v52 = vpop.permute.xlu1 %2982  ;;  %v4077_v24 = vsel %vm4063_vm14, %v3948_v3, %v3045_v11 }
 0x385   : > { %2938 = vrot.lane.b32.xlu0 %v11814_v54, %s6437_s28  ;;  %6201 = vmatprep.mubr.msk.bf16.mxu0 %vm4214_vm15, %v4077_v24  ;;  %v4014_v3 = vsel %vm3934_vm13, %v3885_v4, %v2983_v52  ;;  %v11823_v24 = vld [vmem:[#allocation228_spill] sm:$0xff]  ;;  %v11836_v4 = vld [vmem:[#allocation11_spill] sm:$0xff] }
 0x386   : > { %3000 = vrot.lane.b32.xlu1 %v11816_v33, %s6437_s28  ;;  %v11826_v54 = vld [vmem:[#allocation252_spill] sm:$0xff] }
 0x387   : > { %v3047_v23 = vpop.permute.xlu0 %3046 }
 0x388   : > { %v3109_v20 = vpop.permute.xlu1 %3108  ;;  %v4079_v38 = vsel %vm4063_vm14, %v3950_v59, %v3047_v23  ;;  %v11830_v59 = vld [vmem:[#allocation124_spill] sm:$0xff] }
 0x389   : > { %v4141_v60 = vsel %vm4063_vm14, %v4012_v5, %v3109_v20  ;;  %3064 = vrot.lane.b32.xlu0 %v11819_v1, %s6438_s29  ;;  %6202 = vmatmul.mubr.msk.bf16.gmra.mrb[12].mxu0 %vm4214_vm15, %v4079_v38  ;;  %v3180_v26 = vsel %vm3160_vm8, %v6593_v50, %v11830_v59  ;;  %v11831_v5 = vld [vmem:[#allocation201_spill] sm:$0xff] }
 0x38a   : > { %3002 = vrot.lane.b32.xlu1 %v11820_v31, %s6437_s28  ;;  %6265 = vmatprep.mubr.msk.bf16.mxu1 %vm4214_vm15, %v4141_v60  ;;  %v3242_v23 = vsel %vm3160_vm8, %v11279_v56, %v11831_v5  ;;  %v3309_v38 = vsel %vm3289_vm7, %v3180_v26, %v11833_v48  ;;  %v11834_v60 = vld [vmem:[#allocation284_spill] sm:$0xff]  ;;  %v11835_v50 = vld [vmem:[#allocation125_spill] sm:$0xff]  ;;  %v11837_v31 = vld [vmem:[#allocation335_spill] sm:$0xff] }
 0x38b   : > { %v2793_v11 = vpop.permute.xlu0 %2792  ;;  %v3371_v2 = vsel %vm3289_vm7, %v3242_v23, %v11834_v60  ;;  %v3438_v56 = vsel %vm3418_vm9, %v3309_v38, %v11836_v4  ;;  %v11844_v5 = vld [vmem:[#allocation334_spill] sm:$0xff]  ;;  %v11845_v48 = vld [vmem:[#allocation383_spill] sm:$0xff] }
 0x38c   : > { %v3111_v53 = vpop.permute.xlu1 %3110 }
 0x38d   : > { %v4143_v34 = vsel %vm4063_vm14, %v4014_v3, %v3111_v53  ;;  %3066 = vrot.lane.b32.xlu0 %v11821_v36, %s6438_s29  ;;  %v11838_v36 = vld [vmem:[#allocation164_spill] sm:$0xff] }
 0x38e   : > { %6266 = vmatmul.mubr.msk.bf16.gmra.mrb[12].mxu1 %vm4214_vm15, %v4143_v34  ;;  %3128 = vrot.lane.b32.xlu1 %v11658_v7, %s6438_s29  ;;  %v3307_v7 = vsel %vm3289_vm7, %v3178_v9, %v11826_v54  ;;  %v11840_v54 = vld [vmem:[#allocation206_spill] sm:$0xff] }
 0x38f   : > { %v2795_v58 = vpop.permute.xlu0 %2794  ;;  %v3436_v35 = vsel %vm3418_vm9, %v3307_v7, %v11828_v19  ;;  %v3244_v7 = vsel %vm3160_vm8, %v11275_v47, %v11840_v54  ;;  %v11843_v47 = vld [vmem:[#allocation133_spill] sm:$0xff]  ;;  %v11854_v54 = vld [vmem:[#allocation254_spill] sm:$0xff] }
 0x390   : > { %v2857_v15 = vpop.permute.xlu1 %2856  ;;  %v3565_v39 = vsel %vm3547_vm10, %v3436_v35, %v11829_v41  ;;  %v11841_v35 = vld [vmem:[#allocation48_spill] sm:$0xff]  ;;  %v11842_v41 = vld [vmem:[#allocation283_spill] sm:$0xff] }
 0x391   : > { %2812 = vrot.lane.b32.xlu0 %v11822_v25, %s6435_s25  ;;  %v3694_v20 = vsel %vm3676_vm12, %v3565_v39, %v8751_v57  ;;  %v3500_v57 = vsel %vm3418_vm9, %v3371_v2, %v11837_v31  ;;  %v3373_v39 = vsel %vm3289_vm7, %v3244_v7, %v11842_v41  ;;  %v11846_v2 = vld [vmem:[#allocation47_spill] sm:$0xff] }
 0x392   : > { %3130 = vrot.lane.b32.xlu1 %v11823_v24, %s6438_s29  ;;  %v3823_v1 = vsel %vm3805_vm11, %v3694_v20, %v2793_v11  ;;  %v3567_v24 = vsel %vm3547_vm10, %v3438_v56, %v11838_v36  ;;  %v3629_v9 = vsel %vm3547_vm10, %v3500_v57, %v11839_v43  ;;  %v11849_v57 = vld [vmem:[#allocation232_spill] sm:$0xff]  ;;  %v11851_v36 = vld [vmem:[#allocation230_spill] sm:$0xff] }
 0x393   : > { %v2921_v52 = vpop.permute.xlu0 %2920  ;;  %v3696_v19 = vsel %vm3676_vm12, %v3567_v24, %v8749_v55  ;;  %v3502_v55 = vsel %vm3418_vm9, %v3373_v39, %v11844_v5  ;;  %v11852_v43 = vld [vmem:[#allocation120_spill] sm:$0xff] }
 0x394   : > { %v2859_v18 = vpop.permute.xlu1 %2858  ;;  %v3952_v3 = vsel %vm3934_vm13, %v3823_v1, %v2921_v52  ;;  %v3758_v52 = vsel %vm3676_vm12, %v3629_v9, %v8879_v46  ;;  %v3825_v59 = vsel %vm3805_vm11, %v3696_v19, %v2795_v58  ;;  %v3631_v38 = vsel %vm3547_vm10, %v3502_v55, %v11845_v48  ;;  %v11855_v19 = vld [vmem:[#allocation132_spill] sm:$0xff]  ;;  %v11859_v55 = vld [vmem:[#allocation46_spill] sm:$0xff] }
 0x395   : > { %2814 = vrot.lane.b32.xlu0 %v11825_v44, %s6435_s25  ;;  %v3887_v26 = vsel %vm3805_vm11, %v3758_v52, %v2857_v15  ;;  %v3760_v15 = vsel %vm3676_vm12, %v3631_v38, %v8877_v27  ;;  %v11848_v27 = vld [vmem:[#allocation198_spill] sm:$0xff]  ;;  %v3182_v9 = vsel %vm3160_vm8, %v6608_v51, %v11852_v43  ;;  %v11856_v52 = vld [vmem:[#allocation9_spill] sm:$0xff]  ;;  %v11857_v39 = vld [vmem:[#allocation168_spill] sm:$0xff] }
 0x396   : > { %2876 = vrot.lane.b32.xlu1 %v11827_v10, %s6435_s25  ;;  %v3311_v7 = vsel %vm3289_vm7, %v3182_v9, %v11854_v54  ;;  %v11862_v38 = vld [vmem:[#allocation135_spill] sm:$0xff] }
 0x397   : > { %v2923_v63 = vpop.permute.xlu0 %2922 }
 0x398   : > { %v2985_v33 = vpop.permute.xlu1 %2984  ;;  %v3954_v46 = vsel %vm3934_vm13, %v3825_v59, %v2923_v63  ;;  %v3889_v63 = vsel %vm3805_vm11, %v3760_v15, %v2859_v18 }
 0x399   : > { %2940 = vrot.lane.b32.xlu0 %v11832_v0, %s6437_s28  ;;  %v4016_v23 = vsel %vm3934_vm13, %v3887_v26, %v2985_v33  ;;  %v11847_v33 = vld [vmem:[#allocation143_spill] sm:$0xff] }
 0x39a   : > { %2878 = vrot.lane.b32.xlu1 %v11835_v50, %s6435_s25 }
 0x39b   : > { %v3049_v53 = vpop.permute.xlu0 %3048 }
 0x39c   : > { %v2987_v34 = vpop.permute.xlu1 %2986  ;;  %v4081_v11 = vsel %vm4063_vm14, %v3952_v3, %v3049_v53  ;;  %v11850_v53 = vld [vmem:[#allocation40_spill] sm:$0xff] }
 0x39d   : > { %2942 = vrot.lane.b32.xlu0 %v11841_v35, %s6437_s28  ;;  %6205 = vmatprep.mubr.msk.bf16.mxu0 %vm4214_vm15, %v4081_v11  ;;  %v4018_v1 = vsel %vm3934_vm13, %v3889_v63, %v2987_v34  ;;  %v11853_v11 = vld [vmem:[#allocation42_spill] sm:$0xff]  ;;  %v3440_v35 = vsel %vm3418_vm9, %v3311_v7, %v11856_v52  ;;  %v11865_v63 = vld [vmem:[#allocation76_spill] sm:$0xff]  ;;  %v11871_v52 = vld [vmem:[#allocation285_spill] sm:$0xff] }
 0x39e   : > { %3004 = vrot.lane.b32.xlu1 %v11843_v47, %s6437_s28  ;;  %v3569_v59 = vsel %vm3547_vm10, %v3440_v35, %v11857_v39  ;;  %v11858_v47 = vld [vmem:[#allocation131_spill] sm:$0xff]  ;;  %v11870_v7 = vld [vmem:[#allocation140_spill] sm:$0xff] }
 0x39f   : > { %v3051_v20 = vpop.permute.xlu0 %3050  ;;  %v3184_v51 = vsel %vm3160_vm8, %v6614_v13, %v11858_v47  ;;  %v3698_v5 = vsel %vm3676_vm12, %v3569_v59, %v8759_v28  ;;  %v11872_v47 = vld [vmem:[#allocation82_spill] sm:$0xff] }
 0x3a0   : > { %v3113_v0 = vpop.permute.xlu1 %3112  ;;  %v4083_v60 = vsel %vm4063_vm14, %v3954_v46, %v3051_v20  ;;  %v11860_v46 = vld [vmem:[#allocation204_spill] sm:$0xff]  ;;  %v11861_v20 = vld [vmem:[#allocation253_spill] sm:$0xff] }
 0x3a1   : > { %v4145_v58 = vsel %vm4063_vm14, %v4016_v23, %v3113_v0  ;;  %3068 = vrot.lane.b32.xlu0 %v11846_v2, %s6438_s29  ;;  %6206 = vmatmul.mubr.msk.bf16.gmra.mrb[16].mxu0 %vm4214_vm15, %v4083_v60  ;;  %v3246_v23 = vsel %vm3160_vm8, %v11390_v62, %v11860_v46  ;;  %v3313_v0 = vsel %vm3289_vm7, %v3184_v51, %v11861_v20  ;;  %v11863_v60 = vld [vmem:[#allocation286_spill] sm:$0xff]  ;;  %v11874_v46 = vld [vmem:[#allocation52_spill] sm:$0xff]  ;;  %v11876_v20 = vld [vmem:[#allocation149_spill] sm:$0xff] }
 0x3a2   : > { %3006 = vrot.lane.b32.xlu1 %v11847_v33, %s6437_s28  ;;  %6269 = vmatprep.mubr.msk.bf16.mxu1 %vm4214_vm15, %v4145_v58  ;;  %v3375_v13 = vsel %vm3289_vm7, %v3246_v23, %v11863_v60  ;;  %v11864_v58 = vld [vmem:[#allocation13_spill] sm:$0xff]  ;;  %v11866_v33 = vld [vmem:[#allocation167_spill] sm:$0xff] }
 0x3a3   : > { %v2797_v4 = vpop.permute.xlu0 %2796  ;;  %v3442_v28 = vsel %vm3418_vm9, %v3313_v0, %v11864_v58  ;;  %v3504_v62 = vsel %vm3418_vm9, %v3375_v13, %v11865_v63  ;;  %v11877_v13 = vld [vmem:[#allocation200_spill] sm:$0xff]  ;;  %v11879_v63 = vld [vmem:[#allocation233_spill] sm:$0xff] }
 0x3a4   : > { %v3115_v56 = vpop.permute.xlu1 %3114  ;;  %v3827_v48 = vsel %vm3805_vm11, %v3698_v5, %v2797_v4 }
 0x3a5   : > { %v4147_v31 = vsel %vm4063_vm14, %v4018_v1, %v3115_v56  ;;  %3070 = vrot.lane.b32.xlu0 %v11848_v27, %s6438_s29  ;;  %v3571_v1 = vsel %vm3547_vm10, %v3442_v28, %v11866_v33  ;;  %v11878_v28 = vld [vmem:[#allocation234_spill] sm:$0xff]  ;;  %v11880_v33 = vld [vmem:[#allocation128_spill] sm:$0xff] }
 0x3a6   : > { %6270 = vmatmul.mubr.msk.bf16.gmra.mrb[16].mxu1 %vm4214_vm15, %v4147_v31  ;;  %3132 = vrot.lane.b32.xlu1 %v11849_v57, %s6438_s29  ;;  %v11867_v31 = vld [vmem:[#allocation83_spill] sm:$0xff]  ;;  %v3700_v57 = vsel %vm3676_vm12, %v3571_v1, %v8757_v22  ;;  %v11881_v1 = vld [vmem:[#allocation16_spill] sm:$0xff] }
 0x3a7   : > { %v2799_v18 = vpop.permute.xlu0 %2798  ;;  %v3633_v27 = vsel %vm3547_vm10, %v3504_v62, %v11867_v31  ;;  %v11883_v31 = vld [vmem:[#allocation256_spill] sm:$0xff] }
 0x3a8   : > { %v2861_v3 = vpop.permute.xlu1 %2860  ;;  %v3762_v9 = vsel %vm3676_vm12, %v3633_v27, %v8887_v6  ;;  %v3829_v54 = vsel %vm3805_vm11, %v3700_v57, %v2799_v18  ;;  %v11873_v18 = vld [vmem:[#allocation74_spill] sm:$0xff]  ;;  %v11884_v57 = vld [vmem:[#allocation44_spill] sm:$0xff] }
 0x3a9   : > { %2816 = vrot.lane.b32.xlu0 %v11850_v53, %s6435_s25  ;;  %v3891_v35 = vsel %vm3805_vm11, %v3762_v9, %v2861_v3  ;;  %v11886_v9 = vld [vmem:[#allocation172_spill] sm:$0xff] }
 0x3aa   : > { %3134 = vrot.lane.b32.xlu1 %v11851_v36, %s6438_s29  ;;  %v11868_v36 = vld [vmem:[#allocation53_spill] sm:$0xff] }
 0x3ab   : > { %v2925_v34 = vpop.permute.xlu0 %2924 }
 0x3ac   : > { %v2863_v24 = vpop.permute.xlu1 %2862  ;;  %v3956_v15 = vsel %vm3934_vm13, %v3827_v48, %v2925_v34  ;;  %v11869_v34 = vld [vmem:[#allocation209_spill] sm:$0xff] }
 0x3ad   : > { %2818 = vrot.lane.b32.xlu0 %v11853_v11, %s6435_s25  ;;  %v3248_v43 = vsel %vm3160_vm8, %v11389_v37, %v11869_v34 }
 0x3ae   : > { %2880 = vrot.lane.b32.xlu1 %v11855_v19, %s6435_s25  ;;  %v3377_v22 = vsel %vm3289_vm7, %v3248_v43, %v11871_v52  ;;  %v11887_v52 = vld [vmem:[#allocation138_spill] sm:$0xff] }
 0x3af   : > { %v2927_v41 = vpop.permute.xlu0 %2926  ;;  %v3506_v51 = vsel %vm3418_vm9, %v3377_v22, %v11872_v47  ;;  %v11888_v22 = vld [vmem:[#allocation18_spill] sm:$0xff] }
 0x3b0   : > { %v2989_v26 = vpop.permute.xlu1 %2988  ;;  %v3958_v39 = vsel %vm3934_vm13, %v3829_v54, %v2927_v41  ;;  %v11875_v41 = vld [vmem:[#allocation418_spill] sm:$0xff] }
 0x3b1   : > { %2944 = vrot.lane.b32.xlu0 %v11859_v55, %s6437_s28  ;;  %v4020_v37 = vsel %vm3934_vm13, %v3891_v35, %v2989_v26  ;;  %v3635_v55 = vsel %vm3547_vm10, %v3506_v51, %v11873_v18  ;;  %v3188_v35 = vsel %vm3160_vm8, %v11888_v22, %v11887_v52  ;;  %v11890_v47 = vld [vmem:[#allocation142_spill] sm:$0xff]  ;;  %v11891_v51 = vld [vmem:[#allocation208_spill] sm:$0xff] }
 0x3b2   : > { %2882 = vrot.lane.b32.xlu1 %v11862_v38, %s6435_s25  ;;  %v3764_v23 = vsel %vm3676_vm12, %v3635_v55, %v11875_v41  ;;  %v11905_v22 = vld [vmem:[#allocation50_spill] sm:$0xff] }
 0x3b3   : > { %v3053_v2 = vpop.permute.xlu0 %3052  ;;  %v3893_v26 = vsel %vm3805_vm11, %v3764_v23, %v2863_v24  ;;  %v11896_v23 = vld [vmem:[#allocation15_spill] sm:$0xff] }
 0x3b4   : > { %v4085_v4 = vsel %vm4063_vm14, %v3956_v15, %v3053_v2  ;;  %v2991_v56 = vpop.permute.xlu1 %2990 }
 0x3b5   : > { %2946 = vrot.lane.b32.xlu0 %v11868_v36, %s6437_s28  ;;  %6209 = vmatprep.mubr.msk.bf16.mxu0 %vm4214_vm15, %v4085_v4  ;;  %v4022_v48 = vsel %vm3934_vm13, %v3893_v26, %v2991_v56  ;;  %v3186_v4 = vsel %vm3160_vm8, %v11881_v1, %v11880_v33  ;;  %v11882_v56 = vld [vmem:[#allocation139_spill] sm:$0xff]  ;;  %v11885_v36 = vld [vmem:[#allocation12_spill] sm:$0xff] }
 0x3b6   : > { %3008 = vrot.lane.b32.xlu1 %v11870_v7, %s6437_s28  ;;  %v3315_v27 = vsel %vm3289_vm7, %v3186_v4, %v11883_v31  ;;  %v11899_v33 = vld [vmem:[#allocation88_spill] sm:$0xff]  ;;  %v11900_v4 = vld [vmem:[#allocation398_spill] sm:$0xff] }
 0x3b7   : > { %v3055_v59 = vpop.permute.xlu0 %3054  ;;  %v3444_v34 = vsel %vm3418_vm9, %v3315_v27, %v11885_v36  ;;  %v11901_v27 = vld [vmem:[#allocation146_spill] sm:$0xff]  ;;  %v11903_v36 = vld [vmem:[#allocation93_spill] sm:$0xff] }
 0x3b8   : > { %v4087_v6 = vsel %vm4063_vm14, %v3958_v39, %v3055_v59  ;;  %v3117_v5 = vpop.permute.xlu1 %3116  ;;  %v3573_v54 = vsel %vm3547_vm10, %v3444_v34, %v11886_v9  ;;  %v11889_v39 = vld [vmem:[#allocation399_spill] sm:$0xff]  ;;  %v11904_v9 = vld [vmem:[#allocation420_spill] sm:$0xff] }
 0x3b9   : > { %3072 = vrot.lane.b32.xlu0 %v11874_v46, %s6438_s29  ;;  %6210 = vmatmul.mubr.msk.bf16.gmra.mrb[20].mxu0 %vm4214_vm15, %v4087_v6  ;;  %v4149_v3 = vsel %vm4063_vm14, %v4020_v37, %v3117_v5  ;;  %v3702_v59 = vsel %vm3676_vm12, %v3573_v54, %v11889_v39  ;;  %v11892_v37 = vld [vmem:[#allocation90_spill] sm:$0xff]  ;;  %v11893_v5 = vld [vmem:[#allocation255_spill] sm:$0xff]  ;;  %v11894_v46 = vld [vmem:[#allocation45_spill] sm:$0xff] }
 0x3ba   : > { %3010 = vrot.lane.b32.xlu1 %v11876_v20, %s6437_s28  ;;  %6273 = vmatprep.mubr.msk.bf16.mxu1 %vm4214_vm15, %v4149_v3  ;;  %v3250_v6 = vsel %vm3160_vm8, %v11892_v37, %v11891_v51  ;;  %v3317_v18 = vsel %vm3289_vm7, %v3188_v35, %v11893_v5  ;;  %v11895_v3 = vld [vmem:[#allocation288_spill] sm:$0xff]  ;;  %v11906_v35 = vld [vmem:[#allocation287_spill] sm:$0xff] }
 0x3bb   : > { %v2801_v0 = vpop.permute.xlu0 %2800  ;;  %v3379_v41 = vsel %vm3289_vm7, %v3250_v6, %v11895_v3  ;;  %v3446_v20 = vsel %vm3418_vm9, %v3317_v18, %v11896_v23  ;;  %v11907_v6 = vld [vmem:[#allocation89_spill] sm:$0xff]  ;;  %v11909_v23 = vld [vmem:[#allocation156_spill] sm:$0xff] }
 0x3bc   : > { %v3119_v60 = vpop.permute.xlu1 %3118  ;;  %v3831_v55 = vsel %vm3805_vm11, %v3702_v59, %v2801_v0 }
 0x3bd   : > { %3074 = vrot.lane.b32.xlu0 %v11877_v13, %s6438_s29  ;;  %v4151_v58 = vsel %vm4063_vm14, %v4022_v48, %v3119_v60  ;;  %v11897_v60 = vld [vmem:[#allocation80_spill] sm:$0xff] }
 0x3be   : > { %3136 = vrot.lane.b32.xlu1 %v11878_v28, %s6438_s29  ;;  %6274 = vmatmul.mubr.msk.bf16.gmra.mrb[20].mxu1 %vm4214_vm15, %v4151_v58  ;;  %v3508_v13 = vsel %vm3418_vm9, %v3379_v41, %v11897_v60  ;;  %v11898_v58 = vld [vmem:[#allocation171_spill] sm:$0xff] }
 0x3bf   : > { %v2803_v15 = vpop.permute.xlu0 %2802  ;;  %v3575_v28 = vsel %vm3547_vm10, %v3446_v20, %v11898_v58  ;;  %v3637_v1 = vsel %vm3547_vm10, %v3508_v13, %v11899_v33  ;;  %v11912_v58 = vld [vmem:[#allocation238_spill] sm:$0xff] }
 0x3c0   : > { %v2865_v2 = vpop.permute.xlu1 %2864  ;;  %v3704_v31 = vsel %vm3676_vm12, %v3575_v28, %v11900_v4  ;;  %v3766_v54 = vsel %vm3676_vm12, %v3637_v1, %v11904_v9  ;;  %v11914_v4 = vld [vmem:[#allocation237_spill] sm:$0xff] }
 0x3c1   : > { %2758 = vrot.lane.b32.xlu0 %v11879_v63, %s6434_s22  ;;  %v3833_v52 = vsel %vm3805_vm11, %v3704_v31, %v2803_v15  ;;  %v3895_v59 = vsel %vm3805_vm11, %v3766_v54, %v2865_v2  ;;  %v11908_v15 = vld [vmem:[#allocation81_spill] sm:$0xff]  ;;  %v11919_v54 = vld [vmem:[#allocation14_spill] sm:$0xff] }
 0x3c2   : > { %3138 = vrot.lane.b32.xlu1 %v11879_v63, %s6438_s29 }
 0x3c3   : > { %v2929_v24 = vpop.permute.xlu0 %2928 }
 0x3c4   : > { %v2867_v62 = vpop.permute.xlu1 %2866  ;;  %v3960_v26 = vsel %vm3934_vm13, %v3831_v55, %v2929_v24  ;;  %v11902_v24 = vld [vmem:[#allocation71_spill] sm:$0xff] }
 0x3c5   : > { %2884 = vrot.lane.b32.xlu0 %v11882_v56, %s6435_s25  ;;  %v3252_v34 = vsel %vm3160_vm8, %v11903_v36, %v11902_v24  ;;  %v11917_v24 = vld [vmem:[#allocation21_spill] sm:$0xff] }
 0x3c6   : > { %2820 = vrot.lane.b32.xlu1 %v11884_v57, %s6435_s25  ;;  %v3381_v39 = vsel %vm3289_vm7, %v3252_v34, %v11906_v35  ;;  %v11918_v34 = vld [vmem:[#allocation258_spill] sm:$0xff]  ;;  %v11920_v35 = vld [vmem:[#allocation176_spill] sm:$0xff] }
 0x3c7   : > { %v2931_v43 = vpop.permute.xlu0 %2930  ;;  %v3510_v5 = vsel %vm3418_vm9, %v3381_v39, %v11907_v6 }
 0x3c8   : > { %v2993_v7 = vpop.permute.xlu1 %2992  ;;  %v3962_v51 = vsel %vm3934_vm13, %v3833_v52, %v2931_v43  ;;  %v3639_v41 = vsel %vm3547_vm10, %v3510_v5, %v11908_v15  ;;  %v11910_v43 = vld [vmem:[#allocation419_spill] sm:$0xff]  ;;  %v11923_v5 = vld [vmem:[#allocation401_spill] sm:$0xff] }
 0x3c9   : > { %2886 = vrot.lane.b32.xlu0 %v11890_v47, %s6435_s25  ;;  %v4024_v18 = vsel %vm3934_vm13, %v3895_v59, %v2993_v7  ;;  %v3768_v20 = vsel %vm3676_vm12, %v3639_v41, %v11910_v43  ;;  %v11926_v15 = vld [vmem:[#allocation97_spill] sm:$0xff] }
 0x3ca   : > { %2822 = vrot.lane.b32.xlu1 %v11894_v46, %s6435_s25  ;;  %v3897_v7 = vsel %vm3805_vm11, %v3768_v20, %v2867_v62  ;;  %v11915_v62 = vld [vmem:[#allocation58_spill] sm:$0xff]  ;;  %v11928_v20 = vld [vmem:[#allocation49_spill] sm:$0xff] }
 0x3cb   : > { %v3057_v48 = vpop.permute.xlu0 %3056 }
 0x3cc   : > { %v4089_v0 = vsel %vm4063_vm14, %v3960_v26, %v3057_v48  ;;  %v2995_v63 = vpop.permute.xlu1 %2994  ;;  %v11911_v26 = vld [vmem:[#allocation57_spill] sm:$0xff] }
 0x3cd   : > { %3012 = vrot.lane.b32.xlu0 %v11901_v27, %s6437_s28  ;;  %6213 = vmatprep.mubr.msk.bf16.mxu0 %vm4214_vm15, %v4089_v0  ;;  %v4026_v60 = vsel %vm3934_vm13, %v3897_v7, %v2995_v63  ;;  %v11913_v0 = vld [vmem:[#allocation203_spill] sm:$0xff]  ;;  %v11916_v27 = vld [vmem:[#allocation134_spill] sm:$0xff] }
 0x3ce   : > { %2948 = vrot.lane.b32.xlu1 %v11905_v22, %s6437_s28  ;;  %v3190_v36 = vsel %vm3160_vm8, %v11917_v24, %v11916_v27 }
 0x3cf   : > { %v3059_v37 = vpop.permute.xlu0 %3058  ;;  %v3319_v9 = vsel %vm3289_vm7, %v3190_v36, %v11918_v34  ;;  %v11933_v36 = vld [vmem:[#allocation94_spill] sm:$0xff] }
 0x3d0   : > { %v4091_v55 = vsel %vm4063_vm14, %v3962_v51, %v3059_v37  ;;  %v3121_v3 = vpop.permute.xlu1 %3120  ;;  %v3448_v52 = vsel %vm3418_vm9, %v3319_v9, %v11919_v54  ;;  %v11921_v51 = vld [vmem:[#allocation144_spill] sm:$0xff] }
 0x3d1   : > { %3014 = vrot.lane.b32.xlu0 %v11909_v23, %s6437_s28  ;;  %6214 = vmatmul.mubr.msk.bf16.gmra.mrb[24].mxu0 %vm4214_vm15, %v4091_v55  ;;  %v4153_v2 = vsel %vm4063_vm14, %v4024_v18, %v3121_v3  ;;  %v3577_v39 = vsel %vm3547_vm10, %v3448_v52, %v11920_v35  ;;  %v11922_v37 = vld [vmem:[#allocation20_spill] sm:$0xff]  ;;  %v11924_v55 = vld [vmem:[#allocation145_spill] sm:$0xff]  ;;  %v11925_v3 = vld [vmem:[#allocation211_spill] sm:$0xff] }
 0x3d2   : > { %2950 = vrot.lane.b32.xlu1 %v11911_v26, %s6437_s28  ;;  %6277 = vmatprep.mubr.msk.bf16.mxu1 %vm4214_vm15, %v4153_v2  ;;  %v3192_v6 = vsel %vm3160_vm8, %v11922_v37, %v11921_v51  ;;  %v3706_v18 = vsel %vm3676_vm12, %v3577_v39, %v11923_v5  ;;  %v3254_v41 = vsel %vm3160_vm8, %v11926_v15, %v11925_v3  ;;  %v11927_v23 = vld [vmem:[#allocation257_spill] sm:$0xff]  ;;  %v11929_v26 = vld [vmem:[#allocation290_spill] sm:$0xff]  ;;  %v11934_v9 = vld [vmem:[#allocation400_spill] sm:$0xff] }
 0x3d3   : > { %v2805_v48 = vpop.permute.xlu0 %2804  ;;  %v3321_v2 = vsel %vm3289_vm7, %v3192_v6, %v11927_v23  ;;  %v3383_v7 = vsel %vm3289_vm7, %v3254_v41, %v11929_v26  ;;  %v11935_v52 = vld [vmem:[#allocation148_spill] sm:$0xff]  ;;  %v11938_v51 = vld [vmem:[#allocation422_spill] sm:$0xff]  ;;  %v11939_v5 = vld [vmem:[#allocation51_spill] sm:$0xff] }
 0x3d4   : > { %v3123_v13 = vpop.permute.xlu1 %3122  ;;  %v3835_v43 = vsel %vm3805_vm11, %v3706_v18, %v2805_v48  ;;  %v11937_v35 = vld [vmem:[#allocation96_spill] sm:$0xff]  ;;  %v11940_v18 = vld [vmem:[#allocation289_spill] sm:$0xff] }
 0x3d5   : > { %3140 = vrot.lane.b32.xlu0 %v11912_v58, %s6438_s29  ;;  %v4155_v28 = vsel %vm4063_vm14, %v4026_v60, %v3123_v13  ;;  %v11930_v60 = vld [vmem:[#allocation19_spill] sm:$0xff] }
 0x3d6   : > { %3076 = vrot.lane.b32.xlu1 %v11913_v0, %s6438_s29  ;;  %6278 = vmatmul.mubr.msk.bf16.gmra.mrb[24].mxu1 %vm4214_vm15, %v4155_v28  ;;  %v3450_v13 = vsel %vm3418_vm9, %v3321_v2, %v11930_v60  ;;  %v11931_v0 = vld [vmem:[#allocation87_spill] sm:$0xff] }
 0x3d7   : > { %v2807_v33 = vpop.permute.xlu0 %2806  ;;  %v11941_v2 = vld [vmem:[#allocation95_spill] sm:$0xff] }
 0x3d8   : > { %v2869_v1 = vpop.permute.xlu1 %2868 }
 0x3d9   : > { %3142 = vrot.lane.b32.xlu0 %v11914_v4, %s6438_s29 }
 0x3da   : > { %3078 = vrot.lane.b32.xlu1 %v11915_v62, %s6438_s29  ;;  %v11932_v62 = vld [vmem:[#allocation175_spill] sm:$0xff] }
 0x3db   : > { %v2933_v63 = vpop.permute.xlu0 %2932  ;;  %v3579_v27 = vsel %vm3547_vm10, %v3450_v13, %v11932_v62 }
 0x3dc   : > { %v2871_v31 = vpop.permute.xlu1 %2870  ;;  %v3708_v54 = vsel %vm3676_vm12, %v3579_v27, %v11934_v9 }
 0x3dd   : > { %2762 = vrot.lane.b32.xlu0 %v11914_v4, %s6434_s22  ;;  %v3512_v4 = vsel %vm3418_vm9, %v3383_v7, %v11931_v0  ;;  %v3837_v6 = vsel %vm3805_vm11, %v3708_v54, %v2807_v33  ;;  %v11942_v33 = vld [vmem:[#allocation214_spill] sm:$0xff]  ;;  %v11945_v0 = vld [vmem:[#allocation56_spill] sm:$0xff] }
 0x3de   : > { %2760 = vrot.lane.b32.xlu1 %v11912_v58, %s6434_s22  ;;  %v3964_v58 = vsel %vm3934_vm13, %v3835_v43, %v2933_v63  ;;  %v3641_v34 = vsel %vm3547_vm10, %v3512_v4, %v11933_v36  ;;  %v11936_v63 = vld [vmem:[#allocation75_spill] sm:$0xff] }
 0x3df   : > { %v2935_v22 = vpop.permute.xlu0 %2934  ;;  %v3256_v39 = vsel %vm3160_vm8, %v11937_v35, %v11936_v63  ;;  %v3770_v37 = vsel %vm3676_vm12, %v3641_v34, %v11938_v51  ;;  %v11947_v34 = vld [vmem:[#allocation62_spill] sm:$0xff] }
 0x3e0   : > { %v2997_v59 = vpop.permute.xlu1 %2996  ;;  %v3385_v3 = vsel %vm3289_vm7, %v3256_v39, %v11940_v18  ;;  %v3899_v15 = vsel %vm3805_vm11, %v3770_v37, %v2869_v1  ;;  %v3966_v41 = vsel %vm3934_vm13, %v3837_v6, %v2935_v22  ;;  %v11944_v22 = vld [vmem:[#allocation421_spill] sm:$0xff]  ;;  %v11948_v63 = vld [vmem:[#allocation242_spill] sm:$0xff]  ;;  %v11952_v6 = vld [vmem:[#allocation260_spill] sm:$0xff] }
 0x3e1   : > { %2888 = vrot.lane.b32.xlu0 %v11924_v55, %s6435_s25  ;;  %v3514_v43 = vsel %vm3418_vm9, %v3385_v3, %v11941_v2  ;;  %v4028_v26 = vsel %vm3934_vm13, %v3899_v15, %v2997_v59  ;;  %v11950_v39 = vld [vmem:[#allocation141_spill] sm:$0xff]  ;;  %v11955_v2 = vld [vmem:[#allocation179_spill] sm:$0xff] }
 0x3e2   : > { %2824 = vrot.lane.b32.xlu1 %v11928_v20, %s6435_s25  ;;  %v3643_v13 = vsel %vm3547_vm10, %v3514_v43, %v11942_v33  ;;  %v3194_v51 = vsel %vm3160_vm8, %v11735_v45, %v11950_v39  ;;  %v11951_v37 = vld [vmem:[#allocation241_spill] sm:$0xff] }
 0x3e3   : > { %v3061_v28 = vpop.permute.xlu0 %3060  ;;  %v3323_v18 = vsel %vm3289_vm7, %v3194_v51, %v11952_v6  ;;  %v11953_v3 = vld [vmem:[#allocation205_spill] sm:$0xff]  ;;  %v11964_v51 = vld [vmem:[#allocation216_spill] sm:$0xff] }
 0x3e4   : > { %v4093_v48 = vsel %vm4063_vm14, %v3964_v58, %v3061_v28  ;;  %v2999_v24 = vpop.permute.xlu1 %2998  ;;  %v11943_v58 = vld [vmem:[#allocation151_spill] sm:$0xff]  ;;  %v3772_v28 = vsel %vm3676_vm12, %v3643_v13, %v11944_v22  ;;  %v11954_v15 = vld [vmem:[#allocation17_spill] sm:$0xff] }
 0x3e5   : > { %2890 = vrot.lane.b32.xlu0 %v11935_v52, %s6435_s25  ;;  %6217 = vmatprep.mubr.msk.bf16.mxu0 %vm4214_vm15, %v4093_v48  ;;  %v3901_v59 = vsel %vm3805_vm11, %v3772_v28, %v2871_v31  ;;  %v11946_v48 = vld [vmem:[#allocation160_spill] sm:$0xff]  ;;  %v11949_v31 = vld [vmem:[#allocation63_spill] sm:$0xff]  ;;  %v11958_v13 = vld [vmem:[#allocation69_spill] sm:$0xff] }
 0x3e6   : > { %2826 = vrot.lane.b32.xlu1 %v11939_v5, %s6435_s25  ;;  %v4030_v62 = vsel %vm3934_vm13, %v3901_v59, %v2999_v24  ;;  %v11961_v59 = vld [vmem:[#allocation23_spill] sm:$0xff] }
 0x3e7   : > { %v3063_v23 = vpop.permute.xlu0 %3062 }
 0x3e8   : > { %v4095_v7 = vsel %vm4063_vm14, %v3966_v41, %v3063_v23  ;;  %v3125_v60 = vpop.permute.xlu1 %3124  ;;  %v3452_v41 = vsel %vm3418_vm9, %v3323_v18, %v11954_v15  ;;  %v11966_v18 = vld [vmem:[#allocation152_spill] sm:$0xff] }
 0x3e9   : > { %3016 = vrot.lane.b32.xlu0 %v11943_v58, %s6437_s28  ;;  %6218 = vmatmul.mubr.msk.bf16.gmra.mrb[28].mxu0 %vm4214_vm15, %v4095_v7  ;;  %v4157_v1 = vsel %vm4063_vm14, %v4028_v26, %v3125_v60  ;;  %v3581_v43 = vsel %vm3547_vm10, %v3452_v41, %v11955_v2  ;;  %v11956_v7 = vld [vmem:[#allocation150_spill] sm:$0xff]  ;;  %v11957_v60 = vld [vmem:[#allocation403_spill] sm:$0xff]  ;;  %v3258_v58 = vsel %vm3160_vm8, %v11741_v21, %v11958_v13  ;;  %v11968_v15 = vld [vmem:[#allocation424_spill] sm:$0xff] }
 0x3ea   : > { %2952 = vrot.lane.b32.xlu1 %v11945_v0, %s6437_s28  ;;  %6281 = vmatprep.mubr.msk.bf16.mxu1 %vm4214_vm15, %v4157_v1  ;;  %v3196_v45 = vsel %vm3160_vm8, %v11739_v14, %v11956_v7  ;;  %v3710_v33 = vsel %vm3676_vm12, %v3581_v43, %v11957_v60  ;;  %v11959_v1 = vld [vmem:[#allocation259_spill] sm:$0xff]  ;;  %v11960_v0 = vld [vmem:[#allocation84_spill] sm:$0xff]  ;;  %v11970_v7 = vld [vmem:[#allocation85_spill] sm:$0xff] }
 0x3eb   : > { %v2809_v4 = vpop.permute.xlu0 %2808  ;;  %v3325_v22 = vsel %vm3289_vm7, %v3196_v45, %v11959_v1  ;;  %v3387_v14 = vsel %vm3289_vm7, %v3258_v58, %v11960_v0  ;;  %v11969_v43 = vld [vmem:[#allocation55_spill] sm:$0xff]  ;;  %v11971_v58 = vld [vmem:[#allocation100_spill] sm:$0xff] }
 0x3ec   : > { %v3127_v27 = vpop.permute.xlu1 %3126  ;;  %v3839_v28 = vsel %vm3805_vm11, %v3710_v33, %v2809_v4 }
 0x3ed   : > { %3018 = vrot.lane.b32.xlu0 %v11946_v48, %s6437_s28  ;;  %v4159_v36 = vsel %vm4063_vm14, %v4030_v62, %v3127_v27  ;;  %v3454_v62 = vsel %vm3418_vm9, %v3325_v22, %v11961_v59 }
 0x3ee   : > { %2954 = vrot.lane.b32.xlu1 %v11947_v34, %s6437_s28  ;;  %6282 = vmatmul.mubr.msk.bf16.gmra.mrb[28].mxu1 %vm4214_vm15, %v4159_v36  ;;  %v11962_v36 = vld [vmem:[#allocation91_spill] sm:$0xff]  ;;  %v11963_v34 = vld [vmem:[#allocation178_spill] sm:$0xff] }
 0x3ef   : > { %v2811_v9 = vpop.permute.xlu0 %2810  ;;  %v3516_v21 = vsel %vm3418_vm9, %v3387_v14, %v11962_v36  ;;  %v11973_v14 = vld [vmem:[#allocation154_spill] sm:$0xff] }
 0x3f0   : > { %v2873_v54 = vpop.permute.xlu1 %2872 }
 0x3f1   : > { %3144 = vrot.lane.b32.xlu0 %v11948_v63, %s6438_s29 }
 0x3f2   : > { %3080 = vrot.lane.b32.xlu1 %v11949_v31, %s6438_s29  ;;  %v3583_v31 = vsel %vm3547_vm10, %v3454_v62, %v11963_v34  ;;  %v11975_v62 = vld [vmem:[#allocation54_spill] sm:$0xff] }
 0x3f3   : > { %v2937_v24 = vpop.permute.xlu0 %2936 }
 0x3f4   : > { %v2875_v35 = vpop.permute.xlu1 %2874  ;;  %v3968_v27 = vsel %vm3934_vm13, %v3839_v28, %v2937_v24  ;;  %v11967_v24 = vld [vmem:[#allocation213_spill] sm:$0xff] }
 0x3f5   : > { %3146 = vrot.lane.b32.xlu0 %v11951_v37, %s6438_s29 }
 0x3f6   : > { %3082 = vrot.lane.b32.xlu1 %v11953_v3, %s6438_s29  ;;  %v3260_v3 = vsel %vm3160_vm8, %v11751_v17, %v11967_v24 }
 0x3f7   : > { %v2939_v23 = vpop.permute.xlu0 %2938  ;;  %v3389_v45 = vsel %vm3289_vm7, %v3260_v3, %v11970_v7  ;;  %v11981_v3 = vld [vmem:[#allocation246_spill] sm:$0xff] }
 0x3f8   : > { %v3001_v26 = vpop.permute.xlu1 %3000  ;;  %v3518_v1 = vsel %vm3418_vm9, %v3389_v45, %v11971_v58  ;;  %v11984_v7 = vld [vmem:[#allocation22_spill] sm:$0xff] }
 0x3f9   : > { %2766 = vrot.lane.b32.xlu0 %v11951_v37, %s6434_s22  ;;  %v11965_v37 = vld [vmem:[#allocation402_spill] sm:$0xff] }
 0x3fa   : > { %2764 = vrot.lane.b32.xlu1 %v11948_v63, %s6434_s22  ;;  %v3645_v63 = vsel %vm3547_vm10, %v3516_v21, %v11964_v51  ;;  %v3712_v6 = vsel %vm3676_vm12, %v3583_v31, %v11965_v37  ;;  %v11976_v21 = vld [vmem:[#allocation159_spill] sm:$0xff]  ;;  %v11977_v31 = vld [vmem:[#allocation60_spill] sm:$0xff] }
 0x3fb   : > { %v3065_v48 = vpop.permute.xlu0 %3064  ;;  %v3774_v41 = vsel %vm3676_vm12, %v3645_v63, %v11968_v15  ;;  %v3841_v2 = vsel %vm3805_vm11, %v3712_v6, %v2811_v9  ;;  %v11972_v9 = vld [vmem:[#allocation215_spill] sm:$0xff]  ;;  %v11978_v63 = vld [vmem:[#allocation162_spill] sm:$0xff] }
 0x3fc   : > { %v4097_v4 = vsel %vm4063_vm14, %v3968_v27, %v3065_v48  ;;  %v3003_v39 = vpop.permute.xlu1 %3002  ;;  %v3903_v60 = vsel %vm3805_vm11, %v3774_v41, %v2873_v54  ;;  %v3970_v33 = vsel %vm3934_vm13, %v3841_v2, %v2939_v23  ;;  %v3647_v0 = vsel %vm3547_vm10, %v3518_v1, %v11972_v9  ;;  %v11974_v23 = vld [vmem:[#allocation423_spill] sm:$0xff]  ;;  %v11982_v15 = vld [vmem:[#allocation262_spill] sm:$0xff] }
 0x3fd   : > { %2892 = vrot.lane.b32.xlu0 %v11966_v18, %s6435_s25  ;;  %6221 = vmatprep.mubr.msk.bf16.mxu0 %vm4214_vm15, %v4097_v4  ;;  %v4032_v17 = vsel %vm3934_vm13, %v3903_v60, %v3001_v26  ;;  %v3776_v59 = vsel %vm3676_vm12, %v3647_v0, %v11974_v23  ;;  %v11980_v6 = vld [vmem:[#allocation147_spill] sm:$0xff]  ;;  %v11989_v0 = vld [vmem:[#allocation245_spill] sm:$0xff] }
 0x3fe   : > { %2828 = vrot.lane.b32.xlu1 %v11969_v43, %s6435_s25  ;;  %v3905_v26 = vsel %vm3805_vm11, %v3776_v59, %v2875_v35  ;;  %v11979_v35 = vld [vmem:[#allocation68_spill] sm:$0xff]  ;;  %v3198_v24 = vsel %vm3160_vm8, %v11767_v29, %v11980_v6  ;;  %v11983_v2 = vld [vmem:[#allocation67_spill] sm:$0xff]  ;;  %v11991_v59 = vld [vmem:[#allocation261_spill] sm:$0xff] }
 0x3ff   : > { %v3067_v13 = vpop.permute.xlu0 %3066  ;;  %v4034_v48 = vsel %vm3934_vm13, %v3905_v26, %v3003_v39  ;;  %v3327_v41 = vsel %vm3289_vm7, %v3198_v24, %v11982_v15  ;;  %v11986_v1 = vld [vmem:[#allocation155_spill] sm:$0xff]  ;;  %v11997_v15 = vld [vmem:[#allocation337_spill] sm:$0xff] }
 0x400   : > { %v4099_v22 = vsel %vm4063_vm14, %v3970_v33, %v3067_v13  ;;  %v3129_v28 = vpop.permute.xlu1 %3128  ;;  %v3456_v45 = vsel %vm3418_vm9, %v3327_v41, %v11984_v7  ;;  %v11985_v33 = vld [vmem:[#allocation362_spill] sm:$0xff]  ;;  %v3200_v29 = vsel %vm3160_vm8, %v11770_v61, %v11986_v1 }
 0x401   : > { %2894 = vrot.lane.b32.xlu0 %v11973_v14, %s6435_s25  ;;  %6222 = vmatmul.mubr.msk.bf16.gmra.mrb[32].mxu0 %vm4214_vm15, %v4099_v22  ;;  %v4161_v54 = vsel %vm4063_vm14, %v4032_v17, %v3129_v28  ;;  %v3585_v13 = vsel %vm3547_vm10, %v3456_v45, %v11985_v33  ;;  %v11987_v17 = vld [vmem:[#allocation217_spill] sm:$0xff]  ;;  %v3329_v26 = vsel %vm3289_vm7, %v3200_v29, %v11991_v59 }
 0x402   : > { %2830 = vrot.lane.b32.xlu1 %v11975_v62, %s6435_s25  ;;  %6285 = vmatprep.mubr.msk.bf16.mxu1 %vm4214_vm15, %v4161_v54  ;;  %v3264_v22 = vsel %vm3160_vm8, %v11780_v40, %v11987_v17  ;;  %v11988_v28 = vld [vmem:[#allocation405_spill] sm:$0xff]  ;;  %v11990_v54 = vld [vmem:[#allocation79_spill] sm:$0xff]  ;;  %v9735_v40 = vld [vmem:[%s10625_s2] ss:$0 sm:$0xff] }
 0x403   : > { %v2813_v27 = vpop.permute.xlu0 %2812  ;;  %v3714_v9 = vsel %vm3676_vm12, %v3585_v13, %v11988_v28  ;;  %v3262_v23 = vsel %vm3160_vm8, %v11772_v16, %v11990_v54  ;;  %v11995_v16 = vld [vmem:[#allocation27_spill] sm:$0xff]  ;;  %v11999_v45 = vld [vmem:[#allocation385_spill] sm:$0xff]  ;;  %v12000_v17 = vld [vmem:[#allocation386_spill] sm:$0xff] }
 0x404   : > { %v3131_v36 = vpop.permute.xlu1 %3130  ;;  %v12001_v28 = vld [vmem:[#allocation404_spill] sm:$0xff] }
 0x405   : > { %3020 = vrot.lane.b32.xlu0 %v11976_v21, %s6437_s28  ;;  %v4163_v34 = vsel %vm4063_vm14, %v4034_v48, %v3131_v36  ;;  %v11992_v48 = vld [vmem:[#allocation291_spill] sm:$0xff]  ;;  %v3843_v36 = vsel %vm3805_vm11, %v3714_v9, %v2813_v27 }
 0x406   : > { %2956 = vrot.lane.b32.xlu1 %v11977_v31, %s6437_s28  ;;  %6286 = vmatmul.mubr.msk.bf16.gmra.mrb[32].mxu1 %vm4214_vm15, %v4163_v34  ;;  %v3393_v61 = vsel %vm3289_vm7, %v3264_v22, %v11992_v48  ;;  %v11993_v21 = vld [vmem:[#allocation207_spill] sm:$0xff]  ;;  %v11994_v34 = vld [vmem:[#allocation292_spill] sm:$0xff] }
 0x407   : > { %v2815_v4 = vpop.permute.xlu0 %2814  ;;  %v3391_v31 = vsel %vm3289_vm7, %v3262_v23, %v11994_v34  ;;  %v12002_v23 = vld [vmem:[#allocation426_spill] sm:$0xff] }
 0x408   : > { %v2877_v51 = vpop.permute.xlu1 %2876  ;;  %v3520_v41 = vsel %vm3418_vm9, %v3391_v31, %v11997_v15 }
 0x409   : > { %3022 = vrot.lane.b32.xlu0 %v11978_v63, %s6437_s28  ;;  %v3458_v63 = vsel %vm3418_vm9, %v3329_v26, %v11995_v16  ;;  %v3649_v22 = vsel %vm3547_vm10, %v3520_v41, %v12000_v17  ;;  %v12005_v17 = vld [vmem:[#allocation59_spill] sm:$0xff] }
 0x40a   : > { %2958 = vrot.lane.b32.xlu1 %v11979_v35, %s6437_s28  ;;  %v11996_v35 = vld [vmem:[#allocation336_spill] sm:$0xff]  ;;  %v3778_v59 = vsel %vm3676_vm12, %v3649_v22, %v12002_v23 }
 0x40b   : > { %v2941_v39 = vpop.permute.xlu0 %2940  ;;  %v3522_v6 = vsel %vm3418_vm9, %v3393_v61, %v11996_v35 }
 0x40c   : > { %v9699_v37 = vpop.permute.xlu1 %2878  ;;  %v3972_v24 = vsel %vm3934_vm13, %v3843_v36, %v2941_v39  ;;  %v3651_v33 = vsel %vm3547_vm10, %v3522_v6, %v11999_v45  ;;  %v3907_v36 = vsel %vm3805_vm11, %v3778_v59, %v2877_v51 }
 0x40d   : > { %3148 = vrot.lane.b32.xlu0 %v11981_v3, %s6438_s29 }
 0x40e   : > { %3084 = vrot.lane.b32.xlu1 %v11983_v2, %s6438_s29  ;;  %v11998_v2 = vld [vmem:[#allocation361_spill] sm:$0xff] }
 0x40f   : > { %v2943_v60 = vpop.permute.xlu0 %2942  ;;  %v3587_v7 = vsel %vm3547_vm10, %v3458_v63, %v11998_v2  ;;  %v12004_v2 = vld [vmem:[#allocation425_spill] sm:$0xff] }
 0x410   : > { %v3005_v58 = vpop.permute.xlu1 %3004  ;;  %v3716_v39 = vsel %vm3676_vm12, %v3587_v7, %v12001_v28  ;;  %v3780_v7 = vsel %vm3676_vm12, %v3651_v33, %v12004_v2  ;;  %v12011_v2 = vld [vmem:[#allocation264_spill] sm:$0xff] }
 0x411   : > { %3150 = vrot.lane.b32.xlu0 %v11989_v0, %s6438_s29  ;;  %v3845_v26 = vsel %vm3805_vm11, %v3716_v39, %v2815_v4  ;;  %v4036_v63 = vsel %vm3934_vm13, %v3907_v36, %v3005_v58  ;;  %v3909_v28 = vsel %vm3805_vm11, %v3780_v7, %v9699_v37 }
 0x412   : > { %3086 = vrot.lane.b32.xlu1 %v11993_v21, %s6438_s29 }
 0x413   : > { %v3069_v27 = vpop.permute.xlu0 %3068 }
 0x414   : > { %v4101_v13 = vsel %vm4063_vm14, %v3972_v24, %v3069_v27  ;;  %v6191_v1 = vpop.f32.mrb[0].mxu0  ;;  %v3007_v29 = vpop.permute.xlu1 %3006  ;;  %v12003_v27 = vld [vmem:[#allocation3_spill] sm:$0xff] }
 0x415   : > { %v4393_v9 = vadd.f32 %v6191_v1, %v9735_v40  ;;  %2770 = vrot.lane.b32.xlu0 %v11989_v0, %s6434_s22  ;;  %v4384_v54 = vpop.f32.mrb[1].mxu0  ;;  %6225 = vmatprep.mubr.msk.bf16.mxu0 %vm4214_vm15, %v4101_v13  ;;  %v3974_v0 = vsel %vm3934_vm13, %v3845_v26, %v2943_v60  ;;  %v4038_v26 = vsel %vm3934_vm13, %v3909_v28, %v3007_v29 }
 0x416   : > { %v4385_v48 = vadd.f32 %v9735_v40, %v4384_v54  ;;  %v6192_v61 = vpop.f32.mrb[2].mxu0  ;;  %2768 = vrot.lane.b32.xlu1 %v11981_v3, %s6434_s22 }
 0x417   : > { %v4897_v21 = vmax.f32 %v4393_v9, 0.0  ;;  %v4396_v34 = vadd.f32 %v6192_v61, %v9735_v40  ;;  %v3071_v31 = vpop.permute.xlu0 %3070  ;;  %v4387_v16 = vpop.f32.mrb[3].mxu0 }
 0x418   : > { %v4895_v4 = vmax.f32 %v4385_v48, 0.0  ;;  %v4103_v3 = vsel %vm4063_vm14, %v3974_v0, %v3071_v31  ;;  %v4388_v51 = vadd.f32 %v9735_v40, %v4387_v16  ;;  %v3133_v35 = vpop.permute.xlu1 %3132  ;;  %v12006_v0 = vld [vmem:[#allocation309_spill] sm:$0xff] }
 0x419   : > { %v6255_v60 = vpop.f32.mrb[0].mxu1  ;;  %v5993_v6 = vpack.c.bf16 %v4897_v21, %v4897_v21  ;;  %v4898_v24 = vmax.f32 %v4396_v34, 0.0  ;;  %2896 = vrot.lane.b32.xlu0 %v12003_v27, %s6435_s25  ;;  %6226 = vmatmul.mubr.msk.bf16.gmra.mrb[36].mxu0 %vm4214_vm15, %v4103_v3  ;;  %v4165_v58 = vsel %vm4063_vm14, %v4036_v63, %v3133_v35  ;;  %v12008_v35 = vld [vmem:[#allocation66_spill] sm:$0xff] }
 0x41a   : > { %v4649_v15 = vadd.f32 %v6255_v60, %v9735_v40  ;;  %v4640_v41 = vpop.f32.mrb[1].mxu1  ;;  %v5991_v45 = vpack.c.bf16 %v4895_v4, %v4895_v4  ;;  %v4896_v13 = vmax.f32 %v4388_v51, 0.0  ;;  %2832 = vrot.lane.b32.xlu1 %v12005_v17, %s6435_s25  ;;  %6289 = vmatprep.mubr.msk.bf16.mxu1 %vm4214_vm15, %v4165_v58  ;;  %v12007_v51 = vld [vmem:[#allocation356_spill] sm:$0xff]  ;;  %v2132_v60 = vrot.slane %v12006_v0, 1  ;;  %v12009_v58 = vld [vmem:[#allocation153_spill] sm:$0xff]  ;;  %v12014_v17 = vld [vmem:[#allocation315_spill] sm:$0xff] }
 0x41b   : > { %v4641_v1 = vadd.f32 %v9735_v40, %v4640_v41  ;;  %v6256_v22 = vpop.f32.mrb[2].mxu1  ;;  %5538 = vst.msk [vmem:[%s9776_s7 + $0x8] sm:$0xf] %vm5535_vm0, %v5993_v6  ;;  %v5994_v39 = vpack.c.bf16 %v4898_v24, %v4898_v24  ;;  %v2817_v9 = vpop.permute.xlu0 %2816  ;;  %v12010_v41 = vld [vmem:[#allocation355_spill] sm:$0xff] }
 0x41c   : > { %v4961_v33 = vmax.f32 %v4649_v15, 0.0  ;;  %v4652_v54 = vadd.f32 %v6256_v22, %v9735_v40  ;;  %v4643_v23 = vpop.f32.mrb[3].mxu1  ;;  %5536 = vst.msk [vmem:[%s9776_s7] sm:$0xf] %vm5535_vm0, %v5991_v45  ;;  %v5992_v59 = vpack.c.bf16 %v4896_v13, %v4896_v13  ;;  %v3135_v37 = vpop.permute.xlu1 %3134  ;;  %v3202_v15 = vsel %vm3160_vm8, %v11795_v30, %v12009_v58  ;;  %v12013_v13 = vld [vmem:[#allocation350_spill] sm:$0xff] }
 0x41d   : > { %v4959_v48 = vmax.f32 %v4641_v1, 0.0  ;;  %v4644_v61 = vadd.f32 %v9735_v40, %v4643_v23  ;;  %5539 = vst.msk [vmem:[%s9776_s7 + $0xc] sm:$0xf] %vm5535_vm0, %v5994_v39  ;;  %2898 = vrot.lane.b32.xlu0 %v12006_v0, %s6435_s25  ;;  %v4167_v34 = vsel %vm4063_vm14, %v4038_v26, %v3135_v37  ;;  %v3331_v7 = vsel %vm3289_vm7, %v3202_v15, %v12011_v2  ;;  %v12015_v39 = vld [vmem:[#allocation364_spill] sm:$0xff]  ;;  %v12019_v37 = vld [vmem:[#allocation407_spill] sm:$0xff] }
 0x41e   : > { %v6057_v36 = vpack.c.bf16 %v4961_v33, %v4961_v33  ;;  %v4962_v21 = vmax.f32 %v4652_v54, 0.0  ;;  %5537 = vst.msk [vmem:[%s9776_s7 + $0x4] sm:$0xf] %vm5535_vm0, %v5992_v59  ;;  %2834 = vrot.lane.b32.xlu1 %v11725_v32, %s6435_s25  ;;  %6290 = vmatmul.mubr.msk.bf16.gmra.mrb[36].mxu1 %vm4214_vm15, %v4167_v34  ;;  %v2131_v32 = vrot.slane %v12003_v27, 1  ;;  %v12012_v27 = vld [vmem:[#allocation73_spill] sm:$0xff]  ;;  %v2134_v1 = vrot.slane %v12013_v13, 1 }
 0x41f   : > { %v6055_v31 = vpack.c.bf16 %v4959_v48, %v4959_v48  ;;  %v4960_v29 = vmax.f32 %v4644_v61, 0.0  ;;  %v2819_v63 = vpop.permute.xlu0 %2818  ;;  %v3460_v22 = vsel %vm3418_vm9, %v3331_v7, %v12014_v17  ;;  %v12016_v54 = vld [vmem:[#allocation161_spill] sm:$0xff]  ;;  %v12018_v48 = vld [vmem:[#allocation220_spill] sm:$0xff]  ;;  %v12020_v0 = vld [vmem:[#allocation263_spill] sm:$0xff] }
 0x420   : > { %5602 = vst.msk [vmem:[%s9776_s7 + $0x108] sm:$0xf] %vm5535_vm0, %v6057_v36  ;;  %v6058_v16 = vpack.c.bf16 %v4962_v21, %v4962_v21  ;;  %v2881_v3 = vpop.permute.xlu1 %2880  ;;  %v9834_v45 = vsel %vm1948_vm4, %v2131_v32, %v2132_v60  ;;  %v3589_v30 = vsel %vm3547_vm10, %v3460_v22, %v12015_v39  ;;  %v3204_v23 = vsel %vm3160_vm8, %v11798_v49, %v12016_v54  ;;  %v12017_v59 = vld [vmem:[#allocation101_spill] sm:$0xff]  ;;  %v12027_v2 = vld [vmem:[#allocation363_spill] sm:$0xff]  ;;  %v12029_v22 = vld [vmem:[#allocation388_spill] sm:$0xff] }
 0x421   : > { %5600 = vst.msk [vmem:[%s9776_s7 + $0x100] sm:$0xf] %vm5535_vm0, %v6055_v31  ;;  %v6056_v4 = vpack.c.bf16 %v4960_v29, %v4960_v29  ;;  %3024 = vrot.lane.b32.xlu0 %v12007_v51, %s6437_s28  ;;  %v3266_v26 = vsel %vm3160_vm8, %v11800_v12, %v12017_v59  ;;  %v3268_v61 = vsel %vm3160_vm8, %v11808_v8, %v12018_v48  ;;  %v12021_v34 = vld [vmem:[#allocation293_spill] sm:$0xff]  ;;  %v12022_v29 = vld [vmem:[#allocation72_spill] sm:$0xff]  ;;  %v12023_v8 = vld [vmem:[#allocation294_spill] sm:$0xff] }
 0x422   : > { %5603 = vst.msk [vmem:[%s9776_s7 + $0x10c] sm:$0xf] %vm5535_vm0, %v6058_v16  ;;  %2960 = vrot.lane.b32.xlu1 %v12008_v35, %s6437_s28  ;;  %v3718_v36 = vsel %vm3676_vm12, %v3589_v30, %v12019_v37  ;;  %v3333_v21 = vsel %vm3289_vm7, %v3204_v23, %v12020_v0  ;;  %v3397_v49 = vsel %vm3289_vm7, %v3268_v61, %v12021_v34  ;;  %v12025_v35 = vld [vmem:[#allocation338_spill] sm:$0xff]  ;;  %v12028_v7 = vld [vmem:[#allocation387_spill] sm:$0xff]  ;;  %v12033_v0 = vld [vmem:[#allocation4_spill] sm:$0xff] }
 0x423   : > { %5601 = vst.msk [vmem:[%s9776_s7 + $0x104] sm:$0xf] %vm5535_vm0, %v6056_v4  ;;  %v2945_v6 = vpop.permute.xlu0 %2944  ;;  %v3847_v31 = vsel %vm3805_vm11, %v3718_v36, %v2817_v9  ;;  %v2135_v12 = vsel %vm1948_vm4, %v2132_v60, %v2134_v1  ;;  %v3395_v16 = vsel %vm3289_vm7, %v3266_v26, %v12023_v8  ;;  %v12024_v4 = vld [vmem:[#allocation314_spill] sm:$0xff]  ;;  %v3526_v32 = vsel %vm3418_vm9, %v3397_v49, %v12025_v35  ;;  %v12031_v59 = vld [vmem:[#allocation427_spill] sm:$0xff] }
 0x424   : > { %v9824_v24 = vpop.permute.xlu1 %2882  ;;  %v3462_v51 = vsel %vm3418_vm9, %v3333_v21, %v12024_v4  ;;  %v3976_v58 = vsel %vm3934_vm13, %v3847_v31, %v2945_v6  ;;  %v12030_v30 = vld [vmem:[#allocation406_spill] sm:$0xff] }
 0x425   : > { %3026 = vrot.lane.b32.xlu0 %v12010_v41, %s6437_s28  ;;  %v12026_v41 = vld [vmem:[#allocation339_spill] sm:$0xff]  ;;  %v3591_v60 = vsel %vm3547_vm10, %v3462_v51, %v12027_v2  ;;  %v12032_v36 = vld [vmem:[#allocation210_spill] sm:$0xff] }
 0x426   : > { %2962 = vrot.lane.b32.xlu1 %v12012_v27, %s6437_s28  ;;  %v3524_v9 = vsel %vm3418_vm9, %v3395_v16, %v12026_v41  ;;  %v3655_v27 = vsel %vm3547_vm10, %v3526_v32, %v12028_v7  ;;  %v3720_v6 = vsel %vm3676_vm12, %v3591_v60, %v12030_v30  ;;  %v12034_v21 = vld [vmem:[#allocation2_spill] sm:$0xff]  ;;  %v12035_v2 = vld [vmem:[#allocation99_spill] sm:$0xff] }
 0x427   : > { %v2947_v28 = vpop.permute.xlu0 %2946  ;;  %v3653_v39 = vsel %vm3547_vm10, %v3524_v9, %v12029_v22  ;;  %v3849_v48 = vsel %vm3805_vm11, %v3720_v6, %v2819_v63  ;;  %v6344_v34 = vpack.i.bf16 %v12034_v21, %v12033_v0  ;;  %v3784_v60 = vsel %vm3676_vm12, %v3655_v27, %v12035_v2 }
 0x428   : > { %v3009_v33 = vpop.permute.xlu1 %3008  ;;  %v3782_v26 = vsel %vm3676_vm12, %v3653_v39, %v12031_v59  ;;  %v3978_v31 = vsel %vm3934_vm13, %v3849_v48, %v2947_v28  ;;  %v3913_v22 = vsel %vm3805_vm11, %v3784_v60, %v9824_v24  ;;  %v12045_v60 = vld [vmem:[#allocation78_spill] sm:$0xff] }
 0x429   : > { %3152 = vrot.lane.b32.xlu0 %v9834_v45, %s6438_s29  ;;  %v3911_v49 = vsel %vm3805_vm11, %v3782_v26, %v2881_v3 }
 0x42a   : > { %3088 = vrot.lane.b32.xlu1 %v12022_v29, %s6438_s29  ;;  %v4040_v63 = vsel %vm3934_vm13, %v3911_v49, %v3009_v33 }
 0x42b   : > { %v3073_v15 = vpop.permute.xlu0 %3072 }
 0x42c   : > { %v4105_v13 = vsel %vm4063_vm14, %v3976_v58, %v3073_v15  ;;  %v6195_v1 = vpop.f32.mrb[4].mxu0  ;;  %v3011_v17 = vpop.permute.xlu1 %3010 }
 0x42d   : > { %v4409_v54 = vadd.f32 %v6195_v1, %v9735_v40  ;;  %3154 = vrot.lane.b32.xlu0 %v2135_v12, %s6438_s29  ;;  %v4400_v23 = vpop.f32.mrb[5].mxu0  ;;  %6229 = vmatprep.mubr.msk.bf16.mxu0 %vm4214_vm15, %v4105_v13 }
 0x42e   : > { %v4401_v61 = vadd.f32 %v9735_v40, %v4400_v23  ;;  %v6196_v37 = vpop.f32.mrb[6].mxu0  ;;  %3090 = vrot.lane.b32.xlu1 %v12032_v36, %s6438_s29  ;;  %v4042_v23 = vsel %vm3934_vm13, %v3913_v22, %v3011_v17  ;;  %v12036_v17 = vld [vmem:[#allocation64_spill] sm:$0xff] }
 0x42f   : > { %v4901_v29 = vmax.f32 %v4409_v54, 0.0  ;;  %v4412_v8 = vadd.f32 %v6196_v37, %v9735_v40  ;;  %v3075_v16 = vpop.permute.xlu0 %3074  ;;  %v4403_v4 = vpop.f32.mrb[7].mxu0 }
 0x430   : > { %v4899_v51 = vmax.f32 %v4401_v61, 0.0  ;;  %v4107_v35 = vsel %vm4063_vm14, %v3978_v31, %v3075_v16  ;;  %v4404_v32 = vadd.f32 %v9735_v40, %v4403_v4  ;;  %v3137_v58 = vpop.permute.xlu1 %3136  ;;  %v12038_v4 = vld [vmem:[#allocation77_spill] sm:$0xff] }
 0x431   : > { %v6259_v15 = vpop.f32.mrb[4].mxu1  ;;  %v5997_v41 = vpack.c.bf16 %v4901_v29, %v4901_v29  ;;  %v4902_v9 = vmax.f32 %v4412_v8, 0.0  ;;  %2774 = vrot.lane.b32.xlu0 %v2135_v12, %s6434_s22  ;;  %6230 = vmatmul.mubr.msk.bf16.gmra.mrb[40].mxu0 %vm4214_vm15, %v4107_v35  ;;  %v4169_v3 = vsel %vm4063_vm14, %v4040_v63, %v3137_v58  ;;  %v12037_v29 = vld [vmem:[#allocation70_spill] sm:$0xff] }
 0x432   : > { %v4665_v28 = vadd.f32 %v6259_v15, %v9735_v40  ;;  %v4656_v33 = vpop.f32.mrb[5].mxu1  ;;  %v5995_v7 = vpack.c.bf16 %v4899_v51, %v4899_v51  ;;  %v4900_v13 = vmax.f32 %v4404_v32, 0.0  ;;  %2772 = vrot.lane.b32.xlu1 %v9834_v45, %s6434_s22  ;;  %6293 = vmatprep.mubr.msk.bf16.mxu1 %vm4214_vm15, %v4169_v3  ;;  %v12039_v63 = vld [vmem:[#allocation6_spill] sm:$0xff]  ;;  %v12043_v3 = vld [vmem:[#allocation224_spill] sm:$0xff] }
 0x433   : > { %v4657_v1 = vadd.f32 %v9735_v40, %v4656_v33  ;;  %v6260_v12 = vpop.f32.mrb[6].mxu1  ;;  %5542 = vst.msk [vmem:[%s9776_s7 + $0x18] sm:$0xf] %vm5535_vm0, %v5997_v41  ;;  %v5998_v39 = vpack.c.bf16 %v4902_v9, %v4902_v9  ;;  %v2759_v30 = vpop.permute.xlu0 %2758  ;;  %v12040_v35 = vld [vmem:[#allocation166_spill] sm:$0xff]  ;;  %v12042_v9 = vld [vmem:[#allocation219_spill] sm:$0xff]  ;;  %v12044_v33 = vld [vmem:[#allocation265_spill] sm:$0xff] }
 0x434   : > { %v4965_v27 = vmax.f32 %v4665_v28, 0.0  ;;  %v4668_v6 = vadd.f32 %v6260_v12, %v9735_v40  ;;  %v4659_v54 = vpop.f32.mrb[7].mxu1  ;;  %5540 = vst.msk [vmem:[%s9776_s7 + $0x10] sm:$0xf] %vm5535_vm0, %v5995_v7  ;;  %v5996_v45 = vpack.c.bf16 %v4900_v13, %v4900_v13  ;;  %v3139_v24 = vpop.permute.xlu1 %3138  ;;  %v3208_v32 = vsel %vm3160_vm8, %v11825_v44, %v12040_v35  ;;  %v12041_v15 = vld [vmem:[#allocation158_spill] sm:$0xff]  ;;  %v12047_v13 = vld [vmem:[#allocation295_spill] sm:$0xff] }
 0x435   : > { %v4963_v59 = vmax.f32 %v4657_v1, 0.0  ;;  %v4660_v26 = vadd.f32 %v9735_v40, %v4659_v54  ;;  %5543 = vst.msk [vmem:[%s9776_s7 + $0x1c] sm:$0xf] %vm5535_vm0, %v5998_v39  ;;  %6345 = vrot.lane.b32.xlu0 %v6344_v34, %s6435_s25  ;;  %v4171_v37 = vsel %vm4063_vm14, %v4042_v23, %v3139_v24  ;;  %v3206_v41 = vsel %vm3160_vm8, %v11822_v25, %v12041_v15  ;;  %v12046_v44 = vld [vmem:[#allocation266_spill] sm:$0xff]  ;;  %v12048_v1 = vld [vmem:[#allocation296_spill] sm:$0xff]  ;;  %v12051_v39 = vld [vmem:[#allocation317_spill] sm:$0xff] }
 0x436   : > { %v6061_v48 = vpack.c.bf16 %v4965_v27, %v4965_v27  ;;  %v4966_v61 = vmax.f32 %v4668_v6, 0.0  ;;  %5541 = vst.msk [vmem:[%s9776_s7 + $0x14] sm:$0xf] %vm5535_vm0, %v5996_v45  ;;  %2836 = vrot.lane.b32.xlu1 %v12036_v17, %s6435_s25  ;;  %6294 = vmatmul.mubr.msk.bf16.gmra.mrb[40].mxu1 %vm4214_vm15, %v4171_v37  ;;  %v3272_v28 = vsel %vm3160_vm8, %v11835_v50, %v12043_v3  ;;  %v12050_v50 = vld [vmem:[#allocation5_spill] sm:$0xff]  ;;  %v12052_v6 = vld [vmem:[#allocation340_spill] sm:$0xff] }
 0x437   : > { %v6059_v36 = vpack.c.bf16 %v4963_v59, %v4963_v59  ;;  %v4964_v0 = vmax.f32 %v4660_v26, 0.0  ;;  %v2885_v49 = vpop.permute.xlu0 %2884  ;;  %v3337_v2 = vsel %vm3289_vm7, %v3208_v32, %v12044_v33  ;;  %v3335_v7 = vsel %vm3289_vm7, %v3206_v41, %v12046_v44  ;;  %v12053_v45 = vld [vmem:[#allocation341_spill] sm:$0xff]  ;;  %v12060_v32 = vld [vmem:[#allocation182_spill] sm:$0xff] }
 0x438   : > { %5606 = vst.msk [vmem:[%s9776_s7 + $0x118] sm:$0xf] %vm5535_vm0, %v6061_v48  ;;  %v6062_v21 = vpack.c.bf16 %v4966_v61, %v4966_v61  ;;  %v2821_v31 = vpop.permute.xlu1 %2820  ;;  %v3401_v25 = vsel %vm3289_vm7, %v3272_v28, %v12047_v13  ;;  %v3464_v27 = vsel %vm3418_vm9, %v3335_v7, %v12051_v39  ;;  %v12054_v59 = vld [vmem:[#allocation365_spill] sm:$0xff]  ;;  %v12055_v48 = vld [vmem:[#allocation366_spill] sm:$0xff] }
 0x439   : > { %5604 = vst.msk [vmem:[%s9776_s7 + $0x110] sm:$0xf] %vm5535_vm0, %v6059_v36  ;;  %v6060_v34 = vpack.c.bf16 %v4964_v0, %v4964_v0  ;;  %2964 = vrot.lane.b32.xlu0 %v12037_v29, %s6437_s28  ;;  %v3530_v54 = vsel %vm3418_vm9, %v3401_v25, %v12052_v6  ;;  %v3593_v61 = vsel %vm3547_vm10, %v3464_v27, %v12055_v48  ;;  %v12056_v37 = vld [vmem:[#allocation389_spill] sm:$0xff]  ;;  %v12057_v0 = vld [vmem:[#allocation390_spill] sm:$0xff] }
 0x43a   : > { %5607 = vst.msk [vmem:[%s9776_s7 + $0x11c] sm:$0xf] %vm5535_vm0, %v6062_v21  ;;  %2838 = vrot.lane.b32.xlu1 %v11757_v42, %s6435_s25  ;;  %v3270_v42 = vsel %vm3160_vm8, %v11827_v10, %v12042_v9  ;;  %v12049_v10 = vld [vmem:[#allocation316_spill] sm:$0xff]  ;;  %v3659_v36 = vsel %vm3547_vm10, %v3530_v54, %v12056_v37  ;;  %v12062_v7 = vld [vmem:[#allocation157_spill] sm:$0xff] }
 0x43b   : > { %5605 = vst.msk [vmem:[%s9776_s7 + $0x114] sm:$0xf] %vm5535_vm0, %v6060_v34  ;;  %v2887_v8 = vpop.permute.xlu0 %2886  ;;  %v3399_v12 = vsel %vm3289_vm7, %v3270_v42, %v12048_v1  ;;  %v3466_v22 = vsel %vm3418_vm9, %v3337_v2, %v12049_v10  ;;  %v12058_v21 = vld [vmem:[#allocation408_spill] sm:$0xff]  ;;  %v3788_v41 = vsel %vm3676_vm12, %v3659_v36, %v2759_v30 }
 0x43c   : > { %v2823_v16 = vpop.permute.xlu1 %2822  ;;  %v3528_v23 = vsel %vm3418_vm9, %v3399_v12, %v12053_v45  ;;  %v3595_v26 = vsel %vm3547_vm10, %v3466_v22, %v12054_v59  ;;  %v12061_v42 = vld [vmem:[#allocation212_spill] sm:$0xff]  ;;  %v3917_v33 = vsel %vm3805_vm11, %v3788_v41, %v2887_v8 }
 0x43d   : > { %2966 = vrot.lane.b32.xlu0 %v12038_v4, %s6437_s28  ;;  %v3657_v17 = vsel %vm3547_vm10, %v3528_v23, %v12057_v0  ;;  %v3724_v34 = vsel %vm3676_vm12, %v3595_v26, %v12058_v21 }
 0x43e   : > { %3028 = vrot.lane.b32.xlu1 %v12039_v63, %s6437_s28  ;;  %v12059_v63 = vld [vmem:[#allocation409_spill] sm:$0xff]  ;;  %v3786_v15 = vsel %vm3676_vm12, %v3657_v17, %v12060_v32  ;;  %v3853_v13 = vsel %vm3805_vm11, %v3724_v34, %v2823_v16 }
 0x43f   : > { %v3013_v51 = vpop.permute.xlu0 %3012  ;;  %v3722_v35 = vsel %vm3676_vm12, %v3593_v61, %v12059_v63  ;;  %v3915_v28 = vsel %vm3805_vm11, %v3786_v15, %v2885_v49 }
 0x440   : > { %v2949_v58 = vpop.permute.xlu1 %2948  ;;  %v3851_v2 = vsel %vm3805_vm11, %v3722_v35, %v2821_v31  ;;  %v4044_v30 = vsel %vm3934_vm13, %v3915_v28, %v3013_v51 }
 0x441   : > { %3092 = vrot.lane.b32.xlu0 %v12045_v60, %s6438_s29  ;;  %v3980_v49 = vsel %vm3934_vm13, %v3851_v2, %v2949_v58 }
 0x442   : > { %3030 = vrot.lane.b32.xlu1 %v12050_v50, %s6437_s28 }
 0x443   : > { %v3015_v24 = vpop.permute.xlu0 %3014 }
 0x444   : > { %v6199_v29 = vpop.f32.mrb[8].mxu0  ;;  %v2951_v4 = vpop.permute.xlu1 %2950  ;;  %v4046_v58 = vsel %vm3934_vm13, %v3917_v33, %v3015_v24 }
 0x445   : > { %v4425_v9 = vadd.f32 %v6199_v29, %v9735_v40  ;;  %3094 = vrot.lane.b32.xlu0 %v12061_v42, %s6438_s29  ;;  %v4416_v3 = vpop.f32.mrb[9].mxu0  ;;  %v3982_v61 = vsel %vm3934_vm13, %v3853_v13, %v2951_v4  ;;  %v12064_v13 = vld [vmem:[#allocation298_spill] sm:$0xff] }
 0x446   : > { %v4417_v60 = vadd.f32 %v9735_v40, %v4416_v3  ;;  %v6200_v44 = vpop.f32.mrb[10].mxu0  ;;  %6350 = vrot.lane.b32.xlu1 %v12062_v7, %s6438_s29  ;;  %v12063_v7 = vld [vmem:[#allocation222_spill] sm:$0xff] }
 0x447   : > { %v4905_v25 = vmax.f32 %v4425_v9, 0.0  ;;  %v4428_v1 = vadd.f32 %v6200_v44, %v9735_v40  ;;  %v3141_v12 = vpop.permute.xlu0 %3140  ;;  %v4419_v10 = vpop.f32.mrb[11].mxu0 }
 0x448   : > { %v4903_v8 = vmax.f32 %v4417_v60, 0.0  ;;  %v4173_v31 = vsel %vm4063_vm14, %v4044_v30, %v3141_v12  ;;  %v4420_v22 = vadd.f32 %v9735_v40, %v4419_v10  ;;  %v3077_v50 = vpop.permute.xlu1 %3076  ;;  %v3274_v30 = vsel %vm3160_vm8, %v11855_v19, %v12063_v7  ;;  %v12066_v10 = vld [vmem:[#allocation170_spill] sm:$0xff]  ;;  %v12069_v19 = vld [vmem:[#allocation267_spill] sm:$0xff] }
 0x449   : > { %v6263_v39 = vpop.f32.mrb[8].mxu1  ;;  %v6001_v27 = vpack.c.bf16 %v4905_v25, %v4905_v25  ;;  %v4906_v6 = vmax.f32 %v4428_v1, 0.0  ;;  %6297 = vmatprep.mubr.msk.bf16.mxu1 %vm4214_vm15, %v4173_v31  ;;  %v4109_v16 = vsel %vm4063_vm14, %v3980_v49, %v3077_v50  ;;  %v3403_v25 = vsel %vm3289_vm7, %v3274_v30, %v12064_v13  ;;  %v12065_v1 = vld [vmem:[#allocation163_spill] sm:$0xff] }
 0x44a   : > { %v4681_v51 = vadd.f32 %v6263_v39, %v9735_v40  ;;  %v4672_v54 = vpop.f32.mrb[9].mxu1  ;;  %v5999_v45 = vpack.c.bf16 %v4903_v8, %v4903_v8  ;;  %v4904_v23 = vmax.f32 %v4420_v22, 0.0  ;;  %6233 = vmatprep.mubr.msk.bf16.mxu0 %vm4214_vm15, %v4109_v16  ;;  %v3210_v12 = vsel %vm3160_vm8, %v11850_v53, %v12065_v1  ;;  %v12067_v8 = vld [vmem:[#allocation343_spill] sm:$0xff] }
 0x44b   : > { %v4673_v59 = vadd.f32 %v9735_v40, %v4672_v54  ;;  %v6264_v26 = vpop.f32.mrb[10].mxu1  ;;  %5546 = vst.msk [vmem:[%s9776_s7 + $0x28] sm:$0xf] %vm5535_vm0, %v6001_v27  ;;  %v6002_v48 = vpack.c.bf16 %v4906_v6, %v4906_v6  ;;  %v3143_v37 = vpop.permute.xlu0 %3142  ;;  %v3212_v49 = vsel %vm3160_vm8, %v11853_v11, %v12066_v10  ;;  %v3532_v31 = vsel %vm3418_vm9, %v3403_v25, %v12067_v8  ;;  %v12068_v50 = vld [vmem:[#allocation227_spill] sm:$0xff]  ;;  %v12070_v6 = vld [vmem:[#allocation268_spill] sm:$0xff]  ;;  %v12072_v11 = vld [vmem:[#allocation297_spill] sm:$0xff] }
 0x44c   : > { %v4969_v36 = vmax.f32 %v4681_v51, 0.0  ;;  %v4684_v0 = vadd.f32 %v6264_v26, %v9735_v40  ;;  %v4675_v17 = vpop.f32.mrb[11].mxu1  ;;  %5544 = vst.msk [vmem:[%s9776_s7 + $0x20] sm:$0xf] %vm5535_vm0, %v5999_v45  ;;  %v6000_v24 = vpack.c.bf16 %v4904_v23, %v4904_v23  ;;  %v4175_v21 = vsel %vm4063_vm14, %v4046_v58, %v3143_v37  ;;  %v3079_v63 = vpop.permute.xlu1 %3078  ;;  %v12071_v51 = vld [vmem:[#allocation392_spill] sm:$0xff]  ;;  %v12073_v23 = vld [vmem:[#allocation318_spill] sm:$0xff] }
 0x44d   : > { %v4967_v34 = vmax.f32 %v4673_v59, 0.0  ;;  %v4676_v29 = vadd.f32 %v9735_v40, %v4675_v17  ;;  %5547 = vst.msk [vmem:[%s9776_s7 + $0x2c] sm:$0xf] %vm5535_vm0, %v6002_v48  ;;  %6298 = vmatmul.mubr.msk.bf16.gmra.mrb[44].mxu1 %vm4214_vm15, %v4175_v21  ;;  %v4111_v32 = vsel %vm4063_vm14, %v3982_v61, %v3079_v63  ;;  %v3276_v39 = vsel %vm3160_vm8, %v11862_v38, %v12068_v50  ;;  %v12074_v61 = vld [vmem:[#allocation319_spill] sm:$0xff] }
 0x44e   : > { %v6065_v4 = vpack.c.bf16 %v4969_v36, %v4969_v36  ;;  %v4970_v35 = vmax.f32 %v4684_v0, 0.0  ;;  %5545 = vst.msk [vmem:[%s9776_s7 + $0x24] sm:$0xf] %vm5535_vm0, %v6000_v24  ;;  %6234 = vmatmul.mubr.msk.bf16.gmra.mrb[44].mxu0 %vm4214_vm15, %v4111_v32  ;;  %v3341_v27 = vsel %vm3289_vm7, %v3212_v49, %v12069_v19  ;;  %v3339_v16 = vsel %vm3289_vm7, %v3210_v12, %v12070_v6  ;;  %v12075_v36 = vld [vmem:[#allocation342_spill] sm:$0xff]  ;;  %v12076_v17 = vld [vmem:[#allocation367_spill] sm:$0xff] }
 0x44f   : > { %v6063_v15 = vpack.c.bf16 %v4967_v34, %v4967_v34  ;;  %v4968_v41 = vmax.f32 %v4676_v29, 0.0  ;;  %v10028_v42 = vpop.permute.xlu0 %2762  ;;  %v3661_v53 = vsel %vm3547_vm10, %v3532_v31, %v12071_v51  ;;  %v3405_v45 = vsel %vm3289_vm7, %v3276_v39, %v12072_v11  ;;  %v12077_v29 = vld [vmem:[#allocation368_spill] sm:$0xff] }
 0x450   : > { %5610 = vst.msk [vmem:[%s9776_s7 + $0x128] sm:$0xf] %vm5535_vm0, %v6065_v4  ;;  %v6066_v9 = vpack.c.bf16 %v4970_v35, %v4970_v35  ;;  %v2761_v28 = vpop.permute.xlu1 %2760  ;;  %v3470_v59 = vsel %vm3418_vm9, %v3341_v27, %v12073_v23  ;;  %v3468_v37 = vsel %vm3418_vm9, %v3339_v16, %v12074_v61  ;;  %v3534_v0 = vsel %vm3418_vm9, %v3405_v45, %v12075_v36  ;;  %v12078_v4 = vld [vmem:[#allocation391_spill] sm:$0xff]  ;;  %v12080_v61 = vld [vmem:[#allocation410_spill] sm:$0xff] }
 0x451   : > { %5608 = vst.msk [vmem:[%s9776_s7 + $0x120] sm:$0xf] %vm5535_vm0, %v6063_v15  ;;  %v6064_v3 = vpack.c.bf16 %v4968_v41, %v4968_v41  ;;  %v3790_v26 = vsel %vm3676_vm12, %v3661_v53, %v2761_v28  ;;  %v3599_v24 = vsel %vm3547_vm10, %v3470_v59, %v12076_v17  ;;  %v3597_v63 = vsel %vm3547_vm10, %v3468_v37, %v12077_v29 }
 0x452   : > { %5611 = vst.msk [vmem:[%s9776_s7 + $0x12c] sm:$0xf] %vm5535_vm0, %v6066_v9  ;;  %v3663_v35 = vsel %vm3547_vm10, %v3534_v0, %v12078_v4  ;;  %v3728_v37 = vsel %vm3676_vm12, %v3599_v24, %v12080_v61  ;;  %v12090_v61 = vld [vmem:[#allocation393_spill] sm:$0xff] }
 0x453   : > { %5609 = vst.msk [vmem:[%s9776_s7 + $0x124] sm:$0xf] %vm5535_vm0, %v6064_v3  ;;  %v2889_v33 = vpop.permute.xlu0 %2888  ;;  %v12079_v3 = vld [vmem:[#allocation411_spill] sm:$0xff] }
 0x454   : > { %v2825_v2 = vpop.permute.xlu1 %2824  ;;  %v3726_v28 = vsel %vm3676_vm12, %v3597_v63, %v12079_v3  ;;  %v3919_v7 = vsel %vm3805_vm11, %v3790_v26, %v2889_v33  ;;  %v3792_v26 = vsel %vm3676_vm12, %v3663_v35, %v10028_v42 }
 0x455   : > { %v3855_v12 = vsel %vm3805_vm11, %v3726_v28, %v2825_v2 }
 0x457   : > { %v10036_v60 = vpop.permute.xlu0 %2890 }
 0x458   : > { %v10038_v44 = vpop.permute.xlu1 %2826  ;;  %v3921_v36 = vsel %vm3805_vm11, %v3792_v26, %v10036_v60 }
 0x459   : > { %v3857_v17 = vsel %vm3805_vm11, %v3728_v37, %v10038_v44 }
 0x45b   : > { %v3017_v22 = vpop.permute.xlu0 %3016 }
 0x45c   : > { %v6203_v54 = vpop.f32.mrb[12].mxu0  ;;  %v2953_v58 = vpop.permute.xlu1 %2952  ;;  %v4048_v50 = vsel %vm3934_vm13, %v3919_v7, %v3017_v22  ;;  %v12081_v7 = vld [vmem:[#allocation169_spill] sm:$0xff] }
 0x45d   : > { %v4441_v38 = vadd.f32 %v6203_v54, %v9735_v40  ;;  %v4432_v48 = vpop.f32.mrb[13].mxu0  ;;  %v3984_v16 = vsel %vm3934_vm13, %v3855_v12, %v2953_v58 }
 0x45e   : > { %v4433_v21 = vadd.f32 %v9735_v40, %v4432_v48  ;;  %v6204_v34 = vpop.f32.mrb[14].mxu0 }
 0x45f   : > { %v4909_v32 = vmax.f32 %v4441_v38, 0.0  ;;  %v4444_v15 = vadd.f32 %v6204_v34, %v9735_v40  ;;  %v3019_v41 = vpop.permute.xlu0 %3018  ;;  %v4435_v9 = vpop.f32.mrb[15].mxu0 }
 0x460   : > { %v4907_v30 = vmax.f32 %v4433_v21, 0.0  ;;  %v4436_v13 = vadd.f32 %v9735_v40, %v4435_v9  ;;  %v2955_v25 = vpop.permute.xlu1 %2954  ;;  %v4050_v21 = vsel %vm3934_vm13, %v3921_v36, %v3019_v41 }
 0x461   : > { %v6267_v1 = vpop.f32.mrb[12].mxu1  ;;  %v6005_v10 = vpack.c.bf16 %v4909_v32, %v4909_v32  ;;  %v4910_v49 = vmax.f32 %v4444_v15, 0.0  ;;  %v3986_v29 = vsel %vm3934_vm13, %v3857_v17, %v2955_v25 }
 0x462   : > { %v4697_v8 = vadd.f32 %v6267_v1, %v9735_v40  ;;  %v4688_v31 = vpop.f32.mrb[13].mxu1  ;;  %v6003_v39 = vpack.c.bf16 %v4907_v30, %v4907_v30  ;;  %v4908_v19 = vmax.f32 %v4436_v13, 0.0  ;;  %v3214_v30 = vsel %vm3160_vm8, %v11884_v57, %v12081_v7  ;;  %v12082_v1 = vld [vmem:[#allocation174_spill] sm:$0xff] }
 0x463   : > { %v4689_v27 = vadd.f32 %v9735_v40, %v4688_v31  ;;  %v6268_v33 = vpop.f32.mrb[14].mxu1  ;;  %5550 = vst.msk [vmem:[%s9776_s7 + $0x38] sm:$0xf] %vm5535_vm0, %v6005_v10  ;;  %v6006_v6 = vpack.c.bf16 %v4910_v49, %v4910_v49  ;;  %v3145_v2 = vpop.permute.xlu0 %3144  ;;  %v3216_v12 = vsel %vm3160_vm8, %v11894_v46, %v12082_v1  ;;  %v12083_v10 = vld [vmem:[#allocation226_spill] sm:$0xff] }
 0x464   : > { %v4973_v51 = vmax.f32 %v4697_v8, 0.0  ;;  %v4700_v53 = vadd.f32 %v6268_v33, %v9735_v40  ;;  %v4691_v54 = vpop.f32.mrb[15].mxu1  ;;  %5548 = vst.msk [vmem:[%s9776_s7 + $0x30] sm:$0xf] %vm5535_vm0, %v6003_v39  ;;  %v6004_v22 = vpack.c.bf16 %v4908_v19, %v4908_v19  ;;  %v4177_v11 = vsel %vm4063_vm14, %v4048_v50, %v3145_v2  ;;  %v3081_v59 = vpop.permute.xlu1 %3080  ;;  %v12084_v8 = vld [vmem:[#allocation231_spill] sm:$0xff]  ;;  %v12085_v19 = vld [vmem:[#allocation269_spill] sm:$0xff] }
 0x465   : > { %v4971_v45 = vmax.f32 %v4689_v27, 0.0  ;;  %v4692_v23 = vadd.f32 %v9735_v40, %v4691_v54  ;;  %5551 = vst.msk [vmem:[%s9776_s7 + $0x3c] sm:$0xf] %vm5535_vm0, %v6006_v6  ;;  %6301 = vmatprep.mubr.msk.bf16.mxu1 %vm4214_vm15, %v4177_v11  ;;  %v4113_v48 = vsel %vm4063_vm14, %v3984_v16, %v3081_v59  ;;  %v3278_v49 = vsel %vm3160_vm8, %v11882_v56, %v12083_v10  ;;  %v12086_v27 = vld [vmem:[#allocation270_spill] sm:$0xff] }
 0x466   : > { %v6069_v58 = vpack.c.bf16 %v4973_v51, %v4973_v51  ;;  %v4974_v38 = vmax.f32 %v4700_v53, 0.0  ;;  %5549 = vst.msk [vmem:[%s9776_s7 + $0x34] sm:$0xf] %vm5535_vm0, %v6004_v22  ;;  %6237 = vmatprep.mubr.msk.bf16.mxu0 %vm4214_vm15, %v4113_v48  ;;  %v3280_v31 = vsel %vm3160_vm8, %v11890_v47, %v12084_v8  ;;  %v3345_v57 = vsel %vm3289_vm7, %v3216_v12, %v12085_v19  ;;  %v12087_v51 = vld [vmem:[#allocation299_spill] sm:$0xff]  ;;  %v12088_v53 = vld [vmem:[#allocation300_spill] sm:$0xff]  ;;  %v12093_v1 = vld [vmem:[#allocation370_spill] sm:$0xff] }
 0x467   : > { %v6067_v0 = vpack.c.bf16 %v4971_v45, %v4971_v45  ;;  %v4972_v42 = vmax.f32 %v4692_v23, 0.0  ;;  %v3147_v24 = vpop.permute.xlu0 %3146  ;;  %v3343_v33 = vsel %vm3289_vm7, %v3214_v30, %v12086_v27  ;;  %v3409_v56 = vsel %vm3289_vm7, %v3280_v31, %v12087_v51  ;;  %v12089_v23 = vld [vmem:[#allocation345_spill] sm:$0xff]  ;;  %v12095_v27 = vld [vmem:[#allocation344_spill] sm:$0xff] }
 0x468   : > { %5614 = vst.msk [vmem:[%s9776_s7 + $0x138] sm:$0xf] %vm5535_vm0, %v6069_v58  ;;  %v6070_v34 = vpack.c.bf16 %v4974_v38, %v4974_v38  ;;  %v4179_v60 = vsel %vm4063_vm14, %v4050_v21, %v3147_v24  ;;  %v3083_v4 = vpop.permute.xlu1 %3082  ;;  %v3407_v47 = vsel %vm3289_vm7, %v3278_v49, %v12088_v53  ;;  %v12094_v8 = vld [vmem:[#allocation413_spill] sm:$0xff] }
 0x469   : > { %5612 = vst.msk [vmem:[%s9776_s7 + $0x130] sm:$0xf] %vm5535_vm0, %v6067_v0  ;;  %v6068_v63 = vpack.c.bf16 %v4972_v42, %v4972_v42  ;;  %6302 = vmatmul.mubr.msk.bf16.gmra.mrb[48].mxu1 %vm4214_vm15, %v4179_v60  ;;  %v4115_v44 = vsel %vm4063_vm14, %v3986_v29, %v3083_v4  ;;  %v3536_v59 = vsel %vm3418_vm9, %v3407_v47, %v12089_v23  ;;  %v12091_v4 = vld [vmem:[#allocation321_spill] sm:$0xff]  ;;  %v12098_v23 = vld [vmem:[#allocation412_spill] sm:$0xff] }
 0x46a   : > { %5615 = vst.msk [vmem:[%s9776_s7 + $0x13c] sm:$0xf] %vm5535_vm0, %v6070_v34  ;;  %6238 = vmatmul.mubr.msk.bf16.gmra.mrb[48].mxu0 %vm4214_vm15, %v4115_v44  ;;  %v3665_v37 = vsel %vm3547_vm10, %v3536_v59, %v12090_v61  ;;  %v3472_v44 = vsel %vm3418_vm9, %v3343_v33, %v12091_v4  ;;  %v12096_v51 = vld [vmem:[#allocation137_spill] sm:$0xff] }
 0x46b   : > { %5613 = vst.msk [vmem:[%s9776_s7 + $0x134] sm:$0xf] %vm5535_vm0, %v6068_v63  ;;  %v10125_v35 = vpop.permute.xlu0 %2766  ;;  %v3601_v12 = vsel %vm3547_vm10, %v3472_v44, %v12093_v1 }
 0x46c   : > { %v2765_v32 = vpop.permute.xlu1 %2764  ;;  %v3730_v31 = vsel %vm3676_vm12, %v3601_v12, %v12094_v8 }
 0x46d   : > { %v3794_v21 = vsel %vm3676_vm12, %v3665_v37, %v2765_v32 }
 0x46f   : > { %v2893_v15 = vpop.permute.xlu0 %2892 }
 0x470   : > { %v2829_v41 = vpop.permute.xlu1 %2828 }
 0x471   : > { %v3859_v33 = vsel %vm3805_vm11, %v3730_v31, %v2829_v41 }
 0x473   : > { %v10127_v9 = vpop.permute.xlu0 %2894 }
 0x474   : > { %v6207_v3 = vpop.f32.mrb[16].mxu0  ;;  %v10129_v28 = vpop.permute.xlu1 %2830 }
 0x475   : > { %v4457_v13 = vadd.f32 %v6207_v3, %v9735_v40  ;;  %v4448_v25 = vpop.f32.mrb[17].mxu0 }
 0x476   : > { %v4449_v50 = vadd.f32 %v9735_v40, %v4448_v25  ;;  %v6208_v39 = vpop.f32.mrb[18].mxu0 }
 0x477   : > { %v4913_v6 = vmax.f32 %v4457_v13, 0.0  ;;  %v4460_v46 = vadd.f32 %v6208_v39, %v9735_v40  ;;  %v3021_v16 = vpop.permute.xlu0 %3020  ;;  %v4451_v2 = vpop.f32.mrb[19].mxu0  ;;  %v12092_v13 = vld [vmem:[#allocation320_spill] sm:$0xff] }
 0x478   : > { %v4911_v54 = vmax.f32 %v4449_v50, 0.0  ;;  %v4452_v22 = vadd.f32 %v9735_v40, %v4451_v2  ;;  %v2957_v11 = vpop.permute.xlu1 %2956  ;;  %v3474_v25 = vsel %vm3418_vm9, %v3345_v57, %v12092_v13  ;;  %v3923_v50 = vsel %vm3805_vm11, %v3794_v21, %v2893_v15 }
 0x479   : > { %v6271_v45 = vpop.f32.mrb[16].mxu1  ;;  %v6009_v26 = vpack.c.bf16 %v4913_v6, %v4913_v6  ;;  %v4914_v58 = vmax.f32 %v4460_v46, 0.0  ;;  %v3538_v57 = vsel %vm3418_vm9, %v3409_v56, %v12095_v27  ;;  %v4052_v6 = vsel %vm3934_vm13, %v3923_v50, %v3021_v16  ;;  %v12100_v27 = vld [vmem:[#allocation302_spill] sm:$0xff] }
 0x47a   : > { %v4713_v38 = vadd.f32 %v6271_v45, %v9735_v40  ;;  %v4704_v48 = vpop.f32.mrb[17].mxu1  ;;  %v6007_v36 = vpack.c.bf16 %v4911_v54, %v4911_v54  ;;  %v4912_v0 = vmax.f32 %v4452_v22, 0.0  ;;  %v3667_v15 = vsel %vm3547_vm10, %v3538_v57, %v12096_v51  ;;  %v12097_v22 = vld [vmem:[#allocation369_spill] sm:$0xff] }
 0x47b   : > { %v4705_v42 = vadd.f32 %v9735_v40, %v4704_v48  ;;  %v6272_v17 = vpop.f32.mrb[18].mxu1  ;;  %5554 = vst.msk [vmem:[%s9776_s7 + $0x48] sm:$0xf] %vm5535_vm0, %v6009_v26  ;;  %v6010_v34 = vpack.c.bf16 %v4914_v58, %v4914_v58  ;;  %v3023_v24 = vpop.permute.xlu0 %3022  ;;  %v3988_v53 = vsel %vm3934_vm13, %v3859_v33, %v2957_v11  ;;  %v3603_v41 = vsel %vm3547_vm10, %v3474_v25, %v12097_v22  ;;  %v12103_v22 = vld [vmem:[#allocation395_spill] sm:$0xff] }
 0x47c   : > { %v4977_v29 = vmax.f32 %v4713_v38, 0.0  ;;  %v4716_v60 = vadd.f32 %v6272_v17, %v9735_v40  ;;  %v4707_v63 = vpop.f32.mrb[19].mxu1  ;;  %5552 = vst.msk [vmem:[%s9776_s7 + $0x40] sm:$0xf] %vm5535_vm0, %v6007_v36  ;;  %v6008_v3 = vpack.c.bf16 %v4912_v0, %v4912_v0  ;;  %v2959_v32 = vpop.permute.xlu1 %2958  ;;  %v3796_v16 = vsel %vm3676_vm12, %v3667_v15, %v10125_v35 }
 0x47d   : > { %v4975_v7 = vmax.f32 %v4705_v42, 0.0  ;;  %v4708_v30 = vadd.f32 %v9735_v40, %v4707_v63  ;;  %5555 = vst.msk [vmem:[%s9776_s7 + $0x4c] sm:$0xf] %vm5535_vm0, %v6010_v34  ;;  %v3732_v11 = vsel %vm3676_vm12, %v3603_v41, %v12098_v23  ;;  %v3925_v59 = vsel %vm3805_vm11, %v3796_v16, %v10127_v9  ;;  %v12104_v23 = vld [vmem:[#allocation272_spill] sm:$0xff] }
 0x47e   : > { %v6073_v10 = vpack.c.bf16 %v4977_v29, %v4977_v29  ;;  %v4978_v49 = vmax.f32 %v4716_v60, 0.0  ;;  %5553 = vst.msk [vmem:[%s9776_s7 + $0x44] sm:$0xf] %vm5535_vm0, %v6008_v3  ;;  %v3861_v26 = vsel %vm3805_vm11, %v3732_v11, %v10129_v28  ;;  %v4054_v35 = vsel %vm3934_vm13, %v3925_v59, %v3023_v24 }
 0x47f   : > { %v6071_v39 = vpack.c.bf16 %v4975_v7, %v4975_v7  ;;  %v4976_v19 = vmax.f32 %v4708_v30, 0.0  ;;  %v3149_v2 = vpop.permute.xlu0 %3148  ;;  %v3990_v38 = vsel %vm3934_vm13, %v3861_v26, %v2959_v32 }
 0x480   : > { %5618 = vst.msk [vmem:[%s9776_s7 + $0x148] sm:$0xf] %vm5535_vm0, %v6073_v10  ;;  %v6074_v46 = vpack.c.bf16 %v4978_v49, %v4978_v49  ;;  %v4181_v47 = vsel %vm4063_vm14, %v4052_v6, %v3149_v2  ;;  %v3085_v56 = vpop.permute.xlu1 %3084  ;;  %v12099_v49 = vld [vmem:[#allocation229_spill] sm:$0xff] }
 0x481   : > { %5616 = vst.msk [vmem:[%s9776_s7 + $0x140] sm:$0xf] %vm5535_vm0, %v6071_v39  ;;  %v6072_v54 = vpack.c.bf16 %v4976_v19, %v4976_v19  ;;  %6305 = vmatprep.mubr.msk.bf16.mxu1 %vm4214_vm15, %v4181_v47  ;;  %v4117_v45 = vsel %vm4063_vm14, %v3988_v53, %v3085_v56  ;;  %v3282_v8 = vsel %vm3160_vm8, %v11924_v55, %v12099_v49  ;;  %v12101_v55 = vld [vmem:[#allocation347_spill] sm:$0xff] }
 0x482   : > { %5619 = vst.msk [vmem:[%s9776_s7 + $0x14c] sm:$0xf] %vm5535_vm0, %v6074_v46  ;;  %6241 = vmatprep.mubr.msk.bf16.mxu0 %vm4214_vm15, %v4117_v45  ;;  %v3411_v57 = vsel %vm3289_vm7, %v3282_v8, %v12100_v27  ;;  %v12116_v27 = vld [vmem:[#allocation414_spill] sm:$0xff] }
 0x483   : > { %5617 = vst.msk [vmem:[%s9776_s7 + $0x144] sm:$0xf] %vm5535_vm0, %v6072_v54  ;;  %v3151_v58 = vpop.permute.xlu0 %3150  ;;  %v3540_v15 = vsel %vm3418_vm9, %v3411_v57, %v12101_v55  ;;  %v12102_v54 = vld [vmem:[#allocation173_spill] sm:$0xff] }
 0x484   : > { %v4183_v48 = vsel %vm4063_vm14, %v4054_v35, %v3151_v58  ;;  %v3087_v61 = vpop.permute.xlu1 %3086  ;;  %v3218_v56 = vsel %vm3160_vm8, %v11928_v20, %v12102_v54  ;;  %v3669_v41 = vsel %vm3547_vm10, %v3540_v15, %v12103_v22  ;;  %v12105_v58 = vld [vmem:[#allocation323_spill] sm:$0xff] }
 0x485   : > { %6306 = vmatmul.mubr.msk.bf16.gmra.mrb[52].mxu1 %vm4214_vm15, %v4183_v48  ;;  %v4119_v37 = vsel %vm4063_vm14, %v3990_v38, %v3087_v61  ;;  %v3347_v11 = vsel %vm3289_vm7, %v3218_v56, %v12104_v23  ;;  %v12106_v61 = vld [vmem:[#allocation236_spill] sm:$0xff] }
 0x486   : > { %6242 = vmatmul.mubr.msk.bf16.gmra.mrb[52].mxu0 %vm4214_vm15, %v4119_v37  ;;  %v3476_v20 = vsel %vm3418_vm9, %v3347_v11, %v12105_v58  ;;  %v3284_v37 = vsel %vm3160_vm8, %v11935_v52, %v12106_v61  ;;  %v12111_v52 = vld [vmem:[#allocation271_spill] sm:$0xff] }
 0x487   : > { %v10216_v9 = vpop.permute.xlu0 %2770 }
 0x488   : > { %v2769_v36 = vpop.permute.xlu1 %2768 }
 0x489   : > { %v3798_v59 = vsel %vm3676_vm12, %v3669_v41, %v2769_v36 }
 0x48b   : > { %v2897_v0 = vpop.permute.xlu0 %2896 }
 0x48c   : > { %v6211_v42 = vpop.f32.mrb[20].mxu0  ;;  %v2833_v28 = vpop.permute.xlu1 %2832 }
 0x48d   : > { %v4473_v17 = vadd.f32 %v6211_v42, %v9735_v40  ;;  %v4464_v21 = vpop.f32.mrb[21].mxu0  ;;  %v12107_v42 = vld [vmem:[#allocation372_spill] sm:$0xff] }
 0x48e   : > { %v4465_v34 = vadd.f32 %v9735_v40, %v4464_v21  ;;  %v6212_v24 = vpop.f32.mrb[22].mxu0  ;;  %v12108_v21 = vld [vmem:[#allocation180_spill] sm:$0xff] }
 0x48f   : > { %v4917_v29 = vmax.f32 %v4473_v17, 0.0  ;;  %v4476_v60 = vadd.f32 %v6212_v24, %v9735_v40  ;;  %v10221_v63 = vpop.permute.xlu0 %2898  ;;  %v4467_v4 = vpop.f32.mrb[23].mxu0  ;;  %v3605_v17 = vsel %vm3547_vm10, %v3476_v20, %v12107_v42  ;;  %v12109_v24 = vld [vmem:[#allocation301_spill] sm:$0xff] }
 0x490   : > { %v4915_v44 = vmax.f32 %v4465_v34, 0.0  ;;  %v4468_v3 = vadd.f32 %v9735_v40, %v4467_v4  ;;  %v10224_v7 = vpop.permute.xlu1 %2834  ;;  %v3220_v34 = vsel %vm3160_vm8, %v11939_v5, %v12108_v21  ;;  %v12117_v42 = vld [vmem:[#allocation177_spill] sm:$0xff] }
 0x491   : > { %v6013_v30 = vpack.c.bf16 %v4917_v29, %v4917_v29  ;;  %v4918_v32 = vmax.f32 %v4476_v60, 0.0  ;;  %v6275_v13 = vpop.f32.mrb[20].mxu1  ;;  %v3413_v29 = vsel %vm3289_vm7, %v3284_v37, %v12109_v24  ;;  %v12110_v60 = vld [vmem:[#allocation415_spill] sm:$0xff] }
 0x492   : > { %v6011_v25 = vpack.c.bf16 %v4915_v44, %v4915_v44  ;;  %v4916_v1 = vmax.f32 %v4468_v3, 0.0  ;;  %v4729_v12 = vadd.f32 %v6275_v13, %v9735_v40  ;;  %v4720_v10 = vpop.f32.mrb[21].mxu1  ;;  %v3734_v4 = vsel %vm3676_vm12, %v3605_v17, %v12110_v60 }
 0x493   : > { %5558 = vst.msk [vmem:[%s9776_s7 + $0x58] sm:$0xf] %vm5535_vm0, %v6013_v30  ;;  %v6014_v31 = vpack.c.bf16 %v4918_v32, %v4918_v32  ;;  %v3025_v50 = vpop.permute.xlu0 %3024  ;;  %v4721_v39 = vadd.f32 %v9735_v40, %v4720_v10  ;;  %v6276_v19 = vpop.f32.mrb[22].mxu1  ;;  %v3927_v44 = vsel %vm3805_vm11, %v3798_v59, %v2897_v0  ;;  %v3349_v3 = vsel %vm3289_vm7, %v3220_v34, %v12111_v52  ;;  %v12112_v30 = vld [vmem:[#allocation346_spill] sm:$0xff] }
 0x494   : > { %5556 = vst.msk [vmem:[%s9776_s7 + $0x50] sm:$0xf] %vm5535_vm0, %v6011_v25  ;;  %v6012_v33 = vpack.c.bf16 %v4916_v1, %v4916_v1  ;;  %v4981_v6 = vmax.f32 %v4729_v12, 0.0  ;;  %v4732_v46 = vadd.f32 %v6276_v19, %v9735_v40  ;;  %v4723_v2 = vpop.f32.mrb[23].mxu1  ;;  %v2961_v51 = vpop.permute.xlu1 %2960  ;;  %v3542_v32 = vsel %vm3418_vm9, %v3413_v29, %v12112_v30  ;;  %v12113_v1 = vld [vmem:[#allocation322_spill] sm:$0xff] }
 0x495   : > { %5559 = vst.msk [vmem:[%s9776_s7 + $0x5c] sm:$0xf] %vm5535_vm0, %v6014_v31  ;;  %v4979_v53 = vmax.f32 %v4721_v39, 0.0  ;;  %v4724_v47 = vadd.f32 %v9735_v40, %v4723_v2  ;;  %v3863_v13 = vsel %vm3805_vm11, %v3734_v4, %v2833_v28  ;;  %v4056_v5 = vsel %vm3934_vm13, %v3927_v44, %v3025_v50  ;;  %v12114_v10 = vld [vmem:[#allocation394_spill] sm:$0xff]  ;;  %v12115_v39 = vld [vmem:[#allocation371_spill] sm:$0xff] }
 0x496   : > { %5557 = vst.msk [vmem:[%s9776_s7 + $0x54] sm:$0xf] %vm5535_vm0, %v6012_v33  ;;  %v6077_v16 = vpack.c.bf16 %v4981_v6, %v4981_v6  ;;  %v4982_v45 = vmax.f32 %v4732_v46, 0.0  ;;  %v3478_v12 = vsel %vm3418_vm9, %v3349_v3, %v12113_v1  ;;  %v3671_v0 = vsel %vm3547_vm10, %v3542_v32, %v12114_v10  ;;  %v12118_v29 = vld [vmem:[#allocation274_spill] sm:$0xff] }
 0x497   : > { %v6075_v26 = vpack.c.bf16 %v4979_v53, %v4979_v53  ;;  %v3027_v40 = vpop.permute.xlu0 %3026  ;;  %v4980_v35 = vmax.f32 %v4724_v47, 0.0  ;;  %v3992_v49 = vsel %vm3934_vm13, %v3863_v13, %v2961_v51  ;;  %v3607_v19 = vsel %vm3547_vm10, %v3478_v12, %v12115_v39 }
 0x498   : > { %5622 = vst.msk [vmem:[%s9776_s7 + $0x158] sm:$0xf] %vm5535_vm0, %v6077_v16  ;;  %v6078_v38 = vpack.c.bf16 %v4982_v45, %v4982_v45  ;;  %v2963_v48 = vpop.permute.xlu1 %2962  ;;  %v3800_v28 = vsel %vm3676_vm12, %v3671_v0, %v10216_v9  ;;  %v3736_v57 = vsel %vm3676_vm12, %v3607_v19, %v12116_v27  ;;  %v3222_v17 = vsel %vm3160_vm8, %v11969_v43, %v12117_v42  ;;  %v12119_v43 = vld [vmem:[#allocation325_spill] sm:$0xff]  ;;  %v12121_v0 = vld [vmem:[#allocation184_spill] sm:$0xff] }
 0x499   : > { %5620 = vst.msk [vmem:[%s9776_s7 + $0x150] sm:$0xf] %vm5535_vm0, %v6075_v26  ;;  %v6076_v36 = vpack.c.bf16 %v4980_v35, %v4980_v35  ;;  %v3929_v33 = vsel %vm3805_vm11, %v3800_v28, %v10221_v63  ;;  %v3865_v6 = vsel %vm3805_vm11, %v3736_v57, %v10224_v7  ;;  %v10314_v7 = vld [vmem:[%s10625_s2] ss:$0 sm:$0xff]  ;;  %v3351_v60 = vsel %vm3289_vm7, %v3222_v17, %v12118_v29 }
 0x49a   : > { %5623 = vst.msk [vmem:[%s9776_s7 + $0x15c] sm:$0xf] %vm5535_vm0, %v6078_v38  ;;  %v4058_v46 = vsel %vm3934_vm13, %v3929_v33, %v3027_v40  ;;  %v3994_v9 = vsel %vm3934_vm13, %v3865_v6, %v2963_v48  ;;  %v3480_v32 = vsel %vm3418_vm9, %v3351_v60, %v12119_v43 }
 0x49b   : > { %5621 = vst.msk [vmem:[%s9776_s7 + $0x154] sm:$0xf] %vm5535_vm0, %v6076_v36  ;;  %v3153_v25 = vpop.permute.xlu0 %3152 }
 0x49c   : > { %v4185_v8 = vsel %vm4063_vm14, %v4056_v5, %v3153_v25  ;;  %v3089_v31 = vpop.permute.xlu1 %3088  ;;  %v12120_v25 = vld [vmem:[#allocation374_spill] sm:$0xff] }
 0x49d   : > { %6309 = vmatprep.mubr.msk.bf16.mxu1 %vm4214_vm15, %v4185_v8  ;;  %v4121_v50 = vsel %vm4063_vm14, %v3992_v49, %v3089_v31  ;;  %v3609_v1 = vsel %vm3547_vm10, %v3480_v32, %v12120_v25  ;;  %v3224_v49 = vsel %vm3160_vm8, %v11975_v62, %v12121_v0  ;;  %v12122_v8 = vld [vmem:[#allocation417_spill] sm:$0xff] }
 0x49e   : > { %6245 = vmatprep.mubr.msk.bf16.mxu0 %vm4214_vm15, %v4121_v50  ;;  %v3738_v31 = vsel %vm3676_vm12, %v3609_v1, %v12122_v8  ;;  %v12123_v50 = vld [vmem:[#allocation273_spill] sm:$0xff] }
 0x49f   : > { %v3155_v2 = vpop.permute.xlu0 %3154  ;;  %v3353_v27 = vsel %vm3289_vm7, %v3224_v49, %v12123_v50 }
 0x4a0   : > { %v4187_v51 = vsel %vm4063_vm14, %v4058_v46, %v3155_v2  ;;  %v3091_v55 = vpop.permute.xlu1 %3090  ;;  %v12124_v46 = vld [vmem:[#allocation324_spill] sm:$0xff] }
 0x4a1   : > { %6310 = vmatmul.mubr.msk.bf16.gmra.mrb[56].mxu1 %vm4214_vm15, %v4187_v51  ;;  %v4123_v15 = vsel %vm4063_vm14, %v3994_v9, %v3091_v55  ;;  %v3482_v2 = vsel %vm3418_vm9, %v3353_v27, %v12124_v46  ;;  %v12125_v9 = vld [vmem:[#allocation235_spill] sm:$0xff]  ;;  %v12126_v55 = vld [vmem:[#allocation373_spill] sm:$0xff] }
 0x4a2   : > { %6246 = vmatmul.mubr.msk.bf16.gmra.mrb[56].mxu0 %vm4214_vm15, %v4123_v15  ;;  %v3286_v51 = vsel %vm3160_vm8, %v11966_v18, %v12125_v9  ;;  %v3611_v15 = vsel %vm3547_vm10, %v3482_v2, %v12126_v55 }
 0x4a3   : > { %v10307_v63 = vpop.permute.xlu0 %2774 }
 0x4a4   : > { %v6215_v53 = vpop.f32.mrb[24].mxu0  ;;  %v10309_v47 = vpop.permute.xlu1 %2772 }
 0x4a5   : > { %v4489_v54 = vadd.f32 %v10314_v7, %v6215_v53  ;;  %v4480_v56 = vpop.f32.mrb[25].mxu0  ;;  %v12127_v53 = vld [vmem:[#allocation304_spill] sm:$0xff] }
 0x4a6   : > { %v4481_v22 = vadd.f32 %v10314_v7, %v4480_v56  ;;  %v6216_v41 = vpop.f32.mrb[26].mxu0  ;;  %v12128_v56 = vld [vmem:[#allocation416_spill] sm:$0xff] }
 0x4a7   : > { %v4921_v16 = vmax.f32 %v4489_v54, 0.0  ;;  %v4492_v45 = vadd.f32 %v10314_v7, %v6216_v41  ;;  %v10319_v23 = vpop.permute.xlu0 %6345  ;;  %v4483_v11 = vpop.f32.mrb[27].mxu0  ;;  %v3415_v54 = vsel %vm3289_vm7, %v3286_v51, %v12127_v53 }
 0x4a8   : > { %v4919_v59 = vmax.f32 %v4481_v22, 0.0  ;;  %v4484_v26 = vadd.f32 %v10314_v7, %v4483_v11  ;;  %v2837_v40 = vpop.permute.xlu1 %2836  ;;  %v3740_v22 = vsel %vm3676_vm12, %v3611_v15, %v12128_v56  ;;  %v12130_v11 = vld [vmem:[#allocation349_spill] sm:$0xff] }
 0x4a9   : > { %v6017_v35 = vpack.c.bf16 %v4921_v16, %v4921_v16  ;;  %v4922_v58 = vmax.f32 %v4492_v45, 0.0  ;;  %v6279_v20 = vpop.f32.mrb[24].mxu1  ;;  %v3867_v57 = vsel %vm3805_vm11, %v3738_v31, %v2837_v40  ;;  %v12129_v45 = vld [vmem:[#allocation240_spill] sm:$0xff] }
 0x4aa   : > { %v6015_v38 = vpack.c.bf16 %v4919_v59, %v4919_v59  ;;  %v4920_v48 = vmax.f32 %v4484_v26, 0.0  ;;  %v4745_v61 = vadd.f32 %v10314_v7, %v6279_v20  ;;  %v4736_v37 = vpop.f32.mrb[25].mxu1  ;;  %v3288_v18 = vsel %vm3160_vm8, %v11973_v14, %v12129_v45  ;;  %v12133_v14 = vld [vmem:[#allocation348_spill] sm:$0xff] }
 0x4ab   : > { %5562 = vst.msk [vmem:[%s9776_s7 + $0x68] sm:$0xf] %vm5535_vm0, %v6017_v35  ;;  %v6018_v36 = vpack.c.bf16 %v4922_v58, %v4922_v58  ;;  %v2965_v21 = vpop.permute.xlu0 %2964  ;;  %v4737_v34 = vadd.f32 %v10314_v7, %v4736_v37  ;;  %v6280_v24 = vpop.f32.mrb[26].mxu1  ;;  %v3544_v59 = vsel %vm3418_vm9, %v3415_v54, %v12130_v11  ;;  %v12131_v58 = vld [vmem:[#allocation303_spill] sm:$0xff]  ;;  %v6347_v37 = vunpack.i.l.bf16 %v10319_v23 }
 0x4ac   : > { %5560 = vst.msk [vmem:[%s9776_s7 + $0x60] sm:$0xf] %vm5535_vm0, %v6015_v38  ;;  %v6016_v4 = vpack.c.bf16 %v4920_v48, %v4920_v48  ;;  %v4985_v44 = vmax.f32 %v4745_v61, 0.0  ;;  %v4748_v52 = vadd.f32 %v10314_v7, %v6280_v24  ;;  %v4739_v3 = vpop.f32.mrb[27].mxu1  ;;  %v2839_v30 = vpop.permute.xlu1 %2838  ;;  %v3996_v16 = vsel %vm3934_vm13, %v3867_v57, %v2965_v21  ;;  %v12132_v38 = vld [vmem:[#allocation397_spill] sm:$0xff] }
 0x4ad   : > { %5563 = vst.msk [vmem:[%s9776_s7 + $0x6c] sm:$0xf] %vm5535_vm0, %v6018_v36  ;;  %v4983_v13 = vmax.f32 %v4737_v34, 0.0  ;;  %v4740_v5 = vadd.f32 %v10314_v7, %v4739_v3  ;;  %v3869_v26 = vsel %vm3805_vm11, %v3740_v22, %v2839_v30  ;;  %v3417_v20 = vsel %vm3289_vm7, %v3288_v18, %v12131_v58  ;;  %v12134_v36 = vld [vmem:[#allocation396_spill] sm:$0xff] }
 0x4ae   : > { %5561 = vst.msk [vmem:[%s9776_s7 + $0x64] sm:$0xf] %vm5535_vm0, %v6016_v4  ;;  %v6081_v12 = vpack.c.bf16 %v4985_v44, %v4985_v44  ;;  %v4986_v10 = vmax.f32 %v4748_v52, 0.0  ;;  %v3673_v48 = vsel %vm3547_vm10, %v3544_v59, %v12132_v38  ;;  %v6348_v61 = vunpack.i.h.bf16 %v10319_v23 }
 0x4af   : > { %v6079_v39 = vpack.c.bf16 %v4983_v13, %v4983_v13  ;;  %v2967_v19 = vpop.permute.xlu0 %2966  ;;  %v4984_v28 = vmax.f32 %v4740_v5, 0.0  ;;  %v3546_v42 = vsel %vm3418_vm9, %v3417_v20, %v12133_v14  ;;  %v3802_v17 = vsel %vm3676_vm12, %v3673_v48, %v10309_v47 }
 0x4b0   : > { %5626 = vst.msk [vmem:[%s9776_s7 + $0x168] sm:$0xf] %vm5535_vm0, %v6081_v12  ;;  %v6082_v33 = vpack.c.bf16 %v4986_v10, %v4986_v10  ;;  %v3029_v6 = vpop.permute.xlu1 %3028  ;;  %v3675_v21 = vsel %vm3547_vm10, %v3546_v42, %v12134_v36  ;;  %v3998_v24 = vsel %vm3934_vm13, %v3869_v26, %v2967_v19  ;;  %v3931_v4 = vsel %vm3805_vm11, %v3802_v17, %v6347_v37 }
 0x4b1   : > { %5624 = vst.msk [vmem:[%s9776_s7 + $0x160] sm:$0xf] %vm5535_vm0, %v6079_v39  ;;  %v6080_v62 = vpack.c.bf16 %v4984_v28, %v4984_v28  ;;  %v3804_v29 = vsel %vm3676_vm12, %v3675_v21, %v10307_v63  ;;  %v4060_v3 = vsel %vm3934_vm13, %v3931_v4, %v3029_v6 }
 0x4b2   : > { %5627 = vst.msk [vmem:[%s9776_s7 + $0x16c] sm:$0xf] %vm5535_vm0, %v6082_v33  ;;  %v3933_v44 = vsel %vm3805_vm11, %v3804_v29, %v6348_v61 }
 0x4b3   : > { %5625 = vst.msk [vmem:[%s9776_s7 + $0x164] sm:$0xf] %vm5535_vm0, %v6080_v62  ;;  %v3093_v41 = vpop.permute.xlu0 %3092 }
 0x4b4   : > { %v4125_v40 = vsel %vm4063_vm14, %v3996_v16, %v3093_v41  ;;  %v3031_v35 = vpop.permute.xlu1 %3030 }
 0x4b5   : > { %6249 = vmatprep.mubr.msk.bf16.mxu0 %vm4214_vm15, %v4125_v40  ;;  %v4062_v30 = vsel %vm3934_vm13, %v3933_v44, %v3031_v35 }
 0x4b7   : > { %v3095_v34 = vpop.permute.xlu0 %3094 }
 0x4b8   : > { %v4127_v60 = vsel %vm4063_vm14, %v3998_v24, %v3095_v34  ;;  %v6351_v23 = vpop.permute.xlu1 %6350 }
 0x4b9   : > { %6250 = vmatmul.mubr.msk.bf16.gmra.mrb[60].mxu0 %vm4214_vm15, %v4127_v60  ;;  %v6353_v52 = vunpack.i.h.bf16 %v6351_v23  ;;  %v6352_v47 = vunpack.i.l.bf16 %v6351_v23 }
 0x4bb   : > { %v4189_v43 = vsel %vm4063_vm14, %v4060_v3, %v6352_v47  ;;  %v4191_v32 = vsel %vm4063_vm14, %v4062_v30, %v6353_v52 }
 0x4bc   : > { %v6219_v63 = vpop.f32.mrb[28].mxu0  ;;  %6313 = vmatprep.mubr.msk.bf16.mxu1 %vm4214_vm15, %v4189_v43 }
 0x4bd   : > { %v4505_v13 = vadd.f32 %v10314_v7, %v6219_v63  ;;  %v4496_v5 = vpop.f32.mrb[29].mxu0  ;;  %6314 = vmatmul.mubr.msk.bf16.gmra.mrb[60].mxu1 %vm4214_vm15, %v4191_v32 }
 0x4be   : > { %v4497_v25 = vadd.f32 %v10314_v7, %v4496_v5  ;;  %v6220_v1 = vpop.f32.mrb[30].mxu0 }
 0x4bf   : > { %v4925_v12 = vmax.f32 %v4505_v13, 0.0  ;;  %v4508_v10 = vadd.f32 %v10314_v7, %v6220_v1  ;;  %v4499_v0 = vpop.f32.mrb[31].mxu0 }
 0x4c0   : > { %v4923_v49 = vmax.f32 %v4497_v25, 0.0  ;;  %v4500_v8 = vadd.f32 %v10314_v7, %v4499_v0 }
 0x4c1   : > { %v6021_v31 = vpack.c.bf16 %v4925_v12, %v4925_v12  ;;  %v4926_v39 = vmax.f32 %v4508_v10, 0.0  ;;  %v6283_v19 = vpop.f32.mrb[28].mxu1 }
 0x4c2   : > { %v6019_v28 = vpack.c.bf16 %v4923_v49, %v4923_v49  ;;  %v4924_v50 = vmax.f32 %v4500_v8, 0.0  ;;  %v4761_v27 = vadd.f32 %v10314_v7, %v6283_v19  ;;  %v4752_v57 = vpop.f32.mrb[29].mxu1 }
 0x4c3   : > { %5566 = vst.msk [vmem:[%s9776_s7 + $0x78] sm:$0xf] %vm5535_vm0, %v6021_v31  ;;  %v6022_v33 = vpack.c.bf16 %v4926_v39, %v4926_v39  ;;  %v4753_v6 = vadd.f32 %v10314_v7, %v4752_v57  ;;  %v6284_v46 = vpop.f32.mrb[30].mxu1 }
 0x4c4   : > { %5564 = vst.msk [vmem:[%s9776_s7 + $0x70] sm:$0xf] %vm5535_vm0, %v6019_v28  ;;  %v6020_v2 = vpack.c.bf16 %v4924_v50, %v4924_v50  ;;  %v4989_v62 = vmax.f32 %v4761_v27, 0.0  ;;  %v4764_v9 = vadd.f32 %v10314_v7, %v6284_v46  ;;  %v4755_v51 = vpop.f32.mrb[31].mxu1 }
 0x4c5   : > { %5567 = vst.msk [vmem:[%s9776_s7 + $0x7c] sm:$0xf] %vm5535_vm0, %v6022_v33  ;;  %v4987_v55 = vmax.f32 %v4753_v6, 0.0  ;;  %v4756_v15 = vadd.f32 %v10314_v7, %v4755_v51 }
 0x4c6   : > { %5565 = vst.msk [vmem:[%s9776_s7 + $0x74] sm:$0xf] %vm5535_vm0, %v6020_v2  ;;  %v6085_v53 = vpack.c.bf16 %v4989_v62, %v4989_v62  ;;  %v4990_v54 = vmax.f32 %v4764_v9, 0.0 }
 0x4c7   : > { %v6083_v56 = vpack.c.bf16 %v4987_v55, %v4987_v55  ;;  %v4988_v22 = vmax.f32 %v4756_v15, 0.0 }
 0x4c8   : > { %5630 = vst.msk [vmem:[%s9776_s7 + $0x178] sm:$0xf] %vm5535_vm0, %v6085_v53  ;;  %v6086_v41 = vpack.c.bf16 %v4990_v54, %v4990_v54 }
 0x4c9   : > { %5628 = vst.msk [vmem:[%s9776_s7 + $0x170] sm:$0xf] %vm5535_vm0, %v6083_v56  ;;  %v6084_v16 = vpack.c.bf16 %v4988_v22, %v4988_v22 }
 0x4ca   : > { %5631 = vst.msk [vmem:[%s9776_s7 + $0x17c] sm:$0xf] %vm5535_vm0, %v6086_v41 }
 0x4cb   : > { %5629 = vst.msk [vmem:[%s9776_s7 + $0x174] sm:$0xf] %vm5535_vm0, %v6084_v16 }
 0x4d4   : > { %v6223_v45 = vpop.f32.mrb[32].mxu0 }
 0x4d5   : > { %v4521_v18 = vadd.f32 %v10314_v7, %v6223_v45  ;;  %v4512_v11 = vpop.f32.mrb[33].mxu0 }
 0x4d6   : > { %v4513_v59 = vadd.f32 %v10314_v7, %v4512_v11  ;;  %v6224_v26 = vpop.f32.mrb[34].mxu0 }
 0x4d7   : > { %v4929_v40 = vmax.f32 %v4521_v18, 0.0  ;;  %v4524_v35 = vadd.f32 %v10314_v7, %v6224_v26  ;;  %v4515_v58 = vpop.f32.mrb[35].mxu0 }
 0x4d8   : > { %v4927_v20 = vmax.f32 %v4513_v59, 0.0  ;;  %v4516_v38 = vadd.f32 %v10314_v7, %v4515_v58 }
 0x4d9   : > { %v6025_v48 = vpack.c.bf16 %v4929_v40, %v4929_v40  ;;  %v4930_v61 = vmax.f32 %v4524_v35, 0.0  ;;  %v6287_v37 = vpop.f32.mrb[32].mxu1 }
 0x4da   : > { %v6023_v14 = vpack.c.bf16 %v4927_v20, %v4927_v20  ;;  %v4928_v42 = vmax.f32 %v4516_v38, 0.0  ;;  %v4777_v17 = vadd.f32 %v10314_v7, %v6287_v37  ;;  %v4768_v36 = vpop.f32.mrb[33].mxu1 }
 0x4db   : > { %5570 = vst.msk [vmem:[%s9776_s7 + $0x88] sm:$0xf] %vm5535_vm0, %v6025_v48  ;;  %v6026_v21 = vpack.c.bf16 %v4930_v61, %v4930_v61  ;;  %v4769_v34 = vadd.f32 %v10314_v7, %v4768_v36  ;;  %v6288_v24 = vpop.f32.mrb[34].mxu1 }
 0x4dc   : > { %5568 = vst.msk [vmem:[%s9776_s7 + $0x80] sm:$0xf] %vm5535_vm0, %v6023_v14  ;;  %v6024_v29 = vpack.c.bf16 %v4928_v42, %v4928_v42  ;;  %v4993_v60 = vmax.f32 %v4777_v17, 0.0  ;;  %v4780_v23 = vadd.f32 %v10314_v7, %v6288_v24  ;;  %v4771_v4 = vpop.f32.mrb[35].mxu1 }
 0x4dd   : > { %5571 = vst.msk [vmem:[%s9776_s7 + $0x8c] sm:$0xf] %vm5535_vm0, %v6026_v21  ;;  %v4991_v44 = vmax.f32 %v4769_v34, 0.0  ;;  %v4772_v52 = vadd.f32 %v10314_v7, %v4771_v4 }
 0x4de   : > { %5569 = vst.msk [vmem:[%s9776_s7 + $0x84] sm:$0xf] %vm5535_vm0, %v6024_v29  ;;  %v6089_v47 = vpack.c.bf16 %v4993_v60, %v4993_v60  ;;  %v4994_v3 = vmax.f32 %v4780_v23, 0.0 }
 0x4df   : > { %v6087_v30 = vpack.c.bf16 %v4991_v44, %v4991_v44  ;;  %v4992_v43 = vmax.f32 %v4772_v52, 0.0 }
 0x4e0   : > { %5634 = vst.msk [vmem:[%s9776_s7 + $0x188] sm:$0xf] %vm5535_vm0, %v6089_v47  ;;  %v6090_v32 = vpack.c.bf16 %v4994_v3, %v4994_v3 }
 0x4e1   : > { %5632 = vst.msk [vmem:[%s9776_s7 + $0x180] sm:$0xf] %vm5535_vm0, %v6087_v30  ;;  %v6088_v63 = vpack.c.bf16 %v4992_v43, %v4992_v43 }
 0x4e2   : > { %5635 = vst.msk [vmem:[%s9776_s7 + $0x18c] sm:$0xf] %vm5535_vm0, %v6090_v32 }
 0x4e3   : > { %5633 = vst.msk [vmem:[%s9776_s7 + $0x184] sm:$0xf] %vm5535_vm0, %v6088_v63 }
 0x4ec   : > { %v6227_v13 = vpop.f32.mrb[36].mxu0 }
 0x4ed   : > { %v4537_v5 = vadd.f32 %v10314_v7, %v6227_v13  ;;  %v4528_v25 = vpop.f32.mrb[37].mxu0 }
 0x4ee   : > { %v4529_v1 = vadd.f32 %v10314_v7, %v4528_v25  ;;  %v6228_v12 = vpop.f32.mrb[38].mxu0 }
 0x4ef   : > { %v4933_v10 = vmax.f32 %v4537_v5, 0.0  ;;  %v4540_v0 = vadd.f32 %v10314_v7, %v6228_v12  ;;  %v4531_v49 = vpop.f32.mrb[39].mxu0 }
 0x4f0   : > { %v4931_v8 = vmax.f32 %v4529_v1, 0.0  ;;  %v4532_v31 = vadd.f32 %v10314_v7, %v4531_v49 }
 0x4f1   : > { %v6029_v39 = vpack.c.bf16 %v4933_v10, %v4933_v10  ;;  %v4934_v19 = vmax.f32 %v4540_v0, 0.0  ;;  %v6291_v28 = vpop.f32.mrb[36].mxu1 }
 0x4f2   : > { %v6027_v50 = vpack.c.bf16 %v4931_v8, %v4931_v8  ;;  %v4932_v27 = vmax.f32 %v4532_v31, 0.0  ;;  %v4793_v57 = vadd.f32 %v10314_v7, %v6291_v28  ;;  %v4784_v33 = vpop.f32.mrb[37].mxu1 }
 0x4f3   : > { %5574 = vst.msk [vmem:[%s9776_s7 + $0x98] sm:$0xf] %vm5535_vm0, %v6029_v39  ;;  %v6030_v6 = vpack.c.bf16 %v4934_v19, %v4934_v19  ;;  %v4785_v46 = vadd.f32 %v10314_v7, %v4784_v33  ;;  %v6292_v2 = vpop.f32.mrb[38].mxu1 }
 0x4f4   : > { %5572 = vst.msk [vmem:[%s9776_s7 + $0x90] sm:$0xf] %vm5535_vm0, %v6027_v50  ;;  %v6028_v62 = vpack.c.bf16 %v4932_v27, %v4932_v27  ;;  %v4997_v9 = vmax.f32 %v4793_v57, 0.0  ;;  %v4796_v51 = vadd.f32 %v10314_v7, %v6292_v2  ;;  %v4787_v55 = vpop.f32.mrb[39].mxu1 }
 0x4f5   : > { %5575 = vst.msk [vmem:[%s9776_s7 + $0x9c] sm:$0xf] %vm5535_vm0, %v6030_v6  ;;  %v4995_v15 = vmax.f32 %v4785_v46, 0.0  ;;  %v4788_v53 = vadd.f32 %v10314_v7, %v4787_v55 }
 0x4f6   : > { %5573 = vst.msk [vmem:[%s9776_s7 + $0x94] sm:$0xf] %vm5535_vm0, %v6028_v62  ;;  %v6093_v54 = vpack.c.bf16 %v4997_v9, %v4997_v9  ;;  %v4998_v56 = vmax.f32 %v4796_v51, 0.0 }
 0x4f7   : > { %v6091_v22 = vpack.c.bf16 %v4995_v15, %v4995_v15  ;;  %v4996_v41 = vmax.f32 %v4788_v53, 0.0 }
 0x4f8   : > { %5638 = vst.msk [vmem:[%s9776_s7 + $0x198] sm:$0xf] %vm5535_vm0, %v6093_v54  ;;  %v6094_v16 = vpack.c.bf16 %v4998_v56, %v4998_v56 }
 0x4f9   : > { %5636 = vst.msk [vmem:[%s9776_s7 + $0x190] sm:$0xf] %vm5535_vm0, %v6091_v22  ;;  %v6092_v45 = vpack.c.bf16 %v4996_v41, %v4996_v41 }
 0x4fa   : > { %5639 = vst.msk [vmem:[%s9776_s7 + $0x19c] sm:$0xf] %vm5535_vm0, %v6094_v16 }
 0x4fb   : > { %5637 = vst.msk [vmem:[%s9776_s7 + $0x194] sm:$0xf] %vm5535_vm0, %v6092_v45 }
 0x504   : > { %v6231_v18 = vpop.f32.mrb[40].mxu0 }
 0x505   : > { %v4553_v11 = vadd.f32 %v10314_v7, %v6231_v18  ;;  %v4544_v59 = vpop.f32.mrb[41].mxu0 }
 0x506   : > { %v4545_v26 = vadd.f32 %v10314_v7, %v4544_v59  ;;  %v6232_v40 = vpop.f32.mrb[42].mxu0 }
 0x507   : > { %v4937_v35 = vmax.f32 %v4553_v11, 0.0  ;;  %v4556_v58 = vadd.f32 %v10314_v7, %v6232_v40  ;;  %v4547_v20 = vpop.f32.mrb[43].mxu0 }
 0x508   : > { %v4935_v38 = vmax.f32 %v4545_v26, 0.0  ;;  %v4548_v48 = vadd.f32 %v10314_v7, %v4547_v20 }
 0x509   : > { %v6033_v61 = vpack.c.bf16 %v4937_v35, %v4937_v35  ;;  %v4938_v37 = vmax.f32 %v4556_v58, 0.0  ;;  %v6295_v14 = vpop.f32.mrb[40].mxu1 }
 0x50a   : > { %v6031_v42 = vpack.c.bf16 %v4935_v38, %v4935_v38  ;;  %v4936_v17 = vmax.f32 %v4548_v48, 0.0  ;;  %v4809_v36 = vadd.f32 %v10314_v7, %v6295_v14  ;;  %v4800_v21 = vpop.f32.mrb[41].mxu1 }
 0x50b   : > { %5578 = vst.msk [vmem:[%s9776_s7 + $0xa8] sm:$0xf] %vm5535_vm0, %v6033_v61  ;;  %v6034_v34 = vpack.c.bf16 %v4938_v37, %v4938_v37  ;;  %v4801_v24 = vadd.f32 %v10314_v7, %v4800_v21  ;;  %v6296_v29 = vpop.f32.mrb[42].mxu1 }
 0x50c   : > { %5576 = vst.msk [vmem:[%s9776_s7 + $0xa0] sm:$0xf] %vm5535_vm0, %v6031_v42  ;;  %v6032_v60 = vpack.c.bf16 %v4936_v17, %v4936_v17  ;;  %v5001_v23 = vmax.f32 %v4809_v36, 0.0  ;;  %v4812_v4 = vadd.f32 %v10314_v7, %v6296_v29  ;;  %v4803_v44 = vpop.f32.mrb[43].mxu1 }
 0x50d   : > { %5579 = vst.msk [vmem:[%s9776_s7 + $0xac] sm:$0xf] %vm5535_vm0, %v6034_v34  ;;  %v4999_v52 = vmax.f32 %v4801_v24, 0.0  ;;  %v4804_v47 = vadd.f32 %v10314_v7, %v4803_v44 }
 0x50e   : > { %5577 = vst.msk [vmem:[%s9776_s7 + $0xa4] sm:$0xf] %vm5535_vm0, %v6032_v60  ;;  %v6097_v3 = vpack.c.bf16 %v5001_v23, %v5001_v23  ;;  %v5002_v30 = vmax.f32 %v4812_v4, 0.0 }
 0x50f   : > { %v6095_v43 = vpack.c.bf16 %v4999_v52, %v4999_v52  ;;  %v5000_v32 = vmax.f32 %v4804_v47, 0.0 }
 0x510   : > { %5642 = vst.msk [vmem:[%s9776_s7 + $0x1a8] sm:$0xf] %vm5535_vm0, %v6097_v3  ;;  %v6098_v63 = vpack.c.bf16 %v5002_v30, %v5002_v30 }
 0x511   : > { %5640 = vst.msk [vmem:[%s9776_s7 + $0x1a0] sm:$0xf] %vm5535_vm0, %v6095_v43  ;;  %v6096_v13 = vpack.c.bf16 %v5000_v32, %v5000_v32 }
 0x512   : > { %5643 = vst.msk [vmem:[%s9776_s7 + $0x1ac] sm:$0xf] %vm5535_vm0, %v6098_v63 }
 0x513   : > { %5641 = vst.msk [vmem:[%s9776_s7 + $0x1a4] sm:$0xf] %vm5535_vm0, %v6096_v13 }
 0x520   : > { %v6299_v5 = vpop.f32.mrb[44].mxu1 }
 0x521   : > { %v4825_v25 = vadd.f32 %v10314_v7, %v6299_v5  ;;  %v4816_v1 = vpop.f32.mrb[45].mxu1  ;;  %v6235_v12 = vpop.f32.mrb[44].mxu0 }
 0x522   : > { %v4817_v10 = vadd.f32 %v10314_v7, %v4816_v1  ;;  %v6300_v0 = vpop.f32.mrb[46].mxu1  ;;  %v4569_v49 = vadd.f32 %v10314_v7, %v6235_v12  ;;  %v4560_v8 = vpop.f32.mrb[45].mxu0 }
 0x523   : > { %v5005_v31 = vmax.f32 %v4825_v25, 0.0  ;;  %v4828_v39 = vadd.f32 %v10314_v7, %v6300_v0  ;;  %v4819_v19 = vpop.f32.mrb[47].mxu1  ;;  %v4561_v28 = vadd.f32 %v10314_v7, %v4560_v8  ;;  %v6236_v50 = vpop.f32.mrb[46].mxu0 }
 0x524   : > { %v5003_v27 = vmax.f32 %v4817_v10, 0.0  ;;  %v4820_v57 = vadd.f32 %v10314_v7, %v4819_v19  ;;  %v4941_v33 = vmax.f32 %v4569_v49, 0.0  ;;  %v4572_v6 = vadd.f32 %v10314_v7, %v6236_v50  ;;  %v4563_v46 = vpop.f32.mrb[47].mxu0 }
 0x525   : > { %v6101_v2 = vpack.c.bf16 %v5005_v31, %v5005_v31  ;;  %v5006_v62 = vmax.f32 %v4828_v39, 0.0  ;;  %v4939_v9 = vmax.f32 %v4561_v28, 0.0  ;;  %v4564_v51 = vadd.f32 %v10314_v7, %v4563_v46 }
 0x526   : > { %v6099_v55 = vpack.c.bf16 %v5003_v27, %v5003_v27  ;;  %v5004_v15 = vmax.f32 %v4820_v57, 0.0  ;;  %v6037_v53 = vpack.c.bf16 %v4941_v33, %v4941_v33  ;;  %v4942_v54 = vmax.f32 %v4572_v6, 0.0 }
 0x527   : > { %5646 = vst.msk [vmem:[%s9776_s7 + $0x1b8] sm:$0xf] %vm5535_vm0, %v6101_v2  ;;  %v6102_v56 = vpack.c.bf16 %v5006_v62, %v5006_v62  ;;  %v6035_v22 = vpack.c.bf16 %v4939_v9, %v4939_v9  ;;  %v4940_v41 = vmax.f32 %v4564_v51, 0.0 }
 0x528   : > { %5644 = vst.msk [vmem:[%s9776_s7 + $0x1b0] sm:$0xf] %vm5535_vm0, %v6099_v55  ;;  %v6100_v16 = vpack.c.bf16 %v5004_v15, %v5004_v15  ;;  %5582 = vst.msk [vmem:[%s9776_s7 + $0xb8] sm:$0xf] %vm5535_vm0, %v6037_v53  ;;  %v6038_v45 = vpack.c.bf16 %v4942_v54, %v4942_v54 }
 0x529   : > { %5647 = vst.msk [vmem:[%s9776_s7 + $0x1bc] sm:$0xf] %vm5535_vm0, %v6102_v56  ;;  %5580 = vst.msk [vmem:[%s9776_s7 + $0xb0] sm:$0xf] %vm5535_vm0, %v6035_v22  ;;  %v6036_v18 = vpack.c.bf16 %v4940_v41, %v4940_v41 }
 0x52a   : > { %5645 = vst.msk [vmem:[%s9776_s7 + $0x1b4] sm:$0xf] %vm5535_vm0, %v6100_v16  ;;  %5583 = vst.msk [vmem:[%s9776_s7 + $0xbc] sm:$0xf] %vm5535_vm0, %v6038_v45 }
 0x52b   : > { %5581 = vst.msk [vmem:[%s9776_s7 + $0xb4] sm:$0xf] %vm5535_vm0, %v6036_v18 }
 0x53c   : > { %v6303_v11 = vpop.f32.mrb[48].mxu1 }
 0x53d   : > { %v4841_v59 = vadd.f32 %v10314_v7, %v6303_v11  ;;  %v4832_v26 = vpop.f32.mrb[49].mxu1  ;;  %v6239_v40 = vpop.f32.mrb[48].mxu0 }
 0x53e   : > { %v4833_v35 = vadd.f32 %v10314_v7, %v4832_v26  ;;  %v6304_v58 = vpop.f32.mrb[50].mxu1  ;;  %v4585_v20 = vadd.f32 %v10314_v7, %v6239_v40  ;;  %v4576_v38 = vpop.f32.mrb[49].mxu0 }
 0x53f   : > { %v5009_v48 = vmax.f32 %v4841_v59, 0.0  ;;  %v4844_v61 = vadd.f32 %v10314_v7, %v6304_v58  ;;  %v4835_v37 = vpop.f32.mrb[51].mxu1  ;;  %v4577_v14 = vadd.f32 %v10314_v7, %v4576_v38  ;;  %v6240_v42 = vpop.f32.mrb[50].mxu0 }
 0x540   : > { %v5007_v17 = vmax.f32 %v4833_v35, 0.0  ;;  %v4836_v36 = vadd.f32 %v10314_v7, %v4835_v37  ;;  %v4945_v21 = vmax.f32 %v4585_v20, 0.0  ;;  %v4588_v34 = vadd.f32 %v10314_v7, %v6240_v42  ;;  %v4579_v24 = vpop.f32.mrb[51].mxu0 }
 0x541   : > { %v6105_v29 = vpack.c.bf16 %v5009_v48, %v5009_v48  ;;  %v5010_v60 = vmax.f32 %v4844_v61, 0.0  ;;  %v4943_v23 = vmax.f32 %v4577_v14, 0.0  ;;  %v4580_v4 = vadd.f32 %v10314_v7, %v4579_v24 }
 0x542   : > { %v6103_v44 = vpack.c.bf16 %v5007_v17, %v5007_v17  ;;  %v5008_v52 = vmax.f32 %v4836_v36, 0.0  ;;  %v6041_v47 = vpack.c.bf16 %v4945_v21, %v4945_v21  ;;  %v4946_v3 = vmax.f32 %v4588_v34, 0.0 }
 0x543   : > { %5650 = vst.msk [vmem:[%s9776_s7 + $0x1c8] sm:$0xf] %vm5535_vm0, %v6105_v29  ;;  %v6106_v30 = vpack.c.bf16 %v5010_v60, %v5010_v60  ;;  %v6039_v43 = vpack.c.bf16 %v4943_v23, %v4943_v23  ;;  %v4944_v32 = vmax.f32 %v4580_v4, 0.0 }
 0x544   : > { %5648 = vst.msk [vmem:[%s9776_s7 + $0x1c0] sm:$0xf] %vm5535_vm0, %v6103_v44  ;;  %v6104_v63 = vpack.c.bf16 %v5008_v52, %v5008_v52  ;;  %5586 = vst.msk [vmem:[%s9776_s7 + $0xc8] sm:$0xf] %vm5535_vm0, %v6041_v47  ;;  %v6042_v13 = vpack.c.bf16 %v4946_v3, %v4946_v3 }
 0x545   : > { %5651 = vst.msk [vmem:[%s9776_s7 + $0x1cc] sm:$0xf] %vm5535_vm0, %v6106_v30  ;;  %5584 = vst.msk [vmem:[%s9776_s7 + $0xc0] sm:$0xf] %vm5535_vm0, %v6039_v43  ;;  %v6040_v5 = vpack.c.bf16 %v4944_v32, %v4944_v32 }
 0x546   : > { %5649 = vst.msk [vmem:[%s9776_s7 + $0x1c4] sm:$0xf] %vm5535_vm0, %v6104_v63  ;;  %5587 = vst.msk [vmem:[%s9776_s7 + $0xcc] sm:$0xf] %vm5535_vm0, %v6042_v13 }
 0x547   : > { %5585 = vst.msk [vmem:[%s9776_s7 + $0xc4] sm:$0xf] %vm5535_vm0, %v6040_v5 }
 0x558   : > { %v6307_v25 = vpop.f32.mrb[52].mxu1 }
 0x559   : > { %v4857_v1 = vadd.f32 %v10314_v7, %v6307_v25  ;;  %v4848_v12 = vpop.f32.mrb[53].mxu1  ;;  %v6243_v10 = vpop.f32.mrb[52].mxu0 }
 0x55a   : > { %v4849_v0 = vadd.f32 %v10314_v7, %v4848_v12  ;;  %v6308_v49 = vpop.f32.mrb[54].mxu1  ;;  %v4601_v8 = vadd.f32 %v10314_v7, %v6243_v10  ;;  %v4592_v31 = vpop.f32.mrb[53].mxu0 }
 0x55b   : > { %v5013_v39 = vmax.f32 %v4857_v1, 0.0  ;;  %v4860_v19 = vadd.f32 %v10314_v7, %v6308_v49  ;;  %v4851_v28 = vpop.f32.mrb[55].mxu1  ;;  %v4593_v50 = vadd.f32 %v10314_v7, %v4592_v31  ;;  %v6244_v27 = vpop.f32.mrb[54].mxu0 }
 0x55c   : > { %v5011_v57 = vmax.f32 %v4849_v0, 0.0  ;;  %v4852_v33 = vadd.f32 %v10314_v7, %v4851_v28  ;;  %v4949_v6 = vmax.f32 %v4601_v8, 0.0  ;;  %v4604_v46 = vadd.f32 %v10314_v7, %v6244_v27  ;;  %v4595_v2 = vpop.f32.mrb[55].mxu0 }
 0x55d   : > { %v6109_v62 = vpack.c.bf16 %v5013_v39, %v5013_v39  ;;  %v5014_v9 = vmax.f32 %v4860_v19, 0.0  ;;  %v4947_v51 = vmax.f32 %v4593_v50, 0.0  ;;  %v4596_v55 = vadd.f32 %v10314_v7, %v4595_v2 }
 0x55e   : > { %v6107_v15 = vpack.c.bf16 %v5011_v57, %v5011_v57  ;;  %v5012_v53 = vmax.f32 %v4852_v33, 0.0  ;;  %v6045_v54 = vpack.c.bf16 %v4949_v6, %v4949_v6  ;;  %v4950_v56 = vmax.f32 %v4604_v46, 0.0 }
 0x55f   : > { %5654 = vst.msk [vmem:[%s9776_s7 + $0x1d8] sm:$0xf] %vm5535_vm0, %v6109_v62  ;;  %v6110_v22 = vpack.c.bf16 %v5014_v9, %v5014_v9  ;;  %v6043_v41 = vpack.c.bf16 %v4947_v51, %v4947_v51  ;;  %v4948_v16 = vmax.f32 %v4596_v55, 0.0 }
 0x560   : > { %5652 = vst.msk [vmem:[%s9776_s7 + $0x1d0] sm:$0xf] %vm5535_vm0, %v6107_v15  ;;  %v6108_v45 = vpack.c.bf16 %v5012_v53, %v5012_v53  ;;  %5590 = vst.msk [vmem:[%s9776_s7 + $0xd8] sm:$0xf] %vm5535_vm0, %v6045_v54  ;;  %v6046_v18 = vpack.c.bf16 %v4950_v56, %v4950_v56 }
 0x561   : > { %5655 = vst.msk [vmem:[%s9776_s7 + $0x1dc] sm:$0xf] %vm5535_vm0, %v6110_v22  ;;  %5588 = vst.msk [vmem:[%s9776_s7 + $0xd0] sm:$0xf] %vm5535_vm0, %v6043_v41  ;;  %v6044_v11 = vpack.c.bf16 %v4948_v16, %v4948_v16 }
 0x562   : > { %5653 = vst.msk [vmem:[%s9776_s7 + $0x1d4] sm:$0xf] %vm5535_vm0, %v6108_v45  ;;  %5591 = vst.msk [vmem:[%s9776_s7 + $0xdc] sm:$0xf] %vm5535_vm0, %v6046_v18 }
 0x563   : > { %5589 = vst.msk [vmem:[%s9776_s7 + $0xd4] sm:$0xf] %vm5535_vm0, %v6044_v11 }
 0x574   : > { %v6311_v59 = vpop.f32.mrb[56].mxu1 }
 0x575   : > { %v4873_v26 = vadd.f32 %v10314_v7, %v6311_v59  ;;  %v4864_v40 = vpop.f32.mrb[57].mxu1  ;;  %v6247_v35 = vpop.f32.mrb[56].mxu0 }
 0x576   : > { %v4865_v58 = vadd.f32 %v10314_v7, %v4864_v40  ;;  %v6312_v20 = vpop.f32.mrb[58].mxu1  ;;  %v4617_v38 = vadd.f32 %v10314_v7, %v6247_v35  ;;  %v4608_v48 = vpop.f32.mrb[57].mxu0 }
 0x577   : > { %v5017_v61 = vmax.f32 %v4873_v26, 0.0  ;;  %v4876_v37 = vadd.f32 %v10314_v7, %v6312_v20  ;;  %v4867_v14 = vpop.f32.mrb[59].mxu1  ;;  %v4609_v42 = vadd.f32 %v10314_v7, %v4608_v48  ;;  %v6248_v17 = vpop.f32.mrb[58].mxu0 }
 0x578   : > { %v5015_v36 = vmax.f32 %v4865_v58, 0.0  ;;  %v4868_v21 = vadd.f32 %v10314_v7, %v4867_v14  ;;  %v4953_v34 = vmax.f32 %v4617_v38, 0.0  ;;  %v4620_v24 = vadd.f32 %v10314_v7, %v6248_v17  ;;  %v4611_v29 = vpop.f32.mrb[59].mxu0 }
 0x579   : > { %v6113_v60 = vpack.c.bf16 %v5017_v61, %v5017_v61  ;;  %v5018_v23 = vmax.f32 %v4876_v37, 0.0  ;;  %v4951_v4 = vmax.f32 %v4609_v42, 0.0  ;;  %v4612_v44 = vadd.f32 %v10314_v7, %v4611_v29 }
 0x57a   : > { %v6111_v52 = vpack.c.bf16 %v5015_v36, %v5015_v36  ;;  %v5016_v47 = vmax.f32 %v4868_v21, 0.0  ;;  %v6049_v3 = vpack.c.bf16 %v4953_v34, %v4953_v34  ;;  %v4954_v30 = vmax.f32 %v4620_v24, 0.0 }
 0x57b   : > { %5658 = vst.msk [vmem:[%s9776_s7 + $0x1e8] sm:$0xf] %vm5535_vm0, %v6113_v60  ;;  %v6114_v43 = vpack.c.bf16 %v5018_v23, %v5018_v23  ;;  %v6047_v32 = vpack.c.bf16 %v4951_v4, %v4951_v4  ;;  %v4952_v63 = vmax.f32 %v4612_v44, 0.0 }
 0x57c   : > { %5656 = vst.msk [vmem:[%s9776_s7 + $0x1e0] sm:$0xf] %vm5535_vm0, %v6111_v52  ;;  %v6112_v13 = vpack.c.bf16 %v5016_v47, %v5016_v47  ;;  %5594 = vst.msk [vmem:[%s9776_s7 + $0xe8] sm:$0xf] %vm5535_vm0, %v6049_v3  ;;  %v6050_v5 = vpack.c.bf16 %v4954_v30, %v4954_v30 }
 0x57d   : > { %5659 = vst.msk [vmem:[%s9776_s7 + $0x1ec] sm:$0xf] %vm5535_vm0, %v6114_v43  ;;  %5592 = vst.msk [vmem:[%s9776_s7 + $0xe0] sm:$0xf] %vm5535_vm0, %v6047_v32  ;;  %v6048_v25 = vpack.c.bf16 %v4952_v63, %v4952_v63 }
 0x57e   : > { %5657 = vst.msk [vmem:[%s9776_s7 + $0x1e4] sm:$0xf] %vm5535_vm0, %v6112_v13  ;;  %5595 = vst.msk [vmem:[%s9776_s7 + $0xec] sm:$0xf] %vm5535_vm0, %v6050_v5 }
 0x57f   : > { %5593 = vst.msk [vmem:[%s9776_s7 + $0xe4] sm:$0xf] %vm5535_vm0, %v6048_v25 }
 0x58c   : > { %v6251_v1 = vpop.f32.mrb[60].mxu0 }
 0x58d   : > { %v4633_v12 = vadd.f32 %v10314_v7, %v6251_v1  ;;  %v4624_v10 = vpop.f32.mrb[61].mxu0 }
 0x58e   : > { %v4625_v0 = vadd.f32 %v10314_v7, %v4624_v10  ;;  %v6252_v49 = vpop.f32.mrb[62].mxu0 }
 0x58f   : > { %v4957_v8 = vmax.f32 %v4633_v12, 0.0  ;;  %v4636_v31 = vadd.f32 %v10314_v7, %v6252_v49  ;;  %v4627_v39 = vpop.f32.mrb[63].mxu0 }
 0x590   : > { %v4955_v19 = vmax.f32 %v4625_v0, 0.0  ;;  %v4628_v28 = vadd.f32 %v10314_v7, %v4627_v39  ;;  %v6315_v50 = vpop.f32.mrb[60].mxu1 }
 0x591   : > { %v6053_v27 = vpack.c.bf16 %v4957_v8, %v4957_v8  ;;  %v4958_v57 = vmax.f32 %v4636_v31, 0.0  ;;  %v4889_v33 = vadd.f32 %v10314_v7, %v6315_v50  ;;  %v4880_v6 = vpop.f32.mrb[61].mxu1 }
 0x592   : > { %v6051_v46 = vpack.c.bf16 %v4955_v19, %v4955_v19  ;;  %v4956_v2 = vmax.f32 %v4628_v28, 0.0  ;;  %v4881_v62 = vadd.f32 %v10314_v7, %v4880_v6  ;;  %v6316_v9 = vpop.f32.mrb[62].mxu1 }
 0x593   : > { %5598 = vst.msk [vmem:[%s9776_s7 + $0xf8] sm:$0xf] %vm5535_vm0, %v6053_v27  ;;  %v6054_v51 = vpack.c.bf16 %v4958_v57, %v4958_v57  ;;  %v5021_v55 = vmax.f32 %v4889_v33, 0.0  ;;  %v4892_v15 = vadd.f32 %v10314_v7, %v6316_v9  ;;  %v4883_v53 = vpop.f32.mrb[63].mxu1 }
 0x594   : > { %5596 = vst.msk [vmem:[%s9776_s7 + $0xf0] sm:$0xf] %vm5535_vm0, %v6051_v46  ;;  %v6052_v54 = vpack.c.bf16 %v4956_v2, %v4956_v2  ;;  %v5019_v56 = vmax.f32 %v4881_v62, 0.0  ;;  %v4884_v22 = vadd.f32 %v10314_v7, %v4883_v53 }
 0x595   : > { %5599 = vst.msk [vmem:[%s9776_s7 + $0xfc] sm:$0xf] %vm5535_vm0, %v6054_v51  ;;  %v6117_v41 = vpack.c.bf16 %v5021_v55, %v5021_v55  ;;  %v5022_v16 = vmax.f32 %v4892_v15, 0.0 }
 0x596   : > { %5597 = vst.msk [vmem:[%s9776_s7 + $0xf4] sm:$0xf] %vm5535_vm0, %v6052_v54  ;;  %v6115_v45 = vpack.c.bf16 %v5019_v56, %v5019_v56  ;;  %v5020_v18 = vmax.f32 %v4884_v22, 0.0 }
 0x597   : > { %5662 = vst.msk [vmem:[%s9776_s7 + $0x1f8] sm:$0xf] %vm5535_vm0, %v6117_v41  ;;  %v6118_v11 = vpack.c.bf16 %v5022_v16, %v5022_v16 }
 0x598   : > { %5660 = vst.msk [vmem:[%s9776_s7 + $0x1f0] sm:$0xf] %vm5535_vm0, %v6115_v45  ;;  %v6116_v59 = vpack.c.bf16 %v5020_v18, %v5020_v18 }
 0x599   : > { %5663 = vst.msk [vmem:[%s9776_s7 + $0x1fc] sm:$0xf] %vm5535_vm0, %v6118_v11 }
 0x59a   : > { %5661 = vst.msk [vmem:[%s9776_s7 + $0x1f4] sm:$0xf] %vm5535_vm0, %v6116_v59 }
 0x59b PF: > { %s13_s12 = sadd.s32 1, %s6427_s12  }
 0x59c   : > { %p10_p4 = scmp.ge.s32.totalorder %s13_s12, 7  }
 0x59e   :  { %12 = sbr.rel (!%p10_p4) target bundleno = 1 (0x1), region = 62 }

</bundles_post_ra>
